<compile_context>
chip_gen: v7x
topology: tpu7x:2x2x1
jax: 0.10.0
libtpu: 0.0.40
codegen_flags: <defaults>
</compile_context>

<pallas_src>
import numpy as np
import jax
import jax.numpy as jnp
from jax import lax
from jax.experimental import pallas as pl
from jax.experimental.pallas import tpu as pltpu

WAY, SHOT, SEQ, DIM = 5, 5, 8, 2048
N_SUPPORT = WAY * SHOT          # 25  (docstring: S = 25 x 8 x 2048)
N_QUERY = 20                    # 20  (docstring: Q = 20 x 8 x 2048)
D_CHUNK = 512                   # reduction-grid tile along the feature dim
assert DIM % D_CHUNK == 0

_CPARAMS = pltpu.CompilerParams(
    dimension_semantics=("arbitrary",),          # D is a reduction axis
    vmem_limit_bytes=16 * 1024 * 1024,
)


# ---------------------------------------------------------------- kernel -----

def _fused_kernel(lab_ref, s1_ref, q1_ref, s2_ref, q2_ref,
                  kl_ref, ce_ref, sup_ref,
                  sqd1_acc, sqd2_acc, sup_acc):
    """One D-chunk of the fused e_dist(kl) + e_dist(ce) + SupportDK forward.

    Per-step blocks:
      lab_ref : (n_s, 1) int32            (constant block across the grid)
      s*_ref  : (n_s, SEQ, D_CHUNK) f32   q*_ref: (n_q, SEQ, D_CHUNK) f32
      kl/ce   : (n_q, WAY)  f32           sup   : (WAY, WAY-1) f32
      sqd*_acc: (n_q, n_s)  f32 VMEM      sup_acc: (WAY, WAY) f32 VMEM
    """
    k = pl.program_id(0)
    last = pl.num_programs(0) - 1

    @pl.when(k == 0)
    def _init():
        sqd1_acc[...] = jnp.zeros_like(sqd1_acc)
        sqd2_acc[...] = jnp.zeros_like(sqd2_acc)
        sup_acc[...] = jnp.zeros_like(sup_acc)

    # --- partial ||q_mean - s_mean||^2 per D chunk (cross term on the MXU) ---
    def partial_sq_dist(s_ref, q_ref):
        s_mean = jnp.mean(s_ref[...], axis=1)                        # (n_s, Dc)
        q_mean = jnp.mean(q_ref[...], axis=1)                        # (n_q, Dc)
        qs = jnp.einsum('qd,sd->qs', q_mean, s_mean,
                        preferred_element_type=jnp.float32)          # (n_q, n_s)
        q_sq = jnp.sum(q_mean * q_mean, axis=-1, keepdims=True)      # (n_q, 1)
        s_sq = jnp.sum(s_mean * s_mean, axis=-1)                     # (n_s,)
        return q_sq + s_sq[None, :] - 2.0 * qs

    sqd1_acc[...] += partial_sq_dist(s1_ref, q1_ref)
    sqd2_acc[...] += partial_sq_dist(s2_ref, q2_ref)

    # --- SupportDK: exact per-chunk prototype squared differences (VPU) ------
    s2c = s2_ref[...]                                                # (n_s, 8, Dc)
    proto = jnp.mean(s2c.reshape(WAY, SHOT, SEQ, s2c.shape[-1]), axis=1)
    diff = proto[:, None, :, :] - proto[None, :, :, :]               # (5,5,8,Dc)
    sup_acc[...] += jnp.sum(jnp.sum(diff * diff, axis=-1), axis=-1)  # (5,5)

    @pl.when(k == last)
    def _finalize():
        # pre-negated, count-normalized class-selection matrix from labels
        lab = lab_ref[...]                                           # (n_s, 1)
        cls = lax.broadcasted_iota(jnp.int32, (lab.shape[0], WAY), 1)
        onehot = (lab == cls).astype(jnp.float32)                    # (n_s, WAY)
        counts = jnp.sum(onehot, axis=0, keepdims=True)              # (1, WAY)
        # NOTE: an empty class yields 0 logits (torch would produce NaN).
        neg_sel = -onehot / jnp.maximum(counts, 1.0)

        dist1 = jnp.sqrt(jnp.maximum(sqd1_acc[...], 0.0))            # (n_q, n_s)
        dist2 = jnp.sqrt(jnp.maximum(sqd2_acc[...], 0.0))
        kl_ref[...] = jnp.dot(dist1, neg_sel, preferred_element_type=jnp.float32)
        ce_ref[...] = jnp.dot(dist2, neg_sel, preferred_element_type=jnp.float32)

        # fold the off-diagonal (5,5) -> (5,4) selection into the kernel:
        # row i keeps columns n != i in increasing order:
        #   out[i, m] = sq[i, m] if m < i else sq[i, m + 1]
        sq = sup_acc[...]                                            # (5, 5)
        left = sq[:, :WAY - 1]                                       # cols 0..3
        right = sq[:, 1:]                                            # cols 1..4
        i_r = lax.broadcasted_iota(jnp.int32, (WAY, WAY - 1), 0)
        m_c = lax.broadcasted_iota(jnp.int32, (WAY, WAY - 1), 1)
        sup_off = jnp.where(m_c < i_r, left, right)                  # (5, 4)
        sup_ref[...] = -sup_off * (1.0 / float(SEQ))


# --------------------------------------------------------------- wrapper -----

@jax.jit
def e_dist_fc2_sup_forward(context_feature, context_labels, target_feature):
    cf1 = context_feature['context_features_1'].reshape(-1, SEQ, DIM)
    cf2 = context_feature['context_features_2'].reshape(-1, SEQ, DIM)
    tf1 = target_feature['target_features_1'].reshape(-1, SEQ, DIM)
    tf2 = target_feature['target_features_2'].reshape(-1, SEQ, DIM)
    labels2d = context_labels.reshape(-1, 1).astype(jnp.int32)       # (25, 1)
    n_s = cf1.shape[0]
    n_q = tf1.shape[0]
    kd = DIM // D_CHUNK

    kl, ce, sup = pl.pallas_call(
        _fused_kernel,
        out_shape=(jax.ShapeDtypeStruct((n_q, WAY), jnp.float32),
                   jax.ShapeDtypeStruct((n_q, WAY), jnp.float32),
                   jax.ShapeDtypeStruct((WAY, WAY - 1), jnp.float32)),
        grid_spec=pltpu.PrefetchScalarGridSpec(
            num_scalar_prefetch=0,
            grid=(kd,),
            in_specs=[
                pl.BlockSpec((n_s, 1), lambda k: (0, 0)),
                pl.BlockSpec((n_s, SEQ, D_CHUNK), lambda k: (0, 0, k)),
                pl.BlockSpec((n_q, SEQ, D_CHUNK), lambda k: (0, 0, k)),
                pl.BlockSpec((n_s, SEQ, D_CHUNK), lambda k: (0, 0, k)),
                pl.BlockSpec((n_q, SEQ, D_CHUNK), lambda k: (0, 0, k)),
            ],
            out_specs=(
                pl.BlockSpec((n_q, WAY), lambda k: (0, 0)),
                pl.BlockSpec((n_q, WAY), lambda k: (0, 0)),
                pl.BlockSpec((WAY, WAY - 1), lambda k: (0, 0)),
            ),
            scratch_shapes=[
                pltpu.VMEM((n_q, n_s), jnp.float32),
                pltpu.VMEM((n_q, n_s), jnp.float32),
                pltpu.VMEM((WAY, WAY), jnp.float32),
            ],
        ),
        compiler_params=_CPARAMS,
    )(labels2d, cf1, tf1, cf2, tf2)

    return {'logits': {'kl': kl, 'ce': ce, 'sup': sup}}


# -------------------------------------------------------- reference (test) ----

def _ref_e_dist(supports, queries, labels):
    supports = np.asarray(supports).reshape(-1, SEQ, DIM)
    queries = np.asarray(queries).reshape(-1, SEQ, DIM).mean(axis=1)
    labels = np.asarray(labels)
    dist_all = np.zeros((queries.shape[0], WAY), np.float32)
    for c in range(WAY):
        cls = supports[labels == c].mean(axis=1)                     # (shot, 2048)
        dm = np.sqrt(((queries[:, None, :] - cls[None, :, :]) ** 2).sum(-1))
        dist_all[:, c] = -dm.mean(axis=1)
    return dist_all


def _ref_sup_dk(supports):
    proto = np.asarray(supports).reshape(WAY, SHOT, SEQ, DIM).mean(axis=1)
    new = np.zeros((5, 4), np.float32)
    for i in range(5):
        m = 0
        for n in range(5):
            if i != n:
                d = proto[i] - proto[n]
                new[i, m] = -(np.linalg.norm(d) ** 2) / SEQ
                m += 1
    return new


# ------------------------------------------------------------------- main ----

if __name__ == "__main__":
    key = jax.random.PRNGKey(0)
    k1, k2, k3, k4 = jax.random.split(key, 4)
    context_feature = {
        'context_features_1': jax.random.normal(k1, (N_SUPPORT, SEQ, DIM), jnp.float32),
        'context_features_2': jax.random.normal(k2, (N_SUPPORT, SEQ, DIM), jnp.float32),
    }
    target_feature = {
        'target_features_1': jax.random.normal(k3, (N_QUERY, SEQ, DIM), jnp.float32),
        'target_features_2': jax.random.normal(k4, (N_QUERY, SEQ, DIM), jnp.float32),
    }
    context_labels = jnp.repeat(jnp.arange(WAY, dtype=jnp.int32), SHOT)   # (25,)

    out = e_dist_fc2_sup_forward(context_feature, context_labels, target_feature)
    out = jax.block_until_ready(out)

    assert out['logits']['kl'].shape == (N_QUERY, WAY)
    assert out['logits']['ce'].shape == (N_QUERY, WAY)
    assert out['logits']['sup'].shape == (WAY, WAY - 1)

    # correctness checks against pure numpy references of the torch semantics
    np.testing.assert_allclose(np.asarray(out['logits']['kl']),
                               _ref_e_dist(context_feature['context_features_1'],
                                           target_feature['target_features_1'],
                                           context_labels),
                               rtol=5e-3, atol=5e-3)
    np.testing.assert_allclose(np.asarray(out['logits']['ce']),
                               _ref_e_dist(context_feature['context_features_2'],
                                           target_feature['target_features_2'],
                                           context_labels),
                               rtol=5e-3, atol=5e-3)
    np.testing.assert_allclose(np.asarray(out['logits']['sup']),
                               _ref_sup_dk(context_feature['context_features_2']),
                               rtol=1e-3, atol=1e-3)

    print("KERNEL_OK")
</pallas_src>

<mosaic_0001>
module attributes {stable_mosaic.version = 11 : i64} {
  func.func @_fused_kernel(%arg0: i32, %arg1: memref<25x1xi32, #tpu.memory_space<vmem>>, %arg2: memref<25x8x512xf32, #tpu.memory_space<vmem>>, %arg3: memref<20x8x512xf32, #tpu.memory_space<vmem>>, %arg4: memref<25x8x512xf32, #tpu.memory_space<vmem>>, %arg5: memref<20x8x512xf32, #tpu.memory_space<vmem>>, %arg6: memref<20x5xf32, #tpu.memory_space<vmem>>, %arg7: memref<20x5xf32, #tpu.memory_space<vmem>>, %arg8: memref<5x4xf32, #tpu.memory_space<vmem>>, %arg9: memref<20x25xf32, #tpu.memory_space<vmem>>, %arg10: memref<20x25xf32, #tpu.memory_space<vmem>>, %arg11: memref<5x5xf32, #tpu.memory_space<vmem>>) attributes {dimension_semantics = [#tpu.dimension_semantics<arbitrary>], iteration_bounds = array<i64: 4>, scalar_prefetch = 0 : i64, scratch_operands = 3 : i64, tpu.core_type = #tpu.core_type<tc>, window_params = [{pipeline_mode = #tpu.pipeline_mode<synchronous>, transform_indices = @transform_0, window_bounds = array<i64: 25, 1>}, {transform_indices = @transform_1, window_bounds = array<i64: 25, 8, 512>}, {transform_indices = @transform_2, window_bounds = array<i64: 20, 8, 512>}, {transform_indices = @transform_3, window_bounds = array<i64: 25, 8, 512>}, {transform_indices = @transform_4, window_bounds = array<i64: 20, 8, 512>}, {pipeline_mode = #tpu.pipeline_mode<synchronous>, transform_indices = @transform_5, window_bounds = array<i64: 20, 5>}, {pipeline_mode = #tpu.pipeline_mode<synchronous>, transform_indices = @transform_6, window_bounds = array<i64: 20, 5>}, {pipeline_mode = #tpu.pipeline_mode<synchronous>, transform_indices = @transform_7, window_bounds = array<i64: 5, 4>}]} {
    %c0_i32 = arith.constant 0 : i32
    %0 = arith.cmpi eq, %arg0, %c0_i32 : i32
    %1 = arith.extui %0 : i1 to i32
    %c0_i32_0 = arith.constant 0 : i32
    %2 = arith.cmpi ne, %1, %c0_i32_0 : i32
    scf.if %2 {
      %cst_47 = arith.constant 0.000000e+00 : f32
      %70 = vector.broadcast %cst_47 : f32 to vector<20x25xf32>
      %c0_48 = arith.constant 0 : index
      %c0_49 = arith.constant 0 : index
      %71 = vector.load %arg9[%c0_48, %c0_49] : memref<20x25xf32, #tpu.memory_space<vmem>>, vector<20x25xf32>
      tpu.vector_store %arg9[%c0_48, %c0_49], %70 {strides = array<i32>} : memref<20x25xf32, #tpu.memory_space<vmem>>, vector<20x25xf32>,
      %cst_50 = arith.constant 0.000000e+00 : f32
      %72 = vector.broadcast %cst_50 : f32 to vector<20x25xf32>
      %c0_51 = arith.constant 0 : index
      %c0_52 = arith.constant 0 : index
      %73 = vector.load %arg10[%c0_51, %c0_52] : memref<20x25xf32, #tpu.memory_space<vmem>>, vector<20x25xf32>
      tpu.vector_store %arg10[%c0_51, %c0_52], %72 {strides = array<i32>} : memref<20x25xf32, #tpu.memory_space<vmem>>, vector<20x25xf32>,
      %cst_53 = arith.constant 0.000000e+00 : f32
      %74 = vector.broadcast %cst_53 : f32 to vector<5x5xf32>
      %c0_54 = arith.constant 0 : index
      %c0_55 = arith.constant 0 : index
      %75 = vector.load %arg11[%c0_54, %c0_55] : memref<5x5xf32, #tpu.memory_space<vmem>>, vector<5x5xf32>
      tpu.vector_store %arg11[%c0_54, %c0_55], %74 {strides = array<i32>} : memref<5x5xf32, #tpu.memory_space<vmem>>, vector<5x5xf32>,
    } else {
    }
    %c0 = arith.constant 0 : index
    %c0_1 = arith.constant 0 : index
    %3 = vector.load %arg9[%c0, %c0_1] : memref<20x25xf32, #tpu.memory_space<vmem>>, vector<20x25xf32>
    %c0_2 = arith.constant 0 : index
    %c0_3 = arith.constant 0 : index
    %c0_4 = arith.constant 0 : index
    %4 = vector.load %arg2[%c0_2, %c0_3, %c0_4] : memref<25x8x512xf32, #tpu.memory_space<vmem>>, vector<25x8x512xf32>
    %cst = arith.constant dense<0.000000e+00> : vector<25x512xf32>
    %5 = vector.multi_reduction <add>, %4, %cst [1] : vector<25x8x512xf32> to vector<25x512xf32>
    %cst_5 = arith.constant 8.000000e+00 : f32
    %6 = vector.broadcast %cst_5 : f32 to vector<25x512xf32>
    %7 = arith.divf %5, %6 : vector<25x512xf32>
    %c0_6 = arith.constant 0 : index
    %c0_7 = arith.constant 0 : index
    %c0_8 = arith.constant 0 : index
    %8 = vector.load %arg3[%c0_6, %c0_7, %c0_8] : memref<20x8x512xf32, #tpu.memory_space<vmem>>, vector<20x8x512xf32>
    %cst_9 = arith.constant dense<0.000000e+00> : vector<20x512xf32>
    %9 = vector.multi_reduction <add>, %8, %cst_9 [1] : vector<20x8x512xf32> to vector<20x512xf32>
    %cst_10 = arith.constant 8.000000e+00 : f32
    %10 = vector.broadcast %cst_10 : f32 to vector<20x512xf32>
    %11 = arith.divf %9, %10 : vector<20x512xf32>
    "tpu.trace_start"() <{level = 10 : i32, message = "qd,sd->qs"}> : () -> ()
    %cst_11 = arith.constant dense<0.000000e+00> : vector<20x25xf32>
    %12 = tpu.matmul %11, %7, %cst_11 {dimension_numbers = #tpu.dot_dimension_numbers<[1], [1], [0], [0], [0, 0, 1, 0], [], []>} : vector<20x512xf32>, vector<25x512xf32>, vector<20x25xf32> -> vector<20x25xf32>
    "tpu.trace_stop"() : () -> ()
    %13 = arith.mulf %11, %11 : vector<20x512xf32>
    %cst_12 = arith.constant dense<0.000000e+00> : vector<20xf32>
    %14 = vector.multi_reduction <add>, %13, %cst_12 [1] : vector<20x512xf32> to vector<20xf32>
    %15 = vector.shape_cast %14 : vector<20xf32> to vector<20x1xf32>
    %16 = arith.mulf %7, %7 : vector<25x512xf32>
    %cst_13 = arith.constant dense<0.000000e+00> : vector<25xf32>
    %17 = vector.multi_reduction <add>, %16, %cst_13 [1] : vector<25x512xf32> to vector<25xf32>
    %18 = vector.shape_cast %17 : vector<25xf32> to vector<1x25xf32>
    %19 = vector.broadcast %15 : vector<20x1xf32> to vector<20x25xf32>
    %20 = vector.broadcast %18 : vector<1x25xf32> to vector<20x25xf32>
    %21 = arith.addf %19, %20 : vector<20x25xf32>
    %cst_14 = arith.constant 2.000000e+00 : f32
    %22 = vector.broadcast %cst_14 : f32 to vector<20x25xf32>
    %23 = arith.mulf %22, %12 : vector<20x25xf32>
    %24 = arith.subf %21, %23 : vector<20x25xf32>
    %25 = arith.addf %3, %24 : vector<20x25xf32>
    %c0_15 = arith.constant 0 : index
    %c0_16 = arith.constant 0 : index
    %26 = vector.load %arg9[%c0_15, %c0_16] : memref<20x25xf32, #tpu.memory_space<vmem>>, vector<20x25xf32>
    tpu.vector_store %arg9[%c0_15, %c0_16], %25 {strides = array<i32>} : memref<20x25xf32, #tpu.memory_space<vmem>>, vector<20x25xf32>,
    %c0_17 = arith.constant 0 : index
    %c0_18 = arith.constant 0 : index
    %27 = vector.load %arg10[%c0_17, %c0_18] : memref<20x25xf32, #tpu.memory_space<vmem>>, vector<20x25xf32>
    %c0_19 = arith.constant 0 : index
    %c0_20 = arith.constant 0 : index
    %c0_21 = arith.constant 0 : index
    %28 = vector.load %arg4[%c0_19, %c0_20, %c0_21] : memref<25x8x512xf32, #tpu.memory_space<vmem>>, vector<25x8x512xf32>
    %cst_22 = arith.constant dense<0.000000e+00> : vector<25x512xf32>
    %29 = vector.multi_reduction <add>, %28, %cst_22 [1] : vector<25x8x512xf32> to vector<25x512xf32>
    %cst_23 = arith.constant 8.000000e+00 : f32
    %30 = vector.broadcast %cst_23 : f32 to vector<25x512xf32>
    %31 = arith.divf %29, %30 : vector<25x512xf32>
    %c0_24 = arith.constant 0 : index
    %c0_25 = arith.constant 0 : index
    %c0_26 = arith.constant 0 : index
    %32 = vector.load %arg5[%c0_24, %c0_25, %c0_26] : memref<20x8x512xf32, #tpu.memory_space<vmem>>, vector<20x8x512xf32>
    %cst_27 = arith.constant dense<0.000000e+00> : vector<20x512xf32>
    %33 = vector.multi_reduction <add>, %32, %cst_27 [1] : vector<20x8x512xf32> to vector<20x512xf32>
    %cst_28 = arith.constant 8.000000e+00 : f32
    %34 = vector.broadcast %cst_28 : f32 to vector<20x512xf32>
    %35 = arith.divf %33, %34 : vector<20x512xf32>
    "tpu.trace_start"() <{level = 10 : i32, message = "qd,sd->qs"}> : () -> ()
    %cst_29 = arith.constant dense<0.000000e+00> : vector<20x25xf32>
    %36 = tpu.matmul %35, %31, %cst_29 {dimension_numbers = #tpu.dot_dimension_numbers<[1], [1], [0], [0], [0, 0, 1, 0], [], []>} : vector<20x512xf32>, vector<25x512xf32>, vector<20x25xf32> -> vector<20x25xf32>
    "tpu.trace_stop"() : () -> ()
    %37 = arith.mulf %35, %35 : vector<20x512xf32>
    %cst_30 = arith.constant dense<0.000000e+00> : vector<20xf32>
    %38 = vector.multi_reduction <add>, %37, %cst_30 [1] : vector<20x512xf32> to vector<20xf32>
    %39 = vector.shape_cast %38 : vector<20xf32> to vector<20x1xf32>
    %40 = arith.mulf %31, %31 : vector<25x512xf32>
    %cst_31 = arith.constant dense<0.000000e+00> : vector<25xf32>
    %41 = vector.multi_reduction <add>, %40, %cst_31 [1] : vector<25x512xf32> to vector<25xf32>
    %42 = vector.shape_cast %41 : vector<25xf32> to vector<1x25xf32>
    %43 = vector.broadcast %39 : vector<20x1xf32> to vector<20x25xf32>
    %44 = vector.broadcast %42 : vector<1x25xf32> to vector<20x25xf32>
    %45 = arith.addf %43, %44 : vector<20x25xf32>
    %cst_32 = arith.constant 2.000000e+00 : f32
    %46 = vector.broadcast %cst_32 : f32 to vector<20x25xf32>
    %47 = arith.mulf %46, %36 : vector<20x25xf32>
    %48 = arith.subf %45, %47 : vector<20x25xf32>
    %49 = arith.addf %27, %48 : vector<20x25xf32>
    %c0_33 = arith.constant 0 : index
    %c0_34 = arith.constant 0 : index
    %50 = vector.load %arg10[%c0_33, %c0_34] : memref<20x25xf32, #tpu.memory_space<vmem>>, vector<20x25xf32>
    tpu.vector_store %arg10[%c0_33, %c0_34], %49 {strides = array<i32>} : memref<20x25xf32, #tpu.memory_space<vmem>>, vector<20x25xf32>,
    %c0_35 = arith.constant 0 : index
    %c0_36 = arith.constant 0 : index
    %c0_37 = arith.constant 0 : index
    %51 = vector.load %arg4[%c0_35, %c0_36, %c0_37] : memref<25x8x512xf32, #tpu.memory_space<vmem>>, vector<25x8x512xf32>
    %52 = vector.shape_cast %51 : vector<25x8x512xf32> to vector<5x5x8x512xf32>
    %cst_38 = arith.constant dense<0.000000e+00> : vector<5x8x512xf32>
    %53 = vector.multi_reduction <add>, %52, %cst_38 [1] : vector<5x5x8x512xf32> to vector<5x8x512xf32>
    %cst_39 = arith.constant 5.000000e+00 : f32
    %54 = vector.broadcast %cst_39 : f32 to vector<5x8x512xf32>
    %55 = arith.divf %53, %54 : vector<5x8x512xf32>
    %56 = vector.shape_cast %55 : vector<5x8x512xf32> to vector<5x1x8x512xf32>
    %57 = vector.shape_cast %55 : vector<5x8x512xf32> to vector<1x5x8x512xf32>
    %58 = vector.broadcast %56 : vector<5x1x8x512xf32> to vector<5x5x8x512xf32>
    %59 = vector.broadcast %57 : vector<1x5x8x512xf32> to vector<5x5x8x512xf32>
    %60 = arith.subf %58, %59 : vector<5x5x8x512xf32>
    %c0_40 = arith.constant 0 : index
    %c0_41 = arith.constant 0 : index
    %61 = vector.load %arg11[%c0_40, %c0_41] : memref<5x5xf32, #tpu.memory_space<vmem>>, vector<5x5xf32>
    %62 = arith.mulf %60, %60 : vector<5x5x8x512xf32>
    %cst_42 = arith.constant dense<0.000000e+00> : vector<5x5x8xf32>
    %63 = vector.multi_reduction <add>, %62, %cst_42 [3] : vector<5x5x8x512xf32> to vector<5x5x8xf32>
    %cst_43 = arith.constant dense<0.000000e+00> : vector<5x5xf32>
    %64 = vector.multi_reduction <add>, %63, %cst_43 [2] : vector<5x5x8xf32> to vector<5x5xf32>
    %65 = arith.addf %61, %64 : vector<5x5xf32>
    %c0_44 = arith.constant 0 : index
    %c0_45 = arith.constant 0 : index
    %66 = vector.load %arg11[%c0_44, %c0_45] : memref<5x5xf32, #tpu.memory_space<vmem>>, vector<5x5xf32>
    tpu.vector_store %arg11[%c0_44, %c0_45], %65 {strides = array<i32>} : memref<5x5xf32, #tpu.memory_space<vmem>>, vector<5x5xf32>,
    %c3_i32 = arith.constant 3 : i32
    %67 = arith.cmpi eq, %arg0, %c3_i32 : i32
    %68 = arith.extui %67 : i1 to i32
    %c0_i32_46 = arith.constant 0 : i32
    %69 = arith.cmpi ne, %68, %c0_i32_46 : i32
    scf.if %69 {
      %c0_47 = arith.constant 0 : index
      %c0_48 = arith.constant 0 : index
      %70 = vector.load %arg1[%c0_47, %c0_48] : memref<25x1xi32, #tpu.memory_space<vmem>>, vector<25x1xi32>
      %71 = tpu.iota {dimensions = array<i32: 1>} : vector<25x5xi32>
      %72 = vector.broadcast %70 : vector<25x1xi32> to vector<25x5xi32>
      %73 = arith.cmpi eq, %72, %71 : vector<25x5xi32>
      %74 = arith.extui %73 : vector<25x5xi1> to vector<25x5xi32>
      %75 = arith.sitofp %74 : vector<25x5xi32> to vector<25x5xf32>
      %cst_49 = arith.constant dense<0.000000e+00> : vector<5xf32>
      %76 = vector.multi_reduction <add>, %75, %cst_49 [0] : vector<25x5xf32> to vector<5xf32>
      %77 = vector.shape_cast %76 : vector<5xf32> to vector<1x5xf32>
      %cst_50 = arith.constant 0.000000e+00 : f32
      %78 = vector.broadcast %cst_50 : f32 to vector<25x5xf32>
      %79 = arith.subf %78, %75 : vector<25x5xf32>
      %cst_51 = arith.constant 1.000000e+00 : f32
      %80 = vector.broadcast %cst_51 : f32 to vector<1x5xf32>
      %81 = arith.maximumf %77, %80 : vector<1x5xf32>
      %82 = vector.broadcast %81 : vector<1x5xf32> to vector<25x5xf32>
      %83 = arith.divf %79, %82 : vector<25x5xf32>
      %c0_52 = arith.constant 0 : index
      %c0_53 = arith.constant 0 : index
      %84 = vector.load %arg9[%c0_52, %c0_53] : memref<20x25xf32, #tpu.memory_space<vmem>>, vector<20x25xf32>
      %cst_54 = arith.constant 0.000000e+00 : f32
      %85 = vector.broadcast %cst_54 : f32 to vector<20x25xf32>
      %86 = arith.maximumf %84, %85 : vector<20x25xf32>
      %87 = math.sqrt %86 : vector<20x25xf32>
      %c0_55 = arith.constant 0 : index
      %c0_56 = arith.constant 0 : index
      %88 = vector.load %arg10[%c0_55, %c0_56] : memref<20x25xf32, #tpu.memory_space<vmem>>, vector<20x25xf32>
      %cst_57 = arith.constant 0.000000e+00 : f32
      %89 = vector.broadcast %cst_57 : f32 to vector<20x25xf32>
      %90 = arith.maximumf %88, %89 : vector<20x25xf32>
      %91 = math.sqrt %90 : vector<20x25xf32>
      %cst_58 = arith.constant dense<0.000000e+00> : vector<20x5xf32>
      %92 = tpu.matmul %87, %83, %cst_58 {dimension_numbers = #tpu.dot_dimension_numbers<[1], [0], [0], [1], [0, 0, 1, 1], [], []>} : vector<20x25xf32>, vector<25x5xf32>, vector<20x5xf32> -> vector<20x5xf32>
      %c0_59 = arith.constant 0 : index
      %c0_60 = arith.constant 0 : index
      %93 = vector.load %arg6[%c0_59, %c0_60] : memref<20x5xf32, #tpu.memory_space<vmem>>, vector<20x5xf32>
      tpu.vector_store %arg6[%c0_59, %c0_60], %92 {strides = array<i32>} : memref<20x5xf32, #tpu.memory_space<vmem>>, vector<20x5xf32>,
      %cst_61 = arith.constant dense<0.000000e+00> : vector<20x5xf32>
      %94 = tpu.matmul %91, %83, %cst_61 {dimension_numbers = #tpu.dot_dimension_numbers<[1], [0], [0], [1], [0, 0, 1, 1], [], []>} : vector<20x25xf32>, vector<25x5xf32>, vector<20x5xf32> -> vector<20x5xf32>
      %c0_62 = arith.constant 0 : index
      %c0_63 = arith.constant 0 : index
      %95 = vector.load %arg7[%c0_62, %c0_63] : memref<20x5xf32, #tpu.memory_space<vmem>>, vector<20x5xf32>
      tpu.vector_store %arg7[%c0_62, %c0_63], %94 {strides = array<i32>} : memref<20x5xf32, #tpu.memory_space<vmem>>, vector<20x5xf32>,
      %c0_64 = arith.constant 0 : index
      %c0_65 = arith.constant 0 : index
      %96 = vector.load %arg11[%c0_64, %c0_65] : memref<5x5xf32, #tpu.memory_space<vmem>>, vector<5x5xf32>
      %97 = vector.extract_strided_slice %96 {offsets = [0, 0], sizes = [5, 4], strides = [1, 1]} : vector<5x5xf32> to vector<5x4xf32>
      %98 = vector.extract_strided_slice %96 {offsets = [0, 1], sizes = [5, 4], strides = [1, 1]} : vector<5x5xf32> to vector<5x4xf32>
      %99 = tpu.iota {dimensions = array<i32: 0>} : vector<5x4xi32>
      %100 = tpu.iota {dimensions = array<i32: 1>} : vector<5x4xi32>
      %101 = arith.cmpi slt, %100, %99 : vector<5x4xi32>
      %102 = arith.select %101, %97, %98 : vector<5x4xi1>, vector<5x4xf32>
      %cst_66 = arith.constant 0.000000e+00 : f32
      %103 = vector.broadcast %cst_66 : f32 to vector<5x4xf32>
      %104 = arith.subf %103, %102 : vector<5x4xf32>
      %cst_67 = arith.constant 1.250000e-01 : f32
      %105 = vector.broadcast %cst_67 : f32 to vector<5x4xf32>
      %106 = arith.mulf %104, %105 : vector<5x4xf32>
      %c0_68 = arith.constant 0 : index
      %c0_69 = arith.constant 0 : index
      %107 = vector.load %arg8[%c0_68, %c0_69] : memref<5x4xf32, #tpu.memory_space<vmem>>, vector<5x4xf32>
      tpu.vector_store %arg8[%c0_68, %c0_69], %106 {strides = array<i32>} : memref<5x4xf32, #tpu.memory_space<vmem>>, vector<5x4xf32>,
    } else {
    }
    return
  }
  func.func @transform_0(%arg0: i32) -> (i32, i32) {
    %c0_i32 = arith.constant 0 : i32
    %c0_i32_0 = arith.constant 0 : i32
    %c0_i32_1 = arith.constant 0 : i32
    return %c0_i32, %c0_i32_0 : i32, i32
  }
  func.func @transform_1(%arg0: i32) -> (i32, i32, i32) {
    %c0_i32 = arith.constant 0 : i32
    %c0_i32_0 = arith.constant 0 : i32
    %c0_i32_1 = arith.constant 0 : i32
    return %c0_i32, %c0_i32_0, %arg0 : i32, i32, i32
  }
  func.func @transform_2(%arg0: i32) -> (i32, i32, i32) {
    %c0_i32 = arith.constant 0 : i32
    %c0_i32_0 = arith.constant 0 : i32
    %c0_i32_1 = arith.constant 0 : i32
    return %c0_i32, %c0_i32_0, %arg0 : i32, i32, i32
  }
  func.func @transform_3(%arg0: i32) -> (i32, i32, i32) {
    %c0_i32 = arith.constant 0 : i32
    %c0_i32_0 = arith.constant 0 : i32
    %c0_i32_1 = arith.constant 0 : i32
    return %c0_i32, %c0_i32_0, %arg0 : i32, i32, i32
  }
  func.func @transform_4(%arg0: i32) -> (i32, i32, i32) {
    %c0_i32 = arith.constant 0 : i32
    %c0_i32_0 = arith.constant 0 : i32
    %c0_i32_1 = arith.constant 0 : i32
    return %c0_i32, %c0_i32_0, %arg0 : i32, i32, i32
  }
  func.func @transform_5(%arg0: i32) -> (i32, i32) {
    %c0_i32 = arith.constant 0 : i32
    %c0_i32_0 = arith.constant 0 : i32
    %c0_i32_1 = arith.constant 0 : i32
    return %c0_i32, %c0_i32_0 : i32, i32
  }
  func.func @transform_6(%arg0: i32) -> (i32, i32) {
    %c0_i32 = arith.constant 0 : i32
    %c0_i32_0 = arith.constant 0 : i32
    %c0_i32_1 = arith.constant 0 : i32
    return %c0_i32, %c0_i32_0 : i32, i32
  }
  func.func @transform_7(%arg0: i32) -> (i32, i32) {
    %c0_i32 = arith.constant 0 : i32
    %c0_i32_0 = arith.constant 0 : i32
    %c0_i32_1 = arith.constant 0 : i32
    return %c0_i32, %c0_i32_0 : i32, i32
  }
}

</mosaic_0001>

<bundles_post_ra>
// kernel: e_dist_fc2_sup_forward.1
= control target key start
LH: loop header
LB: loop body
LE: loop exit
PB: predicated region body
PF: predicated region fallthrough
CT: control target
= control target key end

     0   :  { %s10787_s0 = inlined_call_operand.vmem [shape: s32[25,1], index: 0, kind: input, shape index: {}]   ;;  %s10788_s1 = inlined_call_operand.hbm [shape: f32[25,8,2048], index: 1, kind: input, shape index: {}]   ;;  %s10789_s2 = inlined_call_operand.hbm [shape: f32[20,8,2048], index: 2, kind: input, shape index: {}]   ;;  %s10790_s3 = inlined_call_operand.hbm [shape: f32[25,8,2048], index: 3, kind: input, shape index: {}]   ;;  %s10791_s4 = inlined_call_operand.hbm [shape: f32[20,8,2048], index: 4, kind: input, shape index: {}]   ;;  %s10792_s5 = inlined_call_operand.vmem [shape: f32[20,5], index: 5, kind: output, shape index: {0}]   ;;  %s10793_s6 = inlined_call_operand.vmem [shape: f32[20,5], index: 6, kind: output, shape index: {1}]   ;;  %s10794_s7 = inlined_call_operand.vmem [shape: f32[5,4], index: 7, kind: output, shape index: {2}]  }
   0x1   :  { %10964 = sst [smem:[#allocation337_spill]] %s10789_s2 }
   0x2   :  { %13 = vsyncpa [#allocation6], 0 }
   0x3   :  { %15 = vsyncpa [#allocation6 + $0x1], 0 }
   0x4   :  { %16 = vsyncpa [#allocation8], 0 }
   0x5   :  { %18 = vsyncpa [#allocation8 + $0x1], 0 }
   0x6   :  { %19 = vsyncpa [#allocation11], 0 }
   0x7   :  { %21 = vsyncpa [#allocation11 + $0x1], 0  ;;  %s7215_s24 = smov 0   ;;  %s7217_s25 = smov 0  }
   0x8   :  { %s7219_s26 = smov 0   ;;  %s7221_s27 = smov 0  }
   0x9 LB: > { %10965 = sst [smem:[#allocation15_spill]] %s7155_s26  ;;  %s7234_s28 = sadd.s32 4294967295, %s7159_s27   ;;  %s7159_s27 = sphi %s7221_s27, %s11624_s27   ;;  %s7155_s26 = sphi %s7219_s26, %s11621_s26   ;;  %s7151_s25 = sphi %s7217_s25, %s11623_s25   ;;  %s7147_s24 = sphi %s7215_s24, %s11622_s24  }
   0xa   : > { %s7237_s29 = sadd.s32 1, %s7159_s27   ;;  %s55_s8 = sadd.s32 1, %s7155_s26 }
   0xb   : > { %s52_s30 = ssub.s32 %s7159_s27, %s7237_s29  ;;  %p62_p1 = scmp.ne.s32.totalorder %s7155_s26, %s7151_s25 }
   0xc   : > { %p53_p0 = scmp.eq.s32.totalorder %s52_s30, 0  ;;  %p63_p2 = scmp.eq.s32.totalorder %s7159_s27, 0 }
   0xd   : > { %p68_p3 = scmp.ne.s32.totalorder %s7151_s25, %s7147_s24  ;;  %p69_p5 = scmp.eq.s32.totalorder %s7234_s28, 0 }
   0xe   : > { %s7247_s9 = scalar_select %p53_p0, %s7155_s26, %s55_s8  }
   0xf   : > { %p64_p4 = por %p63_p2, %p62_p1  ;;  %p6938_p6 = scmp.lt.s32.totalorder %s7159_s27, 4 }
  0x10   : > { %10966 = sst [smem:[#allocation16_spill]] %s7247_s9  ;;  %p7251_p7 = por %p69_p5, %p68_p3 }
  0x11   : > { %s7256_s11 = sand.u32 1, %s7155_s26   ;;  %s7259_s12 = sshll.u32 %s7159_s27, 9 }
  0x12   : > { %s10967_s10 = scalar_select %p7251_p7, 1, 0 }
  0x13   : > { %p7261_p8 = pnand %p6938_p6, %p64_p4  ;;  %s257_s14 = sand.u32 1, %s7159_s27  }
  0x14   : > { %s10796_s15 = smul.u32 640, %s7256_s11  ;;  %s10969_s2 = sld [smem:[#allocation337_spill]] }
  0x15   : > { %s7279_s21 = scalar_lea.sflag [#allocation8], %s257_s14  ;;  %p7285_p12 = pneg %p7261_p8 }
  0x16   : > { %s261_s19 = scalar_lea.vmem [#allocation7], %s10796_s15 }
  0x17   : > { %s268_s20 = sshll.u32 %s261_s19, 4  ;;  %s7277_s20 = int_to_ptr.vmem [resolvable:$true] %s268_s20 }
  0x1a   : > { %s7271_s18 = scalar_lea.hbm %s10969_s2, %s7259_s12  ;;  %s7002_s8 = scalar_lea.hbm %s10969_s2, 40960 }
  0x1b   : > { %s6997_s22 = scalar_lea.hbm %s7271_s18, 10240  ;;  %p7003_p1 = scmp.lt.u32.totalorder %s7271_s18, %s10969_s2 }
  0x1c   : > { %p6998_p11 = scmp.ne.s32.totalorder %s7271_s18, %s6997_s22  ;;  %p7004_p2 = scmp.lt.u32.totalorder %s7002_s8, %s6997_s22 }
  0x1d   : > { %p7006_p4 = scmp.lt.u32.totalorder %s6997_s22, %s7271_s18 }
  0x1e   : > { %p7000_p13 = pnand %p7285_p12, %p6998_p11  ;;  %p7005_p3 = por %p7004_p2, %p7003_p1 }
  0x20   : > { %p7001_p0 = pneg %p7000_p13  ;;  %p7007_p5 = por %p7006_p4, %p7005_p3 }
  0x22   : > { %p7008_p6 = pnand %p7007_p5, %p7001_p0 }
  0x24   : > { %7011 = shalt.err (!%p7008_p6)
}
  0x25   : > { %s7012_s14 = scalar_lea.vmem %s7277_s20, 10240  ;;  %s7161_s19 = smov [#allocation7]  }
  0x26   : > { %p7013_p11 = scmp.ne.s32.totalorder %s7277_s20, %s7012_s14  ;;  %s7017_s24 = sshll.u32 %s7161_s19, 4  ;;  %s7018_s24 = int_to_ptr.vmem [resolvable:$false] %s7017_s24 }
  0x27   : > { %s7019_s30 = scalar_lea.vmem %s7018_s24, 20480  ;;  %p7020_p10 = scmp.lt.s32.totalorder %s7277_s20, %s7018_s24 }
  0x28   : > { %p7015_p13 = pnand %p7013_p11, %p7285_p12  ;;  %p7021_p7 = scmp.lt.s32.totalorder %s7019_s30, %s7012_s14 }
  0x2a   : > { %p7016_p9 = pneg %p7015_p13  ;;  %p7022_p1 = por %p7021_p7, %p7020_p10 }
  0x2c   : > { %p7023_p2 = pnand %p7022_p1, %p7016_p9 }
  0x2e   : > { %7026 = shalt.err (!%p7023_p2)
}
  0x2f   : > { %s10797_s22 = smov 2048   ;;  %s10799_s8 = smov 512  }
  0x30   : > { %s10801_s16 = smov 32   ;;  %p10971_p7 = scmp.lt.s32.totalorder %s7159_s27, 5 }
  0x31   : > { %6931 = dma.hbm_to_vmem [thread:$0]  (!%p7261_p8), %s7271_s18, 10240, %s7277_s20, %s7279_s21, %s10797_s22, %s10799_s8, %s10801_s16  }
  0x32   : > { %p10972_p9 = scmp.ge.s32.totalorder %s7159_s27, 1  ;;  %s6911_s14 = smul.u32 800, %s7256_s11 }
  0x33   : > { %s7325_s30 = scalar_lea.hbm %s10788_s1, %s7259_s12  ;;  %s7331_s9 = scalar_lea.hbm %s10790_s3, %s7259_s12 }
  0x34   : > { %p7316_p10 = pnand %p10972_p9, %p10971_p7  ;;  %s240_s27 = scalar_lea.vmem [#allocation5], %s6911_s14 }
  0x35   : > { %s247_s18 = sshll.u32 %s240_s27, 4  ;;  %s282_s20 = scalar_lea.vmem [#allocation9], %s6911_s14  ;;  %s7333_s18 = int_to_ptr.vmem [resolvable:$true] %s247_s18 }
  0x36   : > { %s10973_s17 = scalar_select %p7316_p10, 1, 0 }
  0x37   : > { %s289_s22 = sshll.u32 %s282_s20, 4  ;;  %s237_s19 = scalar_lea.sflag [#allocation6], %s7256_s11  ;;  %s7335_s22 = int_to_ptr.vmem [resolvable:$true] %s289_s22 }
  0x38   : > { %s7027_s24 = scalar_lea.hbm %s7325_s30, 12800  ;;  %s7032_s8 = scalar_lea.hbm %s10788_s1, 51200 }
  0x39   : > { %p7028_p0 = scmp.ne.s32.totalorder %s7325_s30, %s7027_s24  ;;  %p7033_p5 = scmp.lt.u32.totalorder %s7325_s30, %s10788_s1 }
  0x3a   : > { %p7034_p6 = scmp.lt.u32.totalorder %s7032_s8, %s7027_s24  ;;  %p7036_p13 = scmp.lt.u32.totalorder %s7027_s24, %s7325_s30 }
  0x3b   : > { %p7030_p3 = pnand %p7028_p0, %p7285_p12 }
  0x3c   : > { %p7035_p11 = por %p7034_p6, %p7033_p5 }
  0x3d   : > { %p7031_p4 = pneg %p7030_p3 }
  0x3e   : > { %p7037_p1 = por %p7036_p13, %p7035_p11 }
  0x40   : > { %p7038_p2 = pnand %p7037_p1, %p7031_p4 }
  0x42   : > { %7041 = shalt.err (!%p7038_p2)
}
  0x43   : > { %s7042_s14 = scalar_lea.vmem %s7333_s18, 12800  ;;  %s7165_s27 = smov [#allocation5]  }
  0x44   : > { %p7043_p7 = scmp.ne.s32.totalorder %s7333_s18, %s7042_s14  ;;  %s7047_s20 = sshll.u32 %s7165_s27, 4  ;;  %s7048_s20 = int_to_ptr.vmem [resolvable:$false] %s7047_s20 }
  0x45   : > { %s7049_s26 = scalar_lea.vmem %s7048_s20, 25600  ;;  %p7050_p3 = scmp.lt.s32.totalorder %s7333_s18, %s7048_s20 }
  0x46   : > { %p7045_p9 = pnand %p7043_p7, %p7285_p12  ;;  %p7051_p10 = scmp.lt.s32.totalorder %s7049_s26, %s7042_s14 }
  0x48   : > { %p7046_p0 = pneg %p7045_p9  ;;  %p7052_p5 = por %p7051_p10, %p7050_p3 }
  0x4a   : > { %p7053_p6 = pnand %p7052_p5, %p7046_p0 }
  0x4c   : > { %7056 = shalt.err (!%p7053_p6)
}
  0x4d   : > { %s10974_s8 = smov 32   ;;  %s10975_s16 = smov 512  }
  0x4e   : > { %s10976_s24 = smov 2048   ;;  %s7057_s2 = scalar_lea.hbm %s7331_s9, 12800 }
  0x4f   : > { %6928 = dma.hbm_to_vmem [thread:$0]  (!%p7261_p8), %s7325_s30, 12800, %s7333_s18, %s237_s19, %s10976_s24, %s10975_s16, %s10974_s8  }
  0x50   : > { %p7058_p4 = scmp.ne.s32.totalorder %s7331_s9, %s7057_s2  ;;  %s7062_s27 = scalar_lea.hbm %s10790_s3, 51200 }
  0x51   : > { %p7063_p13 = scmp.lt.u32.totalorder %s7331_s9, %s10790_s3  ;;  %p7064_p1 = scmp.lt.u32.totalorder %s7062_s27, %s7057_s2 }
  0x52   : > { %p7060_p10 = pnand %p7058_p4, %p7285_p12  ;;  %p7066_p7 = scmp.lt.u32.totalorder %s7057_s2, %s7331_s9 }
  0x53   : > { %p7065_p2 = por %p7064_p1, %p7063_p13 }
  0x54   : > { %p7061_p11 = pneg %p7060_p10 }
  0x55   : > { %p7067_p9 = por %p7066_p7, %p7065_p2 }
  0x57   : > { %p7068_p0 = pnand %p7067_p9, %p7061_p11 }
  0x59   : > { %7071 = shalt.err (!%p7068_p0)
}
  0x5a   : > { %s7072_s30 = scalar_lea.vmem %s7335_s22, 12800  ;;  %s7166_s18 = smov [#allocation9]  }
  0x5b   : > { %p7073_p3 = scmp.ne.s32.totalorder %s7335_s22, %s7072_s30  ;;  %s7077_s19 = sshll.u32 %s7166_s18, 4  ;;  %s7078_s19 = int_to_ptr.vmem [resolvable:$false] %s7077_s19 }
  0x5c   : > { %s7079_s15 = scalar_lea.vmem %s7078_s19, 25600  ;;  %p7080_p4 = scmp.lt.s32.totalorder %s7335_s22, %s7078_s19 }
  0x5d   : > { %p7075_p5 = pnand %p7073_p3, %p7285_p12  ;;  %p7081_p10 = scmp.lt.s32.totalorder %s7079_s15, %s7072_s30 }
  0x5f   : > { %p7076_p6 = pneg %p7075_p5  ;;  %p7082_p13 = por %p7081_p10, %p7080_p4 }
  0x61   : > { %p7083_p1 = pnand %p7082_p13, %p7076_p6 }
  0x63   : > { %7086 = shalt.err (!%p7083_p1)
}
  0x64   : > { %6934 = dma.hbm_to_vmem [thread:$0]  (!%p7261_p8), %s7331_s9, 12800, %s7335_s22, %s7279_s21, %s10976_s24, %s10975_s16, %s10974_s8  }
  0x65   : > { %s7393_s27 = scalar_lea.hbm %s10791_s4, %s7259_s12  ;;  %s10977_s20 = smul.u32 640, %s7256_s11 }
  0x66   : > { %s300_s18 = scalar_lea.sflag [#allocation11], %s7256_s11  ;;  %s7087_s19 = scalar_lea.hbm %s7393_s27, 10240 }
  0x67   : > { %s303_s26 = scalar_lea.vmem [#allocation10], %s10977_s20  ;;  %p7088_p11 = scmp.ne.s32.totalorder %s7393_s27, %s7087_s19 }
  0x68   : > { %s310_s30 = sshll.u32 %s303_s26, 4  ;;  %s7092_s12 = scalar_lea.hbm %s10791_s4, 40960  ;;  %s7397_s30 = int_to_ptr.vmem [resolvable:$true] %s310_s30 }
  0x69   : > { %p7090_p2 = pnand %p7088_p11, %p7285_p12  ;;  %p7093_p9 = scmp.lt.u32.totalorder %s7393_s27, %s10791_s4 }
  0x6a   : > { %p7094_p0 = scmp.lt.u32.totalorder %s7092_s12, %s7087_s19  ;;  %p7096_p5 = scmp.lt.u32.totalorder %s7087_s19, %s7393_s27 }
  0x6b   : > { %p7091_p7 = pneg %p7090_p2 }
  0x6c   : > { %p7095_p3 = por %p7094_p0, %p7093_p9 }
  0x6e   : > { %p7097_p6 = por %p7096_p5, %p7095_p3 }
  0x70   : > { %p7098_p4 = pnand %p7097_p6, %p7091_p7 }
  0x72   : > { %7101 = shalt.err (!%p7098_p4)
}
  0x73   : > { %s7102_s2 = scalar_lea.vmem %s7397_s30, 10240  ;;  %s7167_s14 = smov [#allocation10]  }
  0x74   : > { %p7103_p10 = scmp.ne.s32.totalorder %s7397_s30, %s7102_s2  ;;  %s7107_s20 = sshll.u32 %s7167_s14, 4  ;;  %s7108_s20 = int_to_ptr.vmem [resolvable:$false] %s7107_s20 }
  0x75   : > { %s7109_s26 = scalar_lea.vmem %s7108_s20, 20480  ;;  %p7110_p11 = scmp.lt.s32.totalorder %s7397_s30, %s7108_s20 }
  0x76   : > { %p7105_p13 = pnand %p7103_p10, %p7285_p12  ;;  %p7111_p2 = scmp.lt.s32.totalorder %s7109_s26, %s7102_s2 }
  0x78   : > { %p7106_p1 = pneg %p7105_p13  ;;  %p7112_p9 = por %p7111_p2, %p7110_p11 }
  0x7a   : > { %p7113_p0 = pnand %p7112_p9, %p7106_p1 }
  0x7c   : > { %7116 = shalt.err (!%p7113_p0)
}
  0x7d   : > { %6937 = dma.hbm_to_vmem [thread:$0]  (!%p7261_p8), %s7393_s27, 10240, %s7397_s30, %s300_s18, %s10976_s24, %s10975_s16, %s10974_s8  }
  0x7e   : > { %p10978_p12 = scmp.ne.s32.totalorder %s10973_s17, 0 }
  0x80   : > { %322 = sbr.rel (%p10978_p12) target bundleno = 1707 (0x6ab), region = 40 }
  0x87   : > { %s324_s23 = sand.u32 1, %s7151_s25   ;;  %p10979_p7 = scmp.ne.s32.totalorder %s10967_s10, 0 }
  0x88   : > { %s6915_s19 = smul.u32 800, %s324_s23  ;;  %s325_s9 = scalar_lea.sflag [#allocation6], %s324_s23 }
  0x8a   : > { %s7429_s21 = scalar_lea.vmem [#allocation5], %s6915_s19 }
  0x8b   : > { %7134 = dma.done.wait (%p10979_p7), %s325_s9, 12800  }
  0x8c   : > { %7136 = vsyncadd (%p10979_p7), %s325_s9, 4294954496  ;;  %s333_s11 = sand.u32 1, %s7234_s28   ;;  %s6916_s13 = smul.u32 640, %s324_s23 }
  0x8d   : > { %s334_s8 = scalar_lea.sflag [#allocation8], %s333_s11 }
  0x8e   : > { %s7436_s16 = scalar_lea.vmem [#allocation7], %s6916_s13 }
  0x8f   : > { %7138 = dma.done.wait (%p10979_p7), %s334_s8, 23040  }
  0x90   : > { %7140 = vsyncadd (%p10979_p7), %s334_s8, 4294944256  ;;  %s7442_s17 = scalar_lea.vmem [#allocation9], %s6915_s19  ;;  %s352_s24 = scalar_lea.sflag [#allocation11], %s324_s23 }
  0x91   : > { %s7444_s27 = scalar_lea.vmem [#allocation10], %s6916_s13 }
  0x92   : > { %7142 = dma.done.wait (%p10979_p7), %s352_s24, 10240  }
  0x93   : > { %7144 = vsyncadd (%p10979_p7), %s352_s24, 4294957056  ;;  %p6785_p8 = scmp.ne.s32.totalorder %s7234_s28, 0 }
  0x94   : > { %vm404_vm0 = vcmask (!%p6785_p8), 203776   ;;  %vm407_vm1 = vcmask (!%p6785_p8), 199680   ;;  %vm412_vm2 = vcmask (!%p6785_p8), 36864   ;;  %v7168_v0 = vmov (!%p6785_p8), 0.0  }
  0x95   : > { %403 = sbr.rel (%p6785_p8) target bundleno = 156 (0x9c), region = 60  ;;  %405 = vst.msk [vmem:[#allocation2] sm:$0xff] (!%p6785_p8), %vm404_vm0, %v7168_v0  ;;  %406 = vst.msk [vmem:[#allocation2 + $0x8] sm:$0xff] (!%p6785_p8), %vm404_vm0, %v7168_v0 }
  0x96   : > { %409 = vst.msk [vmem:[#allocation3] sm:$0xff] (!%p6785_p8), %vm404_vm0, %v7168_v0  ;;  %410 = vst.msk [vmem:[#allocation3 + $0x8] sm:$0xff] (!%p6785_p8), %vm404_vm0, %v7168_v0 }
  0x97   : > { %408 = vst.msk [vmem:[#allocation2 + $0x10] sm:$0xf] (!%p6785_p8), %vm407_vm1, %v7168_v0  ;;  %411 = vst.msk [vmem:[#allocation3 + $0x10] sm:$0xf] (!%p6785_p8), %vm407_vm1, %v7168_v0 }
  0x98   : > { %413 = vst.msk [vmem:[#allocation4] sm:$0x1f] (!%p6785_p8), %vm412_vm2, %v7168_v0 }
  0x9c PF: > { %v5618_v1 = vld [vmem:[%s7442_s17] sm:$0xff]  ;;  %v5619_v2 = vld [vmem:[%s7442_s17 + $0x8] sm:$0xff]  ;;  %v5620_v3 = vld [vmem:[%s7442_s17 + $0x10] sm:$0xff]  ;;  %vm1938_vm3 = vcmask 1041409   ;;  %vm1940_vm4 = vcmask 1042434   ;;  %vm1942_vm5 = vcmask 1043459  }
  0x9d   : > { %v5621_v4 = vld [vmem:[%s7442_s17 + $0x18] sm:$0xff]  ;;  %v5622_v5 = vld [vmem:[%s7442_s17 + $0x20] sm:$0xff]  ;;  %v5623_v6 = vld [vmem:[%s7442_s17 + $0x28] sm:$0xff]  ;;  %vm1944_vm6 = vcmask 1044484   ;;  %vm1946_vm7 = vcmask 1045509   ;;  %vm1948_vm8 = vcmask 1046534  }
  0x9e   : > { %v5624_v7 = vld [vmem:[%s7442_s17 + $0x30] sm:$0xff]  ;;  %v5625_v8 = vld [vmem:[%s7442_s17 + $0x38] sm:$0xff]  ;;  %v5626_v9 = vld [vmem:[%s7442_s17 + $0x40] sm:$0xff]  ;;  %v5718_v10 = vadd.f32 %v5622_v5, %v5618_v1  ;;  %v5722_v11 = vadd.f32 %v5623_v6, %v5619_v2  ;;  %vm1950_vm9 = vcmask 1047559   ;;  %vm2960_vm10 = vcmask 1040384   ;;  %p6786_p3 = scmp.ne.s32.totalorder %s7234_s28, 3 }
  0x9f   : > { %v5627_v12 = vld [vmem:[%s7442_s17 + $0x48] sm:$0xff]  ;;  %v5628_v13 = vld [vmem:[%s7442_s17 + $0x50] sm:$0xff]  ;;  %v5629_v14 = vld [vmem:[%s7442_s17 + $0x58] sm:$0xff]  ;;  %v5726_v15 = vadd.f32 %v5624_v7, %v5620_v3  ;;  %v5730_v16 = vadd.f32 %v5625_v8, %v5621_v4  ;;  %vm2635_vm11 = vcmask 1043456   ;;  %vm6295_vm12 = vcmask 61440   ;;  %s7173_s14 = smov (!%p6786_p3), 127  }
  0xa0   : > { %v5630_v17 = vld [vmem:[%s7442_s17 + $0x60] sm:$0xff]  ;;  %v5631_v18 = vld [vmem:[%s7442_s17 + $0x68] sm:$0xff]  ;;  %v5632_v19 = vld [vmem:[%s7442_s17 + $0x70] sm:$0xff]  ;;  %v5719_v20 = vadd.f32 %v5718_v10, %v5626_v9  ;;  %v5723_v21 = vadd.f32 %v5722_v11, %v5627_v12  ;;  %vm2985_vm13 = vcmask 130112   ;;  %vm2992_vm14 = vcmask 195712  }
  0xa1   : > { %v5633_v22 = vld [vmem:[%s7442_s17 + $0x78] sm:$0xff]  ;;  %v5634_v23 = vld [vmem:[%s7442_s17 + $0x80] sm:$0xff]  ;;  %v5635_v24 = vld [vmem:[%s7442_s17 + $0x88] sm:$0xff]  ;;  %v5727_v25 = vadd.f32 %v5726_v15, %v5628_v13  ;;  %v5731_v26 = vadd.f32 %v5730_v16, %v5629_v14  ;;  %vm2999_vm15 = vcmask 261312   ;;  %vm3021_vm0 = vcmask 203776  }
  0xa2   : > { %v5636_v27 = vld [vmem:[%s7442_s17 + $0x90] sm:$0xff]  ;;  %v5637_v28 = vld [vmem:[%s7442_s17 + $0x98] sm:$0xff]  ;;  %v5638_v29 = vld [vmem:[%s7442_s17 + $0xa0] sm:$0xff]  ;;  %v5720_v30 = vadd.f32 %v5719_v20, %v5630_v17  ;;  %v5724_v31 = vadd.f32 %v5723_v21, %v5631_v18  ;;  %vm3024_vm1 = vcmask 199680   ;;  %vm6342_vm2 = vcmask 36864  }
  0xa3   : > { %v5639_v32 = vld [vmem:[%s7442_s17 + $0xa8] sm:$0xff]  ;;  %v5640_v33 = vld [vmem:[%s7442_s17 + $0xb0] sm:$0xff]  ;;  %v5641_v34 = vld [vmem:[%s7442_s17 + $0xb8] sm:$0xff]  ;;  %v5728_v35 = vadd.f32 %v5727_v25, %v5632_v19  ;;  %v5732_v36 = vadd.f32 %v5731_v26, %v5633_v22 }
  0xa4   : > { %v5642_v37 = vld [vmem:[%s7442_s17 + $0xc0] sm:$0xff]  ;;  %v5643_v38 = vld [vmem:[%s7442_s17 + $0xc8] sm:$0xff]  ;;  %v5644_v39 = vld [vmem:[%s7442_s17 + $0xd0] sm:$0xff]  ;;  %v5721_v40 = vadd.f32 %v5720_v30, %v5634_v23  ;;  %v5725_v41 = vadd.f32 %v5724_v31, %v5635_v24 }
  0xa5   : > { %v5645_v42 = vld [vmem:[%s7442_s17 + $0xd8] sm:$0xff]  ;;  %v5646_v43 = vld [vmem:[%s7442_s17 + $0xe0] sm:$0xff]  ;;  %v5647_v44 = vld [vmem:[%s7442_s17 + $0xe8] sm:$0xff]  ;;  %v5729_v45 = vadd.f32 %v5728_v35, %v5636_v27  ;;  %v5733_v46 = vadd.f32 %v5732_v36, %v5637_v28  ;;  %v5734_v47 = vadd.f32 %v5642_v37, %v5638_v29  ;;  %v5738_v48 = vadd.f32 %v5643_v38, %v5639_v32 }
  0xa6   : > { %v5648_v49 = vld [vmem:[%s7442_s17 + $0xf0] sm:$0xff]  ;;  %v5649_v50 = vld [vmem:[%s7442_s17 + $0xf8] sm:$0xff]  ;;  %v5650_v51 = vld [vmem:[%s7442_s17 + $0x100] sm:$0xff]  ;;  %v5742_v52 = vadd.f32 %v5644_v39, %v5640_v33  ;;  %v5746_v53 = vadd.f32 %v5645_v42, %v5641_v34  ;;  %v7484_v54 = vmul.f32 0.2, %v5721_v40 }
  0xa7   : > { %v5651_v55 = vld [vmem:[%s7442_s17 + $0x108] sm:$0xff]  ;;  %v5652_v56 = vld [vmem:[%s7442_s17 + $0x110] sm:$0xff]  ;;  %v5653_v57 = vld [vmem:[%s7442_s17 + $0x118] sm:$0xff]  ;;  %v5735_v58 = vadd.f32 %v5734_v47, %v5646_v43  ;;  %v5739_v59 = vadd.f32 %v5738_v48, %v5647_v44  ;;  %v7489_v60 = vmul.f32 0.2, %v5725_v41 }
  0xa8   : > { %v5654_v61 = vld [vmem:[%s7442_s17 + $0x120] sm:$0xff]  ;;  %v5655_v62 = vld [vmem:[%s7442_s17 + $0x128] sm:$0xff]  ;;  %v5743_v63 = vadd.f32 %v5742_v52, %v5648_v49  ;;  %v5747_v0 = vadd.f32 %v5746_v53, %v5649_v50  ;;  %v7493_v1 = vmul.f32 0.2, %v5729_v45  ;;  %v5819_v2 = vsub.f32 %v7484_v54, %v7484_v54  ;;  %v5656_v3 = vld [vmem:[%s7442_s17 + $0x130] sm:$0xff] }
  0xa9   : > { %v5657_v4 = vld [vmem:[%s7442_s17 + $0x138] sm:$0xff]  ;;  %v5736_v5 = vadd.f32 %v5735_v58, %v5650_v51  ;;  %v5740_v6 = vadd.f32 %v5739_v59, %v5651_v55  ;;  %v7499_v7 = vmul.f32 0.2, %v5733_v46  ;;  %v5820_v8 = vsub.f32 %v7489_v60, %v7489_v60  ;;  %v5658_v9 = vld [vmem:[%s7442_s17 + $0x140] sm:$0xff]  ;;  %v5659_v19 = vld [vmem:[%s7442_s17 + $0x148] sm:$0xff] }
  0xaa   : > { %v5744_v10 = vadd.f32 %v5743_v63, %v5652_v56  ;;  %v5748_v11 = vadd.f32 %v5747_v0, %v5653_v57  ;;  %v5821_v12 = vsub.f32 %v7493_v1, %v7493_v1  ;;  %v5920_v13 = vmul.f32 %v5819_v2, %v5819_v2  ;;  %v5662_v14 = vld [vmem:[%s7442_s17 + $0x160] sm:$0xff]  ;;  %v5663_v20 = vld [vmem:[%s7442_s17 + $0x168] sm:$0xff]  ;;  %v5660_v50 = vld [vmem:[%s7442_s17 + $0x150] sm:$0xff] }
  0xab   : > { %v5737_v15 = vadd.f32 %v5736_v5, %v5654_v61  ;;  %v5741_v16 = vadd.f32 %v5740_v6, %v5655_v62  ;;  %v5822_v17 = vsub.f32 %v7499_v7, %v7499_v7  ;;  %v5921_v18 = vmul.f32 %v5820_v8, %v5820_v8  ;;  %v5666_v24 = vld [vmem:[%s7442_s17 + $0x180] sm:$0xff]  ;;  %v5667_v51 = vld [vmem:[%s7442_s17 + $0x188] sm:$0xff]  ;;  %v5661_v58 = vld [vmem:[%s7442_s17 + $0x158] sm:$0xff] }
  0xac   : > { %v5745_v21 = vadd.f32 %v5744_v10, %v5656_v3  ;;  %v5749_v22 = vadd.f32 %v5748_v11, %v5657_v4  ;;  %v5922_v23 = vmul.f32 %v5821_v12, %v5821_v12  ;;  %v5750_v25 = vadd.f32 %v5662_v14, %v5658_v9  ;;  %v5670_v52 = vld [vmem:[%s7442_s17 + $0x1a0] sm:$0xff]  ;;  %v5664_v59 = vld [vmem:[%s7442_s17 + $0x170] sm:$0xff]  ;;  %v5665_v61 = vld [vmem:[%s7442_s17 + $0x178] sm:$0xff] }
  0xad   : > { %v7512_v26 = vmul.f32 0.2, %v5737_v15  ;;  %v7514_v27 = vmul.f32 0.2, %v5741_v16  ;;  %v5923_v28 = vmul.f32 %v5822_v17, %v5822_v17  ;;  %v6020_v29 = vadd.f32 %v5921_v18, %v5920_v13  ;;  %v5668_v3 = vld [vmem:[%s7442_s17 + $0x190] sm:$0xff]  ;;  %v5671_v4 = vld [vmem:[%s7442_s17 + $0x1a8] sm:$0xff] }
  0xae   : > { %v7516_v30 = vmul.f32 0.2, %v5745_v21  ;;  %v7518_v31 = vmul.f32 0.2, %v5749_v22  ;;  %v5751_v32 = vadd.f32 %v5750_v25, %v5666_v24  ;;  %v5754_v33 = vadd.f32 %v5663_v20, %v5659_v19  ;;  %v5674_v5 = vld [vmem:[%s7442_s17 + $0x1c0] sm:$0xff]  ;;  %v5669_v9 = vld [vmem:[%s7442_s17 + $0x198] sm:$0xff] }
  0xaf   : > { %v5839_v34 = vsub.f32 %v7512_v26, %v7484_v54  ;;  %v5840_v35 = vsub.f32 %v7514_v27, %v7489_v60  ;;  %v6021_v36 = vadd.f32 %v6020_v29, %v5922_v23  ;;  %v5843_v37 = vsub.f32 %v7512_v26, %v7512_v26  ;;  %v5678_v12 = vld [vmem:[%s7442_s17 + $0x1e0] sm:$0xff]  ;;  %v5675_v18 = vld [vmem:[%s7442_s17 + $0x1c8] sm:$0xff]  ;;  %v5680_v25 = vld [vmem:[%s7442_s17 + $0x1f0] sm:$0xff] }
  0xb0   : > { %v5841_v38 = vsub.f32 %v7516_v30, %v7493_v1  ;;  %v5842_v39 = vsub.f32 %v7518_v31, %v7499_v7  ;;  %v5844_v40 = vsub.f32 %v7514_v27, %v7514_v27  ;;  %v5845_v41 = vsub.f32 %v7516_v30, %v7516_v30  ;;  %v5682_v13 = vld [vmem:[%s7442_s17 + $0x200] sm:$0xff]  ;;  %v5679_v19 = vld [vmem:[%s7442_s17 + $0x1e8] sm:$0xff] }
  0xb1   : > { %v5940_v42 = vmul.f32 %v5839_v34, %v5839_v34  ;;  %v5941_v43 = vmul.f32 %v5840_v35, %v5840_v35  ;;  %v6022_v44 = vadd.f32 %v6021_v36, %v5923_v28  ;;  %v5846_v45 = vsub.f32 %v7518_v31, %v7518_v31  ;;  %v5683_v20 = vld [vmem:[%s7442_s17 + $0x208] sm:$0xff]  ;;  %v5684_v28 = vld [vmem:[%s7442_s17 + $0x210] sm:$0xff]  ;;  %v5686_v29 = vld [vmem:[%s7442_s17 + $0x220] sm:$0xff] }
  0xb2   : > { %v5942_v46 = vmul.f32 %v5841_v38, %v5841_v38  ;;  %v5943_v47 = vmul.f32 %v5842_v39, %v5842_v39  ;;  %v5944_v48 = vmul.f32 %v5843_v37, %v5843_v37  ;;  %v5945_v49 = vmul.f32 %v5844_v40, %v5844_v40  ;;  %v5672_v34 = vld [vmem:[%s7442_s17 + $0x1b0] sm:$0xff]  ;;  %v5673_v37 = vld [vmem:[%s7442_s17 + $0x1b8] sm:$0xff] }
  0xb3   : > { %v6045_v53 = vadd.f32 %v5941_v43, %v5940_v42  ;;  %6023 = vadd.xlane.f32.xlu0 %v6022_v44  ;;  %v5946_v55 = vmul.f32 %v5845_v41, %v5845_v41  ;;  %v5947_v56 = vmul.f32 %v5846_v45, %v5846_v45  ;;  %v5823_v57 = vsub.f32 %v7484_v54, %v7512_v26  ;;  %v5676_v43 = vld [vmem:[%s7442_s17 + $0x1d0] sm:$0xff] }
  0xb4   : > { %v6050_v62 = vadd.f32 %v5945_v49, %v5944_v48  ;;  %v5824_v63 = vsub.f32 %v7489_v60, %v7514_v27  ;;  %v5825_v0 = vsub.f32 %v7493_v1, %v7516_v30  ;;  %v5826_v2 = vsub.f32 %v7499_v7, %v7518_v31 }
  0xb5   : > { %v6046_v6 = vadd.f32 %v6045_v53, %v5942_v46  ;;  %v5924_v8 = vmul.f32 %v5823_v57, %v5823_v57  ;;  %v5752_v10 = vadd.f32 %v5751_v32, %v5670_v52  ;;  %v5755_v11 = vadd.f32 %v5754_v33, %v5667_v51 }
  0xb6   : > { %v6051_v14 = vadd.f32 %v6050_v62, %v5946_v55  ;;  %v5925_v15 = vmul.f32 %v5824_v63, %v5824_v63  ;;  %v5926_v16 = vmul.f32 %v5825_v0, %v5825_v0  ;;  %v5927_v17 = vmul.f32 %v5826_v2, %v5826_v2  ;;  %v5690_v62 = vld [vmem:[%s7442_s17 + $0x240] sm:$0xff] }
  0xb7   : > { %v6047_v21 = vadd.f32 %v6046_v6, %v5943_v47  ;;  %v5753_v22 = vadd.f32 %v5752_v10, %v5674_v5  ;;  %v5756_v23 = vadd.f32 %v5755_v11, %v5671_v4  ;;  %v5758_v24 = vadd.f32 %v5664_v59, %v5660_v50  ;;  %v5677_v47 = vld [vmem:[%s7442_s17 + $0x1d8] sm:$0xff] }
  0xb8   : > { %v6052_v32 = vadd.f32 %v6051_v14, %v5947_v56  ;;  %v6025_v33 = vadd.f32 %v5925_v15, %v5924_v8  ;;  %v5762_v35 = vadd.f32 %v5665_v61, %v5661_v58  ;;  %v5766_v36 = vadd.f32 %v5682_v13, %v5678_v12 }
  0xb9   : > { %6048 = vadd.xlane.f32.xlu1 %v6047_v21  ;;  %v5757_v38 = vadd.f32 %v5756_v23, %v5675_v18  ;;  %v5759_v39 = vadd.f32 %v5758_v24, %v5668_v3  ;;  %v7564_v40 = vmul.f32 0.2, %v5753_v22  ;;  %v7566_v41 = vadd.f32 %v5683_v20, %v5679_v19 }
  0xba   : > { %v6026_v42 = vadd.f32 %v6025_v33, %v5926_v16  ;;  %v5763_v44 = vadd.f32 %v5762_v35, %v5669_v9  ;;  %v5767_v45 = vadd.f32 %v5766_v36, %v5686_v29  ;;  %v7569_v46 = vadd.f32 %v5684_v28, %v5680_v25  ;;  %v5687_v25 = vld [vmem:[%s7442_s17 + $0x228] sm:$0xff]  ;;  %v5694_v28 = vld [vmem:[%s7442_s17 + $0x260] sm:$0xff]  ;;  %v5681_v35 = vld [vmem:[%s7442_s17 + $0x1f8] sm:$0xff] }
  0xbb   : > { %v5760_v48 = vadd.f32 %v5759_v39, %v5672_v34  ;;  %v7572_v49 = vmul.f32 0.2, %v5757_v38  ;;  %v5847_v50 = vsub.f32 %v7512_v26, %v7564_v40  ;;  %v5827_v51 = vsub.f32 %v7484_v54, %v7564_v40 }
  0xbc   : > { %v6027_v52 = vadd.f32 %v6026_v42, %v5927_v17  ;;  %v5764_v53 = vadd.f32 %v5763_v44, %v5673_v37  ;;  %v5863_v55 = vsub.f32 %v7564_v40, %v7512_v26  ;;  %v5859_v56 = vsub.f32 %v7564_v40, %v7484_v54  ;;  %v5685_v42 = vld [vmem:[%s7442_s17 + $0x218] sm:$0xff]  ;;  %v5691_v44 = vld [vmem:[%s7442_s17 + $0x248] sm:$0xff] }
  0xbd   : > { %6053 = vadd.xlane.f32.xlu1 %v6052_v32  ;;  %v5761_v57 = vadd.f32 %v5760_v48, %v5676_v43  ;;  %v5848_v58 = vsub.f32 %v7514_v27, %v7572_v49  ;;  %v5948_v59 = vmul.f32 %v5847_v50, %v5847_v50  ;;  %v5828_v61 = vsub.f32 %v7489_v60, %v7572_v49  ;;  %v5688_v43 = vld [vmem:[%s7442_s17 + $0x230] sm:$0xff] }
  0xbe   : > { %6028 = vadd.xlane.f32.xlu0 %v6027_v52  ;;  %v5765_v63 = vadd.f32 %v5764_v53, %v5677_v47  ;;  %v5928_v0 = vmul.f32 %v5827_v51, %v5827_v51  ;;  %v5864_v2 = vsub.f32 %v7572_v49, %v7514_v27  ;;  %v5964_v3 = vmul.f32 %v5863_v55, %v5863_v55 }
  0xbf   : > { %v7589_v4 = vmul.f32 0.2, %v5761_v57  ;;  %v5949_v5 = vmul.f32 %v5848_v58, %v5848_v58  ;;  %v5929_v6 = vmul.f32 %v5828_v61, %v5828_v61  ;;  %v5860_v8 = vsub.f32 %v7572_v49, %v7489_v60  ;;  %v5692_v57 = vld [vmem:[%s7442_s17 + $0x250] sm:$0xff]  ;;  %v5695_v58 = vld [vmem:[%s7442_s17 + $0x268] sm:$0xff] }
  0xc0   : > { %v7593_v9 = vmul.f32 0.2, %v5765_v63  ;;  %v5965_v10 = vmul.f32 %v5864_v2, %v5864_v2  ;;  %v5960_v11 = vmul.f32 %v5859_v56, %v5859_v56  ;;  %v5768_v12 = vadd.f32 %v5767_v45, %v5690_v62  ;;  %v5689_v56 = vld [vmem:[%s7442_s17 + $0x238] sm:$0xff] }
  0xc1   : > { %v5849_v13 = vsub.f32 %v7516_v30, %v7589_v4  ;;  %v6055_v14 = vadd.f32 %v5949_v5, %v5948_v59  ;;  %v5829_v15 = vsub.f32 %v7493_v1, %v7589_v4  ;;  %v6030_v16 = vadd.f32 %v5929_v6, %v5928_v0  ;;  %v5693_v2 = vld [vmem:[%s7442_s17 + $0x258] sm:$0xff] }
  0xc2   : > { %v5850_v17 = vsub.f32 %v7518_v31, %v7593_v9  ;;  %v5830_v18 = vsub.f32 %v7499_v7, %v7593_v9  ;;  %v5865_v19 = vsub.f32 %v7589_v4, %v7516_v30  ;;  %v5866_v20 = vsub.f32 %v7593_v9, %v7518_v31 }
  0xc3   : > { %v5950_v21 = vmul.f32 %v5849_v13, %v5849_v13  ;;  %v5930_v22 = vmul.f32 %v5829_v15, %v5829_v15  ;;  %v6075_v23 = vadd.f32 %v5965_v10, %v5964_v3  ;;  %v5861_v24 = vsub.f32 %v7589_v4, %v7493_v1 }
  0xc4   : > { %v5951_v29 = vmul.f32 %v5850_v17, %v5850_v17  ;;  %v5931_v32 = vmul.f32 %v5830_v18, %v5830_v18  ;;  %v5966_v33 = vmul.f32 %v5865_v19, %v5865_v19  ;;  %v5967_v34 = vmul.f32 %v5866_v20, %v5866_v20 }
  0xc5   : > { %v6056_v36 = vadd.f32 %v6055_v14, %v5950_v21  ;;  %v6031_v37 = vadd.f32 %v6030_v16, %v5930_v22  ;;  %v5862_v38 = vsub.f32 %v7593_v9, %v7499_v7  ;;  %v5961_v39 = vmul.f32 %v5860_v8, %v5860_v8  ;;  %v5697_v14 = vld [vmem:[%s7442_s17 + $0x278] sm:$0xff] }
  0xc6   : > { %v6076_v45 = vadd.f32 %v6075_v23, %v5966_v33  ;;  %v5962_v47 = vmul.f32 %v5861_v24, %v5861_v24  ;;  %v5769_v48 = vadd.f32 %v5768_v12, %v5694_v28  ;;  %v5771_v50 = vadd.f32 %v7566_v41, %v5687_v25  ;;  %v5696_v41 = vld [vmem:[%s7442_s17 + $0x270] sm:$0xff]  ;;  %v7633_v12 = vld [vmem:[%s7429_s21 + $0x8] sm:$0xff] }
  0xc7   : > { %v6057_v51 = vadd.f32 %v6056_v36, %v5951_v29  ;;  %v6032_v52 = vadd.f32 %v6031_v37, %v5931_v32  ;;  %v5963_v53 = vmul.f32 %v5862_v38, %v5862_v38  ;;  %v6070_v55 = vadd.f32 %v5961_v39, %v5960_v11 }
  0xc8   : > { %v6077_v59 = vadd.f32 %v6076_v45, %v5967_v34  ;;  %v5772_v61 = vadd.f32 %v5771_v50, %v5691_v44  ;;  %v5775_v62 = vadd.f32 %v7569_v46, %v5688_v43  ;;  %v5778_v63 = vadd.f32 %v5685_v42, %v5681_v35 }
  0xc9   : > { %6058 = vadd.xlane.f32.xlu1 %v6057_v51  ;;  %6033 = vadd.xlane.f32.xlu0 %v6032_v52  ;;  %v6071_v0 = vadd.f32 %v6070_v55, %v5962_v47  ;;  %v7624_v3 = vmul.f32 0.2, %v5769_v48  ;;  %v5867_v5 = vsub.f32 %v7564_v40, %v7564_v40  ;;  %v5868_v6 = vsub.f32 %v7572_v49, %v7572_v49  ;;  %v5698_v55 = vld [vmem:[%s7442_s17 + $0x280] sm:$0xff] }
  0xca   : > { %v5773_v8 = vadd.f32 %v5772_v61, %v5695_v58  ;;  %v5776_v10 = vadd.f32 %v5775_v62, %v5692_v57  ;;  %v5779_v11 = vadd.f32 %v5778_v63, %v5689_v56  ;;  %v5869_v46 = vsub.f32 %v7589_v4, %v7589_v4  ;;  %v5699_v56 = vld [vmem:[%s7442_s17 + $0x288] sm:$0xff]  ;;  %v5702_v57 = vld [vmem:[%s7442_s17 + $0x2a0] sm:$0xff]  ;;  %v5700_v63 = vld [vmem:[%s7442_s17 + $0x290] sm:$0xff] }
  0xcb   : > { %v6072_v13 = vadd.f32 %v6071_v0, %v5963_v53  ;;  %v5851_v15 = vsub.f32 %v7512_v26, %v7624_v3  ;;  %v5831_v16 = vsub.f32 %v7484_v54, %v7624_v3  ;;  %v5879_v17 = vsub.f32 %v7624_v3, %v7484_v54  ;;  %v5703_v0 = vld [vmem:[%s7442_s17 + $0x2a8] sm:$0xff] }
  0xcc   : > { %v5777_v18 = vadd.f32 %v5776_v10, %v5696_v41  ;;  %v5780_v19 = vadd.f32 %v5779_v11, %v5693_v2  ;;  %v7642_v20 = vmul.f32 0.2, %v5773_v8  ;;  %v5870_v21 = vsub.f32 %v7593_v9, %v7593_v9  ;;  %v5704_v2 = vld [vmem:[%s7442_s17 + $0x2b0] sm:$0xff]  ;;  %v5701_v10 = vld [vmem:[%s7442_s17 + $0x298] sm:$0xff] }
  0xcd   : > { %6078 = vadd.xlane.f32.xlu1 %v6077_v59  ;;  %6073 = vadd.xlane.f32.xlu0 %v6072_v13  ;;  %v5952_v22 = vmul.f32 %v5851_v15, %v5851_v15  ;;  %v5932_v23 = vmul.f32 %v5831_v16, %v5831_v16  ;;  %v5980_v24 = vmul.f32 %v5879_v17, %v5879_v17  ;;  %v523_v25 = vrot.slane %v7633_v12, 4  ;;  %v5705_v11 = vld [vmem:[%s7442_s17 + $0x2b8] sm:$0xff]  ;;  %v5707_v16 = vld [vmem:[%s7442_s17 + $0x2c8] sm:$0xff]  ;;  %v5708_v17 = vld [vmem:[%s7442_s17 + $0x2d0] sm:$0xff] }
  0xce   : > { %v5781_v28 = vadd.f32 %v5780_v19, %v5697_v14  ;;  %v7647_v29 = vmul.f32 0.2, %v5777_v18  ;;  %v5852_v32 = vsub.f32 %v7514_v27, %v7642_v20  ;;  %v5832_v33 = vsub.f32 %v7489_v60, %v7642_v20 }
  0xcf   : > { %v5880_v34 = vsub.f32 %v7642_v20, %v7489_v60  ;;  %v5968_v35 = vmul.f32 %v5867_v5, %v5867_v5  ;;  %v5969_v36 = vmul.f32 %v5868_v6, %v5868_v6  ;;  %v5970_v37 = vmul.f32 %v5869_v46, %v5869_v46  ;;  %v5706_v46 = vld [vmem:[%s7442_s17 + $0x2c0] sm:$0xff] }
  0xd0   : > { %v7655_v38 = vmul.f32 0.2, %v5781_v28  ;;  %v5853_v39 = vsub.f32 %v7516_v30, %v7647_v29  ;;  %v5953_v42 = vmul.f32 %v5852_v32, %v5852_v32  ;;  %v5833_v43 = vsub.f32 %v7493_v1, %v7647_v29 }
  0xd1   : > { %v5933_v44 = vmul.f32 %v5832_v33, %v5832_v33  ;;  %v5881_v45 = vsub.f32 %v7647_v29, %v7493_v1  ;;  %v5981_v47 = vmul.f32 %v5880_v34, %v5880_v34  ;;  %v5971_v48 = vmul.f32 %v5870_v21, %v5870_v21  ;;  %v5711_v34 = vld [vmem:[%s7442_s17 + $0x2e8] sm:$0xff] }
  0xd2   : > { %v5854_v50 = vsub.f32 %v7518_v31, %v7655_v38  ;;  %v5954_v51 = vmul.f32 %v5853_v39, %v5853_v39  ;;  %v6060_v52 = vadd.f32 %v5953_v42, %v5952_v22  ;;  %v5834_v53 = vsub.f32 %v7499_v7, %v7655_v38  ;;  %v5709_v22 = vld [vmem:[%s7442_s17 + $0x2d8] sm:$0xff]  ;;  %v5712_v39 = vld [vmem:[%s7442_s17 + $0x2f0] sm:$0xff] }
  0xd3   : > { %v5934_v58 = vmul.f32 %v5833_v43, %v5833_v43  ;;  %v6035_v59 = vadd.f32 %v5933_v44, %v5932_v23  ;;  %v5882_v61 = vsub.f32 %v7655_v38, %v7499_v7  ;;  %v5982_v62 = vmul.f32 %v5881_v45, %v5881_v45  ;;  %v5710_v23 = vld [vmem:[%s7442_s17 + $0x2e0] sm:$0xff]  ;;  %v5713_v43 = vld [vmem:[%s7442_s17 + $0x2f8] sm:$0xff] }
  0xd4   : > { %v5955_v41 = vmul.f32 %v5854_v50, %v5854_v50  ;;  %v6061_v5 = vadd.f32 %v6060_v52, %v5954_v51  ;;  %v5935_v6 = vmul.f32 %v5834_v53, %v5834_v53  ;;  %v6095_v8 = vadd.f32 %v5981_v47, %v5980_v24  ;;  %v5714_v44 = vld [vmem:[%s7442_s17 + $0x300] sm:$0xff]  ;;  %v5715_v52 = vld [vmem:[%s7442_s17 + $0x308] sm:$0xff]  ;;  %v5716_v53 = vld [vmem:[%s7442_s17 + $0x310] sm:$0xff] }
  0xd5   : > { %v6036_v13 = vadd.f32 %v6035_v59, %v5934_v58  ;;  %v5983_v14 = vmul.f32 %v5882_v61, %v5882_v61  ;;  %v6080_v15 = vadd.f32 %v5969_v36, %v5968_v35  ;;  %v5782_v18 = vadd.f32 %v5702_v57, %v5698_v55  ;;  %v5717_v57 = vld [vmem:[%s7442_s17 + $0x318] sm:$0xff] }
  0xd6   : > { %v6062_v19 = vadd.f32 %v6061_v5, %v5955_v41  ;;  %v6096_v21 = vadd.f32 %v6095_v8, %v5982_v62  ;;  %v5786_v28 = vadd.f32 %v5703_v0, %v5699_v56  ;;  %v5790_v32 = vadd.f32 %v5704_v2, %v5700_v63 }
  0xd7   : > { %v6037_v24 = vadd.f32 %v6036_v13, %v5935_v6  ;;  %v6081_v33 = vadd.f32 %v6080_v15, %v5970_v37  ;;  %v5783_v42 = vadd.f32 %v5782_v18, %v5706_v46  ;;  %v5794_v35 = vadd.f32 %v5705_v11, %v5701_v10 }
  0xd8   : > { %6063 = vadd.xlane.f32.xlu1 %v6062_v19  ;;  %v6097_v36 = vadd.f32 %v6096_v21, %v5983_v14  ;;  %v5787_v45 = vadd.f32 %v5786_v28, %v5707_v16  ;;  %v5791_v47 = vadd.f32 %v5790_v32, %v5708_v17  ;;  %v5883_v50 = vsub.f32 %v7624_v3, %v7512_v26 }
  0xd9   : > { %6038 = vadd.xlane.f32.xlu0 %v6037_v24  ;;  %v6082_v51 = vadd.f32 %v6081_v33, %v5971_v48  ;;  %v5784_v55 = vadd.f32 %v5783_v42, %v5710_v23  ;;  %v5795_v37 = vadd.f32 %v5794_v35, %v5709_v22  ;;  %v5884_v56 = vsub.f32 %v7642_v20, %v7514_v27 }
  0xda   : > { %v5788_v58 = vadd.f32 %v5787_v45, %v5711_v34  ;;  %v5792_v59 = vadd.f32 %v5791_v47, %v5712_v39  ;;  %v5885_v61 = vsub.f32 %v7647_v29, %v7516_v30  ;;  %v5886_v62 = vsub.f32 %v7655_v38, %v7518_v31 }
  0xdb   : > { %v5785_v63 = vadd.f32 %v5784_v55, %v5714_v44  ;;  %v5796_v0 = vadd.f32 %v5795_v37, %v5713_v43  ;;  %v5984_v2 = vmul.f32 %v5883_v50, %v5883_v50  ;;  %v5985_v48 = vmul.f32 %v5884_v56, %v5884_v56 }
  0xdc   : > { %6098 = vadd.xlane.f32.xlu1 %v6097_v36  ;;  %v5789_v41 = vadd.f32 %v5788_v58, %v5715_v52  ;;  %v5793_v5 = vadd.f32 %v5792_v59, %v5716_v53  ;;  %v5986_v6 = vmul.f32 %v5885_v61, %v5885_v61  ;;  %v5987_v8 = vmul.f32 %v5886_v62, %v5886_v62 }
  0xdd   : > { %6083 = vadd.xlane.f32.xlu0 %v6082_v51  ;;  %v5797_v10 = vadd.f32 %v5796_v0, %v5717_v57  ;;  %v7697_v11 = vmul.f32 0.2, %v5785_v63  ;;  %v6100_v46 = vadd.f32 %v5985_v48, %v5984_v2  ;;  %v5871_v13 = vsub.f32 %v7564_v40, %v7624_v3 }
  0xde   : > { %v7701_v14 = vmul.f32 0.2, %v5789_v41  ;;  %v7703_v15 = vmul.f32 0.2, %v5793_v5  ;;  %v5872_v16 = vsub.f32 %v7572_v49, %v7642_v20  ;;  %v5873_v17 = vsub.f32 %v7589_v4, %v7647_v29 }
  0xdf   : > { %v7709_v18 = vmul.f32 0.2, %v5797_v10  ;;  %v5835_v19 = vsub.f32 %v7484_v54, %v7697_v11  ;;  %v6101_v21 = vadd.f32 %v6100_v46, %v5986_v6  ;;  %v5874_v22 = vsub.f32 %v7593_v9, %v7655_v38 }
  0xe0   : > { %v5836_v23 = vsub.f32 %v7489_v60, %v7701_v14  ;;  %v5837_v28 = vsub.f32 %v7493_v1, %v7703_v15  ;;  %v5972_v32 = vmul.f32 %v5871_v13, %v5871_v13  ;;  %v5973_v24 = vmul.f32 %v5872_v16, %v5872_v16 }
  0xe1   : > { %v5838_v33 = vsub.f32 %v7499_v7, %v7709_v18  ;;  %v5936_v34 = vmul.f32 %v5835_v19, %v5835_v19  ;;  %v6102_v39 = vadd.f32 %v6101_v21, %v5987_v8  ;;  %v5974_v42 = vmul.f32 %v5873_v17, %v5873_v17 }
  0xe2   : > { %v5937_v35 = vmul.f32 %v5836_v23, %v5836_v23  ;;  %v5938_v36 = vmul.f32 %v5837_v28, %v5837_v28  ;;  %v5975_v43 = vmul.f32 %v5874_v22, %v5874_v22  ;;  %v6085_v44 = vadd.f32 %v5973_v24, %v5972_v32 }
  0xe3   : > { %v5939_v45 = vmul.f32 %v5838_v33, %v5838_v33  ;;  %6103 = vadd.xlane.f32.xlu0 %v6102_v39  ;;  %v5855_v47 = vsub.f32 %v7512_v26, %v7697_v11  ;;  %v5856_v50 = vsub.f32 %v7514_v27, %v7701_v14  ;;  %v5857_v51 = vsub.f32 %v7516_v30, %v7703_v15 }
  0xe4   : > { %v6040_v52 = vadd.f32 %v5937_v35, %v5936_v34  ;;  %v6086_v53 = vadd.f32 %v6085_v44, %v5974_v42  ;;  %v5858_v55 = vsub.f32 %v7518_v31, %v7709_v18  ;;  %v5899_v37 = vsub.f32 %v7697_v11, %v7484_v54 }
  0xe5   : > { %v5956_v56 = vmul.f32 %v5855_v47, %v5855_v47  ;;  %v5957_v57 = vmul.f32 %v5856_v50, %v5856_v50  ;;  %v5958_v58 = vmul.f32 %v5857_v51, %v5857_v51  ;;  %v5900_v59 = vsub.f32 %v7701_v14, %v7489_v60 }
  0xe6   : > { %v6041_v61 = vadd.f32 %v6040_v52, %v5938_v36  ;;  %v6087_v62 = vadd.f32 %v6086_v53, %v5975_v43  ;;  %v5959_v63 = vmul.f32 %v5858_v55, %v5858_v55  ;;  %v5901_v0 = vsub.f32 %v7703_v15, %v7493_v1  ;;  %v7762_v55 = vld [vmem:[%s7429_s21 + $0x28] sm:$0xff] }
  0xe7   : > { %v6065_v2 = vadd.f32 %v5957_v57, %v5956_v56  ;;  %v5902_v48 = vsub.f32 %v7709_v18, %v7499_v7  ;;  %v6000_v41 = vmul.f32 %v5899_v37, %v5899_v37  ;;  %v6001_v5 = vmul.f32 %v5900_v59, %v5900_v59 }
  0xe8   : > { %v6042_v6 = vadd.f32 %v6041_v61, %v5939_v45  ;;  %v6002_v54 = vmul.f32 %v5901_v0, %v5901_v0  ;;  %v5887_v8 = vsub.f32 %v7624_v3, %v7564_v40  ;;  %v5888_v60 = vsub.f32 %v7642_v20, %v7572_v49 }
  0xe9   : > { %v6066_v10 = vadd.f32 %v6065_v2, %v5958_v58  ;;  %v6003_v46 = vmul.f32 %v5902_v48, %v5902_v48  ;;  %v6120_v13 = vadd.f32 %v6001_v5, %v6000_v41  ;;  %v5889_v1 = vsub.f32 %v7647_v29, %v7589_v4 }
  0xea   : > { %6043 = vadd.xlane.f32.xlu1 %v6042_v6  ;;  %v5890_v7 = vsub.f32 %v7655_v38, %v7593_v9  ;;  %v5988_v16 = vmul.f32 %v5887_v8, %v5887_v8  ;;  %v5989_v17 = vmul.f32 %v5888_v60, %v5888_v60  ;;  %v5875_v19 = vsub.f32 %v7564_v40, %v7697_v11 }
  0xeb   : > { %v6067_v21 = vadd.f32 %v6066_v10, %v5959_v63  ;;  %v6121_v22 = vadd.f32 %v6120_v13, %v6002_v54  ;;  %v5990_v23 = vmul.f32 %v5889_v1, %v5889_v1  ;;  %v5876_v28 = vsub.f32 %v7572_v49, %v7701_v14 }
  0xec   : > { %v5991_v32 = vmul.f32 %v5890_v7, %v5890_v7  ;;  %v6105_v24 = vadd.f32 %v5989_v17, %v5988_v16  ;;  %v5877_v33 = vsub.f32 %v7589_v4, %v7703_v15  ;;  %v5878_v34 = vsub.f32 %v7593_v9, %v7709_v18 }
  0xed   : > { %6068 = vadd.xlane.f32.xlu0 %v6067_v21  ;;  %v6122_v39 = vadd.f32 %v6121_v22, %v6003_v46  ;;  %v5976_v42 = vmul.f32 %v5875_v19, %v5875_v19  ;;  %v5977_v35 = vmul.f32 %v5876_v28, %v5876_v28  ;;  %v5903_v36 = vsub.f32 %v7697_v11, %v7512_v26 }
  0xee   : > { %6088 = vadd.xlane.f32.xlu1 %v6087_v62  ;;  %v6106_v43 = vadd.f32 %v6105_v24, %v5990_v23  ;;  %v5978_v44 = vmul.f32 %v5877_v33, %v5877_v33  ;;  %v5979_v45 = vmul.f32 %v5878_v34, %v5878_v34  ;;  %v5904_v47 = vsub.f32 %v7701_v14, %v7514_v27 }
  0xef   : > { %v6090_v50 = vadd.f32 %v5977_v35, %v5976_v42  ;;  %v5905_v51 = vsub.f32 %v7703_v15, %v7516_v30  ;;  %v5906_v52 = vsub.f32 %v7709_v18, %v7518_v31  ;;  %v6004_v53 = vmul.f32 %v5903_v36, %v5903_v36 }
  0xf0   : > { %v6107_v37 = vadd.f32 %v6106_v43, %v5991_v32  ;;  %v6005_v56 = vmul.f32 %v5904_v47, %v5904_v47  ;;  %v5907_v26 = vsub.f32 %v7697_v11, %v7564_v40  ;;  %v5908_v57 = vsub.f32 %v7701_v14, %v7572_v49 }
  0xf1   : > { %v6091_v58 = vadd.f32 %v6090_v50, %v5978_v44  ;;  %v6006_v27 = vmul.f32 %v5905_v51, %v5905_v51  ;;  %v6007_v59 = vmul.f32 %v5906_v52, %v5906_v52  ;;  %v5909_v30 = vsub.f32 %v7703_v15, %v7589_v4 }
  0xf2   : > { %6123 = vadd.xlane.f32.xlu1 %v6122_v39  ;;  %6108 = vadd.xlane.f32.xlu0 %v6107_v37  ;;  %v6125_v31 = vadd.f32 %v6005_v56, %v6004_v53  ;;  %v5910_v61 = vsub.f32 %v7709_v18, %v7593_v9  ;;  %v6008_v62 = vmul.f32 %v5907_v26, %v5907_v26  ;;  %v547_v63 = vrot.slane %v7762_v55, 4  ;;  %v430_v37 = vld [vmem:[%s7429_s21 + $0x68] sm:$0xff] }
  0xf3   : > { %v6092_v0 = vadd.f32 %v6091_v58, %v5979_v45  ;;  %v6009_v40 = vmul.f32 %v5908_v57, %v5908_v57  ;;  %v6010_v2 = vmul.f32 %v5909_v30, %v5909_v30  ;;  %v5891_v49 = vsub.f32 %v7624_v3, %v7624_v3  ;;  %v434_v26 = vld [vmem:[%s7429_s21 + $0x88] sm:$0xff] }
  0xf4   : > { %v6126_v48 = vadd.f32 %v6125_v31, %v6006_v27  ;;  %v6011_v41 = vmul.f32 %v5910_v61, %v5910_v61  ;;  %v5892_v4 = vsub.f32 %v7642_v20, %v7642_v20  ;;  %v5893_v5 = vsub.f32 %v7647_v29, %v7647_v29  ;;  %v442_v31 = vld [vmem:[%s7429_s21 + $0xc8] sm:$0xff] }
  0xf5   : > { %v6130_v6 = vadd.f32 %v6009_v40, %v6008_v62  ;;  %v5894_v9 = vsub.f32 %v7655_v38, %v7655_v38  ;;  %v5992_v54 = vmul.f32 %v5891_v49, %v5891_v49  ;;  %v5911_v8 = vsub.f32 %v7697_v11, %v7624_v3 }
  0xf6   : > { %6093 = vadd.xlane.f32.xlu1 %v6092_v0  ;;  %v6127_v60 = vadd.f32 %v6126_v48, %v6007_v59  ;;  %v5993_v10 = vmul.f32 %v5892_v4, %v5892_v4  ;;  %v5994_v46 = vmul.f32 %v5893_v5, %v5893_v5  ;;  %v5912_v13 = vsub.f32 %v7701_v14, %v7642_v20 }
  0xf7   : > { %v6131_v1 = vadd.f32 %v6130_v6, %v6010_v2  ;;  %v5995_v7 = vmul.f32 %v5894_v9, %v5894_v9  ;;  %v5913_v16 = vsub.f32 %v7703_v15, %v7647_v29  ;;  %v5914_v17 = vsub.f32 %v7709_v18, %v7655_v38 }
  0xf8   : > { %6128 = vadd.xlane.f32.xlu0 %v6127_v60  ;;  %v6110_v19 = vadd.f32 %v5993_v10, %v5992_v54  ;;  %v6012_v21 = vmul.f32 %v5911_v8, %v5911_v8  ;;  %v6013_v22 = vmul.f32 %v5912_v13, %v5912_v13  ;;  %v5895_v23 = vsub.f32 %v7624_v3, %v7697_v11  ;;  %v454_v13 = vld [vmem:[%s7429_s21 + $0x128] sm:$0xff] }
  0xf9   : > { %v6132_v28 = vadd.f32 %v6131_v1, %v6011_v41  ;;  %v6014_v32 = vmul.f32 %v5913_v16, %v5913_v16  ;;  %v6015_v24 = vmul.f32 %v5914_v17, %v5914_v17  ;;  %v5896_v33 = vsub.f32 %v7642_v20, %v7701_v14  ;;  %v446_v41 = vld [vmem:[%s7429_s21 + $0xe8] sm:$0xff] }
  0xfa   : > { %v6111_v34 = vadd.f32 %v6110_v19, %v5994_v46  ;;  %v6135_v39 = vadd.f32 %v6013_v22, %v6012_v21  ;;  %v5897_v42 = vsub.f32 %v7647_v29, %v7703_v15  ;;  %v5898_v35 = vsub.f32 %v7655_v38, %v7709_v18  ;;  %v426_v29 = vld [vmem:[%s7429_s21 + $0x48] sm:$0xff] }
  0xfb   : > { %6133 = vadd.xlane.f32.xlu1 %v6132_v28  ;;  %v5996_v36 = vmul.f32 %v5895_v23, %v5895_v23  ;;  %v5997_v43 = vmul.f32 %v5896_v33, %v5896_v33  ;;  %v5915_v3 = vsub.f32 %v7697_v11, %v7697_v11  ;;  %v5916_v20 = vsub.f32 %v7701_v14, %v7701_v14  ;;  %v438_v14 = vld [vmem:[%s7429_s21 + $0xa8] sm:$0xff] }
  0xfc   : > { %v6112_v44 = vadd.f32 %v6111_v34, %v5995_v7  ;;  %v6136_v45 = vadd.f32 %v6135_v39, %v6014_v32  ;;  %v5998_v47 = vmul.f32 %v5897_v42, %v5897_v42  ;;  %v5999_v50 = vmul.f32 %v5898_v35, %v5898_v35  ;;  %v450_v46 = vld [vmem:[%s7429_s21 + $0x108] sm:$0xff] }
  0xfd   : > { %v6115_v51 = vadd.f32 %v5997_v43, %v5996_v36  ;;  %v5917_v38 = vsub.f32 %v7703_v15, %v7703_v15  ;;  %v5918_v52 = vsub.f32 %v7709_v18, %v7709_v18  ;;  %v6016_v53 = vmul.f32 %v5915_v3, %v5915_v3  ;;  %v462_v35 = vld [vmem:[%s7429_s21 + $0x168] sm:$0xff] }
  0xfe   : > { %6113 = vadd.xlane.f32.xlu0 %v6112_v44  ;;  %v6137_v11 = vadd.f32 %v6136_v45, %v6015_v24  ;;  %v6017_v56 = vmul.f32 %v5916_v20, %v5916_v20  ;;  %v524_v57 = vadd.f32 %v523_v25, %v7633_v12  ;;  %v548_v58 = vadd.f32 %v547_v63, %v7762_v55  ;;  %v458_v24 = vld [vmem:[%s7429_s21 + $0x148] sm:$0xff] }
  0xff   : > { %v6116_v27 = vadd.f32 %v6115_v51, %v5998_v47  ;;  %v6018_v59 = vmul.f32 %v5917_v38, %v5917_v38  ;;  %v6019_v15 = vmul.f32 %v5918_v52, %v5918_v52  ;;  %v571_v30 = vrot.slane %v426_v29, 4  ;;  %v466_v44 = vld [vmem:[%s7429_s21 + $0x188] sm:$0xff] }
 0x100   : > { %6138 = vadd.xlane.f32.xlu1 %v6137_v11  ;;  %v6140_v18 = vadd.f32 %v6017_v56, %v6016_v53  ;;  %v525_v61 = vrot.slane %v524_v57, 2  ;;  %v549_v62 = vrot.slane %v548_v58, 2  ;;  %v595_v0 = vrot.slane %v430_v37, 4  ;;  %v470_v45 = vld [vmem:[%s7429_s21 + $0x1a8] sm:$0xff] }
 0x101   : > { %v6117_v40 = vadd.f32 %v6116_v27, %v5999_v50  ;;  %v572_v2 = vadd.f32 %v571_v30, %v426_v29  ;;  %v619_v49 = vrot.slane %v434_v26, 4  ;;  %v643_v48 = vrot.slane %v438_v14, 4  ;;  %v474_v11 = vld [vmem:[%s7429_s21 + $0x1c8] sm:$0xff] }
 0x102   : > { %v6141_v12 = vadd.f32 %v6140_v18, %v6018_v59  ;;  %v526_v25 = vadd.f32 %v525_v61, %v524_v57  ;;  %v550_v55 = vadd.f32 %v549_v62, %v548_v58  ;;  %v596_v63 = vadd.f32 %v595_v0, %v430_v37  ;;  %v478_v62 = vld [vmem:[%s7429_s21 + $0x1e8] sm:$0xff] }
 0x103   : > { %6118 = vadd.xlane.f32.xlu0 %v6117_v40  ;;  %v573_v4 = vrot.slane %v572_v2, 2  ;;  %v620_v5 = vadd.f32 %v619_v49, %v434_v26  ;;  %v644_v6 = vadd.f32 %v643_v48, %v438_v14  ;;  %v667_v9 = vrot.slane %v442_v31, 4 }
 0x104   : > { %v6142_v54 = vadd.f32 %v6141_v12, %v6019_v15  ;;  %v527_v8 = vrot.slane %v526_v25, 1  ;;  %v551_v60 = vrot.slane %v550_v55, 1  ;;  %v597_v10 = vrot.slane %v596_v63, 2 }
 0x105   : > { %v574_v1 = vadd.f32 %v573_v4, %v572_v2  ;;  %v621_v7 = vrot.slane %v620_v5, 2  ;;  %v645_v16 = vrot.slane %v644_v6, 2  ;;  %v668_v17 = vadd.f32 %v667_v9, %v442_v31 }
 0x106   : > { %v598_v19 = vadd.f32 %v597_v10, %v596_v63  ;;  %v691_v21 = vrot.slane %v446_v41, 4  ;;  %v715_v39 = vrot.slane %v450_v46, 4  ;;  %v739_v42 = vrot.slane %v454_v13, 4 }
 0x107   : > { %6143 = vadd.xlane.f32.xlu0 %v6142_v54  ;;  %v575_v22 = vrot.slane %v574_v1, 1  ;;  %v622_v23 = vadd.f32 %v621_v7, %v620_v5  ;;  %v646_v28 = vadd.f32 %v645_v16, %v644_v6  ;;  %v669_v32 = vrot.slane %v668_v17, 2 }
 0x108   : > { %v599_v33 = vrot.slane %v598_v19, 1  ;;  %v692_v34 = vadd.f32 %v691_v21, %v446_v41  ;;  %v7819_v36 = vadd.f32 %v527_v8, %v526_v25  ;;  %v7821_v43 = vadd.f32 %v551_v60, %v550_v55 }
 0x109   : > { %v623_v3 = vrot.slane %v622_v23, 1  ;;  %v670_v20 = vadd.f32 %v669_v32, %v668_v17  ;;  %v7825_v47 = vadd.f32 %v575_v22, %v574_v1  ;;  %v716_v29 = vadd.f32 %v715_v39, %v450_v46 }
 0x10a   : > { %v693_v50 = vrot.slane %v692_v34, 2  ;;  %v740_v51 = vadd.f32 %v739_v42, %v454_v13  ;;  %v600_v38 = vadd.f32 %v599_v33, %v598_v19  ;;  %v647_v53 = vrot.slane %v646_v28, 1 }
 0x10b   : > { %v624_v52 = vadd.f32 %v623_v3, %v622_v23  ;;  %v763_v37 = vrot.slane %v458_v24, 4  ;;  %v717_v26 = vrot.slane %v716_v29, 2  ;;  %v787_v57 = vrot.slane %v462_v35, 4 }
 0x10c   : > { %v694_v56 = vadd.f32 %v693_v50, %v692_v34  ;;  %v741_v14 = vrot.slane %v740_v51, 2  ;;  %v671_v58 = vrot.slane %v670_v20, 1  ;;  %v811_v59 = vrot.slane %v466_v44, 4 }
 0x10d   : > { %v764_v27 = vadd.f32 %v763_v37, %v458_v24  ;;  %v835_v15 = vrot.slane %v470_v45, 4  ;;  %v718_v18 = vadd.f32 %v717_v26, %v716_v29  ;;  %v788_v61 = vadd.f32 %v787_v57, %v462_v35 }
 0x10e   : > { %v695_v30 = vrot.slane %v694_v56, 1  ;;  %v742_v31 = vadd.f32 %v741_v14, %v740_v51  ;;  %v812_v40 = vadd.f32 %v811_v59, %v466_v44  ;;  %v859_v49 = vrot.slane %v474_v11, 4 }
 0x10f   : > { %v765_v0 = vrot.slane %v764_v27, 2  ;;  %v836_v2 = vadd.f32 %v835_v15, %v470_v45  ;;  %v648_v48 = vadd.f32 %v647_v53, %v646_v28  ;;  %v719_v12 = vrot.slane %v718_v18, 1 }
 0x110   : > { %v743_v25 = vrot.slane %v742_v31, 1  ;;  %v789_v55 = vrot.slane %v788_v61, 2  ;;  %v813_v41 = vrot.slane %v812_v40, 2  ;;  %v860_v5 = vadd.f32 %v859_v49, %v474_v11 }
 0x111   : > { %v766_v63 = vadd.f32 %v765_v0, %v764_v27  ;;  %v837_v4 = vrot.slane %v836_v2, 2  ;;  %v672_v6 = vadd.f32 %v671_v58, %v670_v20  ;;  %v696_v9 = vadd.f32 %v695_v30, %v694_v56 }
 0x112   : > { %v790_v54 = vadd.f32 %v789_v55, %v788_v61  ;;  %v883_v8 = vrot.slane %v478_v62, 4  ;;  %v814_v10 = vadd.f32 %v813_v41, %v812_v40  ;;  %v861_v13 = vrot.slane %v860_v5, 2  ;;  %v421_v41 = vld [vmem:[%s7429_s21 + $0x20] sm:$0xff] }
 0x113   : > { %v767_v60 = vrot.slane %v766_v63, 1  ;;  %v838_v46 = vadd.f32 %v837_v4, %v836_v2  ;;  %v720_v1 = vadd.f32 %v719_v12, %v718_v18  ;;  %v744_v7 = vadd.f32 %v743_v25, %v742_v31  ;;  %v425_v4 = vld [vmem:[%s7429_s21 + $0x40] sm:$0xff] }
 0x114   : > { %v791_v16 = vrot.slane %v790_v54, 1  ;;  %v884_v17 = vadd.f32 %v883_v8, %v478_v62  ;;  %v815_v21 = vrot.slane %v814_v10, 1  ;;  %v862_v23 = vadd.f32 %v861_v13, %v860_v5  ;;  %v429_v8 = vld [vmem:[%s7429_s21 + $0x60] sm:$0xff] }
 0x115   : > { %v768_v19 = vadd.f32 %v767_v60, %v766_v63  ;;  %v839_v22 = vrot.slane %v838_v46, 1  ;;  %v1119_v24 = vmul.f32 0.125, %v7819_v36  ;;  %v1123_v33 = vmul.f32 0.125, %v7821_v43  ;;  %v417_v63 = vld [vmem:[%s7429_s21] sm:$0xff] }
 0x116   : > { %v792_v28 = vadd.f32 %v791_v16, %v790_v54  ;;  %v885_v32 = vrot.slane %v884_v17, 2  ;;  %v816_v34 = vadd.f32 %v815_v21, %v814_v10  ;;  %v863_v42 = vrot.slane %v862_v23, 1  ;;  %v433_v60 = vld [vmem:[%s7429_s21 + $0x80] sm:$0xff] }
 0x117   : > { %v840_v39 = vadd.f32 %v839_v22, %v838_v46  ;;  %v1127_v35 = vmul.f32 0.125, %v7825_v47  ;;  %v1131_v20 = vmul.f32 0.125, %v600_v38  ;;  %v1135_v44 = vmul.f32 0.125, %v624_v52  ;;  %v437_v10 = vld [vmem:[%s7429_s21 + $0xa0] sm:$0xff] }
 0x118   : > { %v886_v3 = vadd.f32 %v885_v32, %v884_v17  ;;  %v1139_v45 = vmul.f32 0.125, %v648_v48  ;;  %v864_v50 = vadd.f32 %v863_v42, %v862_v23  ;;  %v1151_v29 = vmul.f32 0.125, %v720_v1  ;;  %v441_v16 = vld [vmem:[%s7429_s21 + $0xc0] sm:$0xff] }
 0x119   : > { %v1155_v51 = vmul.f32 0.125, %v744_v7  ;;  %v1159_v53 = vmul.f32 0.125, %v768_v19  ;;  %v1143_v11 = vmul.f32 0.125, %v672_v6  ;;  %v1163_v56 = vmul.f32 0.125, %v792_v28  ;;  %v445_v17 = vld [vmem:[%s7429_s21 + $0xe0] sm:$0xff] }
 0x11a   : > { %v887_v37 = vrot.slane %v886_v3, 1  ;;  %v1167_v36 = vmul.f32 0.125, %v816_v34  ;;  %v1147_v26 = vmul.f32 0.125, %v696_v9  ;;  %v1171_v43 = vmul.f32 0.125, %v840_v39 }
 0x11b   : > { %v2132_v14 = vsel %vm1938_vm3, %v1123_v33, %v1119_v24  ;;  %v2160_v57 = vsel %vm1938_vm3, %v1155_v51, %v1151_v29  ;;  %v7834_v47 = vmul.f32 0.125, %v864_v50  ;;  %v7840_v15 = vmul.f32 %v1119_v24, %v1119_v24 }
 0x11c   : > { %v888_v58 = vadd.f32 %v887_v37, %v886_v3  ;;  %v2133_v38 = vsel %vm1940_vm4, %v1127_v35, %v2132_v14  ;;  %v2161_v52 = vsel %vm1940_vm4, %v1159_v53, %v2160_v57  ;;  %v7842_v30 = vmul.f32 %v1123_v33, %v1123_v33 }
 0x11d   : > { %v2134_v27 = vsel %vm1942_vm5, %v1131_v20, %v2133_v38  ;;  %v2162_v59 = vsel %vm1942_vm5, %v1163_v56, %v2161_v52  ;;  %v7848_v62 = vmul.f32 %v1127_v35, %v1127_v35  ;;  %v7852_v2 = vmul.f32 %v1131_v20, %v1131_v20 }
 0x11e   : > { %v7844_v18 = vmul.f32 0.125, %v888_v58  ;;  %v2135_v31 = vsel %vm1944_vm6, %v1135_v44, %v2134_v27  ;;  %v2163_v61 = vsel %vm1944_vm6, %v1167_v36, %v2162_v59  ;;  %v7854_v49 = vmul.f32 %v1135_v44, %v1135_v44  ;;  %v449_v59 = vld [vmem:[%s7429_s21 + $0x100] sm:$0xff] }
 0x11f   : > { %10980 = vst [vmem:[#allocation17_spill] sm:$0xff] %v7848_v62  ;;  %v2136_v0 = vsel %vm1946_vm7, %v1139_v45, %v2135_v31  ;;  %v2164_v40 = vsel %vm1946_vm7, %v1171_v43, %v2163_v61  ;;  %10981 = vst [vmem:[#allocation18_spill] sm:$0xff] %v7852_v2  ;;  %v7859_v25 = vmul.f32 %v1139_v45, %v1139_v45  ;;  %v517_v22 = vrot.slane %v417_v63, 4 }
 0x120   : > { %10982 = vst [vmem:[#allocation19_spill] sm:$0xff] %v7854_v49  ;;  %v2137_v48 = vsel %vm1948_vm8, %v1143_v11, %v2136_v0  ;;  %v2165_v12 = vsel %vm1948_vm8, %v7834_v47, %v2164_v40  ;;  %v7861_v55 = vmul.f32 %v1143_v11, %v1143_v11  ;;  %v7869_v9 = vmul.f32 %v1147_v26, %v1147_v26 }
 0x121   : > { %10983 = vst [vmem:[#allocation20_spill] sm:$0xff] %v7859_v25  ;;  %v2138_v5 = vsel %vm1950_vm9, %v1147_v26, %v2137_v48  ;;  %v2166_v6 = vsel %vm1950_vm9, %v7844_v18, %v2165_v12  ;;  %v7871_v54 = vmul.f32 %v1151_v29, %v1151_v29  ;;  %v7876_v13 = vmul.f32 %v1155_v51, %v1155_v51  ;;  %v453_v48 = vld [vmem:[%s7429_s21 + $0x120] sm:$0xff] }
 0x122   : > { %10984 = vst [vmem:[#allocation21_spill] sm:$0xff] %v7861_v55  ;;  %10985 = vst [vmem:[#allocation22_spill] sm:$0xff] %v7869_v9  ;;  %v6853_v46 = vpack.c.bf16 %v2166_v6, %v2138_v5  ;;  %v7878_v1 = vmul.f32 %v1159_v53, %v1159_v53  ;;  %v7880_v7 = vmul.f32 %v1163_v56, %v1163_v56  ;;  %v541_v23 = vrot.slane %v421_v41, 4  ;;  %v457_v12 = vld [vmem:[%s7429_s21 + $0x140] sm:$0xff] }
 0x123   : > { %10986 = vst [vmem:[#allocation23_spill] sm:$0xff] %v7871_v54  ;;  %10987 = vst [vmem:[#allocation24_spill] sm:$0xff] %v7876_v13  ;;  %v7884_v19 = vmul.f32 %v1167_v36, %v1167_v36  ;;  %v7886_v21 = vmul.f32 %v1171_v43, %v1171_v43  ;;  %v565_v28 = vrot.slane %v425_v4, 4  ;;  %v589_v32 = vrot.slane %v429_v8, 4 }
 0x124   : > { %10988 = vst [vmem:[#allocation25_spill] sm:$0xff] %v7878_v1  ;;  %10989 = vst [vmem:[#allocation26_spill] sm:$0xff] %v7880_v7  ;;  %6854 = vmatprep.subr.bf16.mxu0 %v6853_v46  ;;  %v613_v24 = vrot.slane %v433_v60, 4  ;;  %v637_v33 = vrot.slane %v437_v10, 4  ;;  %v518_v34 = vadd.f32 %v517_v22, %v417_v63  ;;  %v542_v39 = vadd.f32 %v541_v23, %v421_v41  ;;  %v469_v46 = vld [vmem:[%s7429_s21 + $0x1a0] sm:$0xff] }
 0x125   : > { %10990 = vst [vmem:[#allocation27_spill] sm:$0xff] %v7884_v19  ;;  %10991 = vst [vmem:[#allocation28_spill] sm:$0xff] %v7886_v21  ;;  %v661_v42 = vrot.slane %v441_v16, 4  ;;  %v685_v35 = vrot.slane %v445_v17, 4  ;;  %v566_v3 = vadd.f32 %v565_v28, %v425_v4  ;;  %v590_v20 = vadd.f32 %v589_v32, %v429_v8  ;;  %v473_v22 = vld [vmem:[%s7429_s21 + $0x1c0] sm:$0xff] }
 0x126   : > { %v614_v44 = vadd.f32 %v613_v24, %v433_v60  ;;  %v638_v45 = vadd.f32 %v637_v33, %v437_v10  ;;  %v519_v50 = vrot.slane %v518_v34, 2  ;;  %v543_v29 = vrot.slane %v542_v39, 2  ;;  %v461_v60 = vld [vmem:[%s7429_s21 + $0x160] sm:$0xff] }
 0x127   : > { %v662_v51 = vadd.f32 %v661_v42, %v441_v16  ;;  %v686_v53 = vadd.f32 %v685_v35, %v445_v17  ;;  %v567_v37 = vrot.slane %v566_v3, 2  ;;  %v591_v11 = vrot.slane %v590_v20, 2  ;;  %v465_v10 = vld [vmem:[%s7429_s21 + $0x180] sm:$0xff] }
 0x128   : > { %v615_v56 = vrot.slane %v614_v44, 2  ;;  %v639_v36 = vrot.slane %v638_v45, 2  ;;  %v520_v26 = vadd.f32 %v519_v50, %v518_v34  ;;  %v544_v43 = vadd.f32 %v543_v29, %v542_v39  ;;  %v477_v23 = vld [vmem:[%s7429_s21 + $0x1e0] sm:$0xff] }
 0x129   : > { %v663_v14 = vrot.slane %v662_v51, 2  ;;  %v687_v57 = vrot.slane %v686_v53, 2  ;;  %v568_v58 = vadd.f32 %v567_v37, %v566_v3  ;;  %v592_v38 = vadd.f32 %v591_v11, %v590_v20 }
 0x12a   : > { %v616_v52 = vadd.f32 %v615_v56, %v614_v44  ;;  %v640_v27 = vadd.f32 %v639_v36, %v638_v45  ;;  %v521_v31 = vrot.slane %v520_v26, 1  ;;  %v545_v61 = vrot.slane %v544_v43, 1 }
 0x12b   : > { %v7889_v0 = vadd.f32 %v663_v14, %v662_v51  ;;  %v7891_v40 = vadd.f32 %v687_v57, %v686_v53  ;;  %v569_v63 = vrot.slane %v568_v58, 1  ;;  %v593_v41 = vrot.slane %v592_v38, 1 }
 0x12c   : > { %v617_v4 = vrot.slane %v616_v52, 1  ;;  %v641_v5 = vrot.slane %v640_v27, 1  ;;  %v7897_v6 = vmul.f32 %v7834_v47, %v7834_v47  ;;  %v7901_v8 = vmul.f32 %v7844_v18, %v7844_v18 }
 0x12d   : > { %v522_v16 = vadd.f32 %v521_v31, %v520_v26  ;;  %v546_v17 = vadd.f32 %v545_v61, %v544_v43  ;;  %v570_v28 = vadd.f32 %v569_v63, %v568_v58  ;;  %v594_v32 = vadd.f32 %v593_v41, %v592_v38 }
 0x12e   : > { %10992 = vst [vmem:[#allocation29_spill] sm:$0xff] %v7897_v6  ;;  %10993 = vst [vmem:[#allocation30_spill] sm:$0xff] %v7901_v8  ;;  %v665_v24 = vrot.slane %v7889_v0, 1  ;;  %v689_v33 = vrot.slane %v7891_v40, 1  ;;  %v618_v34 = vadd.f32 %v617_v4, %v616_v52  ;;  %v642_v47 = vadd.f32 %v641_v5, %v640_v27 }
 0x12f   : > { %v709_v39 = vrot.slane %v449_v59, 4  ;;  %v733_v42 = vrot.slane %v453_v48, 4  ;;  %v757_v35 = vrot.slane %v457_v12, 4  ;;  %v781_v18 = vrot.slane %v461_v60, 4 }
 0x130   : > { %v805_v3 = vrot.slane %v465_v10, 4  ;;  %v829_v20 = vrot.slane %v469_v46, 4  ;;  %v853_v50 = vrot.slane %v473_v22, 4  ;;  %v877_v29 = vrot.slane %v477_v23, 4 }
 0x131   : > { %v710_v44 = vadd.f32 %v709_v39, %v449_v59  ;;  %v734_v45 = vadd.f32 %v733_v42, %v453_v48  ;;  %v758_v51 = vadd.f32 %v757_v35, %v457_v12  ;;  %v782_v53 = vadd.f32 %v781_v18, %v461_v60 }
 0x132   : > { %v806_v37 = vadd.f32 %v805_v3, %v465_v10  ;;  %v830_v11 = vadd.f32 %v829_v20, %v469_v46  ;;  %v854_v26 = vadd.f32 %v853_v50, %v473_v22  ;;  %v878_v43 = vadd.f32 %v877_v29, %v477_v23 }
 0x133   : > { %v711_v56 = vrot.slane %v710_v44, 2  ;;  %v735_v36 = vrot.slane %v734_v45, 2  ;;  %v759_v14 = vrot.slane %v758_v51, 2  ;;  %v783_v57 = vrot.slane %v782_v53, 2 }
 0x134   : > { %v807_v58 = vrot.slane %v806_v37, 2  ;;  %v831_v38 = vrot.slane %v830_v11, 2  ;;  %v855_v31 = vrot.slane %v854_v26, 2  ;;  %v879_v61 = vrot.slane %v878_v43, 2 }
 0x135   : > { %v712_v52 = vadd.f32 %v711_v56, %v710_v44  ;;  %v736_v27 = vadd.f32 %v735_v36, %v734_v45  ;;  %v760_v59 = vadd.f32 %v759_v14, %v758_v51  ;;  %v784_v48 = vadd.f32 %v783_v57, %v782_v53 }
 0x136   : > { %v808_v63 = vadd.f32 %v807_v58, %v806_v37  ;;  %v832_v41 = vadd.f32 %v831_v38, %v830_v11  ;;  %v856_v5 = vadd.f32 %v855_v31, %v854_v26  ;;  %v880_v60 = vadd.f32 %v879_v61, %v878_v43 }
 0x137   : > { %v713_v12 = vrot.slane %v712_v52, 1  ;;  %v737_v4 = vrot.slane %v736_v27, 1  ;;  %v761_v10 = vrot.slane %v760_v59, 1  ;;  %v785_v46 = vrot.slane %v784_v48, 1 }
 0x138   : > { %v809_v22 = vrot.slane %v808_v63, 1  ;;  %v833_v23 = vrot.slane %v832_v41, 1  ;;  %v857_v35 = vrot.slane %v856_v5, 1  ;;  %v881_v18 = vrot.slane %v880_v60, 1 }
 0x139   : > { %v714_v39 = vadd.f32 %v713_v12, %v712_v52  ;;  %v738_v42 = vadd.f32 %v737_v4, %v736_v27  ;;  %v666_v3 = vadd.f32 %v665_v24, %v7889_v0  ;;  %v762_v20 = vadd.f32 %v761_v10, %v760_v59  ;;  %v3030_v10 = vld [vmem:[%s7442_s17 + $0x8] sm:$0xff] }
 0x13a   : > { %v786_v44 = vadd.f32 %v785_v46, %v784_v48  ;;  %v810_v45 = vadd.f32 %v809_v22, %v808_v63  ;;  %v690_v50 = vadd.f32 %v689_v33, %v7891_v40  ;;  %v834_v29 = vadd.f32 %v833_v23, %v832_v41 }
 0x13b   : > { %v1118_v51 = vmul.f32 0.125, %v522_v16  ;;  %v1122_v53 = vmul.f32 0.125, %v546_v17  ;;  %v858_v37 = vadd.f32 %v857_v35, %v856_v5  ;;  %v882_v11 = vadd.f32 %v881_v18, %v880_v60  ;;  %v3038_v35 = vld [vmem:[%s7442_s17 + $0x48] sm:$0xff] }
 0x13c   : > { %v1126_v56 = vmul.f32 0.125, %v570_v28  ;;  %v1130_v36 = vmul.f32 0.125, %v594_v32  ;;  %v1134_v26 = vmul.f32 0.125, %v618_v34  ;;  %v1138_v43 = vmul.f32 0.125, %v642_v47  ;;  %v3042_v18 = vld [vmem:[%s7442_s17 + $0x68] sm:$0xff] }
 0x13d   : > { %v1150_v14 = vmul.f32 0.125, %v714_v39  ;;  %v1154_v57 = vmul.f32 0.125, %v738_v42  ;;  %v1142_v58 = vmul.f32 0.125, %v666_v3  ;;  %v1158_v38 = vmul.f32 0.125, %v762_v20  ;;  %v3034_v42 = vld [vmem:[%s7442_s17 + $0x28] sm:$0xff] }
 0x13e   : > { %v1162_v52 = vmul.f32 0.125, %v786_v44  ;;  %v1166_v0 = vmul.f32 0.125, %v810_v45  ;;  %v1146_v24 = vmul.f32 0.125, %v690_v50  ;;  %v1170_v27 = vmul.f32 0.125, %v834_v29  ;;  %v3046_v50 = vld [vmem:[%s7442_s17 + $0x88] sm:$0xff] }
 0x13f   : > { %v2125_v31 = vsel %vm1938_vm3, %v1122_v53, %v1118_v51  ;;  %v2153_v40 = vsel %vm1938_vm3, %v1154_v57, %v1150_v14  ;;  %v7914_v16 = vmul.f32 0.125, %v858_v37  ;;  %v7916_v17 = vmul.f32 0.125, %v882_v11  ;;  %v3050_v29 = vld [vmem:[%s7442_s17 + $0xa8] sm:$0xff] }
 0x140   : > { %v2126_v28 = vsel %vm1940_vm4, %v1126_v56, %v2125_v31  ;;  %v2154_v32 = vsel %vm1940_vm4, %v1158_v38, %v2153_v40  ;;  %v7922_v47 = vmul.f32 %v1118_v51, %v1118_v51  ;;  %v7924_v61 = vmul.f32 %v1122_v53, %v1122_v53  ;;  %v3054_v51 = vld [vmem:[%s7442_s17 + $0xc8] sm:$0xff] }
 0x141   : > { %v2127_v33 = vsel %vm1942_vm5, %v1130_v36, %v2126_v28  ;;  %v2155_v34 = vsel %vm1942_vm5, %v1162_v52, %v2154_v32  ;;  %v7928_v63 = vmul.f32 %v1126_v56, %v1126_v56  ;;  %v7930_v41 = vmul.f32 %v1130_v36, %v1130_v36  ;;  %v3058_v36 = vld [vmem:[%s7442_s17 + $0xe8] sm:$0xff] }
 0x142   : > { %v2128_v59 = vsel %vm1944_vm6, %v1134_v26, %v2127_v33  ;;  %v2156_v48 = vsel %vm1944_vm6, %v1166_v0, %v2155_v34  ;;  %v7934_v5 = vmul.f32 %v1134_v26, %v1134_v26  ;;  %v7936_v60 = vmul.f32 %v1138_v43, %v1138_v43 }
 0x143   : > { %10994 = vst [vmem:[#allocation31_spill] sm:$0xff] %v7928_v63  ;;  %10995 = vst [vmem:[#allocation32_spill] sm:$0xff] %v7930_v41  ;;  %v2129_v12 = vsel %vm1946_vm7, %v1138_v43, %v2128_v59  ;;  %v2157_v4 = vsel %vm1946_vm7, %v1170_v27, %v2156_v48  ;;  %v7942_v23 = vmul.f32 %v1142_v58, %v1142_v58  ;;  %v3135_v43 = vrot.slane %v3030_v10, 4 }
 0x144   : > { %10996 = vst [vmem:[#allocation33_spill] sm:$0xff] %v7934_v5  ;;  %10997 = vst [vmem:[#allocation34_spill] sm:$0xff] %v7936_v60  ;;  %v2130_v46 = vsel %vm1948_vm8, %v1142_v58, %v2129_v12  ;;  %v2158_v22 = vsel %vm1948_vm8, %v7914_v16, %v2157_v4  ;;  %v7944_v39 = vmul.f32 %v1146_v24, %v1146_v24  ;;  %v3159_v58 = vrot.slane %v3034_v42, 4 }
 0x145   : > { %10998 = vst [vmem:[#allocation35_spill] sm:$0xff] %v7942_v23  ;;  %v2131_v3 = vsel %vm1950_vm9, %v1146_v24, %v2130_v46  ;;  %v2159_v20 = vsel %vm1950_vm9, %v7916_v17, %v2158_v22  ;;  %v7952_v44 = vmul.f32 %v1150_v14, %v1150_v14  ;;  %v7954_v45 = vmul.f32 %v1154_v57, %v1154_v57 }
 0x146   : > { %10999 = vst [vmem:[#allocation36_spill] sm:$0xff] %v7944_v39  ;;  %v6855_v53 = vpack.c.bf16 %v2159_v20, %v2131_v3  ;;  %v7959_v37 = vmul.f32 %v1158_v38, %v1158_v38  ;;  %v7961_v11 = vmul.f32 %v1162_v52, %v1162_v52  ;;  %v7963_v56 = vmul.f32 %v1166_v0, %v1166_v0 }
 0x147   : > { %11000 = vst [vmem:[#allocation37_spill] sm:$0xff] %v7952_v44  ;;  %11001 = vst [vmem:[#allocation38_spill] sm:$0xff] %v7954_v45  ;;  %v7966_v26 = vmul.f32 %v1170_v27, %v1170_v27  ;;  %v3183_v24 = vrot.slane %v3038_v35, 4  ;;  %v3207_v14 = vrot.slane %v3042_v18, 4  ;;  %v3231_v57 = vrot.slane %v3046_v50, 4 }
 0x148   : > { %11002 = vst [vmem:[#allocation39_spill] sm:$0xff] %v7959_v37  ;;  %11003 = vst [vmem:[#allocation40_spill] sm:$0xff] %v7961_v11  ;;  %6856 = vmatpush1.bf16.xpose.msra.mxu0 %v6855_v53  ;;  %v3255_v31 = vrot.slane %v3050_v29, 4  ;;  %v3279_v40 = vrot.slane %v3054_v51, 4  ;;  %v3136_v28 = vadd.f32 %v3135_v43, %v3030_v10  ;;  %v3160_v32 = vadd.f32 %v3159_v58, %v3034_v42 }
 0x149   : > { %11004 = vst [vmem:[#allocation41_spill] sm:$0xff] %v7963_v56  ;;  %11005 = vst [vmem:[#allocation42_spill] sm:$0xff] %v7966_v26  ;;  %v3184_v33 = vadd.f32 %v3183_v24, %v3038_v35  ;;  %v3303_v38 = vrot.slane %v3058_v36, 4  ;;  %v3208_v34 = vadd.f32 %v3207_v14, %v3042_v18  ;;  %v3232_v52 = vadd.f32 %v3231_v57, %v3046_v50 }
 0x14a   : > { %v3256_v59 = vadd.f32 %v3255_v31, %v3050_v29  ;;  %v3280_v0 = vadd.f32 %v3279_v40, %v3054_v51  ;;  %v3137_v48 = vrot.slane %v3136_v28, 2  ;;  %v3161_v27 = vrot.slane %v3160_v32, 2  ;;  %v3066_v31 = vld [vmem:[%s7442_s17 + $0x128] sm:$0xff] }
 0x14b   : > { %v3185_v12 = vrot.slane %v3184_v33, 2  ;;  %v3304_v4 = vadd.f32 %v3303_v38, %v3058_v36  ;;  %v3209_v46 = vrot.slane %v3208_v34, 2  ;;  %v3233_v22 = vrot.slane %v3232_v52, 2  ;;  %v3062_v36 = vld [vmem:[%s7442_s17 + $0x108] sm:$0xff] }
 0x14c   : > { %v3257_v3 = vrot.slane %v3256_v59, 2  ;;  %v3281_v20 = vrot.slane %v3280_v0, 2  ;;  %v3138_v53 = vadd.f32 %v3137_v48, %v3136_v28  ;;  %v3162_v10 = vadd.f32 %v3161_v27, %v3160_v32  ;;  %v3070_v40 = vld [vmem:[%s7442_s17 + $0x148] sm:$0xff] }
 0x14d   : > { %v3186_v42 = vadd.f32 %v3185_v12, %v3184_v33  ;;  %v3305_v35 = vrot.slane %v3304_v4, 2  ;;  %v3210_v18 = vadd.f32 %v3209_v46, %v3208_v34  ;;  %v3234_v50 = vadd.f32 %v3233_v22, %v3232_v52  ;;  %v3074_v28 = vld [vmem:[%s7442_s17 + $0x168] sm:$0xff] }
 0x14e   : > { %v3258_v29 = vadd.f32 %v3257_v3, %v3256_v59  ;;  %v7968_v51 = vadd.f32 %v3281_v20, %v3280_v0  ;;  %v3139_v43 = vrot.slane %v3138_v53, 1  ;;  %v3163_v58 = vrot.slane %v3162_v10, 1  ;;  %v3078_v52 = vld [vmem:[%s7442_s17 + $0x188] sm:$0xff] }
 0x14f   : > { %v3187_v24 = vrot.slane %v3186_v42, 1  ;;  %v7971_v14 = vadd.f32 %v3305_v35, %v3304_v4  ;;  %v7975_v57 = vmul.f32 %v7914_v16, %v7914_v16  ;;  %v3211_v32 = vrot.slane %v3210_v18, 1  ;;  %v3082_v59 = vld [vmem:[%s7442_s17 + $0x1a8] sm:$0xff] }
 0x150   : > { %v3235_v33 = vrot.slane %v3234_v50, 1  ;;  %v3259_v38 = vrot.slane %v3258_v29, 1  ;;  %v7982_v34 = vmul.f32 %v7916_v17, %v7916_v17  ;;  %v3086_v0 = vld [vmem:[%s7442_s17 + $0x1c8] sm:$0xff]  ;;  %v3140_v48 = vadd.f32 %v3139_v43, %v3138_v53 }
 0x151   : > { %11006 = vst [vmem:[#allocation43_spill] sm:$0xff] %v7975_v57  ;;  %v3164_v27 = vadd.f32 %v3163_v58, %v3162_v10  ;;  %v3283_v12 = vrot.slane %v7968_v51, 1  ;;  %v3090_v4 = vld [vmem:[%s7442_s17 + $0x1e8] sm:$0xff]  ;;  %v3188_v16 = vadd.f32 %v3187_v24, %v3186_v42  ;;  %v3212_v46 = vadd.f32 %v3211_v32, %v3210_v18 }
 0x152   : > { %11007 = vst [vmem:[#allocation44_spill] sm:$0xff] %v7982_v34  ;;  %v3236_v22 = vadd.f32 %v3235_v33, %v3234_v50  ;;  %v3307_v3 = vrot.slane %v7971_v14, 1  ;;  %v3260_v20 = vadd.f32 %v3259_v38, %v3258_v29  ;;  %v3327_v35 = vrot.slane %v3062_v36, 4 }
 0x153   : > { %v3351_v8 = vrot.slane %v3066_v31, 4  ;;  %v3375_v6 = vrot.slane %v3070_v40, 4  ;;  %v3399_v57 = vrot.slane %v3074_v28, 4  ;;  %v3423_v17 = vrot.slane %v3078_v52, 4 }
 0x154   : > { %v3447_v34 = vrot.slane %v3082_v59, 4  ;;  %v3471_v21 = vrot.slane %v3086_v0, 4  ;;  %v3328_v26 = vadd.f32 %v3327_v35, %v3062_v36  ;;  %v3495_v10 = vrot.slane %v3090_v4, 4 }
 0x155   : > { %v3352_v19 = vadd.f32 %v3351_v8, %v3066_v31  ;;  %v3376_v53 = vadd.f32 %v3375_v6, %v3070_v40  ;;  %v3400_v43 = vadd.f32 %v3399_v57, %v3074_v28  ;;  %v3424_v58 = vadd.f32 %v3423_v17, %v3078_v52 }
 0x156   : > { %v3448_v56 = vadd.f32 %v3447_v34, %v3082_v59  ;;  %v3472_v42 = vadd.f32 %v3471_v21, %v3086_v0  ;;  %v3329_v18 = vrot.slane %v3328_v26, 2  ;;  %v3496_v32 = vadd.f32 %v3495_v10, %v3090_v4 }
 0x157   : > { %v3353_v50 = vrot.slane %v3352_v19, 2  ;;  %v3377_v24 = vrot.slane %v3376_v53, 2  ;;  %v3401_v29 = vrot.slane %v3400_v43, 2  ;;  %v3425_v33 = vrot.slane %v3424_v58, 2 }
 0x158   : > { %v3449_v38 = vrot.slane %v3448_v56, 2  ;;  %v3473_v7 = vrot.slane %v3472_v42, 2  ;;  %v3330_v11 = vadd.f32 %v3329_v18, %v3328_v26  ;;  %v3497_v13 = vrot.slane %v3496_v32, 2 }
 0x159   : > { %v3354_v1 = vadd.f32 %v3353_v50, %v3352_v19  ;;  %v3378_v37 = vadd.f32 %v3377_v24, %v3376_v53  ;;  %v3402_v36 = vadd.f32 %v3401_v29, %v3400_v43  ;;  %v3426_v8 = vadd.f32 %v3425_v33, %v3424_v58 }
 0x15a   : > { %v3450_v6 = vadd.f32 %v3449_v38, %v3448_v56  ;;  %v3474_v31 = vadd.f32 %v3473_v7, %v3472_v42  ;;  %v3331_v57 = vrot.slane %v3330_v11, 1  ;;  %v3498_v21 = vadd.f32 %v3497_v13, %v3496_v32 }
 0x15b   : > { %v3355_v40 = vrot.slane %v3354_v1, 1  ;;  %v3379_v28 = vrot.slane %v3378_v37, 1  ;;  %v3403_v34 = vrot.slane %v3402_v36, 1  ;;  %v3427_v52 = vrot.slane %v3426_v8, 1 }
 0x15c   : > { %v3451_v59 = vrot.slane %v3450_v6, 1  ;;  %v3475_v0 = vrot.slane %v3474_v31, 1  ;;  %v3332_v4 = vadd.f32 %v3331_v57, %v3330_v11  ;;  %v3499_v10 = vrot.slane %v3498_v21, 1 }
 0x15d   : > { %v3356_v35 = vadd.f32 %v3355_v40, %v3354_v1  ;;  %v3380_v17 = vadd.f32 %v3379_v28, %v3378_v37  ;;  %v3284_v19 = vadd.f32 %v3283_v12, %v7968_v51  ;;  %v3308_v26 = vadd.f32 %v3307_v3, %v7971_v14 }
 0x15e   : > { %v3404_v53 = vadd.f32 %v3403_v34, %v3402_v36  ;;  %v3428_v43 = vadd.f32 %v3427_v52, %v3426_v8  ;;  %v3452_v56 = vadd.f32 %v3451_v59, %v3450_v6  ;;  %v3476_v7 = vadd.f32 %v3475_v0, %v3474_v31  ;;  %v3029_v0 = vld [vmem:[%s7442_s17] sm:$0xff] }
 0x15f   : > { %v3730_v58 = vmul.f32 0.125, %v3140_v48  ;;  %v3734_v42 = vmul.f32 0.125, %v3164_v27  ;;  %v3500_v18 = vadd.f32 %v3499_v10, %v3498_v21  ;;  %v3738_v13 = vmul.f32 0.125, %v3188_v16 }
 0x160   : > { %v3742_v50 = vmul.f32 0.125, %v3212_v46  ;;  %v3746_v24 = vmul.f32 0.125, %v3236_v22  ;;  %v3750_v32 = vmul.f32 0.125, %v3260_v20  ;;  %v3762_v29 = vmul.f32 0.125, %v3332_v4  ;;  %v3033_v4 = vld [vmem:[%s7442_s17 + $0x20] sm:$0xff] }
 0x161   : > { %v3766_v11 = vmul.f32 0.125, %v3356_v35  ;;  %v3770_v1 = vmul.f32 0.125, %v3380_v17  ;;  %v3754_v37 = vmul.f32 0.125, %v3284_v19  ;;  %v3758_v33 = vmul.f32 0.125, %v3308_v26  ;;  %v3037_v26 = vld [vmem:[%s7442_s17 + $0x40] sm:$0xff] }
 0x162   : > { %v3774_v38 = vmul.f32 0.125, %v3404_v53  ;;  %v3778_v51 = vmul.f32 0.125, %v3428_v43  ;;  %v3782_v12 = vmul.f32 0.125, %v3452_v56  ;;  %v7992_v14 = vmul.f32 0.125, %v3476_v7  ;;  %v3041_v53 = vld [vmem:[%s7442_s17 + $0x60] sm:$0xff] }
 0x163   : > { %v4736_v3 = vsel %vm1938_vm3, %v3734_v42, %v3730_v58  ;;  %v4764_v48 = vsel %vm1938_vm3, %v3766_v11, %v3762_v29  ;;  %v7996_v27 = vmul.f32 0.125, %v3500_v18  ;;  %v8000_v22 = vmul.f32 %v3730_v58, %v3730_v58  ;;  %v3045_v43 = vld [vmem:[%s7442_s17 + $0x80] sm:$0xff] }
 0x164   : > { %v4737_v16 = vsel %vm1940_vm4, %v3738_v13, %v4736_v3  ;;  %v4765_v46 = vsel %vm1940_vm4, %v3770_v1, %v4764_v48  ;;  %v8004_v8 = vmul.f32 %v3734_v42, %v3734_v42  ;;  %v8006_v6 = vmul.f32 %v3738_v13, %v3738_v13  ;;  %v3049_v18 = vld [vmem:[%s7442_s17 + $0xa0] sm:$0xff] }
 0x165   : > { %11008 = vst [vmem:[#allocation45_spill] sm:$0xff] %v8000_v22  ;;  %v4738_v20 = vsel %vm1942_vm5, %v3742_v50, %v4737_v16  ;;  %v4766_v36 = vsel %vm1942_vm5, %v3774_v38, %v4765_v46  ;;  %v8010_v40 = vmul.f32 %v3742_v50, %v3742_v50  ;;  %v8012_v28 = vmul.f32 %v3746_v24, %v3746_v24  ;;  %v3053_v13 = vld [vmem:[%s7442_s17 + $0xc0] sm:$0xff] }
 0x166   : > { %11009 = vst [vmem:[#allocation46_spill] sm:$0xff] %v8004_v8  ;;  %11010 = vst [vmem:[#allocation47_spill] sm:$0xff] %v8006_v6  ;;  %v4739_v31 = vsel %vm1944_vm6, %v3746_v24, %v4738_v20  ;;  %v4767_v57 = vsel %vm1944_vm6, %v3778_v51, %v4766_v36  ;;  %v8016_v52 = vmul.f32 %v3750_v32, %v3750_v32  ;;  %v3057_v50 = vld [vmem:[%s7442_s17 + $0xe0] sm:$0xff]  ;;  %v3129_v3 = vrot.slane %v3029_v0, 4 }
 0x167   : > { %11011 = vst [vmem:[#allocation48_spill] sm:$0xff] %v8010_v40  ;;  %11012 = vst [vmem:[#allocation49_spill] sm:$0xff] %v8012_v28  ;;  %v4740_v21 = vsel %vm1946_vm7, %v3750_v32, %v4739_v31  ;;  %v4768_v34 = vsel %vm1946_vm7, %v3782_v12, %v4767_v57  ;;  %v8018_v59 = vmul.f32 %v3754_v37, %v3754_v37  ;;  %v3153_v48 = vrot.slane %v3033_v4, 4 }
 0x168   : > { %11013 = vst [vmem:[#allocation50_spill] sm:$0xff] %v8016_v52  ;;  %v4741_v35 = vsel %vm1948_vm8, %v3754_v37, %v4740_v21  ;;  %v4769_v17 = vsel %vm1948_vm8, %v7992_v14, %v4768_v34  ;;  %v8025_v10 = vmul.f32 %v3758_v33, %v3758_v33  ;;  %v8027_v19 = vmul.f32 %v3762_v29, %v3762_v29 }
 0x169   : > { %11014 = vst [vmem:[#allocation51_spill] sm:$0xff] %v8018_v59  ;;  %v4742_v56 = vsel %vm1950_vm9, %v3758_v33, %v4741_v35  ;;  %v4770_v7 = vsel %vm1950_vm9, %v7996_v27, %v4769_v17  ;;  %v8035_v58 = vmul.f32 %v3766_v11, %v3766_v11  ;;  %v8037_v42 = vmul.f32 %v3770_v1, %v3770_v1 }
 0x16a   : > { %11015 = vst [vmem:[#allocation52_spill] sm:$0xff] %v8025_v10  ;;  %11016 = vst [vmem:[#allocation53_spill] sm:$0xff] %v8027_v19  ;;  %v6869_v24 = vpack.c.bf16 %v4770_v7, %v4742_v56  ;;  %v8042_v32 = vmul.f32 %v3774_v38, %v3774_v38  ;;  %v8044_v29 = vmul.f32 %v3778_v51, %v3778_v51  ;;  %v3177_v33 = vrot.slane %v3037_v26, 4 }
 0x16b   : > { %11017 = vst [vmem:[#allocation54_spill] sm:$0xff] %v8035_v58  ;;  %11018 = vst [vmem:[#allocation55_spill] sm:$0xff] %v8037_v42  ;;  %v8046_v37 = vmul.f32 %v3782_v12, %v3782_v12  ;;  %v3201_v16 = vrot.slane %v3041_v53, 4  ;;  %v3225_v46 = vrot.slane %v3045_v43, 4  ;;  %v3249_v11 = vrot.slane %v3049_v18, 4 }
 0x16c   : > { %11019 = vst [vmem:[#allocation56_spill] sm:$0xff] %v8042_v32  ;;  %11020 = vst [vmem:[#allocation57_spill] sm:$0xff] %v8044_v29  ;;  %6870 = vmatprep.subr.bf16.mxu1 %v6869_v24  ;;  %v3273_v20 = vrot.slane %v3053_v13, 4  ;;  %v3297_v1 = vrot.slane %v3057_v50, 4  ;;  %v3130_v36 = vadd.f32 %v3129_v3, %v3029_v0  ;;  %v3154_v31 = vadd.f32 %v3153_v48, %v3033_v4  ;;  %v3065_v3 = vld [vmem:[%s7442_s17 + $0x120] sm:$0xff] }
 0x16d   : > { %11021 = vst [vmem:[#allocation58_spill] sm:$0xff] %v8046_v37  ;;  %v3178_v57 = vadd.f32 %v3177_v33, %v3037_v26  ;;  %v3202_v21 = vadd.f32 %v3201_v16, %v3041_v53  ;;  %v3226_v34 = vadd.f32 %v3225_v46, %v3045_v43  ;;  %v3250_v38 = vadd.f32 %v3249_v11, %v3049_v18 }
 0x16e   : > { %v3274_v35 = vadd.f32 %v3273_v20, %v3053_v13  ;;  %v3298_v51 = vadd.f32 %v3297_v1, %v3057_v50  ;;  %v3131_v17 = vrot.slane %v3130_v36, 2  ;;  %v3155_v12 = vrot.slane %v3154_v31, 2  ;;  %v3061_v50 = vld [vmem:[%s7442_s17 + $0x100] sm:$0xff] }
 0x16f   : > { %v3179_v56 = vrot.slane %v3178_v57, 2  ;;  %v3203_v7 = vrot.slane %v3202_v21, 2  ;;  %v3227_v37 = vrot.slane %v3226_v34, 2  ;;  %v3251_v24 = vrot.slane %v3250_v38, 2  ;;  %v3073_v20 = vld [vmem:[%s7442_s17 + $0x160] sm:$0xff] }
 0x170   : > { %v3275_v29 = vrot.slane %v3274_v35, 2  ;;  %v3299_v32 = vrot.slane %v3298_v51, 2  ;;  %v3132_v42 = vadd.f32 %v3131_v17, %v3130_v36  ;;  %v3156_v0 = vadd.f32 %v3155_v12, %v3154_v31  ;;  %v3077_v1 = vld [vmem:[%s7442_s17 + $0x180] sm:$0xff] }
 0x171   : > { %v3180_v4 = vadd.f32 %v3179_v56, %v3178_v57  ;;  %v3204_v26 = vadd.f32 %v3203_v7, %v3202_v21  ;;  %v3228_v53 = vadd.f32 %v3227_v37, %v3226_v34  ;;  %v3252_v43 = vadd.f32 %v3251_v24, %v3250_v38  ;;  %v3081_v31 = vld [vmem:[%s7442_s17 + $0x1a0] sm:$0xff] }
 0x172   : > { %v8048_v18 = vadd.f32 %v3275_v29, %v3274_v35  ;;  %v8050_v13 = vadd.f32 %v3299_v32, %v3298_v51  ;;  %v3133_v48 = vrot.slane %v3132_v42, 1  ;;  %v3157_v33 = vrot.slane %v3156_v0, 1  ;;  %v3069_v29 = vld [vmem:[%s7442_s17 + $0x140] sm:$0xff] }
 0x173   : > { %v3181_v16 = vrot.slane %v3180_v4, 1  ;;  %v3205_v46 = vrot.slane %v3204_v26, 1  ;;  %v8056_v11 = vmul.f32 %v7992_v14, %v7992_v14  ;;  %v8060_v37 = vmul.f32 %v7996_v27, %v7996_v27  ;;  %v3085_v57 = vld [vmem:[%s7442_s17 + $0x1c0] sm:$0xff] }
 0x174   : > { %v3229_v32 = vrot.slane %v3228_v53, 1  ;;  %v3253_v36 = vrot.slane %v3252_v43, 1  ;;  %v3089_v21 = vld [vmem:[%s7442_s17 + $0x1e0] sm:$0xff]  ;;  %v3134_v34 = vadd.f32 %v3133_v48, %v3132_v42  ;;  %v3158_v38 = vadd.f32 %v3157_v33, %v3156_v0 }
 0x175   : > { %11022 = vst [vmem:[#allocation59_spill] sm:$0xff] %v8056_v11  ;;  %11023 = vst [vmem:[#allocation60_spill] sm:$0xff] %v8060_v37  ;;  %v3277_v35 = vrot.slane %v8048_v18, 1  ;;  %v3301_v51 = vrot.slane %v8050_v13, 1  ;;  %v3182_v14 = vadd.f32 %v3181_v16, %v3180_v4  ;;  %v3206_v17 = vadd.f32 %v3205_v46, %v3204_v26 }
 0x176   : > { %v3230_v12 = vadd.f32 %v3229_v32, %v3228_v53  ;;  %v3254_v56 = vadd.f32 %v3253_v36, %v3252_v43  ;;  %v3321_v27 = vrot.slane %v3061_v50, 4  ;;  %v3345_v7 = vrot.slane %v3065_v3, 4 }
 0x177   : > { %v3369_v24 = vrot.slane %v3069_v29, 4  ;;  %v3393_v37 = vrot.slane %v3073_v20, 4  ;;  %v3417_v11 = vrot.slane %v3077_v1, 4  ;;  %v3441_v58 = vrot.slane %v3081_v31, 4 }
 0x178   : > { %v3465_v19 = vrot.slane %v3085_v57, 4  ;;  %v3489_v10 = vrot.slane %v3089_v21, 4  ;;  %v3322_v59 = vadd.f32 %v3321_v27, %v3061_v50  ;;  %v3346_v52 = vadd.f32 %v3345_v7, %v3065_v3 }
 0x179   : > { %v3370_v42 = vadd.f32 %v3369_v24, %v3069_v29  ;;  %v3394_v0 = vadd.f32 %v3393_v37, %v3073_v20  ;;  %v3418_v48 = vadd.f32 %v3417_v11, %v3077_v1  ;;  %v3442_v33 = vadd.f32 %v3441_v58, %v3081_v31 }
 0x17a   : > { %v3466_v28 = vadd.f32 %v3465_v19, %v3085_v57  ;;  %v3490_v40 = vadd.f32 %v3489_v10, %v3089_v21  ;;  %v3323_v4 = vrot.slane %v3322_v59, 2  ;;  %v3347_v26 = vrot.slane %v3346_v52, 2 }
 0x17b   : > { %v3371_v53 = vrot.slane %v3370_v42, 2  ;;  %v3395_v43 = vrot.slane %v3394_v0, 2  ;;  %v3419_v16 = vrot.slane %v3418_v48, 2  ;;  %v3443_v46 = vrot.slane %v3442_v33, 2 }
 0x17c   : > { %v3467_v32 = vrot.slane %v3466_v28, 2  ;;  %v3491_v36 = vrot.slane %v3490_v40, 2  ;;  %v3324_v6 = vadd.f32 %v3323_v4, %v3322_v59  ;;  %v3348_v8 = vadd.f32 %v3347_v26, %v3346_v52 }
 0x17d   : > { %v3372_v22 = vadd.f32 %v3371_v53, %v3370_v42  ;;  %v3396_v54 = vadd.f32 %v3395_v43, %v3394_v0  ;;  %v3420_v50 = vadd.f32 %v3419_v16, %v3418_v48  ;;  %v3444_v3 = vadd.f32 %v3443_v46, %v3442_v33 }
 0x17e   : > { %v3468_v29 = vadd.f32 %v3467_v32, %v3466_v28  ;;  %v3492_v37 = vadd.f32 %v3491_v36, %v3490_v40  ;;  %v3325_v11 = vrot.slane %v3324_v6, 1  ;;  %v3349_v58 = vrot.slane %v3348_v8, 1 }
 0x17f   : > { %v3373_v19 = vrot.slane %v3372_v22, 1  ;;  %v3397_v10 = vrot.slane %v3396_v54, 1  ;;  %v3421_v20 = vrot.slane %v3420_v50, 1  ;;  %v3445_v1 = vrot.slane %v3444_v3, 1 }
 0x180   : > { %v3469_v31 = vrot.slane %v3468_v29, 1  ;;  %v3493_v57 = vrot.slane %v3492_v37, 1  ;;  %v3326_v21 = vadd.f32 %v3325_v11, %v3324_v6  ;;  %v3350_v27 = vadd.f32 %v3349_v58, %v3348_v8 }
 0x181   : > { %v3374_v7 = vadd.f32 %v3373_v19, %v3372_v22  ;;  %v3398_v24 = vadd.f32 %v3397_v10, %v3396_v54  ;;  %v3278_v52 = vadd.f32 %v3277_v35, %v8048_v18  ;;  %v3302_v59 = vadd.f32 %v3301_v51, %v8050_v13 }
 0x182   : > { %v3422_v42 = vadd.f32 %v3421_v20, %v3420_v50  ;;  %v3446_v0 = vadd.f32 %v3445_v1, %v3444_v3  ;;  %v3470_v28 = vadd.f32 %v3469_v31, %v3468_v29  ;;  %v3494_v40 = vadd.f32 %v3493_v57, %v3492_v37  ;;  %v482_v31 = vld [vmem:[%s7429_s21 + $0x208] sm:$0xff] }
 0x183   : > { %v3729_v48 = vmul.f32 0.125, %v3134_v34  ;;  %v3733_v33 = vmul.f32 0.125, %v3158_v38  ;;  %v3737_v4 = vmul.f32 0.125, %v3182_v14  ;;  %v3741_v26 = vmul.f32 0.125, %v3206_v17  ;;  %v486_v57 = vld [vmem:[%s7429_s21 + $0x228] sm:$0xff] }
 0x184   : > { %v3745_v53 = vmul.f32 0.125, %v3230_v12  ;;  %v3749_v43 = vmul.f32 0.125, %v3254_v56  ;;  %v3761_v16 = vmul.f32 0.125, %v3326_v21  ;;  %v3765_v46 = vmul.f32 0.125, %v3350_v27 }
 0x185   : > { %v3769_v6 = vmul.f32 0.125, %v3374_v7  ;;  %v3773_v8 = vmul.f32 0.125, %v3398_v24  ;;  %v3753_v22 = vmul.f32 0.125, %v3278_v52  ;;  %v3757_v54 = vmul.f32 0.125, %v3302_v59  ;;  %v490_v52 = vld [vmem:[%s7429_s21 + $0x248] sm:$0xff] }
 0x186   : > { %v3777_v32 = vmul.f32 0.125, %v3422_v42  ;;  %v3781_v18 = vmul.f32 0.125, %v3446_v0  ;;  %v8072_v35 = vmul.f32 0.125, %v3470_v28  ;;  %v8074_v13 = vmul.f32 0.125, %v3494_v40  ;;  %v494_v59 = vld [vmem:[%s7429_s21 + $0x268] sm:$0xff] }
 0x187   : > { %v4729_v51 = vsel %vm1938_vm3, %v3733_v33, %v3729_v48  ;;  %v4757_v34 = vsel %vm1938_vm3, %v3765_v46, %v3761_v16  ;;  %v8080_v17 = vmul.f32 %v3729_v48, %v3729_v48  ;;  %v8082_v12 = vmul.f32 %v3733_v33, %v3733_v33  ;;  %v498_v42 = vld [vmem:[%s7429_s21 + $0x288] sm:$0xff] }
 0x188   : > { %v4730_v38 = vsel %vm1940_vm4, %v3737_v4, %v4729_v51  ;;  %v4758_v14 = vsel %vm1940_vm4, %v3769_v6, %v4757_v34  ;;  %v8086_v50 = vmul.f32 %v3737_v4, %v3737_v4  ;;  %v8088_v3 = vmul.f32 %v3741_v26, %v3741_v26  ;;  %v502_v33 = vld [vmem:[%s7429_s21 + $0x2a8] sm:$0xff] }
 0x189   : > { %11024 = vst [vmem:[#allocation61_spill] sm:$0xff] %v8080_v17  ;;  %11025 = vst [vmem:[#allocation62_spill] sm:$0xff] %v8082_v12  ;;  %v4731_v56 = vsel %vm1942_vm5, %v3741_v26, %v4730_v38  ;;  %v4759_v36 = vsel %vm1942_vm5, %v3773_v8, %v4758_v14  ;;  %v8092_v11 = vmul.f32 %v3745_v53, %v3745_v53  ;;  %v506_v4 = vld [vmem:[%s7429_s21 + $0x2c8] sm:$0xff]  ;;  %v955_v51 = vrot.slane %v490_v52, 4 }
 0x18a   : > { %11026 = vst [vmem:[#allocation63_spill] sm:$0xff] %v8086_v50  ;;  %11027 = vst [vmem:[#allocation64_spill] sm:$0xff] %v8088_v3  ;;  %v4732_v29 = vsel %vm1944_vm6, %v3745_v53, %v4731_v56  ;;  %v4760_v37 = vsel %vm1944_vm6, %v3777_v32, %v4759_v36  ;;  %v8094_v58 = vmul.f32 %v3749_v43, %v3749_v43  ;;  %v510_v26 = vld [vmem:[%s7429_s21 + $0x2e8] sm:$0xff]  ;;  %v979_v34 = vrot.slane %v494_v59, 4 }
 0x18b   : > { %11028 = vst [vmem:[#allocation65_spill] sm:$0xff] %v8092_v11  ;;  %v4733_v19 = vsel %vm1946_vm7, %v3749_v43, %v4732_v29  ;;  %v4761_v10 = vsel %vm1946_vm7, %v3781_v18, %v4760_v37  ;;  %v8098_v20 = vmul.f32 %v3753_v22, %v3753_v22  ;;  %v8100_v1 = vmul.f32 %v3757_v54, %v3757_v54 }
 0x18c   : > { %11029 = vst [vmem:[#allocation66_spill] sm:$0xff] %v8094_v58  ;;  %v4734_v21 = vsel %vm1948_vm8, %v3753_v22, %v4733_v19  ;;  %v4762_v27 = vsel %vm1948_vm8, %v8072_v35, %v4761_v10  ;;  %v8107_v7 = vmul.f32 %v3761_v16, %v3761_v16  ;;  %v8109_v24 = vmul.f32 %v3765_v46, %v3765_v46 }
 0x18d   : > { %11030 = vst [vmem:[#allocation67_spill] sm:$0xff] %v8098_v20  ;;  %11031 = vst [vmem:[#allocation68_spill] sm:$0xff] %v8100_v1  ;;  %v4735_v0 = vsel %vm1950_vm9, %v3757_v54, %v4734_v21  ;;  %v4763_v28 = vsel %vm1950_vm9, %v8074_v13, %v4762_v27  ;;  %v8117_v40 = vmul.f32 %v3769_v6, %v3769_v6  ;;  %v907_v46 = vrot.slane %v482_v31, 4 }
 0x18e   : > { %11032 = vst [vmem:[#allocation69_spill] sm:$0xff] %v8107_v7  ;;  %11033 = vst [vmem:[#allocation70_spill] sm:$0xff] %v8109_v24  ;;  %v8119_v48 = vmul.f32 %v3773_v8, %v3773_v8  ;;  %v6871_v53 = vpack.c.bf16 %v4763_v28, %v4735_v0  ;;  %v8124_v43 = vmul.f32 %v3777_v32, %v3777_v32  ;;  %v931_v22 = vrot.slane %v486_v57, 4  ;;  %v476_v24 = vld [vmem:[%s7429_s21 + $0x1d8] sm:$0xff] }
 0x18f   : > { %11034 = vst [vmem:[#allocation71_spill] sm:$0xff] %v8117_v40  ;;  %v8126_v16 = vmul.f32 %v3781_v18, %v3781_v18  ;;  %v1003_v54 = vrot.slane %v498_v42, 4  ;;  %v908_v38 = vadd.f32 %v907_v46, %v482_v31  ;;  %v1027_v14 = vrot.slane %v502_v33, 4 }
 0x190   : > { %11035 = vst [vmem:[#allocation72_spill] sm:$0xff] %v8119_v48  ;;  %11036 = vst [vmem:[#allocation73_spill] sm:$0xff] %v8124_v43  ;;  %6872 = vmatpush1.bf16.xpose.msra.mxu1 %v6871_v53  ;;  %v1051_v6 = vrot.slane %v506_v4, 4  ;;  %v1075_v56 = vrot.slane %v510_v26, 4  ;;  %v932_v8 = vadd.f32 %v931_v22, %v486_v57  ;;  %v956_v36 = vadd.f32 %v955_v51, %v490_v52 }
 0x191   : > { %11037 = vst [vmem:[#allocation74_spill] sm:$0xff] %v8126_v16  ;;  %v980_v29 = vadd.f32 %v979_v34, %v494_v59  ;;  %v1004_v37 = vadd.f32 %v1003_v54, %v498_v42  ;;  %v909_v19 = vrot.slane %v908_v38, 2  ;;  %v1028_v10 = vadd.f32 %v1027_v14, %v502_v33  ;;  %v514_v33 = vld [vmem:[%s7429_s21 + $0x308] sm:$0xff] }
 0x192   : > { %v1052_v32 = vadd.f32 %v1051_v6, %v506_v4  ;;  %v1076_v21 = vadd.f32 %v1075_v56, %v510_v26  ;;  %v933_v18 = vrot.slane %v932_v8, 2  ;;  %v957_v27 = vrot.slane %v956_v36, 2 }
 0x193   : > { %v981_v0 = vrot.slane %v980_v29, 2  ;;  %v1005_v28 = vrot.slane %v1004_v37, 2  ;;  %v910_v16 = vadd.f32 %v909_v19, %v908_v38  ;;  %v1029_v43 = vrot.slane %v1028_v10, 2 }
 0x194   : > { %v1053_v53 = vrot.slane %v1052_v32, 2  ;;  %v1077_v31 = vrot.slane %v1076_v21, 2  ;;  %v934_v46 = vadd.f32 %v933_v18, %v932_v8  ;;  %v958_v48 = vadd.f32 %v957_v27, %v956_v36 }
 0x195   : > { %v982_v40 = vadd.f32 %v981_v0, %v980_v29  ;;  %v1006_v57 = vadd.f32 %v1005_v28, %v1004_v37  ;;  %v911_v52 = vrot.slane %v910_v16, 1  ;;  %v1030_v59 = vadd.f32 %v1029_v43, %v1028_v10  ;;  %v489_v28 = vld [vmem:[%s7429_s21 + $0x240] sm:$0xff] }
 0x196   : > { %v1054_v42 = vadd.f32 %v1053_v53, %v1052_v32  ;;  %v1078_v22 = vadd.f32 %v1077_v31, %v1076_v21  ;;  %v935_v4 = vrot.slane %v934_v46, 1  ;;  %v959_v26 = vrot.slane %v958_v48, 1  ;;  %v481_v32 = vld [vmem:[%s7429_s21 + $0x200] sm:$0xff] }
 0x197   : > { %v983_v51 = vrot.slane %v982_v40, 1  ;;  %v1007_v34 = vrot.slane %v1006_v57, 1  ;;  %v912_v54 = vadd.f32 %v911_v52, %v910_v16  ;;  %v1031_v38 = vrot.slane %v1030_v59, 1  ;;  %v485_v21 = vld [vmem:[%s7429_s21 + $0x220] sm:$0xff] }
 0x198   : > { %v1055_v14 = vrot.slane %v1054_v42, 1  ;;  %v1079_v6 = vrot.slane %v1078_v22, 1  ;;  %v936_v56 = vadd.f32 %v935_v4, %v934_v46  ;;  %v960_v8 = vadd.f32 %v959_v26, %v958_v48  ;;  %v493_v53 = vld [vmem:[%s7429_s21 + $0x260] sm:$0xff] }
 0x199   : > { %v984_v36 = vadd.f32 %v983_v51, %v982_v40  ;;  %v1008_v29 = vadd.f32 %v1007_v34, %v1006_v57  ;;  %v1032_v43 = vadd.f32 %v1031_v38, %v1030_v59  ;;  %v1099_v10 = vrot.slane %v514_v33, 4  ;;  %v497_v57 = vld [vmem:[%s7429_s21 + $0x280] sm:$0xff] }
 0x19a   : > { %v1056_v37 = vadd.f32 %v1055_v14, %v1054_v42  ;;  %v1080_v19 = vadd.f32 %v1079_v6, %v1078_v22  ;;  %v8131_v18 = vmul.f32 0.125, %v912_v54  ;;  %v8133_v27 = vmul.f32 0.125, %v936_v56 }
 0x19b   : > { %v8135_v16 = vmul.f32 0.125, %v960_v8  ;;  %v8137_v0 = vmul.f32 0.125, %v984_v36  ;;  %v1100_v48 = vadd.f32 %v1099_v10, %v514_v33  ;;  %v8141_v40 = vmul.f32 0.125, %v1008_v29 }
 0x19c   : > { %11038 = vst [vmem:[#allocation75_spill] sm:$0xff] %v8131_v18  ;;  %11039 = vst [vmem:[#allocation76_spill] sm:$0xff] %v8133_v27  ;;  %v8143_v31 = vmul.f32 0.125, %v1032_v43  ;;  %v8145_v46 = vmul.f32 0.125, %v1056_v37  ;;  %v8148_v52 = vmul.f32 0.125, %v1080_v19  ;;  %v2188_v59 = vsel %vm1938_vm3, %v8133_v27, %v8131_v18  ;;  %v501_v43 = vld [vmem:[%s7429_s21 + $0x2a0] sm:$0xff] }
 0x19d   : > { %11040 = vst [vmem:[#allocation77_spill] sm:$0xff] %v8135_v16  ;;  %11041 = vst [vmem:[#allocation78_spill] sm:$0xff] %v8137_v0  ;;  %v901_v42 = vrot.slane %v481_v32, 4  ;;  %v925_v22 = vrot.slane %v485_v21, 4  ;;  %v1101_v4 = vrot.slane %v1100_v48, 2  ;;  %v2189_v33 = vsel %vm1940_vm4, %v8135_v16, %v2188_v59 }
 0x19e   : > { %11042 = vst [vmem:[#allocation79_spill] sm:$0xff] %v8141_v40  ;;  %11043 = vst [vmem:[#allocation80_spill] sm:$0xff] %v8143_v31  ;;  %v949_v26 = vrot.slane %v489_v28, 4  ;;  %v973_v51 = vrot.slane %v493_v53, 4  ;;  %v2190_v34 = vsel %vm1942_vm5, %v8137_v0, %v2189_v33  ;;  %v997_v14 = vrot.slane %v497_v57, 4 }
 0x19f   : > { %11044 = vst [vmem:[#allocation81_spill] sm:$0xff] %v8145_v46  ;;  %11045 = vst [vmem:[#allocation82_spill] sm:$0xff] %v8148_v52  ;;  %v902_v54 = vadd.f32 %v901_v42, %v481_v32  ;;  %v926_v38 = vadd.f32 %v925_v22, %v485_v21  ;;  %v1102_v6 = vadd.f32 %v1101_v4, %v1100_v48  ;;  %v505_v32 = vld [vmem:[%s7429_s21 + $0x2c0] sm:$0xff] }
 0x1a0   : > { %v2191_v56 = vsel %vm1944_vm6, %v8141_v40, %v2190_v34  ;;  %v950_v8 = vadd.f32 %v949_v26, %v489_v28  ;;  %v974_v36 = vadd.f32 %v973_v51, %v493_v53  ;;  %v998_v10 = vadd.f32 %v997_v14, %v497_v57 }
 0x1a1   : > { %v2192_v29 = vsel %vm1946_vm7, %v8143_v31, %v2191_v56  ;;  %v903_v37 = vrot.slane %v902_v54, 2  ;;  %v927_v19 = vrot.slane %v926_v38, 2  ;;  %v1103_v59 = vrot.slane %v1102_v6, 1 }
 0x1a2   : > { %v2193_v33 = vsel %vm1948_vm8, %v8145_v46, %v2192_v29  ;;  %v951_v21 = vrot.slane %v950_v8, 2  ;;  %v975_v48 = vrot.slane %v974_v36, 2  ;;  %v999_v22 = vrot.slane %v998_v10, 2  ;;  %v509_v46 = vld [vmem:[%s7429_s21 + $0x2e0] sm:$0xff] }
 0x1a3   : > { %v2194_v42 = vsel %vm1950_vm9, %v8148_v52, %v2193_v33  ;;  %v904_v28 = vadd.f32 %v903_v37, %v902_v54  ;;  %v928_v53 = vadd.f32 %v927_v19, %v926_v38  ;;  %v1104_v4 = vadd.f32 %v1103_v59, %v1102_v6  ;;  %v513_v33 = vld [vmem:[%s7429_s21 + $0x300] sm:$0xff] }
 0x1a4   : > { %v952_v26 = vadd.f32 %v951_v21, %v950_v8  ;;  %v976_v51 = vadd.f32 %v975_v48, %v974_v36  ;;  %v1021_v34 = vrot.slane %v501_v43, 4  ;;  %v1000_v56 = vadd.f32 %v999_v22, %v998_v10 }
 0x1a5   : > { %v905_v57 = vrot.slane %v904_v28, 1  ;;  %v929_v14 = vrot.slane %v928_v53, 1  ;;  %v1045_v31 = vrot.slane %v505_v32, 4  ;;  %v8167_v29 = vmul.f32 0.125, %v1104_v4  ;;  %v3094_v4 = vld [vmem:[%s7442_s17 + $0x208] sm:$0xff] }
 0x1a6   : > { %v953_v40 = vrot.slane %v952_v26, 1  ;;  %v977_v0 = vrot.slane %v976_v51, 1  ;;  %v1022_v16 = vadd.f32 %v1021_v34, %v501_v43  ;;  %v1001_v38 = vrot.slane %v1000_v56, 1 }
 0x1a7   : > { %v906_v54 = vadd.f32 %v905_v57, %v904_v28  ;;  %v930_v37 = vadd.f32 %v929_v14, %v928_v53  ;;  %v1046_v19 = vadd.f32 %v1045_v31, %v505_v32  ;;  %v8173_v6 = vmul.f32 %v8072_v35, %v8072_v35 }
 0x1a8   : > { %v6857_v8 = vpack.c.bf16 %v8167_v29, %v2194_v42  ;;  %v954_v36 = vadd.f32 %v953_v40, %v952_v26  ;;  %v978_v10 = vadd.f32 %v977_v0, %v976_v51  ;;  %v1002_v59 = vadd.f32 %v1001_v38, %v1000_v56  ;;  %v3098_v0 = vld [vmem:[%s7442_s17 + $0x228] sm:$0xff] }
 0x1a9   : > { %11046 = vst [vmem:[#allocation83_spill] sm:$0xff] %v8173_v6  ;;  %v1023_v21 = vrot.slane %v1022_v16, 2  ;;  %v1047_v48 = vrot.slane %v1046_v19, 2  ;;  %v1069_v22 = vrot.slane %v509_v46, 4  ;;  %v1093_v43 = vrot.slane %v513_v33, 4 }
 0x1aa   : > { %6858 = vmatprep.subr.bf16.mxu0 %v6857_v8  ;;  %v8177_v28 = vmul.f32 0.125, %v906_v54  ;;  %v8179_v31 = vmul.f32 0.125, %v930_v37  ;;  %v8181_v32 = vmul.f32 0.125, %v954_v36  ;;  %v8183_v53 = vmul.f32 0.125, %v978_v10  ;;  %v3102_v37 = vld [vmem:[%s7442_s17 + $0x248] sm:$0xff] }
 0x1ab   : > { %v1024_v35 = vadd.f32 %v1023_v21, %v1022_v16  ;;  %v1048_v42 = vadd.f32 %v1047_v48, %v1046_v19  ;;  %v1070_v40 = vadd.f32 %v1069_v22, %v509_v46  ;;  %v1094_v26 = vadd.f32 %v1093_v43, %v513_v33  ;;  %v3106_v33 = vld [vmem:[%s7442_s17 + $0x268] sm:$0xff] }
 0x1ac   : > { %11047 = vst [vmem:[#allocation84_spill] sm:$0xff] %v8177_v28  ;;  %11048 = vst [vmem:[#allocation85_spill] sm:$0xff] %v8179_v31  ;;  %v8186_v51 = vmul.f32 0.125, %v1002_v59  ;;  %v2181_v34 = vsel %vm1938_vm3, %v8179_v31, %v8177_v28  ;;  %v3519_v57 = vrot.slane %v3094_v4, 4  ;;  %v3543_v8 = vrot.slane %v3098_v0, 4  ;;  %v3110_v22 = vld [vmem:[%s7442_s17 + $0x288] sm:$0xff] }
 0x1ad   : > { %11049 = vst [vmem:[#allocation86_spill] sm:$0xff] %v8181_v32  ;;  %11050 = vst [vmem:[#allocation87_spill] sm:$0xff] %v8183_v53  ;;  %v1025_v14 = vrot.slane %v1024_v35, 1  ;;  %v1049_v56 = vrot.slane %v1048_v42, 1  ;;  %v1071_v54 = vrot.slane %v1070_v40, 2  ;;  %v2182_v16 = vsel %vm1940_vm4, %v8181_v32, %v2181_v34 }
 0x1ae   : > { %11051 = vst [vmem:[#allocation88_spill] sm:$0xff] %v8186_v51  ;;  %v1095_v46 = vrot.slane %v1094_v26, 2  ;;  %v2183_v38 = vsel %vm1942_vm5, %v8183_v53, %v2182_v16  ;;  %v3520_v19 = vadd.f32 %v3519_v57, %v3094_v4  ;;  %v3544_v52 = vadd.f32 %v3543_v8, %v3098_v0 }
 0x1af   : > { %v1026_v36 = vadd.f32 %v1025_v14, %v1024_v35  ;;  %v1050_v10 = vadd.f32 %v1049_v56, %v1048_v42  ;;  %v1072_v59 = vadd.f32 %v1071_v54, %v1070_v40  ;;  %v2184_v21 = vsel %vm1944_vm6, %v8186_v51, %v2183_v38 }
 0x1b0   : > { %v1096_v48 = vadd.f32 %v1095_v46, %v1094_v26  ;;  %v3521_v43 = vrot.slane %v3520_v19, 2  ;;  %v3567_v34 = vrot.slane %v3102_v37, 4  ;;  %v3591_v16 = vrot.slane %v3106_v33, 4  ;;  %v3114_v26 = vld [vmem:[%s7442_s17 + $0x2a8] sm:$0xff] }
 0x1b1   : > { %v1073_v32 = vrot.slane %v1072_v59, 1  ;;  %v8200_v27 = vmul.f32 0.125, %v1026_v36  ;;  %v8202_v31 = vmul.f32 0.125, %v1050_v10  ;;  %v3545_v35 = vrot.slane %v3544_v52, 2 }
 0x1b2   : > { %v1097_v4 = vrot.slane %v1096_v48, 1  ;;  %v3522_v57 = vadd.f32 %v3521_v43, %v3520_v19  ;;  %v3568_v42 = vadd.f32 %v3567_v34, %v3102_v37  ;;  %v3592_v56 = vadd.f32 %v3591_v16, %v3106_v33  ;;  %v3126_v16 = vld [vmem:[%s7442_s17 + $0x308] sm:$0xff] }
 0x1b3   : > { %11052 = vst [vmem:[#allocation89_spill] sm:$0xff] %v8200_v27  ;;  %11053 = vst [vmem:[#allocation90_spill] sm:$0xff] %v8202_v31  ;;  %v1074_v40 = vadd.f32 %v1073_v32, %v1072_v59  ;;  %v2185_v14 = vsel %vm1946_vm7, %v8200_v27, %v2184_v21  ;;  %v3615_v0 = vrot.slane %v3110_v22, 4  ;;  %v3546_v8 = vadd.f32 %v3545_v35, %v3544_v52  ;;  %v3118_v59 = vld [vmem:[%s7442_s17 + $0x2c8] sm:$0xff] }
 0x1b4   : > { %v1098_v54 = vadd.f32 %v1097_v4, %v1096_v48  ;;  %v2186_v46 = vsel %vm1948_vm8, %v8202_v31, %v2185_v14  ;;  %v3523_v38 = vrot.slane %v3522_v57, 1  ;;  %v3569_v19 = vrot.slane %v3568_v42, 2  ;;  %v3122_v48 = vld [vmem:[%s7442_s17 + $0x2e8] sm:$0xff] }
 0x1b5   : > { %v8209_v36 = vmul.f32 0.125, %v1074_v40  ;;  %v3593_v10 = vrot.slane %v3592_v56, 2  ;;  %v3616_v37 = vadd.f32 %v3615_v0, %v3110_v22  ;;  %v3547_v43 = vrot.slane %v3546_v8, 1 }
 0x1b6   : > { %v8211_v32 = vmul.f32 0.125, %v1098_v54  ;;  %v3524_v21 = vadd.f32 %v3523_v38, %v3522_v57  ;;  %v3639_v33 = vrot.slane %v3114_v26, 4  ;;  %v3570_v4 = vadd.f32 %v3569_v19, %v3568_v42 }
 0x1b7   : > { %11054 = vst [vmem:[#allocation91_spill] sm:$0xff] %v8209_v36  ;;  %v2187_v34 = vsel %vm1950_vm9, %v8209_v36, %v2186_v46  ;;  %v3594_v14 = vadd.f32 %v3593_v10, %v3592_v56  ;;  %v3617_v31 = vrot.slane %v3616_v37, 2  ;;  %v8220_v52 = vmul.f32 %v8074_v13, %v8074_v13 }
 0x1b8   : > { %v6859_v22 = vpack.c.bf16 %v8211_v32, %v2187_v34  ;;  %v3548_v35 = vadd.f32 %v3547_v43, %v3546_v8  ;;  %v3640_v40 = vadd.f32 %v3639_v33, %v3114_v26  ;;  %v3571_v0 = vrot.slane %v3570_v4, 1  ;;  %v3093_v43 = vld [vmem:[%s7442_s17 + $0x200] sm:$0xff] }
 0x1b9   : > { %11055 = vst [vmem:[#allocation92_spill] sm:$0xff] %v8220_v52  ;;  %v3595_v57 = vrot.slane %v3594_v14, 1  ;;  %v3618_v54 = vadd.f32 %v3617_v31, %v3616_v37  ;;  %v3663_v38 = vrot.slane %v3118_v59, 4  ;;  %v3687_v36 = vrot.slane %v3122_v48, 4 }
 0x1ba   : > { %6860 = vmatpush1.bf16.xpose.msra.mxu0 %v6859_v22  ;;  %v3641_v46 = vrot.slane %v3640_v40, 2  ;;  %v3711_v27 = vrot.slane %v3126_v16, 4  ;;  %v8223_v42 = vmul.f32 0.125, %v3524_v21  ;;  %v3572_v56 = vadd.f32 %v3571_v0, %v3570_v4 }
 0x1bb   : > { %v3596_v19 = vadd.f32 %v3595_v57, %v3594_v14  ;;  %v3619_v13 = vrot.slane %v3618_v54, 1  ;;  %v3664_v10 = vadd.f32 %v3663_v38, %v3118_v59  ;;  %v3688_v34 = vadd.f32 %v3687_v36, %v3122_v48  ;;  %v3097_v36 = vld [vmem:[%s7442_s17 + $0x220] sm:$0xff] }
 0x1bc   : > { %11056 = vst [vmem:[#allocation93_spill] sm:$0xff] %v8223_v42  ;;  %v3642_v51 = vadd.f32 %v3641_v46, %v3640_v40  ;;  %v3712_v26 = vadd.f32 %v3711_v27, %v3126_v16  ;;  %v8225_v8 = vmul.f32 0.125, %v3548_v35  ;;  %v8228_v33 = vmul.f32 0.125, %v3572_v56  ;;  %v3101_v35 = vld [vmem:[%s7442_s17 + $0x240] sm:$0xff] }
 0x1bd   : > { %v3620_v31 = vadd.f32 %v3619_v13, %v3618_v54  ;;  %v3665_v37 = vrot.slane %v3664_v10, 2  ;;  %v8230_v22 = vmul.f32 0.125, %v3596_v19  ;;  %v3689_v4 = vrot.slane %v3688_v34, 2  ;;  %v3105_v46 = vld [vmem:[%s7442_s17 + $0x260] sm:$0xff] }
 0x1be   : > { %11057 = vst [vmem:[#allocation94_spill] sm:$0xff] %v8225_v8  ;;  %11058 = vst [vmem:[#allocation95_spill] sm:$0xff] %v8228_v33  ;;  %v3643_v21 = vrot.slane %v3642_v51, 1  ;;  %v3713_v14 = vrot.slane %v3712_v26, 2  ;;  %v4792_v59 = vsel %vm1938_vm3, %v8225_v8, %v8223_v42  ;;  %v3513_v40 = vrot.slane %v3093_v43, 4  ;;  %v3109_v42 = vld [vmem:[%s7442_s17 + $0x280] sm:$0xff] }
 0x1bf   : > { %11059 = vst [vmem:[#allocation96_spill] sm:$0xff] %v8230_v22  ;;  %v3666_v48 = vadd.f32 %v3665_v37, %v3664_v10  ;;  %v8236_v27 = vmul.f32 0.125, %v3620_v31  ;;  %v4793_v16 = vsel %vm1940_vm4, %v8228_v33, %v4792_v59  ;;  %v3690_v57 = vadd.f32 %v3689_v4, %v3688_v34 }
 0x1c0   : > { %v3644_v0 = vadd.f32 %v3643_v21, %v3642_v51  ;;  %v3714_v54 = vadd.f32 %v3713_v14, %v3712_v26  ;;  %v4794_v38 = vsel %vm1942_vm5, %v8230_v22, %v4793_v16  ;;  %v3514_v13 = vadd.f32 %v3513_v40, %v3093_v43 }
 0x1c1   : > { %11060 = vst [vmem:[#allocation97_spill] sm:$0xff] %v8236_v27  ;;  %v3667_v56 = vrot.slane %v3666_v48, 1  ;;  %v4795_v19 = vsel %vm1944_vm6, %v8236_v27, %v4794_v38  ;;  %v3537_v10 = vrot.slane %v3097_v36, 4  ;;  %v3691_v31 = vrot.slane %v3690_v57, 1 }
 0x1c2   : > { %v3715_v37 = vrot.slane %v3714_v54, 1  ;;  %v8246_v8 = vmul.f32 0.125, %v3644_v0  ;;  %v3561_v59 = vrot.slane %v3101_v35, 4  ;;  %v3515_v51 = vrot.slane %v3514_v13, 2 }
 0x1c3   : > { %v3668_v33 = vadd.f32 %v3667_v56, %v3666_v48  ;;  %v3538_v34 = vadd.f32 %v3537_v10, %v3097_v36  ;;  %v3585_v26 = vrot.slane %v3105_v46, 4  ;;  %v3692_v21 = vadd.f32 %v3691_v31, %v3690_v57  ;;  %v3117_v31 = vld [vmem:[%s7442_s17 + $0x2c0] sm:$0xff] }
 0x1c4   : > { %11061 = vst [vmem:[#allocation98_spill] sm:$0xff] %v8246_v8  ;;  %v3716_v4 = vadd.f32 %v3715_v37, %v3714_v54  ;;  %v4796_v14 = vsel %vm1946_vm7, %v8246_v8, %v4795_v19  ;;  %v3562_v16 = vadd.f32 %v3561_v59, %v3101_v35  ;;  %v3516_v40 = vadd.f32 %v3515_v51, %v3514_v13  ;;  %v3113_v54 = vld [vmem:[%s7442_s17 + $0x2a0] sm:$0xff] }
 0x1c5   : > { %v8251_v43 = vmul.f32 0.125, %v3668_v33  ;;  %v3539_v0 = vrot.slane %v3538_v34, 2  ;;  %v3586_v38 = vadd.f32 %v3585_v26, %v3105_v46  ;;  %v8253_v48 = vmul.f32 0.125, %v3692_v21  ;;  %v3121_v37 = vld [vmem:[%s7442_s17 + $0x2e0] sm:$0xff] }
 0x1c6   : > { %v8255_v56 = vmul.f32 0.125, %v3716_v4  ;;  %v3563_v36 = vrot.slane %v3562_v16, 2  ;;  %v3609_v10 = vrot.slane %v3109_v42, 4  ;;  %v3517_v19 = vrot.slane %v3516_v40, 1  ;;  %v3125_v59 = vld [vmem:[%s7442_s17 + $0x300] sm:$0xff] }
 0x1c7   : > { %11062 = vst [vmem:[#allocation99_spill] sm:$0xff] %v8251_v43  ;;  %11063 = vst [vmem:[#allocation100_spill] sm:$0xff] %v8253_v48  ;;  %v4797_v57 = vsel %vm1948_vm8, %v8251_v43, %v4796_v14  ;;  %v3540_v35 = vadd.f32 %v3539_v0, %v3538_v34  ;;  %v3587_v33 = vrot.slane %v3586_v38, 2  ;;  %v8263_v13 = vmul.f32 %v8167_v29, %v8167_v29 }
 0x1c8   : > { %v4798_v46 = vsel %vm1950_vm9, %v8253_v48, %v4797_v57  ;;  %v3564_v51 = vadd.f32 %v3563_v36, %v3562_v16  ;;  %v3610_v26 = vadd.f32 %v3609_v10, %v3109_v42  ;;  %v3518_v4 = vadd.f32 %v3517_v19, %v3516_v40 }
 0x1c9   : > { %11064 = vst [vmem:[#allocation101_spill] sm:$0xff] %v8263_v13  ;;  %v6873_v21 = vpack.c.bf16 %v8255_v56, %v4798_v46  ;;  %v3541_v14 = vrot.slane %v3540_v35, 1  ;;  %v3588_v43 = vadd.f32 %v3587_v33, %v3586_v38  ;;  %v3633_v34 = vrot.slane %v3113_v54, 4 }
 0x1ca   : > { %v3565_v8 = vrot.slane %v3564_v51, 1  ;;  %v3611_v27 = vrot.slane %v3610_v26, 2  ;;  %v3657_v0 = vrot.slane %v3117_v31, 4  ;;  %v3681_v13 = vrot.slane %v3121_v37, 4 }
 0x1cb   : > { %6874 = vmatprep.subr.bf16.mxu1 %v6873_v21  ;;  %v3542_v22 = vadd.f32 %v3541_v14, %v3540_v35  ;;  %v3589_v29 = vrot.slane %v3588_v43, 1  ;;  %v3705_v53 = vrot.slane %v3125_v59, 4  ;;  %v3634_v18 = vadd.f32 %v3633_v34, %v3113_v54  ;;  %v1219_v35 = vld [vmem:[%s7436_s16 + $0x8] sm:$0xff] }
 0x1cc   : > { %v3566_v57 = vadd.f32 %v3565_v8, %v3564_v51  ;;  %v3612_v48 = vadd.f32 %v3611_v27, %v3610_v26  ;;  %v3658_v16 = vadd.f32 %v3657_v0, %v3117_v31  ;;  %v3682_v36 = vadd.f32 %v3681_v13, %v3121_v37  ;;  %v1223_v31 = vld [vmem:[%s7436_s16 + $0x28] sm:$0xff] }
 0x1cd   : > { %v3590_v42 = vadd.f32 %v3589_v29, %v3588_v43  ;;  %v3706_v40 = vadd.f32 %v3705_v53, %v3125_v59  ;;  %v8270_v10 = vmul.f32 0.125, %v3518_v4  ;;  %v3635_v19 = vrot.slane %v3634_v18, 2  ;;  %v1227_v59 = vld [vmem:[%s7436_s16 + $0x48] sm:$0xff] }
 0x1ce   : > { %v3613_v38 = vrot.slane %v3612_v48, 1  ;;  %v3659_v33 = vrot.slane %v3658_v16, 2  ;;  %v8272_v46 = vmul.f32 0.125, %v3542_v22  ;;  %v3683_v21 = vrot.slane %v3682_v36, 2  ;;  %v1231_v29 = vld [vmem:[%s7436_s16 + $0x68] sm:$0xff] }
 0x1cf   : > { %11065 = vst [vmem:[#allocation102_spill] sm:$0xff] %v8270_v10  ;;  %v3707_v14 = vrot.slane %v3706_v40, 2  ;;  %v8275_v28 = vmul.f32 0.125, %v3566_v57  ;;  %v8277_v8 = vmul.f32 0.125, %v3590_v42  ;;  %v3636_v43 = vadd.f32 %v3635_v19, %v3634_v18 }
 0x1d0   : > { %11066 = vst [vmem:[#allocation103_spill] sm:$0xff] %v8272_v46  ;;  %v3614_v27 = vadd.f32 %v3613_v38, %v3612_v48  ;;  %v3660_v54 = vadd.f32 %v3659_v33, %v3658_v16  ;;  %v4785_v53 = vsel %vm1938_vm3, %v8272_v46, %v8270_v10  ;;  %v3684_v13 = vadd.f32 %v3683_v21, %v3682_v36  ;;  %v1235_v21 = vld [vmem:[%s7436_s16 + $0x88] sm:$0xff]  ;;  %v464_v10 = vld [vmem:[%s7429_s21 + $0x178] sm:$0xff] }
 0x1d1   : > { %11067 = vst [vmem:[#allocation104_spill] sm:$0xff] %v8275_v28  ;;  %11068 = vst [vmem:[#allocation105_spill] sm:$0xff] %v8277_v8  ;;  %v3708_v37 = vadd.f32 %v3707_v14, %v3706_v40  ;;  %v4786_v22 = vsel %vm1940_vm4, %v8275_v28, %v4785_v53  ;;  %v1304_v51 = vrot.slane %v1219_v35, 4  ;;  %v3637_v26 = vrot.slane %v3636_v43, 1 }
 0x1d2   : > { %v3661_v4 = vrot.slane %v3660_v54, 1  ;;  %v8286_v34 = vmul.f32 0.125, %v3614_v27  ;;  %v4787_v18 = vsel %vm1942_vm5, %v8277_v8, %v4786_v22  ;;  %v3685_v48 = vrot.slane %v3684_v13, 1 }
 0x1d3   : > { %v3709_v0 = vrot.slane %v3708_v37, 1  ;;  %v1305_v57 = vadd.f32 %v1304_v51, %v1219_v35  ;;  %v1328_v16 = vrot.slane %v1223_v31, 4  ;;  %v3638_v42 = vadd.f32 %v3637_v26, %v3636_v43 }
 0x1d4   : > { %11069 = vst [vmem:[#allocation106_spill] sm:$0xff] %v8286_v34  ;;  %v3662_v36 = vadd.f32 %v3661_v4, %v3660_v54  ;;  %v4788_v40 = vsel %vm1944_vm6, %v8286_v34, %v4787_v18  ;;  %v1352_v38 = vrot.slane %v1227_v59, 4  ;;  %v3686_v19 = vadd.f32 %v3685_v48, %v3684_v13 }
 0x1d5   : > { %v3710_v33 = vadd.f32 %v3709_v0, %v3708_v37  ;;  %v1306_v14 = vrot.slane %v1305_v57, 2  ;;  %v1329_v27 = vadd.f32 %v1328_v16, %v1223_v31  ;;  %v8294_v53 = vmul.f32 0.125, %v3638_v42  ;;  %v1239_v37 = vld [vmem:[%s7436_s16 + $0xa8] sm:$0xff] }
 0x1d6   : > { %v8296_v22 = vmul.f32 0.125, %v3662_v36  ;;  %v1353_v8 = vadd.f32 %v1352_v38, %v1227_v59  ;;  %v1376_v35 = vrot.slane %v1231_v29, 4  ;;  %v8298_v43 = vmul.f32 0.125, %v3686_v19  ;;  %v1243_v0 = vld [vmem:[%s7436_s16 + $0xc8] sm:$0xff] }
 0x1d7   : > { %11070 = vst [vmem:[#allocation107_spill] sm:$0xff] %v8294_v53  ;;  %v3825_v54 = vmul.f32 0.125, %v3710_v33  ;;  %v1307_v51 = vadd.f32 %v1306_v14, %v1305_v57  ;;  %v1330_v26 = vrot.slane %v1329_v27, 2  ;;  %v4789_v13 = vsel %vm1946_vm7, %v8294_v53, %v4788_v40  ;;  %v1247_v36 = vld [vmem:[%s7436_s16 + $0xe8] sm:$0xff] }
 0x1d8   : > { %11071 = vst [vmem:[#allocation108_spill] sm:$0xff] %v8296_v22  ;;  %11072 = vst [vmem:[#allocation109_spill] sm:$0xff] %v8298_v43  ;;  %v1354_v4 = vrot.slane %v1353_v8, 2  ;;  %v1377_v18 = vadd.f32 %v1376_v35, %v1231_v29  ;;  %v1400_v31 = vrot.slane %v1235_v21, 4  ;;  %v8305_v48 = vmul.f32 %v8211_v32, %v8211_v32 }
 0x1d9   : > { %v4790_v59 = vsel %vm1948_vm8, %v8296_v22, %v4789_v13  ;;  %v1308_v16 = vrot.slane %v1307_v51, 1  ;;  %v1331_v42 = vadd.f32 %v1330_v26, %v1329_v27  ;;  %v1424_v35 = vrot.slane %v1239_v37, 4 }
 0x1da   : > { %11073 = vst [vmem:[#allocation110_spill] sm:$0xff] %v8305_v48  ;;  %v4791_v57 = vsel %vm1950_vm9, %v8298_v43, %v4790_v59  ;;  %v1355_v38 = vadd.f32 %v1354_v4, %v1353_v8  ;;  %v1378_v40 = vrot.slane %v1377_v18, 2  ;;  %v1401_v19 = vadd.f32 %v1400_v31, %v1235_v21 }
 0x1db   : > { %v6875_v33 = vpack.c.bf16 %v3825_v54, %v4791_v57  ;;  %v1309_v29 = vadd.f32 %v1308_v16, %v1307_v51  ;;  %v1332_v14 = vrot.slane %v1331_v42, 1  ;;  %v1448_v34 = vrot.slane %v1243_v0, 4 }
 0x1dc   : > { %v1356_v53 = vrot.slane %v1355_v38, 1  ;;  %v1379_v32 = vadd.f32 %v1378_v40, %v1377_v18  ;;  %v1402_v48 = vrot.slane %v1401_v19, 2  ;;  %v1425_v22 = vadd.f32 %v1424_v35, %v1239_v37  ;;  %v420_v37 = vld [vmem:[%s7429_s21 + $0x18] sm:$0xff] }
 0x1dd   : > { %6876 = vmatpush1.bf16.xpose.msra.mxu1 %v6875_v33  ;;  %v1333_v13 = vadd.f32 %v1332_v14, %v1331_v42  ;;  %v1472_v27 = vrot.slane %v1247_v36, 4  ;;  %v1779_v26 = vmul.f32 0.125, %v1309_v29  ;;  %v1449_v8 = vadd.f32 %v1448_v34, %v1243_v0 }
 0x1de   : > { %v1357_v28 = vadd.f32 %v1356_v53, %v1355_v38  ;;  %v1380_v59 = vrot.slane %v1379_v32, 1  ;;  %v1403_v43 = vadd.f32 %v1402_v48, %v1401_v19  ;;  %v8315_v21 = vmul.f32 %v8255_v56, %v8255_v56  ;;  %v424_v19 = vld [vmem:[%s7429_s21 + $0x38] sm:$0xff] }
 0x1df   : > { %v1426_v51 = vrot.slane %v1425_v22, 2  ;;  %v1473_v4 = vadd.f32 %v1472_v27, %v1247_v36  ;;  %v1783_v18 = vmul.f32 0.125, %v1333_v13  ;;  %v1450_v42 = vrot.slane %v1449_v8, 2 }
 0x1e0   : > { %11074 = vst [vmem:[#allocation111_spill] sm:$0xff] %v8315_v21  ;;  %v1381_v31 = vadd.f32 %v1380_v59, %v1379_v32  ;;  %v1404_v16 = vrot.slane %v1403_v43, 1  ;;  %v1787_v57 = vmul.f32 0.125, %v1357_v28  ;;  %v8318_v40 = vmul.f32 %v3825_v54, %v3825_v54  ;;  %v428_v28 = vld [vmem:[%s7429_s21 + $0x58] sm:$0xff] }
 0x1e1   : > { %v1427_v53 = vadd.f32 %v1426_v51, %v1425_v22  ;;  %v1474_v38 = vrot.slane %v1473_v4, 2  ;;  %v1952_v34 = vsel %vm1938_vm3, %v1783_v18, %v1779_v26  ;;  %v1451_v56 = vadd.f32 %v1450_v42, %v1449_v8  ;;  %v432_v59 = vld [vmem:[%s7429_s21 + $0x78] sm:$0xff] }
 0x1e2   : > { %11075 = vst [vmem:[#allocation112_spill] sm:$0xff] %v8318_v40  ;;  %v1405_v48 = vadd.f32 %v1404_v16, %v1403_v43  ;;  %v1791_v0 = vmul.f32 0.125, %v1381_v31  ;;  %v1953_v36 = vsel %vm1940_vm4, %v1787_v57, %v1952_v34  ;;  %v8323_v14 = vmul.f32 %v1779_v26, %v1779_v26  ;;  %v436_v8 = vld [vmem:[%s7429_s21 + $0x98] sm:$0xff] }
 0x1e3   : > { %v1428_v33 = vrot.slane %v1427_v53, 1  ;;  %v1475_v29 = vadd.f32 %v1474_v38, %v1473_v4  ;;  %v535_v35 = vrot.slane %v420_v37, 4  ;;  %v1452_v54 = vrot.slane %v1451_v56, 1  ;;  %v460_v40 = vld [vmem:[%s7429_s21 + $0x158] sm:$0xff] }
 0x1e4   : > { %11076 = vst [vmem:[#allocation113_spill] sm:$0xff] %v8323_v14  ;;  %v1795_v32 = vmul.f32 0.125, %v1405_v48  ;;  %v1954_v22 = vsel %vm1942_vm5, %v1791_v0, %v1953_v36  ;;  %v8327_v13 = vmul.f32 %v1783_v18, %v1783_v18  ;;  %v559_v31 = vrot.slane %v424_v19, 4 }
 0x1e5   : > { %v1429_v43 = vadd.f32 %v1428_v33, %v1427_v53  ;;  %v1476_v27 = vrot.slane %v1475_v29, 1  ;;  %v536_v51 = vadd.f32 %v535_v35, %v420_v37  ;;  %v1453_v16 = vadd.f32 %v1452_v54, %v1451_v56 }
 0x1e6   : > { %11077 = vst [vmem:[#allocation114_spill] sm:$0xff] %v8327_v13  ;;  %v1955_v4 = vsel %vm1944_vm6, %v1795_v32, %v1954_v22  ;;  %v8332_v26 = vmul.f32 %v1787_v57, %v1787_v57  ;;  %v583_v42 = vrot.slane %v428_v28, 4  ;;  %v560_v18 = vadd.f32 %v559_v31, %v424_v19  ;;  %v440_v57 = vld [vmem:[%s7429_s21 + $0xb8] sm:$0xff] }
 0x1e7   : > { %v1477_v38 = vadd.f32 %v1476_v27, %v1475_v29  ;;  %v1799_v34 = vmul.f32 0.125, %v1429_v43  ;;  %v537_v48 = vrot.slane %v536_v51, 2  ;;  %v8334_v36 = vmul.f32 0.125, %v1453_v16  ;;  %v444_v19 = vld [vmem:[%s7429_s21 + $0xd8] sm:$0xff] }
 0x1e8   : > { %11078 = vst [vmem:[#allocation115_spill] sm:$0xff] %v8332_v26  ;;  %v584_v53 = vadd.f32 %v583_v42, %v428_v28  ;;  %v607_v33 = vrot.slane %v432_v59, 4  ;;  %v631_v13 = vrot.slane %v436_v8, 4  ;;  %v8339_v35 = vmul.f32 %v1791_v0, %v1791_v0  ;;  %v448_v43 = vld [vmem:[%s7429_s21 + $0xf8] sm:$0xff] }
 0x1e9   : > { %v8336_v37 = vmul.f32 0.125, %v1477_v38  ;;  %v1956_v56 = vsel %vm1946_vm7, %v1799_v34, %v1955_v4  ;;  %v538_v54 = vadd.f32 %v537_v48, %v536_v51  ;;  %v8344_v22 = vmul.f32 %v1795_v32, %v1795_v32  ;;  %v452_v51 = vld [vmem:[%s7429_s21 + $0x118] sm:$0xff] }
 0x1ea   : > { %11079 = vst [vmem:[#allocation116_spill] sm:$0xff] %v8339_v35  ;;  %v1957_v29 = vsel %vm1948_vm8, %v8334_v36, %v1956_v56  ;;  %v561_v27 = vrot.slane %v560_v18, 2  ;;  %v585_v28 = vrot.slane %v584_v53, 2  ;;  %v8350_v16 = vmul.f32 %v1799_v34, %v1799_v34 }
 0x1eb   : > { %11080 = vst [vmem:[#allocation117_spill] sm:$0xff] %v8344_v22  ;;  %v1958_v31 = vsel %vm1950_vm9, %v8336_v37, %v1957_v29  ;;  %v539_v42 = vrot.slane %v538_v54, 1  ;;  %v608_v0 = vadd.f32 %v607_v33, %v432_v59  ;;  %v632_v48 = vadd.f32 %v631_v13, %v436_v8 }
 0x1ec   : > { %11081 = vst [vmem:[#allocation118_spill] sm:$0xff] %v8350_v16  ;;  %2289 = vmatprep.mubr.f32.mxu0 %v1958_v31  ;;  %v562_v4 = vadd.f32 %v561_v27, %v560_v18  ;;  %v586_v38 = vadd.f32 %v585_v28, %v584_v53  ;;  %v655_v32 = vrot.slane %v440_v57, 4  ;;  %v679_v35 = vrot.slane %v444_v19, 4  ;;  %v456_v16 = vld [vmem:[%s7429_s21 + $0x138] sm:$0xff] }
 0x1ed   : > { %v8353_v56 = vadd.f32 %v539_v42, %v538_v54  ;;  %v609_v22 = vrot.slane %v608_v0, 2  ;;  %v703_v26 = vrot.slane %v448_v43, 4  ;;  %v633_v29 = vrot.slane %v632_v48, 2 }
 0x1ee   : > { %v563_v14 = vrot.slane %v562_v4, 1  ;;  %v587_v21 = vrot.slane %v586_v38, 1  ;;  %v656_v34 = vadd.f32 %v655_v32, %v440_v57  ;;  %v680_v33 = vadd.f32 %v679_v35, %v444_v19  ;;  %v468_v35 = vld [vmem:[%s7429_s21 + $0x198] sm:$0xff] }
 0x1ef   : > { %v610_v59 = vadd.f32 %v609_v22, %v608_v0  ;;  %v704_v31 = vadd.f32 %v703_v26, %v448_v43  ;;  %v727_v18 = vrot.slane %v452_v51, 4  ;;  %v634_v8 = vadd.f32 %v633_v29, %v632_v48 }
 0x1f0   : > { %v564_v53 = vadd.f32 %v563_v14, %v562_v4  ;;  %v588_v13 = vadd.f32 %v587_v21, %v586_v38  ;;  %v657_v54 = vrot.slane %v656_v34, 2  ;;  %v681_v28 = vrot.slane %v680_v33, 2  ;;  %v472_v38 = vld [vmem:[%s7429_s21 + $0x1b8] sm:$0xff] }
 0x1f1   : > { %v611_v27 = vrot.slane %v610_v59, 1  ;;  %v705_v42 = vrot.slane %v704_v31, 2  ;;  %v728_v46 = vadd.f32 %v727_v18, %v452_v51  ;;  %v635_v52 = vrot.slane %v634_v8, 1 }
 0x1f2   : > { %v658_v6 = vadd.f32 %v657_v54, %v656_v34  ;;  %v751_v57 = vrot.slane %v456_v16, 4  ;;  %v775_v32 = vrot.slane %v460_v40, 4  ;;  %v682_v26 = vadd.f32 %v681_v28, %v680_v33  ;;  %v480_v34 = vld [vmem:[%s7429_s21 + $0x1f8] sm:$0xff] }
 0x1f3   : > { %v612_v22 = vadd.f32 %v611_v27, %v610_v59  ;;  %v706_v19 = vadd.f32 %v705_v42, %v704_v31  ;;  %v729_v14 = vrot.slane %v728_v46, 2  ;;  %v636_v21 = vadd.f32 %v635_v52, %v634_v8 }
 0x1f4   : > { %v659_v43 = vrot.slane %v658_v6, 1  ;;  %v752_v0 = vadd.f32 %v751_v57, %v456_v16  ;;  %v776_v4 = vadd.f32 %v775_v32, %v460_v40  ;;  %v683_v48 = vrot.slane %v682_v26, 1 }
 0x1f5   : > { %v707_v29 = vrot.slane %v706_v19, 1  ;;  %v730_v51 = vadd.f32 %v729_v14, %v728_v46  ;;  %v799_v18 = vrot.slane %v464_v10, 4  ;;  %v823_v20 = vrot.slane %v468_v35, 4 }
 0x1f6   : > { %v660_v54 = vadd.f32 %v659_v43, %v658_v6  ;;  %v753_v7 = vrot.slane %v752_v0, 2  ;;  %v777_v1 = vrot.slane %v776_v4, 2  ;;  %v684_v58 = vadd.f32 %v683_v48, %v682_v26 }
 0x1f7   : > { %v708_v59 = vadd.f32 %v707_v29, %v706_v19  ;;  %v731_v33 = vrot.slane %v730_v51, 1  ;;  %v800_v31 = vadd.f32 %v799_v18, %v464_v10  ;;  %v824_v8 = vadd.f32 %v823_v20, %v468_v35 }
 0x1f8   : > { %v754_v27 = vadd.f32 %v753_v7, %v752_v0  ;;  %v778_v52 = vadd.f32 %v777_v1, %v776_v4  ;;  %v847_v16 = vrot.slane %v472_v38, 4  ;;  %v871_v42 = vrot.slane %v476_v24, 4 }
 0x1f9   : > { %v732_v40 = vadd.f32 %v731_v33, %v730_v51  ;;  %v801_v28 = vrot.slane %v800_v31, 2  ;;  %v895_v57 = vrot.slane %v480_v34, 4  ;;  %v825_v14 = vrot.slane %v824_v8, 2 }
 0x1fa   : > { %v755_v46 = vrot.slane %v754_v27, 1  ;;  %v779_v32 = vrot.slane %v778_v52, 1  ;;  %v848_v11 = vadd.f32 %v847_v16, %v472_v38  ;;  %v872_v43 = vadd.f32 %v871_v42, %v476_v24 }
 0x1fb   : > { %v802_v6 = vadd.f32 %v801_v28, %v800_v31  ;;  %v896_v3 = vadd.f32 %v895_v57, %v480_v34  ;;  %v8363_v26 = vmul.f32 0.125, %v8353_v56  ;;  %v826_v7 = vadd.f32 %v825_v14, %v824_v8  ;;  %v1222_v57 = vld [vmem:[%s7436_s16 + $0x20] sm:$0xff] }
 0x1fc   : > { %v756_v19 = vadd.f32 %v755_v46, %v754_v27  ;;  %v780_v10 = vadd.f32 %v779_v32, %v778_v52  ;;  %v849_v1 = vrot.slane %v848_v11, 2  ;;  %v873_v35 = vrot.slane %v872_v43, 2  ;;  %v1226_v14 = vld [vmem:[%s7436_s16 + $0x40] sm:$0xff] }
 0x1fd   : > { %v803_v20 = vrot.slane %v802_v6, 1  ;;  %v897_v0 = vrot.slane %v896_v3, 2  ;;  %v8365_v4 = vmul.f32 0.125, %v564_v53  ;;  %v827_v48 = vrot.slane %v826_v7, 1 }
 0x1fe   : > { %v850_v29 = vadd.f32 %v849_v1, %v848_v11  ;;  %v8367_v51 = vmul.f32 0.125, %v588_v13  ;;  %v8369_v38 = vmul.f32 0.125, %v612_v22  ;;  %v874_v18 = vadd.f32 %v873_v35, %v872_v43  ;;  %v1218_v22 = vld [vmem:[%s7436_s16] sm:$0xff] }
 0x1ff   : > { %v804_v24 = vadd.f32 %v803_v20, %v802_v6  ;;  %v898_v56 = vadd.f32 %v897_v0, %v896_v3  ;;  %v8371_v34 = vmul.f32 0.125, %v636_v21  ;;  %v828_v33 = vadd.f32 %v827_v48, %v826_v7  ;;  %v1230_v6 = vld [vmem:[%s7436_s16 + $0x60] sm:$0xff] }
 0x200   : > { %v851_v31 = vrot.slane %v850_v29, 1  ;;  %v8373_v27 = vmul.f32 0.125, %v660_v54  ;;  %v8375_v52 = vmul.f32 0.125, %v684_v58  ;;  %v875_v53 = vrot.slane %v874_v18, 1 }
 0x201   : > { %v899_v8 = vrot.slane %v898_v56, 1  ;;  %v8377_v11 = vmul.f32 0.125, %v708_v59  ;;  %v8379_v13 = vmul.f32 0.125, %v732_v40  ;;  %v8382_v3 = vmul.f32 0.125, %v756_v19 }
 0x202   : > { %v852_v16 = vadd.f32 %v851_v31, %v850_v29  ;;  %v8384_v21 = vmul.f32 0.125, %v780_v10  ;;  %v8386_v28 = vmul.f32 0.125, %v804_v24  ;;  %v876_v54 = vadd.f32 %v875_v53, %v874_v18  ;;  %v1234_v18 = vld [vmem:[%s7436_s16 + $0x80] sm:$0xff] }
 0x203   : > { %11082 = vst [vmem:[#allocation119_spill] sm:$0xff] %v8379_v13  ;;  %11083 = vst [vmem:[#allocation120_spill] sm:$0xff] %v8382_v3  ;;  %v900_v42 = vadd.f32 %v899_v8, %v898_v56  ;;  %v8388_v58 = vmul.f32 0.125, %v828_v33  ;;  %v2146_v59 = vsel %vm1938_vm3, %v8365_v4, %v8363_v26  ;;  %v2174_v32 = vsel %vm1938_vm3, %v8382_v3, %v8379_v13  ;;  %v1238_v8 = vld [vmem:[%s7436_s16 + $0xa0] sm:$0xff] }
 0x204   : > { %11084 = vst [vmem:[#allocation121_spill] sm:$0xff] %v8384_v21  ;;  %11085 = vst [vmem:[#allocation122_spill] sm:$0xff] %v8386_v28  ;;  %v8394_v46 = vmul.f32 0.125, %v852_v16  ;;  %v2147_v40 = vsel %vm1940_vm4, %v8367_v51, %v2146_v59  ;;  %v1298_v43 = vrot.slane %v1218_v22, 4  ;;  %v8403_v19 = vmul.f32 0.125, %v876_v54  ;;  %v1242_v59 = vld [vmem:[%s7436_s16 + $0xc0] sm:$0xff] }
 0x205   : > { %11086 = vst [vmem:[#allocation123_spill] sm:$0xff] %v8388_v58  ;;  %v8405_v10 = vmul.f32 0.125, %v900_v42  ;;  %v2148_v7 = vsel %vm1942_vm5, %v8369_v38, %v2147_v40  ;;  %v2175_v1 = vsel %vm1940_vm4, %v8384_v21, %v2174_v32  ;;  %v1322_v48 = vrot.slane %v1222_v57, 4 }
 0x206   : > { %11087 = vst [vmem:[#allocation124_spill] sm:$0xff] %v8394_v46  ;;  %11088 = vst [vmem:[#allocation125_spill] sm:$0xff] %v8403_v19  ;;  %v2149_v20 = vsel %vm1944_vm6, %v8371_v34, %v2148_v7  ;;  %v2176_v35 = vsel %vm1942_vm5, %v8386_v28, %v2175_v1  ;;  %v1299_v0 = vadd.f32 %v1298_v43, %v1218_v22  ;;  %v1346_v56 = vrot.slane %v1226_v14, 4  ;;  %v1246_v7 = vld [vmem:[%s7436_s16 + $0xe0] sm:$0xff] }
 0x207   : > { %11089 = vst [vmem:[#allocation126_spill] sm:$0xff] %v8405_v10  ;;  %v2150_v29 = vsel %vm1946_vm7, %v8373_v27, %v2149_v20  ;;  %v2177_v24 = vsel %vm1944_vm6, %v8388_v58, %v2176_v35  ;;  %v1370_v33 = vrot.slane %v1230_v6, 4  ;;  %v1323_v22 = vadd.f32 %v1322_v48, %v1222_v57 }
 0x208   : > { %v2151_v31 = vsel %vm1948_vm8, %v8375_v52, %v2150_v29  ;;  %v2178_v53 = vsel %vm1946_vm7, %v8394_v46, %v2177_v24  ;;  %v1300_v16 = vrot.slane %v1299_v0, 2  ;;  %v1347_v40 = vadd.f32 %v1346_v56, %v1226_v14 }
 0x209   : > { %v2152_v54 = vsel %vm1950_vm9, %v8377_v11, %v2151_v31  ;;  %v2179_v42 = vsel %vm1948_vm8, %v8403_v19, %v2178_v53  ;;  %v1371_v32 = vadd.f32 %v1370_v33, %v1230_v6  ;;  %v1324_v20 = vrot.slane %v1323_v22, 2 }
 0x20a   : > { %v2180_v43 = vsel %vm1950_vm9, %v8405_v10, %v2179_v42  ;;  %v1301_v1 = vadd.f32 %v1300_v16, %v1299_v0  ;;  %v1394_v35 = vrot.slane %v1234_v18, 4  ;;  %v1348_v24 = vrot.slane %v1347_v40, 2 }
 0x20b   : > { %v6861_v29 = vpack.c.bf16 %v2180_v43, %v2152_v54  ;;  %v1372_v50 = vrot.slane %v1371_v32, 2  ;;  %v1418_v57 = vrot.slane %v1238_v8, 4  ;;  %v1325_v12 = vadd.f32 %v1324_v20, %v1323_v22 }
 0x20c   : > { %v1302_v48 = vrot.slane %v1301_v1, 1  ;;  %v1395_v31 = vadd.f32 %v1394_v35, %v1234_v18  ;;  %v1442_v17 = vrot.slane %v1242_v59, 4  ;;  %v1349_v53 = vadd.f32 %v1348_v24, %v1347_v40  ;;  %v419_v24 = vld [vmem:[%s7429_s21 + $0x10] sm:$0xff] }
 0x20d   : > { %6862 = vmatprep.subr.bf16.mxu0 %v6861_v29  ;;  %v1373_v45 = vadd.f32 %v1372_v50, %v1371_v32  ;;  %v1419_v14 = vadd.f32 %v1418_v57, %v1238_v8  ;;  %v1466_v6 = vrot.slane %v1246_v7, 4  ;;  %v1326_v33 = vrot.slane %v1325_v12, 1  ;;  %v423_v57 = vld [vmem:[%s7429_s21 + $0x30] sm:$0xff] }
 0x20e   : > { %v1303_v56 = vadd.f32 %v1302_v48, %v1301_v1  ;;  %v1396_v42 = vrot.slane %v1395_v31, 2  ;;  %v1443_v44 = vadd.f32 %v1442_v17, %v1242_v59  ;;  %v1350_v0 = vrot.slane %v1349_v53, 1 }
 0x20f   : > { %v1374_v16 = vrot.slane %v1373_v45, 1  ;;  %v1420_v10 = vrot.slane %v1419_v14, 2  ;;  %v1467_v54 = vadd.f32 %v1466_v6, %v1246_v7  ;;  %v1327_v43 = vadd.f32 %v1326_v33, %v1325_v12 }
 0x210   : > { %v1397_v19 = vadd.f32 %v1396_v42, %v1395_v31  ;;  %v1444_v46 = vrot.slane %v1443_v44, 2  ;;  %v1778_v58 = vmul.f32 0.125, %v1303_v56  ;;  %v1351_v22 = vadd.f32 %v1350_v0, %v1349_v53  ;;  %v427_v31 = vld [vmem:[%s7429_s21 + $0x50] sm:$0xff] }
 0x211   : > { %v1375_v18 = vadd.f32 %v1374_v16, %v1373_v45  ;;  %v1421_v40 = vadd.f32 %v1420_v10, %v1419_v14  ;;  %v1468_v50 = vrot.slane %v1467_v54, 2  ;;  %v8435_v8 = vmul.f32 %v8334_v36, %v8334_v36 }
 0x212   : > { %v1398_v32 = vrot.slane %v1397_v19, 1  ;;  %v1445_v17 = vadd.f32 %v1444_v46, %v1443_v44  ;;  %v1782_v59 = vmul.f32 0.125, %v1327_v43  ;;  %v1786_v12 = vmul.f32 0.125, %v1351_v22 }
 0x213   : > { %11090 = vst [vmem:[#allocation127_spill] sm:$0xff] %v8435_v8  ;;  %v1422_v1 = vrot.slane %v1421_v40, 1  ;;  %v1469_v7 = vadd.f32 %v1468_v50, %v1467_v54  ;;  %v1790_v20 = vmul.f32 0.125, %v1375_v18  ;;  %v8439_v35 = vmul.f32 %v8336_v37, %v8336_v37  ;;  %v431_v54 = vld [vmem:[%s7429_s21 + $0x70] sm:$0xff] }
 0x214   : > { %v1399_v45 = vadd.f32 %v1398_v32, %v1397_v19  ;;  %v1446_v29 = vrot.slane %v1445_v17, 1  ;;  %v1939_v10 = vsel %vm1938_vm3, %v1782_v59, %v1778_v58  ;;  %v8445_v46 = vmul.f32 %v1778_v58, %v1778_v58  ;;  %v435_v50 = vld [vmem:[%s7429_s21 + $0x90] sm:$0xff] }
 0x215   : > { %11091 = vst [vmem:[#allocation128_spill] sm:$0xff] %v8439_v35  ;;  %v1423_v36 = vadd.f32 %v1422_v1, %v1421_v40  ;;  %v1470_v48 = vrot.slane %v1469_v7, 1  ;;  %v1941_v44 = vsel %vm1940_vm4, %v1786_v12, %v1939_v10  ;;  %v8449_v19 = vmul.f32 %v1782_v59, %v1782_v59  ;;  %v439_v32 = vld [vmem:[%s7429_s21 + $0xb0] sm:$0xff] }
 0x216   : > { %11092 = vst [vmem:[#allocation129_spill] sm:$0xff] %v8445_v46  ;;  %v1447_v53 = vadd.f32 %v1446_v29, %v1445_v17  ;;  %v1794_v14 = vmul.f32 0.125, %v1399_v45  ;;  %v1943_v37 = vsel %vm1942_vm5, %v1790_v20, %v1941_v44  ;;  %v529_v33 = vrot.slane %v419_v24, 4  ;;  %v447_v45 = vld [vmem:[%s7429_s21 + $0xf0] sm:$0xff] }
 0x217   : > { %11093 = vst [vmem:[#allocation130_spill] sm:$0xff] %v8449_v19  ;;  %v1471_v6 = vadd.f32 %v1470_v48, %v1469_v7  ;;  %v1798_v56 = vmul.f32 0.125, %v1423_v36  ;;  %v553_v42 = vrot.slane %v423_v57, 4  ;;  %v8454_v16 = vmul.f32 %v1786_v12, %v1786_v12  ;;  %v443_v7 = vld [vmem:[%s7429_s21 + $0xd0] sm:$0xff] }
 0x218   : > { %v8451_v0 = vmul.f32 0.125, %v1447_v53  ;;  %v1945_v58 = vsel %vm1944_vm6, %v1794_v14, %v1943_v37  ;;  %v577_v43 = vrot.slane %v427_v31, 4  ;;  %v8460_v40 = vmul.f32 %v1790_v20, %v1790_v20 }
 0x219   : > { %11094 = vst [vmem:[#allocation131_spill] sm:$0xff] %v8454_v16  ;;  %v8457_v22 = vmul.f32 0.125, %v1471_v6  ;;  %v1947_v18 = vsel %vm1946_vm7, %v1798_v56, %v1945_v58  ;;  %v530_v17 = vadd.f32 %v529_v33, %v419_v24  ;;  %v8466_v1 = vmul.f32 %v1794_v14, %v1794_v14 }
 0x21a   : > { %11095 = vst [vmem:[#allocation132_spill] sm:$0xff] %v8460_v40  ;;  %v1949_v59 = vsel %vm1948_vm8, %v8451_v0, %v1947_v18  ;;  %v554_v12 = vadd.f32 %v553_v42, %v423_v57  ;;  %v578_v29 = vadd.f32 %v577_v43, %v427_v31  ;;  %v8472_v36 = vmul.f32 %v1798_v56, %v1798_v56 }
 0x21b   : > { %11096 = vst [vmem:[#allocation133_spill] sm:$0xff] %v8466_v1  ;;  %v1951_v10 = vsel %vm1950_vm9, %v8457_v22, %v1949_v59  ;;  %v531_v48 = vrot.slane %v530_v17, 2  ;;  %v601_v20 = vrot.slane %v431_v54, 4  ;;  %v625_v53 = vrot.slane %v435_v50, 4 }
 0x21c   : > { %11097 = vst [vmem:[#allocation134_spill] sm:$0xff] %v8472_v36  ;;  %2290 = vmatmul.mubr.f32.vlgmr.msra.gmra.mrb[0].mxu0 %v1951_v10  ;;  %v555_v44 = vrot.slane %v554_v12, 2  ;;  %v579_v24 = vrot.slane %v578_v29, 2  ;;  %v649_v37 = vrot.slane %v439_v32, 4  ;;  %v673_v33 = vrot.slane %v443_v7, 4  ;;  %v451_v10 = vld [vmem:[%s7429_s21 + $0x110] sm:$0xff] }
 0x21d   : > { %v532_v6 = vadd.f32 %v531_v48, %v530_v17  ;;  %v602_v14 = vadd.f32 %v601_v20, %v431_v54  ;;  %v697_v57 = vrot.slane %v447_v45, 4  ;;  %v626_v58 = vadd.f32 %v625_v53, %v435_v50  ;;  %v455_v17 = vld [vmem:[%s7429_s21 + $0x130] sm:$0xff] }
 0x21e   : > { %v556_v31 = vadd.f32 %v555_v44, %v554_v12  ;;  %v580_v42 = vadd.f32 %v579_v24, %v578_v29  ;;  %v650_v43 = vadd.f32 %v649_v37, %v439_v32  ;;  %v674_v59 = vadd.f32 %v673_v33, %v443_v7  ;;  %v459_v54 = vld [vmem:[%s7429_s21 + $0x150] sm:$0xff] }
 0x21f   : > { %v533_v56 = vrot.slane %v532_v6, 1  ;;  %v603_v18 = vrot.slane %v602_v14, 2  ;;  %v698_v35 = vadd.f32 %v697_v57, %v447_v45  ;;  %v627_v1 = vrot.slane %v626_v58, 2  ;;  %v463_v33 = vld [vmem:[%s7429_s21 + $0x170] sm:$0xff] }
 0x220   : > { %v557_v8 = vrot.slane %v556_v31, 1  ;;  %v581_v36 = vrot.slane %v580_v42, 1  ;;  %v651_v40 = vrot.slane %v650_v43, 2  ;;  %v675_v12 = vrot.slane %v674_v59, 2 }
 0x221   : > { %v8477_v48 = vadd.f32 %v533_v56, %v532_v6  ;;  %v604_v20 = vadd.f32 %v603_v18, %v602_v14  ;;  %v699_v50 = vrot.slane %v698_v35, 2  ;;  %v628_v44 = vadd.f32 %v627_v1, %v626_v58  ;;  %v467_v14 = vld [vmem:[%s7429_s21 + $0x190] sm:$0xff] }
 0x222   : > { %v558_v32 = vadd.f32 %v557_v8, %v556_v31  ;;  %v582_v29 = vadd.f32 %v581_v36, %v580_v42  ;;  %v652_v7 = vadd.f32 %v651_v40, %v650_v43  ;;  %v676_v24 = vadd.f32 %v675_v12, %v674_v59  ;;  %v471_v18 = vld [vmem:[%s7429_s21 + $0x1b0] sm:$0xff] }
 0x223   : > { %v605_v45 = vrot.slane %v604_v20, 1  ;;  %v700_v53 = vadd.f32 %v699_v50, %v698_v35  ;;  %v721_v37 = vrot.slane %v451_v10, 4  ;;  %v629_v57 = vrot.slane %v628_v44, 1  ;;  %v475_v36 = vld [vmem:[%s7429_s21 + $0x1d0] sm:$0xff] }
 0x224   : > { %v653_v16 = vrot.slane %v652_v7, 1  ;;  %v745_v6 = vrot.slane %v455_v17, 4  ;;  %v769_v56 = vrot.slane %v459_v54, 4  ;;  %v677_v46 = vrot.slane %v676_v24, 1  ;;  %v479_v1 = vld [vmem:[%s7429_s21 + $0x1f0] sm:$0xff] }
 0x225   : > { %v606_v19 = vadd.f32 %v605_v45, %v604_v20  ;;  %v701_v28 = vrot.slane %v700_v53, 1  ;;  %v722_v8 = vadd.f32 %v721_v37, %v451_v10  ;;  %v630_v40 = vadd.f32 %v629_v57, %v628_v44 }
 0x226   : > { %v654_v31 = vadd.f32 %v653_v16, %v652_v7  ;;  %v746_v42 = vadd.f32 %v745_v6, %v455_v17  ;;  %v770_v58 = vadd.f32 %v769_v56, %v459_v54  ;;  %v678_v43 = vadd.f32 %v677_v46, %v676_v24 }
 0x227   : > { %v702_v35 = vadd.f32 %v701_v28, %v700_v53  ;;  %v723_v59 = vrot.slane %v722_v8, 2  ;;  %v793_v12 = vrot.slane %v463_v33, 4  ;;  %v817_v3 = vrot.slane %v467_v14, 4 }
 0x228   : > { %v747_v50 = vrot.slane %v746_v42, 2  ;;  %v771_v21 = vrot.slane %v770_v58, 2  ;;  %v841_v13 = vrot.slane %v471_v18, 4  ;;  %v865_v20 = vrot.slane %v475_v36, 4 }
 0x229   : > { %v724_v9 = vadd.f32 %v723_v59, %v722_v8  ;;  %v794_v39 = vadd.f32 %v793_v12, %v463_v33  ;;  %v889_v45 = vrot.slane %v479_v1, 4  ;;  %v818_v37 = vadd.f32 %v817_v3, %v467_v14 }
 0x22a   : > { %v748_v55 = vadd.f32 %v747_v50, %v746_v42  ;;  %v772_v10 = vadd.f32 %v771_v21, %v770_v58  ;;  %v842_v23 = vadd.f32 %v841_v13, %v471_v18  ;;  %v866_v17 = vadd.f32 %v865_v20, %v475_v36 }
 0x22b   : > { %v725_v44 = vrot.slane %v724_v9, 1  ;;  %v795_v16 = vrot.slane %v794_v39, 2  ;;  %v890_v54 = vadd.f32 %v889_v45, %v479_v1  ;;  %v819_v7 = vrot.slane %v818_v37, 2 }
 0x22c   : > { %v749_v46 = vrot.slane %v748_v55, 1  ;;  %v773_v28 = vrot.slane %v772_v10, 1  ;;  %v843_v24 = vrot.slane %v842_v23, 2  ;;  %v867_v6 = vrot.slane %v866_v17, 2 }
 0x22d   : > { %v726_v53 = vadd.f32 %v725_v44, %v724_v9  ;;  %v796_v57 = vadd.f32 %v795_v16, %v794_v39  ;;  %v891_v56 = vrot.slane %v890_v54, 2  ;;  %v820_v59 = vadd.f32 %v819_v7, %v818_v37  ;;  %v3834_v44 = vld [vmem:[%s7444_s27 + $0x28] sm:$0xff] }
 0x22e   : > { %v750_v8 = vadd.f32 %v749_v46, %v748_v55  ;;  %v774_v33 = vadd.f32 %v773_v28, %v772_v10  ;;  %v844_v12 = vadd.f32 %v843_v24, %v842_v23  ;;  %v868_v21 = vadd.f32 %v867_v6, %v866_v17  ;;  %v3842_v46 = vld [vmem:[%s7444_s27 + $0x68] sm:$0xff] }
 0x22f   : > { %v797_v42 = vrot.slane %v796_v57, 1  ;;  %v892_v3 = vadd.f32 %v891_v56, %v890_v54  ;;  %v8485_v13 = vmul.f32 0.125, %v8477_v48  ;;  %v821_v14 = vrot.slane %v820_v59, 1 }
 0x230   : > { %v845_v18 = vrot.slane %v844_v12, 1  ;;  %v8487_v36 = vmul.f32 0.125, %v558_v32  ;;  %v8489_v9 = vmul.f32 0.125, %v582_v29  ;;  %v869_v1 = vrot.slane %v868_v21, 1  ;;  %v3830_v29 = vld [vmem:[%s7444_s27 + $0x8] sm:$0xff] }
 0x231   : > { %v798_v39 = vadd.f32 %v797_v42, %v796_v57  ;;  %v893_v55 = vrot.slane %v892_v3, 1  ;;  %v8491_v58 = vmul.f32 0.125, %v606_v19  ;;  %v822_v23 = vadd.f32 %v821_v14, %v820_v59 }
 0x232   : > { %v846_v50 = vadd.f32 %v845_v18, %v844_v12  ;;  %v8493_v20 = vmul.f32 0.125, %v630_v40  ;;  %v8495_v48 = vmul.f32 0.125, %v654_v31  ;;  %v870_v45 = vadd.f32 %v869_v1, %v868_v21  ;;  %v3838_v40 = vld [vmem:[%s7444_s27 + $0x48] sm:$0xff] }
 0x233   : > { %v894_v10 = vadd.f32 %v893_v55, %v892_v3  ;;  %v8497_v37 = vmul.f32 0.125, %v678_v43  ;;  %v8499_v32 = vmul.f32 0.125, %v702_v35  ;;  %v8503_v16 = vmul.f32 0.125, %v726_v53 }
 0x234   : > { %v8505_v17 = vmul.f32 0.125, %v750_v8  ;;  %v8507_v19 = vmul.f32 0.125, %v774_v33  ;;  %v8509_v54 = vmul.f32 0.125, %v798_v39  ;;  %v8513_v31 = vmul.f32 0.125, %v822_v23  ;;  %v3846_v23 = vld [vmem:[%s7444_s27 + $0x88] sm:$0xff] }
 0x235   : > { %11098 = vst [vmem:[#allocation135_spill] sm:$0xff] %v8503_v16  ;;  %v8515_v28 = vmul.f32 0.125, %v846_v50  ;;  %v8517_v43 = vmul.f32 0.125, %v870_v45  ;;  %v8519_v35 = vmul.f32 0.125, %v894_v10  ;;  %v2139_v7 = vsel %vm1938_vm3, %v8487_v36, %v8485_v13 }
 0x236   : > { %11099 = vst [vmem:[#allocation136_spill] sm:$0xff] %v8505_v17  ;;  %11100 = vst [vmem:[#allocation137_spill] sm:$0xff] %v8507_v19  ;;  %v2167_v24 = vsel %vm1938_vm3, %v8505_v17, %v8503_v16  ;;  %v3915_v53 = vrot.slane %v3830_v29, 4  ;;  %v3939_v57 = vrot.slane %v3834_v44, 4  ;;  %v2140_v6 = vsel %vm1940_vm4, %v8489_v9, %v2139_v7  ;;  %v3854_v7 = vld [vmem:[%s7444_s27 + $0xc8] sm:$0xff] }
 0x237   : > { %11101 = vst [vmem:[#allocation138_spill] sm:$0xff] %v8509_v54  ;;  %11102 = vst [vmem:[#allocation139_spill] sm:$0xff] %v8513_v31  ;;  %v2168_v56 = vsel %vm1940_vm4, %v8507_v19, %v2167_v24  ;;  %v3963_v8 = vrot.slane %v3838_v40, 4  ;;  %v3987_v33 = vrot.slane %v3842_v46, 4  ;;  %v2141_v59 = vsel %vm1942_vm5, %v8491_v58, %v2140_v6 }
 0x238   : > { %11103 = vst [vmem:[#allocation140_spill] sm:$0xff] %v8515_v28  ;;  %11104 = vst [vmem:[#allocation141_spill] sm:$0xff] %v8517_v43  ;;  %v2169_v12 = vsel %vm1942_vm5, %v8509_v54, %v2168_v56  ;;  %v3916_v42 = vadd.f32 %v3915_v53, %v3830_v29  ;;  %v3940_v21 = vadd.f32 %v3939_v57, %v3834_v44  ;;  %v3850_v44 = vld [vmem:[%s7444_s27 + $0xa8] sm:$0xff] }
 0x239   : > { %11105 = vst [vmem:[#allocation142_spill] sm:$0xff] %v8519_v35  ;;  %v2142_v3 = vsel %vm1944_vm6, %v8493_v20, %v2141_v59  ;;  %v2170_v14 = vsel %vm1944_vm6, %v8513_v31, %v2169_v12  ;;  %v3964_v18 = vadd.f32 %v3963_v8, %v3838_v40  ;;  %v3988_v39 = vadd.f32 %v3987_v33, %v3842_v46  ;;  %v3858_v57 = vld [vmem:[%s7444_s27 + $0xe8] sm:$0xff] }
 0x23a   : > { %v2143_v1 = vsel %vm1946_vm7, %v8495_v48, %v2142_v3  ;;  %v2171_v55 = vsel %vm1946_vm7, %v8515_v28, %v2170_v14  ;;  %v3917_v50 = vrot.slane %v3916_v42, 2  ;;  %v3941_v45 = vrot.slane %v3940_v21, 2 }
 0x23b   : > { %v2144_v10 = vsel %vm1948_vm8, %v8497_v37, %v2143_v1  ;;  %v2172_v29 = vsel %vm1948_vm8, %v8517_v43, %v2171_v55  ;;  %v3965_v24 = vrot.slane %v3964_v18, 2  ;;  %v3989_v40 = vrot.slane %v3988_v39, 2 }
 0x23c   : > { %v2145_v46 = vsel %vm1950_vm9, %v8499_v32, %v2144_v10  ;;  %v2173_v53 = vsel %vm1950_vm9, %v8519_v35, %v2172_v29  ;;  %v3918_v6 = vadd.f32 %v3917_v50, %v3916_v42  ;;  %v3942_v56 = vadd.f32 %v3941_v45, %v3940_v21 }
 0x23d   : > { %v6863_v8 = vpack.c.bf16 %v2173_v53, %v2145_v46  ;;  %v3966_v33 = vadd.f32 %v3965_v24, %v3964_v18  ;;  %v3990_v59 = vadd.f32 %v3989_v40, %v3988_v39  ;;  %v4011_v12 = vrot.slane %v3846_v23, 4 }
 0x23e   : > { %v3919_v3 = vrot.slane %v3918_v6, 1  ;;  %v3943_v14 = vrot.slane %v3942_v56, 1  ;;  %v4035_v1 = vrot.slane %v3850_v44, 4  ;;  %v4059_v55 = vrot.slane %v3854_v7, 4 }
 0x23f   : > { %6864 = vmatpush1.bf16.xpose.msra.mxu0 %v6863_v8  ;;  %v3967_v43 = vrot.slane %v3966_v33, 1  ;;  %v3991_v28 = vrot.slane %v3990_v59, 1  ;;  %v4012_v31 = vadd.f32 %v4011_v12, %v3846_v23  ;;  %v4083_v54 = vrot.slane %v3858_v57, 4 }
 0x240   : > { %v3920_v10 = vadd.f32 %v3919_v3, %v3918_v6  ;;  %v3944_v19 = vadd.f32 %v3943_v14, %v3942_v56  ;;  %v4036_v17 = vadd.f32 %v4035_v1, %v3850_v44  ;;  %v4060_v29 = vadd.f32 %v4059_v55, %v3854_v7  ;;  %v3040_v56 = vld [vmem:[%s7442_s17 + $0x58] sm:$0xff] }
 0x241   : > { %v3968_v35 = vadd.f32 %v3967_v43, %v3966_v33  ;;  %v3992_v42 = vadd.f32 %v3991_v28, %v3990_v59  ;;  %v4013_v21 = vrot.slane %v4012_v31, 2  ;;  %v4084_v18 = vadd.f32 %v4083_v54, %v3858_v57  ;;  %v3032_v54 = vld [vmem:[%s7442_s17 + $0x18] sm:$0xff] }
 0x242   : > { %v4037_v39 = vrot.slane %v4036_v17, 2  ;;  %v4061_v50 = vrot.slane %v4060_v29, 2  ;;  %v4390_v45 = vmul.f32 0.125, %v3920_v10  ;;  %v4394_v24 = vmul.f32 0.125, %v3944_v19 }
 0x243   : > { %v4014_v40 = vadd.f32 %v4013_v21, %v4012_v31  ;;  %v4085_v46 = vrot.slane %v4084_v18, 2  ;;  %v4398_v53 = vmul.f32 0.125, %v3968_v35  ;;  %v4402_v23 = vmul.f32 0.125, %v3992_v42  ;;  %v3036_v35 = vld [vmem:[%s7442_s17 + $0x38] sm:$0xff] }
 0x244   : > { %v8557_v44 = vmul.f32 %v8451_v0, %v8451_v0  ;;  %v4038_v43 = vadd.f32 %v4037_v39, %v4036_v17  ;;  %v4062_v7 = vadd.f32 %v4061_v50, %v4060_v29  ;;  %v4556_v28 = vsel %vm1938_vm3, %v4394_v24, %v4390_v45  ;;  %v3044_v17 = vld [vmem:[%s7442_s17 + $0x78] sm:$0xff] }
 0x245   : > { %v8563_v57 = vmul.f32 %v8457_v22, %v8457_v22  ;;  %v4015_v6 = vrot.slane %v4014_v40, 1  ;;  %v4086_v19 = vadd.f32 %v4085_v46, %v4084_v18  ;;  %v4557_v31 = vsel %vm1940_vm4, %v4398_v53, %v4556_v28 }
 0x246   : > { %11106 = vst [vmem:[#allocation143_spill] sm:$0xff] %v8557_v44  ;;  %v4039_v8 = vrot.slane %v4038_v43, 1  ;;  %v4063_v33 = vrot.slane %v4062_v7, 1  ;;  %v8568_v59 = vmul.f32 %v4390_v45, %v4390_v45  ;;  %v8570_v0 = vmul.f32 %v4394_v24, %v4394_v24 }
 0x247   : > { %11107 = vst [vmem:[#allocation144_spill] sm:$0xff] %v8563_v57  ;;  %v4016_v12 = vadd.f32 %v4015_v6, %v4014_v40  ;;  %v4087_v3 = vrot.slane %v4086_v19, 1  ;;  %v4558_v14 = vsel %vm1942_vm5, %v4402_v23, %v4557_v31  ;;  %v3147_v1 = vrot.slane %v3032_v54, 4 }
 0x248   : > { %11108 = vst [vmem:[#allocation145_spill] sm:$0xff] %v8568_v59  ;;  %11109 = vst [vmem:[#allocation146_spill] sm:$0xff] %v8570_v0  ;;  %v4040_v22 = vadd.f32 %v4039_v8, %v4038_v43  ;;  %v4064_v55 = vadd.f32 %v4063_v33, %v4062_v7  ;;  %v3171_v10 = vrot.slane %v3036_v35, 4  ;;  %v3195_v29 = vrot.slane %v3040_v56, 4  ;;  %v3048_v7 = vld [vmem:[%s7442_s17 + $0x98] sm:$0xff] }
 0x249   : > { %v4088_v42 = vadd.f32 %v4087_v3, %v4086_v19  ;;  %v4406_v21 = vmul.f32 0.125, %v4016_v12  ;;  %v3148_v18 = vadd.f32 %v3147_v1, %v3032_v54  ;;  %v3219_v39 = vrot.slane %v3044_v17, 4  ;;  %v3052_v8 = vld [vmem:[%s7442_s17 + $0xb8] sm:$0xff] }
 0x24a   : > { %v4410_v50 = vmul.f32 0.125, %v4040_v22  ;;  %v8574_v45 = vmul.f32 0.125, %v4064_v55  ;;  %v3172_v24 = vadd.f32 %v3171_v10, %v3036_v35  ;;  %v3196_v40 = vadd.f32 %v3195_v29, %v3040_v56  ;;  %v3056_v33 = vld [vmem:[%s7442_s17 + $0xd8] sm:$0xff] }
 0x24b   : > { %v8576_v46 = vmul.f32 0.125, %v4088_v42  ;;  %v4559_v28 = vsel %vm1944_vm6, %v4406_v21, %v4558_v14  ;;  %v8579_v43 = vmul.f32 %v4398_v53, %v4398_v53  ;;  %v3149_v6 = vrot.slane %v3148_v18, 2  ;;  %v3060_v3 = vld [vmem:[%s7442_s17 + $0xf8] sm:$0xff] }
 0x24c   : > { %v4560_v19 = vsel %vm1946_vm7, %v4410_v50, %v4559_v28  ;;  %v8583_v31 = vmul.f32 %v4402_v23, %v4402_v23  ;;  %v8585_v54 = vmul.f32 %v4406_v21, %v4406_v21  ;;  %v3173_v12 = vrot.slane %v3172_v24, 2  ;;  %v3064_v28 = vld [vmem:[%s7442_s17 + $0x118] sm:$0xff] }
 0x24d   : > { %11110 = vst [vmem:[#allocation147_spill] sm:$0xff] %v8579_v43  ;;  %v4561_v35 = vsel %vm1948_vm8, %v8574_v45, %v4560_v19  ;;  %v8591_v56 = vmul.f32 %v4410_v50, %v4410_v50  ;;  %v3150_v53 = vadd.f32 %v3149_v6, %v3148_v18  ;;  %v3197_v14 = vrot.slane %v3196_v40, 2  ;;  %v3068_v18 = vld [vmem:[%s7442_s17 + $0x138] sm:$0xff] }
 0x24e   : > { %11111 = vst [vmem:[#allocation148_spill] sm:$0xff] %v8583_v31  ;;  %11112 = vst [vmem:[#allocation149_spill] sm:$0xff] %v8585_v54  ;;  %v4562_v1 = vsel %vm1950_vm9, %v8576_v46, %v4561_v35  ;;  %v3174_v23 = vadd.f32 %v3173_v12, %v3172_v24  ;;  %v3220_v22 = vadd.f32 %v3219_v39, %v3044_v17  ;;  %v3243_v55 = vrot.slane %v3048_v7, 4  ;;  %v3072_v17 = vld [vmem:[%s7442_s17 + $0x158] sm:$0xff] }
 0x24f   : > { %11113 = vst [vmem:[#allocation150_spill] sm:$0xff] %v8591_v56  ;;  %4893 = vmatprep.mubr.f32.mxu1 %v4562_v1  ;;  %v3151_v10 = vrot.slane %v3150_v53, 1  ;;  %v3198_v29 = vadd.f32 %v3197_v14, %v3196_v40  ;;  %v3267_v42 = vrot.slane %v3052_v8, 4  ;;  %v3291_v21 = vrot.slane %v3056_v33, 4 }
 0x250   : > { %v3175_v19 = vrot.slane %v3174_v23, 1  ;;  %v3221_v50 = vrot.slane %v3220_v22, 2  ;;  %v3244_v56 = vadd.f32 %v3243_v55, %v3048_v7  ;;  %v3315_v54 = vrot.slane %v3060_v3, 4 }
 0x251   : > { %v8598_v6 = vadd.f32 %v3151_v10, %v3150_v53  ;;  %v3199_v31 = vrot.slane %v3198_v29, 1  ;;  %v3268_v35 = vadd.f32 %v3267_v42, %v3052_v8  ;;  %v3292_v24 = vadd.f32 %v3291_v21, %v3056_v33  ;;  %v3076_v8 = vld [vmem:[%s7442_s17 + $0x178] sm:$0xff] }
 0x252   : > { %v8601_v39 = vadd.f32 %v3175_v19, %v3174_v23  ;;  %v3222_v12 = vadd.f32 %v3221_v50, %v3220_v22  ;;  %v3245_v1 = vrot.slane %v3244_v56, 2  ;;  %v3316_v40 = vadd.f32 %v3315_v54, %v3060_v3 }
 0x253   : > { %v8603_v14 = vadd.f32 %v3199_v31, %v3198_v29  ;;  %v3269_v43 = vrot.slane %v3268_v35, 2  ;;  %v3293_v0 = vrot.slane %v3292_v24, 2  ;;  %v3339_v7 = vrot.slane %v3064_v28, 4  ;;  %v3080_v29 = vld [vmem:[%s7442_s17 + $0x198] sm:$0xff] }
 0x254   : > { %v3223_v55 = vrot.slane %v3222_v12, 1  ;;  %v3246_v59 = vadd.f32 %v3245_v1, %v3244_v56  ;;  %v3317_v53 = vrot.slane %v3316_v40, 2  ;;  %v3363_v10 = vrot.slane %v3068_v18, 4  ;;  %v3084_v56 = vld [vmem:[%s7442_s17 + $0x1b8] sm:$0xff] }
 0x255   : > { %v3270_v33 = vadd.f32 %v3269_v43, %v3268_v35  ;;  %v3294_v42 = vadd.f32 %v3293_v0, %v3292_v24  ;;  %v3340_v23 = vadd.f32 %v3339_v7, %v3064_v28  ;;  %v3387_v21 = vrot.slane %v3072_v17, 4  ;;  %v3088_v1 = vld [vmem:[%s7442_s17 + $0x1d8] sm:$0xff] }
 0x256   : > { %v3224_v22 = vadd.f32 %v3223_v55, %v3222_v12  ;;  %v3247_v54 = vrot.slane %v3246_v59, 1  ;;  %v3318_v31 = vadd.f32 %v3317_v53, %v3316_v40  ;;  %v3364_v3 = vadd.f32 %v3363_v10, %v3068_v18  ;;  %v3092_v43 = vld [vmem:[%s7442_s17 + $0x1f8] sm:$0xff] }
 0x257   : > { %v3271_v19 = vrot.slane %v3270_v33, 1  ;;  %v3295_v50 = vrot.slane %v3294_v42, 1  ;;  %v3341_v57 = vrot.slane %v3340_v23, 2  ;;  %v3388_v44 = vadd.f32 %v3387_v21, %v3072_v17 }
 0x258   : > { %v3248_v16 = vadd.f32 %v3247_v54, %v3246_v59  ;;  %v3319_v25 = vrot.slane %v3318_v31, 1  ;;  %v3365_v60 = vrot.slane %v3364_v3, 2  ;;  %v3411_v49 = vrot.slane %v3076_v8, 4 }
 0x259   : > { %v3272_v0 = vadd.f32 %v3271_v19, %v3270_v33  ;;  %v3296_v28 = vadd.f32 %v3295_v50, %v3294_v42  ;;  %v3342_v35 = vadd.f32 %v3341_v57, %v3340_v23  ;;  %v3389_v24 = vrot.slane %v3388_v44, 2 }
 0x25a   : > { %v3320_v12 = vadd.f32 %v3319_v25, %v3318_v31  ;;  %v3366_v7 = vadd.f32 %v3365_v60, %v3364_v3  ;;  %v3412_v40 = vadd.f32 %v3411_v49, %v3076_v8  ;;  %v3435_v18 = vrot.slane %v3080_v29, 4 }
 0x25b   : > { %v3343_v55 = vrot.slane %v3342_v35, 1  ;;  %v3390_v53 = vadd.f32 %v3389_v24, %v3388_v44  ;;  %v3459_v10 = vrot.slane %v3084_v56, 4  ;;  %v3483_v5 = vrot.slane %v3088_v1, 4 }
 0x25c   : > { %v3367_v17 = vrot.slane %v3366_v7, 1  ;;  %v3413_v21 = vrot.slane %v3412_v40, 2  ;;  %v3436_v2 = vadd.f32 %v3435_v18, %v3080_v29  ;;  %v3507_v59 = vrot.slane %v3092_v43, 4 }
 0x25d   : > { %v3344_v54 = vadd.f32 %v3343_v55, %v3342_v35  ;;  %v3391_v41 = vrot.slane %v3390_v53, 1  ;;  %v3460_v62 = vadd.f32 %v3459_v10, %v3084_v56  ;;  %v3484_v63 = vadd.f32 %v3483_v5, %v3088_v1  ;;  %v3829_v55 = vld [vmem:[%s7444_s27] sm:$0xff] }
 0x25e   : > { %v3368_v33 = vadd.f32 %v3367_v17, %v3366_v7  ;;  %v3414_v42 = vadd.f32 %v3413_v21, %v3412_v40  ;;  %v3437_v57 = vrot.slane %v3436_v2, 2  ;;  %v3508_v23 = vadd.f32 %v3507_v59, %v3092_v43  ;;  %v3837_v17 = vld [vmem:[%s7444_s27 + $0x40] sm:$0xff] }
 0x25f   : > { %v3392_v25 = vadd.f32 %v3391_v41, %v3390_v53  ;;  %v3461_v60 = vrot.slane %v3460_v62, 2  ;;  %v3485_v49 = vrot.slane %v3484_v63, 2  ;;  %v8611_v8 = vmul.f32 0.125, %v8598_v6 }
 0x260   : > { %v3415_v44 = vrot.slane %v3414_v42, 1  ;;  %v3438_v31 = vadd.f32 %v3437_v57, %v3436_v2  ;;  %v3509_v3 = vrot.slane %v3508_v23, 2  ;;  %v8614_v29 = vmul.f32 0.125, %v8601_v39 }
 0x261   : > { %11114 = vst [vmem:[#allocation151_spill] sm:$0xff] %v8611_v8  ;;  %v3462_v19 = vadd.f32 %v3461_v60, %v3460_v62  ;;  %v3486_v50 = vadd.f32 %v3485_v49, %v3484_v63  ;;  %v8617_v5 = vmul.f32 0.125, %v8603_v14  ;;  %v8619_v56 = vmul.f32 0.125, %v3224_v22 }
 0x262   : > { %11115 = vst [vmem:[#allocation152_spill] sm:$0xff] %v8614_v29  ;;  %v3416_v1 = vadd.f32 %v3415_v44, %v3414_v42  ;;  %v3439_v41 = vrot.slane %v3438_v31, 1  ;;  %v3510_v43 = vadd.f32 %v3509_v3, %v3508_v23  ;;  %v8621_v35 = vmul.f32 0.125, %v3248_v16  ;;  %v3841_v42 = vld [vmem:[%s7444_s27 + $0x60] sm:$0xff] }
 0x263   : > { %11116 = vst [vmem:[#allocation153_spill] sm:$0xff] %v8617_v5  ;;  %11117 = vst [vmem:[#allocation154_spill] sm:$0xff] %v8619_v56  ;;  %v3463_v6 = vrot.slane %v3462_v19, 1  ;;  %v3487_v24 = vrot.slane %v3486_v50, 1  ;;  %v8623_v2 = vmul.f32 0.125, %v3272_v0  ;;  %v8625_v39 = vmul.f32 0.125, %v3296_v28 }
 0x264   : > { %11118 = vst [vmem:[#allocation155_spill] sm:$0xff] %v8621_v35  ;;  %v3440_v62 = vadd.f32 %v3439_v41, %v3438_v31  ;;  %v3511_v63 = vrot.slane %v3510_v43, 1  ;;  %v8627_v14 = vmul.f32 0.125, %v3320_v12  ;;  %v8629_v22 = vmul.f32 0.125, %v3344_v54  ;;  %v3833_v12 = vld [vmem:[%s7444_s27 + $0x20] sm:$0xff] }
 0x265   : > { %11119 = vst [vmem:[#allocation156_spill] sm:$0xff] %v8623_v2  ;;  %11120 = vst [vmem:[#allocation157_spill] sm:$0xff] %v8625_v39  ;;  %v3464_v7 = vadd.f32 %v3463_v6, %v3462_v19  ;;  %v3488_v40 = vadd.f32 %v3487_v24, %v3486_v50  ;;  %v8631_v18 = vmul.f32 0.125, %v3368_v33  ;;  %v8633_v16 = vmul.f32 0.125, %v3392_v25 }
 0x266   : > { %11121 = vst [vmem:[#allocation158_spill] sm:$0xff] %v8627_v14  ;;  %11122 = vst [vmem:[#allocation159_spill] sm:$0xff] %v8629_v22  ;;  %v3512_v53 = vadd.f32 %v3511_v63, %v3510_v43  ;;  %v8636_v0 = vmul.f32 0.125, %v3416_v1  ;;  %v8638_v10 = vmul.f32 0.125, %v3440_v62  ;;  %v4750_v28 = vsel %vm1938_vm3, %v8614_v29, %v8611_v8  ;;  %v3845_v1 = vld [vmem:[%s7444_s27 + $0x80] sm:$0xff] }
 0x267   : > { %11123 = vst [vmem:[#allocation160_spill] sm:$0xff] %v8631_v18  ;;  %11124 = vst [vmem:[#allocation161_spill] sm:$0xff] %v8633_v16  ;;  %v8645_v21 = vmul.f32 0.125, %v3464_v7  ;;  %v8647_v59 = vmul.f32 0.125, %v3488_v40  ;;  %v4751_v54 = vsel %vm1940_vm4, %v8617_v5, %v4750_v28  ;;  %v4778_v33 = vsel %vm1938_vm3, %v8631_v18, %v8629_v22  ;;  %v3849_v62 = vld [vmem:[%s7444_s27 + $0xa0] sm:$0xff] }
 0x268   : > { %11125 = vst [vmem:[#allocation162_spill] sm:$0xff] %v8636_v0  ;;  %11126 = vst [vmem:[#allocation163_spill] sm:$0xff] %v8638_v10  ;;  %v8655_v57 = vmul.f32 0.125, %v3512_v53  ;;  %v4752_v23 = vsel %vm1942_vm5, %v8619_v56, %v4751_v54  ;;  %v4779_v25 = vsel %vm1940_vm4, %v8633_v16, %v4778_v33  ;;  %v3909_v60 = vrot.slane %v3829_v55, 4  ;;  %v3853_v28 = vld [vmem:[%s7444_s27 + $0xc0] sm:$0xff] }
 0x269   : > { %11127 = vst [vmem:[#allocation164_spill] sm:$0xff] %v8645_v21  ;;  %11128 = vst [vmem:[#allocation165_spill] sm:$0xff] %v8647_v59  ;;  %v4753_v49 = vsel %vm1944_vm6, %v8621_v35, %v4752_v23  ;;  %v4780_v44 = vsel %vm1942_vm5, %v8636_v0, %v4779_v25  ;;  %v3933_v31 = vrot.slane %v3833_v12, 4  ;;  %v3957_v3 = vrot.slane %v3837_v17, 4  ;;  %v3857_v23 = vld [vmem:[%s7444_s27 + $0xe0] sm:$0xff] }
 0x26a   : > { %11129 = vst [vmem:[#allocation166_spill] sm:$0xff] %v8655_v57  ;;  %v4754_v19 = vsel %vm1946_vm7, %v8623_v2, %v4753_v49  ;;  %v4781_v50 = vsel %vm1944_vm6, %v8638_v10, %v4780_v44  ;;  %v3910_v41 = vadd.f32 %v3909_v60, %v3829_v55  ;;  %v3981_v43 = vrot.slane %v3841_v42, 4 }
 0x26b   : > { %v4755_v6 = vsel %vm1948_vm8, %v8625_v39, %v4754_v19  ;;  %v4782_v24 = vsel %vm1946_vm7, %v8645_v21, %v4781_v50  ;;  %v3934_v63 = vadd.f32 %v3933_v31, %v3833_v12  ;;  %v3958_v7 = vadd.f32 %v3957_v3, %v3837_v17 }
 0x26c   : > { %v4756_v40 = vsel %vm1950_vm9, %v8627_v14, %v4755_v6  ;;  %v4783_v53 = vsel %vm1948_vm8, %v8647_v59, %v4782_v24  ;;  %v3911_v54 = vrot.slane %v3910_v41, 2  ;;  %v3982_v33 = vadd.f32 %v3981_v43, %v3841_v42 }
 0x26d   : > { %v4784_v55 = vsel %vm1950_vm9, %v8655_v57, %v4783_v53  ;;  %v3935_v25 = vrot.slane %v3934_v63, 2  ;;  %v3959_v60 = vrot.slane %v3958_v7, 2  ;;  %v4005_v49 = vrot.slane %v3845_v1, 4 }
 0x26e   : > { %v6877_v44 = vpack.c.bf16 %v4784_v55, %v4756_v40  ;;  %v3912_v19 = vadd.f32 %v3911_v54, %v3910_v41  ;;  %v3983_v12 = vrot.slane %v3982_v33, 2  ;;  %v4029_v17 = vrot.slane %v3849_v62, 4 }
 0x26f   : > { %v3936_v31 = vadd.f32 %v3935_v25, %v3934_v63  ;;  %v3960_v3 = vadd.f32 %v3959_v60, %v3958_v7  ;;  %v4006_v50 = vadd.f32 %v4005_v49, %v3845_v1  ;;  %v4053_v6 = vrot.slane %v3853_v28, 4 }
 0x270   : > { %6878 = vmatprep.subr.bf16.mxu1 %v6877_v44  ;;  %v3913_v24 = vrot.slane %v3912_v19, 1  ;;  %v3984_v59 = vadd.f32 %v3983_v12, %v3982_v33  ;;  %v4030_v21 = vadd.f32 %v4029_v17, %v3849_v62  ;;  %v4077_v42 = vrot.slane %v3857_v23, 4 }
 0x271   : > { %v3937_v43 = vrot.slane %v3936_v31, 1  ;;  %v3961_v10 = vrot.slane %v3960_v3, 1  ;;  %v4007_v53 = vrot.slane %v4006_v50, 2  ;;  %v4054_v57 = vadd.f32 %v4053_v6, %v3853_v28 }
 0x272   : > { %v3914_v0 = vadd.f32 %v3913_v24, %v3912_v19  ;;  %v3985_v16 = vrot.slane %v3984_v59, 1  ;;  %v4031_v18 = vrot.slane %v4030_v21, 2  ;;  %v4078_v40 = vadd.f32 %v4077_v42, %v3857_v23 }
 0x273   : > { %v3938_v41 = vadd.f32 %v3937_v43, %v3936_v31  ;;  %v3962_v54 = vadd.f32 %v3961_v10, %v3960_v3  ;;  %v4008_v55 = vadd.f32 %v4007_v53, %v4006_v50  ;;  %v4055_v63 = vrot.slane %v4054_v57, 2  ;;  %v3039_v3 = vld [vmem:[%s7442_s17 + $0x50] sm:$0xff] }
 0x274   : > { %v3986_v7 = vadd.f32 %v3985_v16, %v3984_v59  ;;  %v4032_v1 = vadd.f32 %v4031_v18, %v4030_v21  ;;  %v4079_v25 = vrot.slane %v4078_v40, 2  ;;  %v4389_v33 = vmul.f32 0.125, %v3914_v0  ;;  %v3031_v59 = vld [vmem:[%s7442_s17 + $0x10] sm:$0xff] }
 0x275   : > { %v4009_v62 = vrot.slane %v4008_v55, 1  ;;  %v4056_v60 = vadd.f32 %v4055_v63, %v4054_v57  ;;  %v4393_v49 = vmul.f32 0.125, %v3938_v41  ;;  %v4397_v44 = vmul.f32 0.125, %v3962_v54  ;;  %v3035_v57 = vld [vmem:[%s7442_s17 + $0x30] sm:$0xff] }
 0x276   : > { %v8685_v28 = vmul.f32 %v8574_v45, %v8574_v45  ;;  %v4033_v23 = vrot.slane %v4032_v1, 1  ;;  %v4080_v19 = vadd.f32 %v4079_v25, %v4078_v40  ;;  %v4401_v10 = vmul.f32 0.125, %v3986_v7  ;;  %v3043_v63 = vld [vmem:[%s7442_s17 + $0x70] sm:$0xff] }
 0x277   : > { %v8689_v16 = vmul.f32 %v8576_v46, %v8576_v46  ;;  %v4010_v18 = vadd.f32 %v4009_v62, %v4008_v55  ;;  %v4057_v21 = vrot.slane %v4056_v60, 1  ;;  %v4549_v0 = vsel %vm1938_vm3, %v4393_v49, %v4389_v33  ;;  %v3047_v62 = vld [vmem:[%s7442_s17 + $0x90] sm:$0xff] }
 0x278   : > { %11130 = vst [vmem:[#allocation167_spill] sm:$0xff] %v8685_v28  ;;  %v4034_v12 = vadd.f32 %v4033_v23, %v4032_v1  ;;  %v4081_v17 = vrot.slane %v4080_v19, 1  ;;  %v4550_v31 = vsel %vm1940_vm4, %v4397_v44, %v4549_v0  ;;  %v8695_v45 = vmul.f32 %v4389_v33, %v4389_v33 }
 0x279   : > { %11131 = vst [vmem:[#allocation168_spill] sm:$0xff] %v8689_v16  ;;  %v4058_v50 = vadd.f32 %v4057_v21, %v4056_v60  ;;  %v4405_v6 = vmul.f32 0.125, %v4010_v18  ;;  %v4551_v46 = vsel %vm1942_vm5, %v4401_v10, %v4550_v31  ;;  %v8699_v24 = vmul.f32 %v4393_v49, %v4393_v49  ;;  %v3051_v60 = vld [vmem:[%s7442_s17 + $0xb0] sm:$0xff] }
 0x27a   : > { %11132 = vst [vmem:[#allocation169_spill] sm:$0xff] %v8695_v45  ;;  %v4082_v42 = vadd.f32 %v4081_v17, %v4080_v19  ;;  %v4409_v43 = vmul.f32 0.125, %v4034_v12  ;;  %v3141_v53 = vrot.slane %v3031_v59, 4  ;;  %v3165_v40 = vrot.slane %v3035_v57, 4  ;;  %v3055_v18 = vld [vmem:[%s7442_s17 + $0xd0] sm:$0xff] }
 0x27b   : > { %11133 = vst [vmem:[#allocation170_spill] sm:$0xff] %v8699_v24  ;;  %v8701_v41 = vmul.f32 0.125, %v4058_v50  ;;  %v4552_v54 = vsel %vm1944_vm6, %v4405_v6, %v4551_v46  ;;  %v8704_v55 = vmul.f32 %v4397_v44, %v4397_v44  ;;  %v3189_v7 = vrot.slane %v3039_v3, 4  ;;  %v3059_v21 = vld [vmem:[%s7442_s17 + $0xf0] sm:$0xff] }
 0x27c   : > { %v8707_v1 = vmul.f32 0.125, %v4082_v42  ;;  %v4553_v25 = vsel %vm1946_vm7, %v4409_v43, %v4552_v54  ;;  %v8710_v33 = vmul.f32 %v4401_v10, %v4401_v10  ;;  %v3142_v49 = vadd.f32 %v3141_v53, %v3031_v59 }
 0x27d   : > { %11134 = vst [vmem:[#allocation171_spill] sm:$0xff] %v8704_v55  ;;  %v4554_v23 = vsel %vm1948_vm8, %v8701_v41, %v4553_v25  ;;  %v8716_v19 = vmul.f32 %v4405_v6, %v4405_v6  ;;  %v3166_v44 = vadd.f32 %v3165_v40, %v3035_v57  ;;  %v3190_v0 = vadd.f32 %v3189_v7, %v3039_v3 }
 0x27e   : > { %11135 = vst [vmem:[#allocation172_spill] sm:$0xff] %v8710_v33  ;;  %v4555_v12 = vsel %vm1950_vm9, %v8707_v1, %v4554_v23  ;;  %v8722_v17 = vmul.f32 %v4409_v43, %v4409_v43  ;;  %v3143_v31 = vrot.slane %v3142_v49, 2  ;;  %v3213_v10 = vrot.slane %v3043_v63, 4 }
 0x27f   : > { %11136 = vst [vmem:[#allocation173_spill] sm:$0xff] %v8716_v19  ;;  %4894 = vmatmul.mubr.f32.vlgmr.msra.gmra.mrb[0].mxu1 %v4555_v12  ;;  %v3167_v50 = vrot.slane %v3166_v44, 2  ;;  %v3191_v59 = vrot.slane %v3190_v0, 2  ;;  %v3237_v46 = vrot.slane %v3047_v62, 4  ;;  %v3261_v42 = vrot.slane %v3051_v60, 4  ;;  %v3063_v12 = vld [vmem:[%s7442_s17 + $0x110] sm:$0xff] }
 0x280   : > { %11137 = vst [vmem:[#allocation174_spill] sm:$0xff] %v8722_v17  ;;  %v3144_v53 = vadd.f32 %v3143_v31, %v3142_v49  ;;  %v3214_v6 = vadd.f32 %v3213_v10, %v3043_v63  ;;  %v3285_v54 = vrot.slane %v3055_v18, 4  ;;  %v3309_v57 = vrot.slane %v3059_v21, 4  ;;  %v3067_v49 = vld [vmem:[%s7442_s17 + $0x130] sm:$0xff] }
 0x281   : > { %v3168_v3 = vadd.f32 %v3167_v50, %v3166_v44  ;;  %v3192_v40 = vadd.f32 %v3191_v59, %v3190_v0  ;;  %v3238_v7 = vadd.f32 %v3237_v46, %v3047_v62  ;;  %v3262_v25 = vadd.f32 %v3261_v42, %v3051_v60  ;;  %v3071_v63 = vld [vmem:[%s7442_s17 + $0x150] sm:$0xff] }
 0x282   : > { %v3145_v43 = vrot.slane %v3144_v53, 1  ;;  %v3215_v23 = vrot.slane %v3214_v6, 2  ;;  %v3286_v16 = vadd.f32 %v3285_v54, %v3055_v18  ;;  %v3310_v28 = vadd.f32 %v3309_v57, %v3059_v21  ;;  %v3075_v54 = vld [vmem:[%s7442_s17 + $0x170] sm:$0xff] }
 0x283   : > { %v3169_v17 = vrot.slane %v3168_v3, 1  ;;  %v3193_v19 = vrot.slane %v3192_v40, 1  ;;  %v3239_v33 = vrot.slane %v3238_v7, 2  ;;  %v3263_v55 = vrot.slane %v3262_v25, 2 }
 0x284   : > { %v8727_v31 = vadd.f32 %v3145_v43, %v3144_v53  ;;  %v3216_v10 = vadd.f32 %v3215_v23, %v3214_v6  ;;  %v3287_v44 = vrot.slane %v3286_v16, 2  ;;  %v3311_v62 = vrot.slane %v3310_v28, 2  ;;  %v3079_v6 = vld [vmem:[%s7442_s17 + $0x190] sm:$0xff] }
 0x285   : > { %v3170_v60 = vadd.f32 %v3169_v17, %v3168_v3  ;;  %v3194_v0 = vadd.f32 %v3193_v19, %v3192_v40  ;;  %v3240_v50 = vadd.f32 %v3239_v33, %v3238_v7  ;;  %v3264_v18 = vadd.f32 %v3263_v55, %v3262_v25  ;;  %v3083_v23 = vld [vmem:[%s7442_s17 + $0x1b0] sm:$0xff] }
 0x286   : > { %v3217_v21 = vrot.slane %v3216_v10, 1  ;;  %v3288_v59 = vadd.f32 %v3287_v44, %v3286_v16  ;;  %v3312_v46 = vadd.f32 %v3311_v62, %v3310_v28  ;;  %v3333_v42 = vrot.slane %v3063_v12, 4  ;;  %v3087_v19 = vld [vmem:[%s7442_s17 + $0x1d0] sm:$0xff] }
 0x287   : > { %v3241_v57 = vrot.slane %v3240_v50, 1  ;;  %v3265_v24 = vrot.slane %v3264_v18, 1  ;;  %v3357_v53 = vrot.slane %v3067_v49, 4  ;;  %v3381_v43 = vrot.slane %v3071_v63, 4  ;;  %v3091_v33 = vld [vmem:[%s7442_s17 + $0x1f0] sm:$0xff] }
 0x288   : > { %v3218_v45 = vadd.f32 %v3217_v21, %v3216_v10  ;;  %v3289_v22 = vrot.slane %v3288_v59, 1  ;;  %v3313_v14 = vrot.slane %v3312_v46, 1  ;;  %v3334_v17 = vadd.f32 %v3333_v42, %v3063_v12 }
 0x289   : > { %v3242_v55 = vadd.f32 %v3241_v57, %v3240_v50  ;;  %v3266_v3 = vadd.f32 %v3265_v24, %v3264_v18  ;;  %v3358_v40 = vadd.f32 %v3357_v53, %v3067_v49  ;;  %v3382_v7 = vadd.f32 %v3381_v43, %v3071_v63 }
 0x28a   : > { %v3290_v16 = vadd.f32 %v3289_v22, %v3288_v59  ;;  %v3314_v28 = vadd.f32 %v3313_v14, %v3312_v46  ;;  %v3335_v25 = vrot.slane %v3334_v17, 2  ;;  %v3405_v44 = vrot.slane %v3075_v54, 4 }
 0x28b   : > { %v3359_v62 = vrot.slane %v3358_v40, 2  ;;  %v3383_v39 = vrot.slane %v3382_v7, 2  ;;  %v3429_v2 = vrot.slane %v3079_v6, 4  ;;  %v3453_v35 = vrot.slane %v3083_v23, 4 }
 0x28c   : > { %v3336_v56 = vadd.f32 %v3335_v25, %v3334_v17  ;;  %v3406_v5 = vadd.f32 %v3405_v44, %v3075_v54  ;;  %v3477_v10 = vrot.slane %v3087_v19, 4  ;;  %v3501_v21 = vrot.slane %v3091_v33, 4 }
 0x28d   : > { %v3360_v29 = vadd.f32 %v3359_v62, %v3358_v40  ;;  %v3384_v12 = vadd.f32 %v3383_v39, %v3382_v7  ;;  %v3430_v42 = vadd.f32 %v3429_v2, %v3079_v6  ;;  %v3454_v8 = vadd.f32 %v3453_v35, %v3083_v23 }
 0x28e   : > { %v3337_v50 = vrot.slane %v3336_v56, 1  ;;  %v3407_v24 = vrot.slane %v3406_v5, 2  ;;  %v3478_v49 = vadd.f32 %v3477_v10, %v3087_v19  ;;  %v3502_v63 = vadd.f32 %v3501_v21, %v3091_v33 }
 0x28f   : > { %v3361_v22 = vrot.slane %v3360_v29, 1  ;;  %v3385_v14 = vrot.slane %v3384_v12, 1  ;;  %v3431_v18 = vrot.slane %v3430_v42, 2  ;;  %v3455_v59 = vrot.slane %v3454_v8, 2 }
 0x290   : > { %v3338_v46 = vadd.f32 %v3337_v50, %v3336_v56  ;;  %v3408_v57 = vadd.f32 %v3407_v24, %v3406_v5  ;;  %v3479_v53 = vrot.slane %v3478_v49, 2  ;;  %v3503_v43 = vrot.slane %v3502_v63, 2  ;;  %v1255_v50 = vld [vmem:[%s7436_s16 + $0x128] sm:$0xff] }
 0x291   : > { %v3362_v17 = vadd.f32 %v3361_v22, %v3360_v29  ;;  %v3386_v54 = vadd.f32 %v3385_v14, %v3384_v12  ;;  %v3432_v25 = vadd.f32 %v3431_v18, %v3430_v42  ;;  %v3456_v44 = vadd.f32 %v3455_v59, %v3454_v8  ;;  %v1263_v22 = vld [vmem:[%s7436_s16 + $0x168] sm:$0xff] }
 0x292   : > { %v3409_v40 = vrot.slane %v3408_v57, 1  ;;  %v3480_v39 = vadd.f32 %v3479_v53, %v3478_v49  ;;  %v3504_v2 = vadd.f32 %v3503_v43, %v3502_v63  ;;  %v8735_v35 = vmul.f32 0.125, %v8727_v31 }
 0x293   : > { %v3433_v6 = vrot.slane %v3432_v25, 1  ;;  %v3457_v23 = vrot.slane %v3456_v44, 1  ;;  %v8737_v19 = vmul.f32 0.125, %v3170_v60  ;;  %v8739_v56 = vmul.f32 0.125, %v3194_v0  ;;  %v1251_v0 = vld [vmem:[%s7436_s16 + $0x108] sm:$0xff] }
 0x294   : > { %v3410_v5 = vadd.f32 %v3409_v40, %v3408_v57  ;;  %v3481_v33 = vrot.slane %v3480_v39, 1  ;;  %v3505_v29 = vrot.slane %v3504_v2, 1  ;;  %v8741_v7 = vmul.f32 0.125, %v3218_v45 }
 0x295   : > { %v3434_v8 = vadd.f32 %v3433_v6, %v3432_v25  ;;  %v3458_v62 = vadd.f32 %v3457_v23, %v3456_v44  ;;  %v8743_v10 = vmul.f32 0.125, %v3242_v55  ;;  %v8745_v31 = vmul.f32 0.125, %v3266_v3  ;;  %v1259_v55 = vld [vmem:[%s7436_s16 + $0x148] sm:$0xff] }
 0x296   : > { %v3482_v21 = vadd.f32 %v3481_v33, %v3480_v39  ;;  %v3506_v12 = vadd.f32 %v3505_v29, %v3504_v2  ;;  %v8747_v42 = vmul.f32 0.125, %v3290_v16  ;;  %v8749_v60 = vmul.f32 0.125, %v3314_v28 }
 0x297   : > { %v8753_v24 = vmul.f32 0.125, %v3338_v46  ;;  %v8755_v49 = vmul.f32 0.125, %v3362_v17  ;;  %v8757_v45 = vmul.f32 0.125, %v3386_v54  ;;  %v8759_v63 = vmul.f32 0.125, %v3410_v5 }
 0x298   : > { %v8763_v3 = vmul.f32 0.125, %v3434_v8  ;;  %v8765_v14 = vmul.f32 0.125, %v3458_v62  ;;  %v8767_v16 = vmul.f32 0.125, %v3482_v21  ;;  %v8769_v28 = vmul.f32 0.125, %v3506_v12  ;;  %v1267_v8 = vld [vmem:[%s7436_s16 + $0x188] sm:$0xff] }
 0x299   : > { %11138 = vst [vmem:[#allocation175_spill] sm:$0xff] %v8753_v24  ;;  %11139 = vst [vmem:[#allocation176_spill] sm:$0xff] %v8755_v49  ;;  %v4743_v18 = vsel %vm1938_vm3, %v8737_v19, %v8735_v35  ;;  %v4771_v59 = vsel %vm1938_vm3, %v8755_v49, %v8753_v24  ;;  %v1496_v46 = vrot.slane %v1251_v0, 4  ;;  %v1520_v57 = vrot.slane %v1255_v50, 4 }
 0x29a   : > { %11140 = vst [vmem:[#allocation177_spill] sm:$0xff] %v8757_v45  ;;  %11141 = vst [vmem:[#allocation178_spill] sm:$0xff] %v8759_v63  ;;  %v4744_v53 = vsel %vm1940_vm4, %v8739_v56, %v4743_v18  ;;  %v4772_v43 = vsel %vm1940_vm4, %v8757_v45, %v4771_v59  ;;  %v1544_v17 = vrot.slane %v1259_v55, 4  ;;  %v1568_v54 = vrot.slane %v1263_v22, 4  ;;  %v1275_v18 = vld [vmem:[%s7436_s16 + $0x1c8] sm:$0xff] }
 0x29b   : > { %11142 = vst [vmem:[#allocation179_spill] sm:$0xff] %v8763_v3  ;;  %11143 = vst [vmem:[#allocation180_spill] sm:$0xff] %v8765_v14  ;;  %v4745_v25 = vsel %vm1942_vm5, %v8741_v7, %v4744_v53  ;;  %v4773_v44 = vsel %vm1942_vm5, %v8759_v63, %v4772_v43  ;;  %v1497_v40 = vadd.f32 %v1496_v46, %v1251_v0 }
 0x29c   : > { %11144 = vst [vmem:[#allocation181_spill] sm:$0xff] %v8767_v16  ;;  %11145 = vst [vmem:[#allocation182_spill] sm:$0xff] %v8769_v28  ;;  %v1521_v39 = vadd.f32 %v1520_v57, %v1255_v50  ;;  %v4746_v2 = vsel %vm1944_vm6, %v8743_v10, %v4745_v25  ;;  %v4774_v6 = vsel %vm1944_vm6, %v8763_v3, %v4773_v44  ;;  %v1271_v50 = vld [vmem:[%s7436_s16 + $0x1a8] sm:$0xff]  ;;  %v1592_v44 = vrot.slane %v1267_v8, 4 }
 0x29d   : > { %v1545_v23 = vadd.f32 %v1544_v17, %v1259_v55  ;;  %v1569_v5 = vadd.f32 %v1568_v54, %v1263_v22  ;;  %v4747_v33 = vsel %vm1946_vm7, %v8745_v31, %v4746_v2  ;;  %v4775_v29 = vsel %vm1946_vm7, %v8765_v14, %v4774_v6  ;;  %v1279_v57 = vld [vmem:[%s7436_s16 + $0x1e8] sm:$0xff] }
 0x29e   : > { %v1498_v62 = vrot.slane %v1497_v40, 2  ;;  %v1522_v21 = vrot.slane %v1521_v39, 2  ;;  %v4748_v12 = vsel %vm1948_vm8, %v8747_v42, %v4747_v33  ;;  %v4776_v0 = vsel %vm1948_vm8, %v8767_v16, %v4775_v29 }
 0x29f   : > { %v1546_v59 = vrot.slane %v1545_v23, 2  ;;  %v1570_v55 = vrot.slane %v1569_v5, 2  ;;  %v4749_v22 = vsel %vm1950_vm9, %v8749_v60, %v4748_v12  ;;  %v4777_v46 = vsel %vm1950_vm9, %v8769_v28, %v4776_v0 }
 0x2a0   : > { %v1499_v53 = vadd.f32 %v1498_v62, %v1497_v40  ;;  %v1523_v43 = vadd.f32 %v1522_v21, %v1521_v39  ;;  %v6879_v17 = vpack.c.bf16 %v4777_v46, %v4749_v22  ;;  %v1616_v33 = vrot.slane %v1271_v50, 4 }
 0x2a1   : > { %v1547_v54 = vadd.f32 %v1546_v59, %v1545_v23  ;;  %v1571_v25 = vadd.f32 %v1570_v55, %v1569_v5  ;;  %v1640_v29 = vrot.slane %v1275_v18, 4  ;;  %v1593_v3 = vadd.f32 %v1592_v44, %v1267_v8 }
 0x2a2   : > { %v1500_v2 = vrot.slane %v1499_v53, 1  ;;  %v1524_v6 = vrot.slane %v1523_v43, 1  ;;  %6880 = vmatpush1.bf16.xpose.msra.mxu1 %v6879_v17  ;;  %v1664_v63 = vrot.slane %v1279_v57, 4  ;;  %v1617_v49 = vadd.f32 %v1616_v33, %v1271_v50 }
 0x2a3   : > { %v1548_v16 = vrot.slane %v1547_v54, 1  ;;  %v1572_v14 = vrot.slane %v1571_v25, 1  ;;  %v1641_v0 = vadd.f32 %v1640_v29, %v1275_v18  ;;  %v1594_v39 = vrot.slane %v1593_v3, 2 }
 0x2a4   : > { %v1501_v12 = vadd.f32 %v1500_v2, %v1499_v53  ;;  %v1525_v45 = vadd.f32 %v1524_v6, %v1523_v43  ;;  %v1665_v23 = vadd.f32 %v1664_v63, %v1279_v57  ;;  %v1618_v5 = vrot.slane %v1617_v49, 2  ;;  %v1250_v63 = vld [vmem:[%s7436_s16 + $0x100] sm:$0xff] }
 0x2a5   : > { %v1549_v28 = vadd.f32 %v1548_v16, %v1547_v54  ;;  %v1573_v40 = vadd.f32 %v1572_v14, %v1571_v25  ;;  %v1642_v62 = vrot.slane %v1641_v0, 2  ;;  %v1595_v55 = vadd.f32 %v1594_v39, %v1593_v3  ;;  %v1258_v43 = vld [vmem:[%s7436_s16 + $0x140] sm:$0xff] }
 0x2a6   : > { %v1811_v21 = vmul.f32 0.125, %v1501_v12  ;;  %v1815_v59 = vmul.f32 0.125, %v1525_v45  ;;  %v1666_v22 = vrot.slane %v1665_v23, 2  ;;  %v8807_v50 = vmul.f32 %v8701_v41, %v8701_v41 }
 0x2a7   : > { %v1819_v46 = vmul.f32 0.125, %v1549_v28  ;;  %v1823_v8 = vmul.f32 0.125, %v1573_v40  ;;  %v1619_v16 = vadd.f32 %v1618_v5, %v1617_v49  ;;  %v1643_v18 = vadd.f32 %v1642_v62, %v1641_v0  ;;  %v1254_v28 = vld [vmem:[%s7436_s16 + $0x120] sm:$0xff] }
 0x2a8   : > { %11146 = vst [vmem:[#allocation183_spill] sm:$0xff] %v8807_v50  ;;  %v1980_v14 = vsel %vm1938_vm3, %v1815_v59, %v1811_v21  ;;  %v8813_v57 = vmul.f32 %v8707_v1, %v8707_v1  ;;  %v1596_v53 = vrot.slane %v1595_v55, 1  ;;  %v1667_v45 = vadd.f32 %v1666_v22, %v1665_v23  ;;  %v1262_v49 = vld [vmem:[%s7436_s16 + $0x160] sm:$0xff] }
 0x2a9   : > { %v1981_v3 = vsel %vm1940_vm4, %v1819_v46, %v1980_v14  ;;  %v1620_v17 = vrot.slane %v1619_v16, 1  ;;  %v1644_v54 = vrot.slane %v1643_v18, 1  ;;  %v8818_v25 = vmul.f32 %v1811_v21, %v1811_v21 }
 0x2aa   : > { %11147 = vst [vmem:[#allocation184_spill] sm:$0xff] %v8813_v57  ;;  %v8820_v41 = vmul.f32 %v1815_v59, %v1815_v59  ;;  %v1597_v44 = vadd.f32 %v1596_v53, %v1595_v55  ;;  %v1668_v2 = vrot.slane %v1667_v45, 1  ;;  %v1982_v6 = vsel %vm1942_vm5, %v1823_v8, %v1981_v3 }
 0x2ab   : > { %11148 = vst [vmem:[#allocation185_spill] sm:$0xff] %v8818_v25  ;;  %v1490_v33 = vrot.slane %v1250_v63, 4  ;;  %v1621_v1 = vadd.f32 %v1620_v17, %v1619_v16  ;;  %v1645_v29 = vadd.f32 %v1644_v54, %v1643_v18  ;;  %v1514_v12 = vrot.slane %v1254_v28, 4  ;;  %v1266_v16 = vld [vmem:[%s7436_s16 + $0x180] sm:$0xff] }
 0x2ac   : > { %11149 = vst [vmem:[#allocation186_spill] sm:$0xff] %v8820_v41  ;;  %v1538_v0 = vrot.slane %v1258_v43, 4  ;;  %v1669_v40 = vadd.f32 %v1668_v2, %v1667_v45  ;;  %v1827_v39 = vmul.f32 0.125, %v1597_v44  ;;  %v1562_v5 = vrot.slane %v1262_v49, 4  ;;  %v1274_v54 = vld [vmem:[%s7436_s16 + $0x1c0] sm:$0xff] }
 0x2ad   : > { %v1491_v23 = vadd.f32 %v1490_v33, %v1250_v63  ;;  %v1831_v62 = vmul.f32 0.125, %v1621_v1  ;;  %v1835_v21 = vmul.f32 0.125, %v1645_v29  ;;  %v1515_v59 = vadd.f32 %v1514_v12, %v1254_v28  ;;  %v1270_v63 = vld [vmem:[%s7436_s16 + $0x1a0] sm:$0xff] }
 0x2ae   : > { %v1539_v55 = vadd.f32 %v1538_v0, %v1258_v43  ;;  %v1839_v22 = vmul.f32 0.125, %v1669_v40  ;;  %v1983_v14 = vsel %vm1944_vm6, %v1827_v39, %v1982_v6  ;;  %v8825_v53 = vmul.f32 %v1819_v46, %v1819_v46  ;;  %v1278_v43 = vld [vmem:[%s7436_s16 + $0x1e0] sm:$0xff] }
 0x2af   : > { %v1492_v18 = vrot.slane %v1491_v23, 2  ;;  %v1984_v3 = vsel %vm1946_vm7, %v1831_v62, %v1983_v14  ;;  %v8829_v45 = vmul.f32 %v1823_v8, %v1823_v8  ;;  %v8831_v17 = vmul.f32 %v1827_v39, %v1827_v39 }
 0x2b0   : > { %11150 = vst [vmem:[#allocation187_spill] sm:$0xff] %v8825_v53  ;;  %v1516_v44 = vrot.slane %v1515_v59, 2  ;;  %v1985_v2 = vsel %vm1948_vm8, %v1835_v21, %v1984_v3  ;;  %v8836_v28 = vmul.f32 %v1831_v62, %v1831_v62  ;;  %v1540_v6 = vrot.slane %v1539_v55, 2 }
 0x2b1   : > { %11151 = vst [vmem:[#allocation188_spill] sm:$0xff] %v8829_v45  ;;  %11152 = vst [vmem:[#allocation189_spill] sm:$0xff] %v8831_v17  ;;  %v1493_v33 = vadd.f32 %v1492_v18, %v1491_v23  ;;  %v1986_v46 = vsel %vm1950_vm9, %v1839_v22, %v1985_v2  ;;  %v1563_v29 = vadd.f32 %v1562_v5, %v1262_v49  ;;  %v1586_v12 = vrot.slane %v1266_v16, 4 }
 0x2b2   : > { %11153 = vst [vmem:[#allocation190_spill] sm:$0xff] %v8836_v28  ;;  %v1517_v1 = vadd.f32 %v1516_v44, %v1515_v59  ;;  %2294 = vmatprep.mubr.f32.mxu0 %v1986_v46  ;;  %v1541_v0 = vadd.f32 %v1540_v6, %v1539_v55  ;;  %v1610_v40 = vrot.slane %v1270_v63, 4  ;;  %v1634_v39 = vrot.slane %v1274_v54, 4 }
 0x2b3   : > { %v1494_v8 = vrot.slane %v1493_v33, 1  ;;  %v1564_v57 = vrot.slane %v1563_v29, 2  ;;  %v1587_v50 = vadd.f32 %v1586_v12, %v1266_v16  ;;  %v1658_v17 = vrot.slane %v1278_v43, 4 }
 0x2b4   : > { %v1518_v14 = vrot.slane %v1517_v1, 1  ;;  %v1542_v62 = vrot.slane %v1541_v0, 1  ;;  %v1611_v28 = vadd.f32 %v1610_v40, %v1270_v63  ;;  %v1635_v45 = vadd.f32 %v1634_v39, %v1274_v54 }
 0x2b5   : > { %v1495_v3 = vadd.f32 %v1494_v8, %v1493_v33  ;;  %v1565_v18 = vadd.f32 %v1564_v57, %v1563_v29  ;;  %v1588_v53 = vrot.slane %v1587_v50, 2  ;;  %v1659_v2 = vadd.f32 %v1658_v17, %v1278_v43  ;;  %v484_v43 = vld [vmem:[%s7429_s21 + $0x218] sm:$0xff] }
 0x2b6   : > { %v1519_v23 = vadd.f32 %v1518_v14, %v1517_v1  ;;  %v1543_v59 = vadd.f32 %v1542_v62, %v1541_v0  ;;  %v1612_v49 = vrot.slane %v1611_v28, 2  ;;  %v1636_v5 = vrot.slane %v1635_v45, 2  ;;  %v488_v29 = vld [vmem:[%s7429_s21 + $0x238] sm:$0xff] }
 0x2b7   : > { %v1810_v55 = vmul.f32 0.125, %v1495_v3  ;;  %v1566_v44 = vrot.slane %v1565_v18, 1  ;;  %v1589_v6 = vadd.f32 %v1588_v53, %v1587_v50  ;;  %v1660_v46 = vrot.slane %v1659_v2, 2  ;;  %v492_v3 = vld [vmem:[%s7429_s21 + $0x258] sm:$0xff] }
 0x2b8   : > { %v1814_v41 = vmul.f32 0.125, %v1519_v23  ;;  %v8840_v16 = vmul.f32 %v1835_v21, %v1835_v21  ;;  %v1613_v33 = vadd.f32 %v1612_v49, %v1611_v28  ;;  %v1637_v12 = vadd.f32 %v1636_v5, %v1635_v45 }
 0x2b9   : > { %v1818_v63 = vmul.f32 0.125, %v1543_v59  ;;  %v1567_v54 = vadd.f32 %v1566_v44, %v1565_v18  ;;  %v1590_v57 = vrot.slane %v1589_v6, 1  ;;  %v1661_v1 = vadd.f32 %v1660_v46, %v1659_v2 }
 0x2ba   : > { %11154 = vst [vmem:[#allocation191_spill] sm:$0xff] %v8840_v16  ;;  %v1973_v17 = vsel %vm1938_vm3, %v1814_v41, %v1810_v55  ;;  %v8845_v8 = vmul.f32 %v1839_v22, %v1839_v22  ;;  %v1614_v0 = vrot.slane %v1613_v33, 1  ;;  %v1638_v40 = vrot.slane %v1637_v12, 1  ;;  %v516_v16 = vld [vmem:[%s7429_s21 + $0x318] sm:$0xff] }
 0x2bb   : > { %v1974_v50 = vsel %vm1940_vm4, %v1818_v63, %v1973_v17  ;;  %v1591_v53 = vadd.f32 %v1590_v57, %v1589_v6  ;;  %v1662_v21 = vrot.slane %v1661_v1, 1  ;;  %v1822_v39 = vmul.f32 0.125, %v1567_v54  ;;  %v500_v54 = vld [vmem:[%s7429_s21 + $0x298] sm:$0xff] }
 0x2bc   : > { %11155 = vst [vmem:[#allocation192_spill] sm:$0xff] %v8845_v8  ;;  %v8848_v28 = vmul.f32 %v1810_v55, %v1810_v55  ;;  %v1615_v45 = vadd.f32 %v1614_v0, %v1613_v33  ;;  %v1639_v14 = vadd.f32 %v1638_v40, %v1637_v12  ;;  %v919_v62 = vrot.slane %v484_v43, 4  ;;  %v496_v12 = vld [vmem:[%s7429_s21 + $0x278] sm:$0xff] }
 0x2bd   : > { %v943_v23 = vrot.slane %v488_v29, 4  ;;  %v1663_v18 = vadd.f32 %v1662_v21, %v1661_v1  ;;  %v1826_v2 = vmul.f32 0.125, %v1591_v53  ;;  %v1975_v22 = vsel %vm1942_vm5, %v1822_v39, %v1974_v50  ;;  %v504_v0 = vld [vmem:[%s7429_s21 + $0x2b8] sm:$0xff] }
 0x2be   : > { %11156 = vst [vmem:[#allocation193_spill] sm:$0xff] %v8848_v28  ;;  %v8852_v59 = vmul.f32 %v1814_v41, %v1814_v41  ;;  %v1830_v49 = vmul.f32 0.125, %v1615_v45  ;;  %v8854_v5 = vmul.f32 0.125, %v1639_v14  ;;  %v920_v55 = vadd.f32 %v919_v62, %v484_v43  ;;  %v508_v40 = vld [vmem:[%s7429_s21 + $0x2d8] sm:$0xff] }
 0x2bf   : > { %v944_v44 = vadd.f32 %v943_v23, %v488_v29  ;;  %v8856_v6 = vmul.f32 0.125, %v1663_v18  ;;  %v1976_v46 = vsel %vm1944_vm6, %v1826_v2, %v1975_v22  ;;  %v8859_v33 = vmul.f32 %v1818_v63, %v1818_v63  ;;  %v512_v53 = vld [vmem:[%s7429_s21 + $0x2f8] sm:$0xff] }
 0x2c0   : > { %11157 = vst [vmem:[#allocation194_spill] sm:$0xff] %v8852_v59  ;;  %v967_v57 = vrot.slane %v492_v3, 4  ;;  %v1977_v1 = vsel %vm1946_vm7, %v1830_v49, %v1976_v46  ;;  %v8864_v17 = vmul.f32 %v1822_v39, %v1822_v39  ;;  %v8866_v41 = vmul.f32 %v1826_v2, %v1826_v2 }
 0x2c1   : > { %11158 = vst [vmem:[#allocation195_spill] sm:$0xff] %v8859_v33  ;;  %v921_v43 = vrot.slane %v920_v55, 2  ;;  %v1978_v29 = vsel %vm1948_vm8, %v8854_v5, %v1977_v1  ;;  %v8872_v50 = vmul.f32 %v1830_v49, %v1830_v49  ;;  %v945_v63 = vrot.slane %v944_v44, 2 }
 0x2c2   : > { %11159 = vst [vmem:[#allocation196_spill] sm:$0xff] %v8864_v17  ;;  %11160 = vst [vmem:[#allocation197_spill] sm:$0xff] %v8866_v41  ;;  %v968_v21 = vadd.f32 %v967_v57, %v492_v3  ;;  %v1979_v45 = vsel %vm1950_vm9, %v8856_v6, %v1978_v29  ;;  %v991_v39 = vrot.slane %v496_v12, 4  ;;  %v1015_v62 = vrot.slane %v500_v54, 4 }
 0x2c3   : > { %11161 = vst [vmem:[#allocation198_spill] sm:$0xff] %v8872_v50  ;;  %v922_v14 = vadd.f32 %v921_v43, %v920_v55  ;;  %2295 = vmatmul.mubr.f32.gmra.mrb[2].mxu0 %v1979_v45  ;;  %v946_v23 = vadd.f32 %v945_v63, %v944_v44  ;;  %v1039_v2 = vrot.slane %v504_v0, 4  ;;  %v1063_v22 = vrot.slane %v508_v40, 4 }
 0x2c4   : > { %v969_v18 = vrot.slane %v968_v21, 2  ;;  %v992_v8 = vadd.f32 %v991_v39, %v496_v12  ;;  %v1016_v1 = vadd.f32 %v1015_v62, %v500_v54  ;;  %v1087_v49 = vrot.slane %v512_v53, 4 }
 0x2c5   : > { %v923_v46 = vrot.slane %v922_v14, 1  ;;  %v947_v50 = vrot.slane %v946_v23, 1  ;;  %v1040_v17 = vadd.f32 %v1039_v2, %v504_v0  ;;  %v1064_v3 = vadd.f32 %v1063_v22, %v508_v40 }
 0x2c6   : > { %v970_v41 = vadd.f32 %v969_v18, %v968_v21  ;;  %v993_v33 = vrot.slane %v992_v8, 2  ;;  %v1017_v29 = vrot.slane %v1016_v1, 2  ;;  %v1088_v55 = vadd.f32 %v1087_v49, %v512_v53  ;;  %v483_v53 = vld [vmem:[%s7429_s21 + $0x210] sm:$0xff] }
 0x2c7   : > { %v924_v57 = vadd.f32 %v923_v46, %v922_v14  ;;  %v948_v43 = vadd.f32 %v947_v50, %v946_v23  ;;  %v1041_v44 = vrot.slane %v1040_v17, 2  ;;  %v1065_v63 = vrot.slane %v1064_v3, 2 }
 0x2c8   : > { %v971_v45 = vrot.slane %v970_v41, 1  ;;  %v994_v25 = vadd.f32 %v993_v33, %v992_v8  ;;  %v1018_v59 = vadd.f32 %v1017_v29, %v1016_v1  ;;  %v1089_v28 = vrot.slane %v1088_v55, 2 }
 0x2c9   : > { %v1111_v12 = vrot.slane %v516_v16, 4  ;;  %v1042_v39 = vadd.f32 %v1041_v44, %v1040_v17  ;;  %v1066_v62 = vadd.f32 %v1065_v63, %v1064_v3  ;;  %v8878_v24 = vmul.f32 0.125, %v924_v57  ;;  %v499_v44 = vld [vmem:[%s7429_s21 + $0x290] sm:$0xff] }
 0x2ca   : > { %v972_v54 = vadd.f32 %v971_v45, %v970_v41  ;;  %v995_v0 = vrot.slane %v994_v25, 1  ;;  %v1019_v40 = vrot.slane %v1018_v59, 1  ;;  %v1090_v21 = vadd.f32 %v1089_v28, %v1088_v55  ;;  %v487_v28 = vld [vmem:[%s7429_s21 + $0x230] sm:$0xff] }
 0x2cb   : > { %11162 = vst [vmem:[#allocation199_spill] sm:$0xff] %v8878_v24  ;;  %v1112_v14 = vadd.f32 %v1111_v12, %v516_v16  ;;  %v1043_v50 = vrot.slane %v1042_v39, 1  ;;  %v1067_v23 = vrot.slane %v1066_v62, 1  ;;  %v8881_v18 = vmul.f32 0.125, %v948_v43  ;;  %v491_v55 = vld [vmem:[%s7429_s21 + $0x250] sm:$0xff] }
 0x2cc   : > { %v8883_v8 = vmul.f32 0.125, %v972_v54  ;;  %v996_v33 = vadd.f32 %v995_v0, %v994_v25  ;;  %v1020_v41 = vadd.f32 %v1019_v40, %v1018_v59  ;;  %v1091_v17 = vrot.slane %v1090_v21, 1  ;;  %v495_v25 = vld [vmem:[%s7429_s21 + $0x270] sm:$0xff] }
 0x2cd   : > { %11163 = vst [vmem:[#allocation200_spill] sm:$0xff] %v8881_v18  ;;  %v1113_v2 = vrot.slane %v1112_v14, 2  ;;  %v1044_v22 = vadd.f32 %v1043_v50, %v1042_v39  ;;  %v1068_v46 = vadd.f32 %v1067_v23, %v1066_v62  ;;  %v2202_v16 = vsel %vm1938_vm3, %v8881_v18, %v8878_v24 }
 0x2ce   : > { %11164 = vst [vmem:[#allocation201_spill] sm:$0xff] %v8883_v8  ;;  %v913_v1 = vrot.slane %v483_v53, 4  ;;  %v1092_v49 = vadd.f32 %v1091_v17, %v1090_v21  ;;  %v8889_v57 = vmul.f32 0.125, %v996_v33  ;;  %v8891_v29 = vmul.f32 0.125, %v1020_v41  ;;  %v503_v33 = vld [vmem:[%s7429_s21 + $0x2b0] sm:$0xff] }
 0x2cf   : > { %v1114_v3 = vadd.f32 %v1113_v2, %v1112_v14  ;;  %v8895_v59 = vmul.f32 0.125, %v1044_v22  ;;  %v8897_v43 = vmul.f32 0.125, %v1068_v46  ;;  %v2203_v45 = vsel %vm1940_vm4, %v8883_v8, %v2202_v16  ;;  %v507_v2 = vld [vmem:[%s7429_s21 + $0x2d0] sm:$0xff] }
 0x2d0   : > { %11165 = vst [vmem:[#allocation202_spill] sm:$0xff] %v8889_v57  ;;  %11166 = vst [vmem:[#allocation203_spill] sm:$0xff] %v8891_v29  ;;  %v914_v63 = vadd.f32 %v913_v1, %v483_v53  ;;  %v8902_v54 = vmul.f32 0.125, %v1092_v49  ;;  %v2204_v39 = vsel %vm1942_vm5, %v8889_v57, %v2203_v45  ;;  %v937_v62 = vrot.slane %v487_v28, 4 }
 0x2d1   : > { %11167 = vst [vmem:[#allocation204_spill] sm:$0xff] %v8895_v59  ;;  %11168 = vst [vmem:[#allocation205_spill] sm:$0xff] %v8897_v43  ;;  %v1115_v12 = vrot.slane %v1114_v3, 1  ;;  %v2205_v0 = vsel %vm1944_vm6, %v8891_v29, %v2204_v39  ;;  %v961_v21 = vrot.slane %v491_v55, 4  ;;  %v985_v14 = vrot.slane %v495_v25, 4  ;;  %v515_v29 = vld [vmem:[%s7429_s21 + $0x310] sm:$0xff] }
 0x2d2   : > { %11169 = vst [vmem:[#allocation206_spill] sm:$0xff] %v8902_v54  ;;  %v915_v40 = vrot.slane %v914_v63, 2  ;;  %v2206_v23 = vsel %vm1946_vm7, %v8895_v59, %v2205_v0  ;;  %v938_v53 = vadd.f32 %v937_v62, %v487_v28  ;;  %v1009_v41 = vrot.slane %v499_v44, 4 }
 0x2d3   : > { %v1116_v50 = vadd.f32 %v1115_v12, %v1114_v3  ;;  %v2207_v17 = vsel %vm1948_vm8, %v8897_v43, %v2206_v23  ;;  %v962_v46 = vadd.f32 %v961_v21, %v491_v55  ;;  %v986_v16 = vadd.f32 %v985_v14, %v495_v25  ;;  %v511_v12 = vld [vmem:[%s7429_s21 + $0x2f0] sm:$0xff] }
 0x2d4   : > { %v916_v22 = vadd.f32 %v915_v40, %v914_v63  ;;  %v2208_v49 = vsel %vm1950_vm9, %v8902_v54, %v2207_v17  ;;  %v939_v3 = vrot.slane %v938_v53, 2  ;;  %v1010_v45 = vadd.f32 %v1009_v41, %v499_v44 }
 0x2d5   : > { %v8914_v1 = vmul.f32 0.125, %v1116_v50  ;;  %v963_v0 = vrot.slane %v962_v46, 2  ;;  %v987_v28 = vrot.slane %v986_v16, 2  ;;  %v1033_v62 = vrot.slane %v503_v33, 4 }
 0x2d6   : > { %v917_v39 = vrot.slane %v916_v22, 1  ;;  %v940_v23 = vadd.f32 %v939_v3, %v938_v53  ;;  %v1011_v43 = vrot.slane %v1010_v45, 2  ;;  %v1057_v63 = vrot.slane %v507_v2, 4 }
 0x2d7   : > { %11170 = vst [vmem:[#allocation207_spill] sm:$0xff] %v8914_v1  ;;  %v6865_v59 = vpack.c.bf16 %v8914_v1, %v2208_v49  ;;  %v964_v25 = vadd.f32 %v963_v0, %v962_v46  ;;  %v988_v40 = vadd.f32 %v987_v28, %v986_v16  ;;  %v1034_v21 = vadd.f32 %v1033_v62, %v503_v33 }
 0x2d8   : > { %v918_v55 = vadd.f32 %v917_v39, %v916_v22  ;;  %v941_v14 = vrot.slane %v940_v23, 1  ;;  %v1012_v50 = vadd.f32 %v1011_v43, %v1010_v45  ;;  %v1058_v17 = vadd.f32 %v1057_v63, %v507_v2  ;;  %v1283_v2 = vld [vmem:[%s7436_s16 + $0x208] sm:$0xff] }
 0x2d9   : > { %6866 = vmatprep.subr.bf16.mxu0 %v6865_v59  ;;  %v1081_v44 = vrot.slane %v511_v12, 4  ;;  %v965_v41 = vrot.slane %v964_v25, 1  ;;  %v989_v54 = vrot.slane %v988_v40, 1  ;;  %v1035_v57 = vrot.slane %v1034_v21, 2 }
 0x2da   : > { %v1105_v8 = vrot.slane %v515_v29, 4  ;;  %v942_v18 = vadd.f32 %v941_v14, %v940_v23  ;;  %v1013_v49 = vrot.slane %v1012_v50, 1  ;;  %v1059_v53 = vrot.slane %v1058_v17, 2  ;;  %v1287_v23 = vld [vmem:[%s7436_s16 + $0x228] sm:$0xff] }
 0x2db   : > { %v1082_v3 = vadd.f32 %v1081_v44, %v511_v12  ;;  %v966_v1 = vadd.f32 %v965_v41, %v964_v25  ;;  %v990_v22 = vadd.f32 %v989_v54, %v988_v40  ;;  %v1036_v46 = vadd.f32 %v1035_v57, %v1034_v21  ;;  %v1291_v21 = vld [vmem:[%s7436_s16 + $0x248] sm:$0xff] }
 0x2dc   : > { %v1106_v16 = vadd.f32 %v1105_v8, %v515_v29  ;;  %v1014_v33 = vadd.f32 %v1013_v49, %v1012_v50  ;;  %v1060_v59 = vadd.f32 %v1059_v53, %v1058_v17  ;;  %v8921_v43 = vmul.f32 0.125, %v918_v55  ;;  %v1295_v41 = vld [vmem:[%s7436_s16 + $0x268] sm:$0xff] }
 0x2dd   : > { %v1083_v39 = vrot.slane %v1082_v3, 2  ;;  %v1037_v45 = vrot.slane %v1036_v46, 1  ;;  %v8924_v28 = vmul.f32 0.125, %v942_v18  ;;  %v8926_v62 = vmul.f32 0.125, %v966_v1 }
 0x2de   : > { %11171 = vst [vmem:[#allocation208_spill] sm:$0xff] %v8921_v43  ;;  %v1107_v0 = vrot.slane %v1106_v16, 2  ;;  %v1061_v63 = vrot.slane %v1060_v59, 1  ;;  %v8929_v54 = vmul.f32 0.125, %v990_v22  ;;  %v8931_v8 = vmul.f32 0.125, %v1014_v33 }
 0x2df   : > { %11172 = vst [vmem:[#allocation209_spill] sm:$0xff] %v8924_v28  ;;  %11173 = vst [vmem:[#allocation210_spill] sm:$0xff] %v8926_v62  ;;  %v1084_v12 = vadd.f32 %v1083_v39, %v1082_v3  ;;  %v1038_v57 = vadd.f32 %v1037_v45, %v1036_v46  ;;  %v2195_v55 = vsel %vm1938_vm3, %v8924_v28, %v8921_v43  ;;  %v1688_v25 = vrot.slane %v1283_v2, 4 }
 0x2e0   : > { %11174 = vst [vmem:[#allocation211_spill] sm:$0xff] %v8929_v54  ;;  %11175 = vst [vmem:[#allocation212_spill] sm:$0xff] %v8931_v8  ;;  %v1108_v29 = vadd.f32 %v1107_v0, %v1106_v16  ;;  %v1062_v18 = vadd.f32 %v1061_v63, %v1060_v59  ;;  %v2196_v1 = vsel %vm1940_vm4, %v8926_v62, %v2195_v55  ;;  %v1712_v14 = vrot.slane %v1287_v23, 4  ;;  %v3862_v16 = vld [vmem:[%s7444_s27 + $0x108] sm:$0xff] }
 0x2e1   : > { %v1085_v40 = vrot.slane %v1084_v12, 1  ;;  %v8939_v17 = vmul.f32 0.125, %v1038_v57  ;;  %v2197_v44 = vsel %vm1942_vm5, %v8929_v54, %v2196_v1  ;;  %v1689_v49 = vadd.f32 %v1688_v25, %v1283_v2  ;;  %v3866_v0 = vld [vmem:[%s7444_s27 + $0x128] sm:$0xff] }
 0x2e2   : > { %v1109_v50 = vrot.slane %v1108_v29, 1  ;;  %v8944_v3 = vmul.f32 0.125, %v1062_v18  ;;  %v2198_v22 = vsel %vm1944_vm6, %v8931_v8, %v2197_v44  ;;  %v1713_v46 = vadd.f32 %v1712_v14, %v1287_v23  ;;  %v3870_v18 = vld [vmem:[%s7444_s27 + $0x148] sm:$0xff] }
 0x2e3   : > { %11176 = vst [vmem:[#allocation213_spill] sm:$0xff] %v8939_v17  ;;  %v1086_v53 = vadd.f32 %v1085_v40, %v1084_v12  ;;  %v2199_v59 = vsel %vm1946_vm7, %v8939_v17, %v2198_v22  ;;  %v1690_v39 = vrot.slane %v1689_v49, 2  ;;  %v1736_v45 = vrot.slane %v1291_v21, 4 }
 0x2e4   : > { %11177 = vst [vmem:[#allocation214_spill] sm:$0xff] %v8944_v3  ;;  %v1110_v33 = vadd.f32 %v1109_v50, %v1108_v29  ;;  %v2200_v2 = vsel %vm1948_vm8, %v8944_v3, %v2199_v59  ;;  %v1714_v12 = vrot.slane %v1713_v46, 2  ;;  %v1760_v57 = vrot.slane %v1295_v41, 4  ;;  %v3874_v50 = vld [vmem:[%s7444_s27 + $0x168] sm:$0xff] }
 0x2e5   : > { %v8952_v63 = vmul.f32 0.125, %v1086_v53  ;;  %v1691_v25 = vadd.f32 %v1690_v39, %v1689_v49  ;;  %v1737_v23 = vadd.f32 %v1736_v45, %v1291_v21  ;;  %v4107_v29 = vrot.slane %v3862_v16, 4 }
 0x2e6   : > { %v8956_v55 = vmul.f32 0.125, %v1110_v33  ;;  %v1715_v1 = vadd.f32 %v1714_v12, %v1713_v46  ;;  %v1761_v14 = vadd.f32 %v1760_v57, %v1295_v41  ;;  %v4131_v44 = vrot.slane %v3866_v0, 4 }
 0x2e7   : > { %11178 = vst [vmem:[#allocation215_spill] sm:$0xff] %v8952_v63  ;;  %v2201_v40 = vsel %vm1950_vm9, %v8952_v63, %v2200_v2  ;;  %v1692_v22 = vrot.slane %v1691_v25, 1  ;;  %v1738_v17 = vrot.slane %v1737_v23, 2  ;;  %v4108_v59 = vadd.f32 %v4107_v29, %v3862_v16 }
 0x2e8   : > { %11179 = vst [vmem:[#allocation216_spill] sm:$0xff] %v8956_v55  ;;  %v6867_v53 = vpack.c.bf16 %v8956_v55, %v2201_v40  ;;  %v1716_v3 = vrot.slane %v1715_v1, 1  ;;  %v1762_v8 = vrot.slane %v1761_v14, 2  ;;  %v4132_v33 = vadd.f32 %v4131_v44, %v3866_v0 }
 0x2e9   : > { %v4155_v54 = vrot.slane %v3870_v18, 4  ;;  %v1693_v21 = vadd.f32 %v1692_v22, %v1691_v25  ;;  %v1739_v49 = vadd.f32 %v1738_v17, %v1737_v23  ;;  %v4109_v39 = vrot.slane %v4108_v59, 2  ;;  %v3878_v23 = vld [vmem:[%s7444_s27 + $0x188] sm:$0xff] }
 0x2ea   : > { %6868 = vmatpush1.bf16.xpose.msra.mxu0 %v6867_v53  ;;  %v4179_v45 = vrot.slane %v3874_v50, 4  ;;  %v1717_v46 = vadd.f32 %v1716_v3, %v1715_v1  ;;  %v1763_v41 = vadd.f32 %v1762_v8, %v1761_v14  ;;  %v4133_v2 = vrot.slane %v4132_v33, 2  ;;  %v3882_v3 = vld [vmem:[%s7444_s27 + $0x1a8] sm:$0xff] }
 0x2eb   : > { %v4156_v12 = vadd.f32 %v4155_v54, %v3870_v18  ;;  %v1740_v57 = vrot.slane %v1739_v49, 1  ;;  %v1843_v40 = vmul.f32 0.125, %v1693_v21  ;;  %v4110_v55 = vadd.f32 %v4109_v39, %v4108_v59  ;;  %v3890_v21 = vld [vmem:[%s7444_s27 + $0x1e8] sm:$0xff] }
 0x2ec   : > { %v4180_v63 = vadd.f32 %v4179_v45, %v3874_v50  ;;  %v1764_v16 = vrot.slane %v1763_v41, 1  ;;  %v1847_v29 = vmul.f32 0.125, %v1717_v46  ;;  %v4134_v62 = vadd.f32 %v4133_v2, %v4132_v33  ;;  %v3886_v33 = vld [vmem:[%s7444_s27 + $0x1c8] sm:$0xff] }
 0x2ed   : > { %v4157_v0 = vrot.slane %v4156_v12, 2  ;;  %v8965_v17 = vmul.f32 %v8854_v5, %v8854_v5  ;;  %v1741_v25 = vadd.f32 %v1740_v57, %v1739_v49  ;;  %v4111_v8 = vrot.slane %v4110_v55, 1 }
 0x2ee   : > { %v4181_v1 = vrot.slane %v4180_v63, 2  ;;  %v8971_v54 = vmul.f32 %v8856_v6, %v8856_v6  ;;  %v1765_v18 = vadd.f32 %v1764_v16, %v1763_v41  ;;  %v2004_v14 = vsel %vm1938_vm3, %v1847_v29, %v1843_v40 }
 0x2ef   : > { %11180 = vst [vmem:[#allocation217_spill] sm:$0xff] %v8965_v17  ;;  %v4135_v50 = vrot.slane %v4134_v62, 1  ;;  %v1851_v44 = vmul.f32 0.125, %v1741_v25  ;;  %v4112_v53 = vadd.f32 %v4111_v8, %v4110_v55  ;;  %v4158_v22 = vadd.f32 %v4157_v0, %v4156_v12 }
 0x2f0   : > { %11181 = vst [vmem:[#allocation218_spill] sm:$0xff] %v8971_v54  ;;  %v4182_v59 = vadd.f32 %v4181_v1, %v4180_v63  ;;  %v1855_v5 = vmul.f32 0.125, %v1765_v18  ;;  %v4203_v39 = vrot.slane %v3878_v23, 4  ;;  %v4227_v45 = vrot.slane %v3882_v3, 4 }
 0x2f1   : > { %v4136_v49 = vadd.f32 %v4135_v50, %v4134_v62  ;;  %v2005_v46 = vsel %vm1940_vm4, %v1851_v44, %v2004_v14  ;;  %v8977_v2 = vmul.f32 %v1843_v40, %v1843_v40  ;;  %v4159_v6 = vrot.slane %v4158_v22, 1 }
 0x2f2   : > { %v4183_v57 = vrot.slane %v4182_v59, 1  ;;  %v2006_v41 = vsel %vm1942_vm5, %v1855_v5, %v2005_v46  ;;  %v8980_v16 = vmul.f32 %v1847_v29, %v1847_v29  ;;  %v4204_v25 = vadd.f32 %v4203_v39, %v3878_v23 }
 0x2f3   : > { %11182 = vst [vmem:[#allocation219_spill] sm:$0xff] %v8977_v2  ;;  %v4228_v55 = vadd.f32 %v4227_v45, %v3882_v3  ;;  %2299 = vmatprep.mubr.f32.mxu0 %v2006_v41  ;;  %v4160_v63 = vadd.f32 %v4159_v6, %v4158_v22  ;;  %v4251_v0 = vrot.slane %v3886_v33, 4  ;;  %v4275_v62 = vrot.slane %v3890_v21, 4 }
 0x2f4   : > { %11183 = vst [vmem:[#allocation220_spill] sm:$0xff] %v8980_v16  ;;  %v4184_v12 = vadd.f32 %v4183_v57, %v4182_v59  ;;  %v4205_v8 = vrot.slane %v4204_v25, 2  ;;  %v4422_v18 = vmul.f32 0.125, %v4112_v53  ;;  %v4426_v40 = vmul.f32 0.125, %v4136_v49  ;;  %v1282_v59 = vld [vmem:[%s7436_s16 + $0x200] sm:$0xff] }
 0x2f5   : > { %v4229_v1 = vrot.slane %v4228_v55, 2  ;;  %v4252_v14 = vadd.f32 %v4251_v0, %v3886_v33  ;;  %v4276_v50 = vadd.f32 %v4275_v62, %v3890_v21  ;;  %v4430_v2 = vmul.f32 0.125, %v4160_v63  ;;  %v1286_v57 = vld [vmem:[%s7436_s16 + $0x220] sm:$0xff] }
 0x2f6   : > { %v4434_v46 = vmul.f32 0.125, %v4184_v12  ;;  %v8982_v29 = vmul.f32 %v1851_v44, %v1851_v44  ;;  %v4206_v23 = vadd.f32 %v4205_v8, %v4204_v25  ;;  %v4584_v22 = vsel %vm1938_vm3, %v4426_v40, %v4422_v18  ;;  %v1290_v49 = vld [vmem:[%s7436_s16 + $0x240] sm:$0xff] }
 0x2f7   : > { %v4230_v3 = vadd.f32 %v4229_v1, %v4228_v55  ;;  %v8986_v39 = vmul.f32 %v1855_v5, %v1855_v5  ;;  %v4253_v45 = vrot.slane %v4252_v14, 2  ;;  %v4277_v6 = vrot.slane %v4276_v50, 2  ;;  %v1294_v44 = vld [vmem:[%s7436_s16 + $0x260] sm:$0xff] }
 0x2f8   : > { %11184 = vst [vmem:[#allocation221_spill] sm:$0xff] %v8982_v29  ;;  %v4585_v53 = vsel %vm1940_vm4, %v4430_v2, %v4584_v22  ;;  %v4207_v33 = vrot.slane %v4206_v23, 1  ;;  %v8991_v41 = vmul.f32 %v4422_v18, %v4422_v18  ;;  %v8993_v63 = vmul.f32 %v4426_v40, %v4426_v40 }
 0x2f9   : > { %11185 = vst [vmem:[#allocation222_spill] sm:$0xff] %v8986_v39  ;;  %v4231_v21 = vrot.slane %v4230_v3, 1  ;;  %v4254_v25 = vadd.f32 %v4253_v45, %v4252_v14  ;;  %v4278_v55 = vadd.f32 %v4277_v6, %v4276_v50  ;;  %v4586_v12 = vsel %vm1942_vm5, %v4434_v46, %v4585_v53  ;;  %v3861_v6 = vld [vmem:[%s7444_s27 + $0x100] sm:$0xff] }
 0x2fa   : > { %11186 = vst [vmem:[#allocation223_spill] sm:$0xff] %v8991_v41  ;;  %11187 = vst [vmem:[#allocation224_spill] sm:$0xff] %v8993_v63  ;;  %v1682_v0 = vrot.slane %v1282_v59, 4  ;;  %v4208_v5 = vadd.f32 %v4207_v33, %v4206_v23  ;;  %v1706_v8 = vrot.slane %v1286_v57, 4  ;;  %v1730_v1 = vrot.slane %v1290_v49, 4 }
 0x2fb   : > { %v4232_v62 = vadd.f32 %v4231_v21, %v4230_v3  ;;  %v4255_v22 = vrot.slane %v4254_v25, 1  ;;  %v4279_v39 = vrot.slane %v4278_v55, 1  ;;  %v1754_v16 = vrot.slane %v1294_v44, 4 }
 0x2fc   : > { %v1683_v29 = vadd.f32 %v1682_v0, %v1282_v59  ;;  %v4438_v54 = vmul.f32 0.125, %v4208_v5  ;;  %v1707_v41 = vadd.f32 %v1706_v8, %v1286_v57  ;;  %v1731_v40 = vadd.f32 %v1730_v1, %v1290_v49  ;;  %v3869_v5 = vld [vmem:[%s7444_s27 + $0x140] sm:$0xff] }
 0x2fd   : > { %v4442_v18 = vmul.f32 0.125, %v4232_v62  ;;  %v4256_v63 = vadd.f32 %v4255_v22, %v4254_v25  ;;  %v4280_v14 = vadd.f32 %v4279_v39, %v4278_v55  ;;  %v1755_v45 = vadd.f32 %v1754_v16, %v1294_v44  ;;  %v3865_v55 = vld [vmem:[%s7444_s27 + $0x120] sm:$0xff] }
 0x2fe   : > { %v1684_v50 = vrot.slane %v1683_v29, 2  ;;  %v4587_v23 = vsel %vm1944_vm6, %v4438_v54, %v4586_v12  ;;  %v8999_v3 = vmul.f32 %v4430_v2, %v4430_v2  ;;  %v9001_v53 = vmul.f32 %v4434_v46, %v4434_v46  ;;  %v3873_v62 = vld [vmem:[%s7444_s27 + $0x160] sm:$0xff] }
 0x2ff   : > { %v1708_v59 = vrot.slane %v1707_v41, 2  ;;  %v4446_v33 = vmul.f32 0.125, %v4256_v63  ;;  %v4450_v21 = vmul.f32 0.125, %v4280_v14  ;;  %v4588_v57 = vsel %vm1946_vm7, %v4442_v18, %v4587_v23 }
 0x300   : > { %11188 = vst [vmem:[#allocation225_spill] sm:$0xff] %v8999_v3  ;;  %11189 = vst [vmem:[#allocation226_spill] sm:$0xff] %v9001_v53  ;;  %v1685_v49 = vadd.f32 %v1684_v50, %v1683_v29  ;;  %v1732_v0 = vrot.slane %v1731_v40, 2  ;;  %v1756_v39 = vrot.slane %v1755_v45, 2  ;;  %v4101_v16 = vrot.slane %v3861_v6, 4 }
 0x301   : > { %v1709_v25 = vadd.f32 %v1708_v59, %v1707_v41  ;;  %v4589_v44 = vsel %vm1948_vm8, %v4446_v33, %v4588_v57  ;;  %v9007_v12 = vmul.f32 %v4438_v54, %v4438_v54  ;;  %v9009_v2 = vmul.f32 %v4442_v18, %v4442_v18 }
 0x302   : > { %v1686_v46 = vrot.slane %v1685_v49, 1  ;;  %v4590_v63 = vsel %vm1950_vm9, %v4450_v21, %v4589_v44  ;;  %v1733_v1 = vadd.f32 %v1732_v0, %v1731_v40  ;;  %v1757_v22 = vadd.f32 %v1756_v39, %v1755_v45 }
 0x303   : > { %11190 = vst [vmem:[#allocation227_spill] sm:$0xff] %v9007_v12  ;;  %11191 = vst [vmem:[#allocation228_spill] sm:$0xff] %v9009_v2  ;;  %v1710_v8 = vrot.slane %v1709_v25, 1  ;;  %4898 = vmatprep.mubr.f32.mxu1 %v4590_v63  ;;  %v4102_v41 = vadd.f32 %v4101_v16, %v3861_v6  ;;  %v4125_v14 = vrot.slane %v3865_v55, 4  ;;  %v4149_v50 = vrot.slane %v3869_v5, 4  ;;  %v3877_v6 = vld [vmem:[%s7444_s27 + $0x180] sm:$0xff] }
 0x304   : > { %v1687_v29 = vadd.f32 %v1686_v46, %v1685_v49  ;;  %v1734_v59 = vrot.slane %v1733_v1, 1  ;;  %v1758_v57 = vrot.slane %v1757_v22, 1  ;;  %v4173_v54 = vrot.slane %v3873_v62, 4 }
 0x305   : > { %v1711_v23 = vadd.f32 %v1710_v8, %v1709_v25  ;;  %v4103_v18 = vrot.slane %v4102_v41, 2  ;;  %v4126_v2 = vadd.f32 %v4125_v14, %v3865_v55  ;;  %v4150_v53 = vadd.f32 %v4149_v50, %v3869_v5  ;;  %v3881_v55 = vld [vmem:[%s7444_s27 + $0x1a0] sm:$0xff] }
 0x306   : > { %v1842_v12 = vmul.f32 0.125, %v1687_v29  ;;  %v1735_v44 = vadd.f32 %v1734_v59, %v1733_v1  ;;  %v1759_v3 = vadd.f32 %v1758_v57, %v1757_v22  ;;  %v4174_v45 = vadd.f32 %v4173_v54, %v3873_v62  ;;  %v3885_v29 = vld [vmem:[%s7444_s27 + $0x1c0] sm:$0xff] }
 0x307   : > { %v1846_v40 = vmul.f32 0.125, %v1711_v23  ;;  %v9013_v0 = vmul.f32 %v4446_v33, %v4446_v33  ;;  %v4104_v49 = vadd.f32 %v4103_v18, %v4102_v41  ;;  %v4127_v39 = vrot.slane %v4126_v2, 2  ;;  %v3889_v50 = vld [vmem:[%s7444_s27 + $0x1e0] sm:$0xff] }
 0x308   : > { %v4151_v25 = vrot.slane %v4150_v53, 2  ;;  %v9016_v16 = vmul.f32 %v4450_v21, %v4450_v21  ;;  %v1850_v46 = vmul.f32 0.125, %v1735_v44  ;;  %v1854_v63 = vmul.f32 0.125, %v1759_v3 }
 0x309   : > { %11192 = vst [vmem:[#allocation229_spill] sm:$0xff] %v9013_v0  ;;  %v2001_v8 = vsel %vm1938_vm3, %v1846_v40, %v1842_v12  ;;  %v4105_v5 = vrot.slane %v4104_v49, 1  ;;  %v4128_v1 = vadd.f32 %v4127_v39, %v4126_v2  ;;  %v4175_v14 = vrot.slane %v4174_v45, 2 }
 0x30a   : > { %11193 = vst [vmem:[#allocation230_spill] sm:$0xff] %v9016_v16  ;;  %v4152_v22 = vadd.f32 %v4151_v25, %v4150_v53  ;;  %v2002_v33 = vsel %vm1940_vm4, %v1850_v46, %v2001_v8  ;;  %v9022_v62 = vmul.f32 %v1842_v12, %v1842_v12  ;;  %v9024_v41 = vmul.f32 %v1846_v40, %v1846_v40 }
 0x30b   : > { %v4197_v23 = vrot.slane %v3877_v6, 4  ;;  %v2003_v21 = vsel %vm1942_vm5, %v1854_v63, %v2002_v33  ;;  %v4106_v59 = vadd.f32 %v4105_v5, %v4104_v49  ;;  %v4129_v3 = vrot.slane %v4128_v1, 1 }
 0x30c   : > { %11194 = vst [vmem:[#allocation231_spill] sm:$0xff] %v9022_v62  ;;  %11195 = vst [vmem:[#allocation232_spill] sm:$0xff] %v9024_v41  ;;  %v4153_v57 = vrot.slane %v4152_v22, 1  ;;  %2300 = vmatmul.mubr.f32.gmra.mrb[4].mxu0 %v2003_v21  ;;  %v4176_v54 = vadd.f32 %v4175_v14, %v4174_v45  ;;  %v4221_v44 = vrot.slane %v3881_v55, 4  ;;  %v4245_v2 = vrot.slane %v3885_v29, 4 }
 0x30d   : > { %v4198_v18 = vadd.f32 %v4197_v23, %v3877_v6  ;;  %v4130_v53 = vadd.f32 %v4129_v3, %v4128_v1  ;;  %v4269_v12 = vrot.slane %v3889_v50, 4  ;;  %v4421_v25 = vmul.f32 0.125, %v4106_v59  ;;  %v3096_v1 = vld [vmem:[%s7442_s17 + $0x218] sm:$0xff] }
 0x30e   : > { %v4154_v39 = vadd.f32 %v4153_v57, %v4152_v22  ;;  %v4177_v40 = vrot.slane %v4176_v54, 1  ;;  %v4222_v16 = vadd.f32 %v4221_v44, %v3881_v55  ;;  %v4246_v0 = vadd.f32 %v4245_v2, %v3885_v29  ;;  %v3100_v23 = vld [vmem:[%s7442_s17 + $0x238] sm:$0xff] }
 0x30f   : > { %v4199_v8 = vrot.slane %v4198_v18, 2  ;;  %v9028_v41 = vmul.f32 %v1850_v46, %v1850_v46  ;;  %v4270_v49 = vadd.f32 %v4269_v12, %v3889_v50  ;;  %v4425_v5 = vmul.f32 0.125, %v4130_v53 }
 0x310   : > { %v4429_v33 = vmul.f32 0.125, %v4154_v39  ;;  %v4178_v21 = vadd.f32 %v4177_v40, %v4176_v54  ;;  %v4223_v6 = vrot.slane %v4222_v16, 2  ;;  %v4247_v14 = vrot.slane %v4246_v0, 2 }
 0x311   : > { %11196 = vst [vmem:[#allocation233_spill] sm:$0xff] %v9028_v41  ;;  %v4200_v45 = vadd.f32 %v4199_v8, %v4198_v18  ;;  %v9032_v22 = vmul.f32 %v1854_v63, %v1854_v63  ;;  %v4271_v3 = vrot.slane %v4270_v49, 2  ;;  %v4577_v59 = vsel %vm1938_vm3, %v4425_v5, %v4421_v25  ;;  %v3104_v18 = vld [vmem:[%s7442_s17 + $0x258] sm:$0xff] }
 0x312   : > { %v9035_v55 = vmul.f32 %v4421_v25, %v4421_v25  ;;  %v4224_v29 = vadd.f32 %v4223_v6, %v4222_v16  ;;  %v4248_v50 = vadd.f32 %v4247_v14, %v4246_v0  ;;  %v4433_v57 = vmul.f32 0.125, %v4178_v21  ;;  %v3108_v8 = vld [vmem:[%s7442_s17 + $0x278] sm:$0xff] }
 0x313   : > { %11197 = vst [vmem:[#allocation234_spill] sm:$0xff] %v9032_v22  ;;  %v4201_v46 = vrot.slane %v4200_v45, 1  ;;  %v4272_v44 = vadd.f32 %v4271_v3, %v4270_v49  ;;  %v4578_v54 = vsel %vm1940_vm4, %v4429_v33, %v4577_v59  ;;  %v3531_v2 = vrot.slane %v3096_v1, 4 }
 0x314   : > { %11198 = vst [vmem:[#allocation235_spill] sm:$0xff] %v9035_v55  ;;  %v3555_v53 = vrot.slane %v3100_v23, 4  ;;  %v4225_v12 = vrot.slane %v4224_v29, 1  ;;  %v4249_v63 = vrot.slane %v4248_v50, 1  ;;  %v9039_v40 = vmul.f32 %v4425_v5, %v4425_v5 }
 0x315   : > { %v4202_v39 = vadd.f32 %v4201_v46, %v4200_v45  ;;  %v4273_v22 = vrot.slane %v4272_v44, 1  ;;  %v4579_v25 = vsel %vm1942_vm5, %v4433_v57, %v4578_v54  ;;  %v3532_v55 = vadd.f32 %v3531_v2, %v3096_v1 }
 0x316   : > { %11199 = vst [vmem:[#allocation236_spill] sm:$0xff] %v9039_v40  ;;  %v3556_v16 = vadd.f32 %v3555_v53, %v3100_v23  ;;  %v4226_v0 = vadd.f32 %v4225_v12, %v4224_v29  ;;  %v4250_v21 = vadd.f32 %v4249_v63, %v4248_v50  ;;  %v3579_v6 = vrot.slane %v3104_v18, 4  ;;  %v3112_v23 = vld [vmem:[%s7442_s17 + $0x298] sm:$0xff] }
 0x317   : > { %v4437_v49 = vmul.f32 0.125, %v4202_v39  ;;  %v4274_v14 = vadd.f32 %v4273_v22, %v4272_v44  ;;  %v3533_v3 = vrot.slane %v3532_v55, 2  ;;  %v3603_v59 = vrot.slane %v3108_v8, 4  ;;  %v3116_v39 = vld [vmem:[%s7442_s17 + $0x2b8] sm:$0xff] }
 0x318   : > { %v3557_v45 = vrot.slane %v3556_v16, 2  ;;  %v4441_v46 = vmul.f32 0.125, %v4226_v0  ;;  %v9043_v5 = vmul.f32 0.125, %v4250_v21  ;;  %v9046_v54 = vmul.f32 %v4429_v33, %v4429_v33  ;;  %v3120_v12 = vld [vmem:[%s7442_s17 + $0x2d8] sm:$0xff] }
 0x319   : > { %v4580_v40 = vsel %vm1944_vm6, %v4437_v49, %v4579_v25  ;;  %v9048_v1 = vmul.f32 0.125, %v4274_v14  ;;  %v3534_v29 = vadd.f32 %v3533_v3, %v3532_v55  ;;  %v3580_v22 = vadd.f32 %v3579_v6, %v3104_v18  ;;  %v3124_v0 = vld [vmem:[%s7442_s17 + $0x2f8] sm:$0xff] }
 0x31a   : > { %11200 = vst [vmem:[#allocation237_spill] sm:$0xff] %v9046_v54  ;;  %v3558_v50 = vadd.f32 %v3557_v45, %v3556_v16  ;;  %v4581_v44 = vsel %vm1946_vm7, %v4441_v46, %v4580_v40  ;;  %v9052_v2 = vmul.f32 %v4433_v57, %v4433_v57  ;;  %v9054_v53 = vmul.f32 %v4437_v49, %v4437_v49  ;;  %v3128_v18 = vld [vmem:[%s7442_s17 + $0x318] sm:$0xff] }
 0x31b   : > { %v3604_v63 = vadd.f32 %v3603_v59, %v3108_v8  ;;  %v4582_v33 = vsel %vm1948_vm8, %v9043_v5, %v4581_v44  ;;  %v9060_v25 = vmul.f32 %v4441_v46, %v4441_v46  ;;  %v3535_v21 = vrot.slane %v3534_v29, 1 }
 0x31c   : > { %11201 = vst [vmem:[#allocation238_spill] sm:$0xff] %v9052_v2  ;;  %11202 = vst [vmem:[#allocation239_spill] sm:$0xff] %v9054_v53  ;;  %v3559_v14 = vrot.slane %v3558_v50, 1  ;;  %v4583_v55 = vsel %vm1950_vm9, %v9048_v1, %v4582_v33  ;;  %v3581_v40 = vrot.slane %v3580_v22, 2  ;;  %v3627_v16 = vrot.slane %v3112_v23, 4 }
 0x31d   : > { %11203 = vst [vmem:[#allocation240_spill] sm:$0xff] %v9060_v25  ;;  %v3605_v57 = vrot.slane %v3604_v63, 2  ;;  %4899 = vmatmul.mubr.f32.gmra.mrb[2].mxu1 %v4583_v55  ;;  %v3536_v49 = vadd.f32 %v3535_v21, %v3534_v29  ;;  %v3651_v3 = vrot.slane %v3116_v39, 4  ;;  %v3675_v8 = vrot.slane %v3120_v12, 4 }
 0x31e   : > { %v3560_v6 = vadd.f32 %v3559_v14, %v3558_v50  ;;  %v3582_v45 = vadd.f32 %v3581_v40, %v3580_v22  ;;  %v3628_v44 = vadd.f32 %v3627_v16, %v3112_v23  ;;  %v3699_v46 = vrot.slane %v3124_v0, 4 }
 0x31f   : > { %v3606_v59 = vadd.f32 %v3605_v57, %v3604_v63  ;;  %v3652_v25 = vadd.f32 %v3651_v3, %v3116_v39  ;;  %v3676_v53 = vadd.f32 %v3675_v8, %v3120_v12  ;;  %v3723_v2 = vrot.slane %v3128_v18, 4  ;;  %v3095_v39 = vld [vmem:[%s7442_s17 + $0x210] sm:$0xff] }
 0x320   : > { %v9066_v54 = vmul.f32 0.125, %v3536_v49  ;;  %v3583_v33 = vrot.slane %v3582_v45, 1  ;;  %v3629_v62 = vrot.slane %v3628_v44, 2  ;;  %v3700_v17 = vadd.f32 %v3699_v46, %v3124_v0  ;;  %v3099_v49 = vld [vmem:[%s7442_s17 + $0x230] sm:$0xff] }
 0x321   : > { %v3607_v41 = vrot.slane %v3606_v59, 1  ;;  %v3653_v55 = vrot.slane %v3652_v25, 2  ;;  %v3677_v29 = vrot.slane %v3676_v53, 2  ;;  %v3724_v50 = vadd.f32 %v3723_v2, %v3128_v18 }
 0x322   : > { %11204 = vst [vmem:[#allocation241_spill] sm:$0xff] %v9066_v54  ;;  %v9068_v21 = vmul.f32 0.125, %v3560_v6  ;;  %v3584_v22 = vadd.f32 %v3583_v33, %v3582_v45  ;;  %v3630_v23 = vadd.f32 %v3629_v62, %v3628_v44  ;;  %v3701_v14 = vrot.slane %v3700_v17, 2 }
 0x323   : > { %v3608_v63 = vadd.f32 %v3607_v41, %v3606_v59  ;;  %v3654_v40 = vadd.f32 %v3653_v55, %v3652_v25  ;;  %v3678_v12 = vadd.f32 %v3677_v29, %v3676_v53  ;;  %v3725_v57 = vrot.slane %v3724_v50, 2  ;;  %v3103_v59 = vld [vmem:[%s7442_s17 + $0x250] sm:$0xff] }
 0x324   : > { %11205 = vst [vmem:[#allocation242_spill] sm:$0xff] %v9068_v21  ;;  %v4806_v16 = vsel %vm1938_vm3, %v9068_v21, %v9066_v54  ;;  %v3631_v0 = vrot.slane %v3630_v23, 1  ;;  %v3702_v3 = vadd.f32 %v3701_v14, %v3700_v17  ;;  %v9075_v8 = vmul.f32 0.125, %v3584_v22 }
 0x325   : > { %v9077_v2 = vmul.f32 0.125, %v3608_v63  ;;  %v3655_v41 = vrot.slane %v3654_v40, 1  ;;  %v3679_v62 = vrot.slane %v3678_v12, 1  ;;  %v3726_v18 = vadd.f32 %v3725_v57, %v3724_v50  ;;  %v3107_v50 = vld [vmem:[%s7442_s17 + $0x270] sm:$0xff] }
 0x326   : > { %11206 = vst [vmem:[#allocation243_spill] sm:$0xff] %v9075_v8  ;;  %v3525_v6 = vrot.slane %v3095_v39, 4  ;;  %v3632_v25 = vadd.f32 %v3631_v0, %v3630_v23  ;;  %v3703_v45 = vrot.slane %v3702_v3, 1  ;;  %v4807_v53 = vsel %vm1940_vm4, %v9075_v8, %v4806_v16  ;;  %v3111_v0 = vld [vmem:[%s7442_s17 + $0x290] sm:$0xff] }
 0x327   : > { %11207 = vst [vmem:[#allocation244_spill] sm:$0xff] %v9077_v2  ;;  %v3549_v44 = vrot.slane %v3099_v49, 4  ;;  %v3656_v46 = vadd.f32 %v3655_v41, %v3654_v40  ;;  %v3680_v17 = vadd.f32 %v3679_v62, %v3678_v12  ;;  %v3727_v33 = vrot.slane %v3726_v18, 1 }
 0x328   : > { %v4808_v55 = vsel %vm1942_vm5, %v9077_v2, %v4807_v53  ;;  %v3704_v29 = vadd.f32 %v3703_v45, %v3702_v3  ;;  %v9084_v22 = vmul.f32 0.125, %v3632_v25  ;;  %v3526_v63 = vadd.f32 %v3525_v6, %v3095_v39  ;;  %v3115_v3 = vld [vmem:[%s7442_s17 + $0x2b0] sm:$0xff] }
 0x329   : > { %v3550_v23 = vadd.f32 %v3549_v44, %v3099_v49  ;;  %v3728_v14 = vadd.f32 %v3727_v33, %v3726_v18  ;;  %v9087_v57 = vmul.f32 0.125, %v3656_v46  ;;  %v9089_v16 = vmul.f32 0.125, %v3680_v17  ;;  %v3119_v53 = vld [vmem:[%s7442_s17 + $0x2d0] sm:$0xff] }
 0x32a   : > { %11208 = vst [vmem:[#allocation245_spill] sm:$0xff] %v9084_v22  ;;  %v3573_v40 = vrot.slane %v3103_v59, 4  ;;  %v9092_v12 = vmul.f32 0.125, %v3704_v29  ;;  %v4809_v41 = vsel %vm1944_vm6, %v9084_v22, %v4808_v55  ;;  %v3527_v62 = vrot.slane %v3526_v63, 2  ;;  %v3123_v55 = vld [vmem:[%s7442_s17 + $0x2f0] sm:$0xff] }
 0x32b   : > { %11209 = vst [vmem:[#allocation246_spill] sm:$0xff] %v9087_v57  ;;  %11210 = vst [vmem:[#allocation247_spill] sm:$0xff] %v9089_v16  ;;  %v3551_v25 = vrot.slane %v3550_v23, 2  ;;  %v9097_v45 = vmul.f32 0.125, %v3728_v14  ;;  %v4810_v39 = vsel %vm1946_vm7, %v9087_v57, %v4809_v41  ;;  %v3597_v18 = vrot.slane %v3107_v50, 4  ;;  %v3127_v57 = vld [vmem:[%s7442_s17 + $0x310] sm:$0xff] }
 0x32c   : > { %11211 = vst [vmem:[#allocation248_spill] sm:$0xff] %v9092_v12  ;;  %v3574_v49 = vadd.f32 %v3573_v40, %v3103_v59  ;;  %v4811_v6 = vsel %vm1948_vm8, %v9089_v16, %v4810_v39  ;;  %v3528_v44 = vadd.f32 %v3527_v62, %v3526_v63  ;;  %v3621_v17 = vrot.slane %v3111_v0, 4 }
 0x32d   : > { %11212 = vst [vmem:[#allocation249_spill] sm:$0xff] %v9097_v45  ;;  %v3552_v46 = vadd.f32 %v3551_v25, %v3550_v23  ;;  %v4812_v33 = vsel %vm1950_vm9, %v9092_v12, %v4811_v6  ;;  %v3598_v14 = vadd.f32 %v3597_v18, %v3107_v50  ;;  %v3645_v22 = vrot.slane %v3115_v3, 4 }
 0x32e   : > { %v3575_v29 = vrot.slane %v3574_v49, 2  ;;  %v6881_v2 = vpack.c.bf16 %v9097_v45, %v4812_v33  ;;  %v3529_v41 = vrot.slane %v3528_v44, 1  ;;  %v3622_v40 = vadd.f32 %v3621_v17, %v3111_v0 }
 0x32f   : > { %v3553_v59 = vrot.slane %v3552_v46, 1  ;;  %v3599_v21 = vrot.slane %v3598_v14, 2  ;;  %v3646_v39 = vadd.f32 %v3645_v22, %v3115_v3  ;;  %v3669_v16 = vrot.slane %v3119_v53, 4 }
 0x330   : > { %v3576_v8 = vadd.f32 %v3575_v29, %v3574_v49  ;;  %6882 = vmatprep.subr.bf16.mxu1 %v6881_v2  ;;  %v3530_v63 = vadd.f32 %v3529_v41, %v3528_v44  ;;  %v3623_v62 = vrot.slane %v3622_v40, 2  ;;  %v3693_v25 = vrot.slane %v3123_v55, 4 }
 0x331   : > { %v3554_v23 = vadd.f32 %v3553_v59, %v3552_v46  ;;  %v3600_v12 = vadd.f32 %v3599_v21, %v3598_v14  ;;  %v3647_v54 = vrot.slane %v3646_v39, 2  ;;  %v3670_v50 = vadd.f32 %v3669_v16, %v3119_v53  ;;  %v1225_v59 = vld [vmem:[%s7436_s16 + $0x38] sm:$0xff] }
 0x332   : > { %v3577_v6 = vrot.slane %v3576_v8, 1  ;;  %v3624_v18 = vadd.f32 %v3623_v62, %v3622_v40  ;;  %v3694_v33 = vadd.f32 %v3693_v25, %v3123_v55  ;;  %v3717_v45 = vrot.slane %v3127_v57, 4  ;;  %v1221_v55 = vld [vmem:[%s7436_s16 + $0x18] sm:$0xff] }
 0x333   : > { %v9109_v28 = vmul.f32 0.125, %v3530_v63  ;;  %v3601_v49 = vrot.slane %v3600_v12, 1  ;;  %v3648_v22 = vadd.f32 %v3647_v54, %v3646_v39  ;;  %v3671_v3 = vrot.slane %v3670_v50, 2  ;;  %v1229_v62 = vld [vmem:[%s7436_s16 + $0x58] sm:$0xff] }
 0x334   : > { %v3578_v0 = vadd.f32 %v3577_v6, %v3576_v8  ;;  %v3625_v2 = vrot.slane %v3624_v18, 1  ;;  %v3695_v44 = vrot.slane %v3694_v33, 2  ;;  %v3718_v46 = vadd.f32 %v3717_v45, %v3127_v57 }
 0x335   : > { %11213 = vst [vmem:[#allocation250_spill] sm:$0xff] %v9109_v28  ;;  %v9111_v17 = vmul.f32 0.125, %v3554_v23  ;;  %v3602_v29 = vadd.f32 %v3601_v49, %v3600_v12  ;;  %v3649_v21 = vrot.slane %v3648_v22, 1  ;;  %v3672_v16 = vadd.f32 %v3671_v3, %v3670_v50 }
 0x336   : > { %v9113_v53 = vmul.f32 0.125, %v3578_v0  ;;  %v3626_v14 = vadd.f32 %v3625_v2, %v3624_v18  ;;  %v3696_v41 = vadd.f32 %v3695_v44, %v3694_v33  ;;  %v3719_v8 = vrot.slane %v3718_v46, 2  ;;  %v1233_v33 = vld [vmem:[%s7436_s16 + $0x78] sm:$0xff] }
 0x337   : > { %11214 = vst [vmem:[#allocation251_spill] sm:$0xff] %v9111_v17  ;;  %v4799_v54 = vsel %vm1938_vm3, %v9111_v17, %v9109_v28  ;;  %v3650_v40 = vadd.f32 %v3649_v21, %v3648_v22  ;;  %v3673_v57 = vrot.slane %v3672_v16, 1  ;;  %v9120_v45 = vmul.f32 0.125, %v3602_v29  ;;  %v1237_v2 = vld [vmem:[%s7436_s16 + $0x98] sm:$0xff] }
 0x338   : > { %11215 = vst [vmem:[#allocation252_spill] sm:$0xff] %v9113_v53  ;;  %v4800_v12 = vsel %vm1940_vm4, %v9113_v53, %v4799_v54  ;;  %v3697_v39 = vrot.slane %v3696_v41, 1  ;;  %v3720_v63 = vadd.f32 %v3719_v8, %v3718_v46  ;;  %v9124_v23 = vmul.f32 0.125, %v3626_v14  ;;  %v1241_v54 = vld [vmem:[%s7436_s16 + $0xb8] sm:$0xff] }
 0x339   : > { %11216 = vst [vmem:[#allocation253_spill] sm:$0xff] %v9120_v45  ;;  %v1316_v25 = vrot.slane %v1221_v55, 4  ;;  %v3674_v6 = vadd.f32 %v3673_v57, %v3672_v16  ;;  %v9127_v50 = vmul.f32 0.125, %v3650_v40  ;;  %v4801_v18 = vsel %vm1942_vm5, %v9120_v45, %v4800_v12  ;;  %v1245_v12 = vld [vmem:[%s7436_s16 + $0xd8] sm:$0xff] }
 0x33a   : > { %11217 = vst [vmem:[#allocation254_spill] sm:$0xff] %v9124_v23  ;;  %v1340_v0 = vrot.slane %v1225_v59, 4  ;;  %v3698_v49 = vadd.f32 %v3697_v39, %v3696_v41  ;;  %v3721_v22 = vrot.slane %v3720_v63, 1  ;;  %v4802_v3 = vsel %vm1944_vm6, %v9124_v23, %v4801_v18 }
 0x33b   : > { %11218 = vst [vmem:[#allocation255_spill] sm:$0xff] %v9127_v50  ;;  %v1317_v44 = vadd.f32 %v1316_v25, %v1221_v55  ;;  %v9135_v46 = vmul.f32 0.125, %v3674_v6  ;;  %v4803_v29 = vsel %vm1946_vm7, %v9127_v50, %v4802_v3  ;;  %v1364_v16 = vrot.slane %v1229_v62, 4 }
 0x33c   : > { %v1341_v21 = vadd.f32 %v1340_v0, %v1225_v59  ;;  %v3722_v14 = vadd.f32 %v3721_v22, %v3720_v63  ;;  %v9139_v8 = vmul.f32 0.125, %v3698_v49  ;;  %v1388_v41 = vrot.slane %v1233_v33, 4  ;;  %v1249_v63 = vld [vmem:[%s7436_s16 + $0xf8] sm:$0xff] }
 0x33d   : > { %11219 = vst [vmem:[#allocation256_spill] sm:$0xff] %v9135_v46  ;;  %v1318_v40 = vrot.slane %v1317_v44, 2  ;;  %v4804_v57 = vsel %vm1948_vm8, %v9135_v46, %v4803_v29  ;;  %v1365_v55 = vadd.f32 %v1364_v16, %v1229_v62  ;;  %v1412_v25 = vrot.slane %v1237_v2, 4 }
 0x33e   : > { %11220 = vst [vmem:[#allocation257_spill] sm:$0xff] %v9139_v8  ;;  %v1342_v39 = vrot.slane %v1341_v21, 2  ;;  %v9145_v6 = vmul.f32 0.125, %v3722_v14  ;;  %v4805_v59 = vsel %vm1950_vm9, %v9139_v8, %v4804_v57  ;;  %v1389_v0 = vadd.f32 %v1388_v41, %v1233_v33 }
 0x33f   : > { %v1319_v18 = vadd.f32 %v1318_v40, %v1317_v44  ;;  %v1366_v22 = vrot.slane %v1365_v55, 2  ;;  %v1413_v3 = vadd.f32 %v1412_v25, %v1237_v2  ;;  %v1436_v50 = vrot.slane %v1241_v54, 4 }
 0x340   : > { %11221 = vst [vmem:[#allocation258_spill] sm:$0xff] %v9145_v6  ;;  %v1343_v49 = vadd.f32 %v1342_v39, %v1341_v21  ;;  %v6883_v23 = vpack.c.bf16 %v9145_v6, %v4805_v59  ;;  %v1390_v29 = vrot.slane %v1389_v0, 2  ;;  %v1460_v46 = vrot.slane %v1245_v12, 4  ;;  %v3894_v39 = vld [vmem:[%s7444_s27 + $0x208] sm:$0xff] }
 0x341   : > { %v1320_v45 = vrot.slane %v1319_v18, 1  ;;  %v1367_v16 = vadd.f32 %v1366_v22, %v1365_v55  ;;  %v1414_v14 = vrot.slane %v1413_v3, 2  ;;  %v1437_v53 = vadd.f32 %v1436_v50, %v1241_v54 }
 0x342   : > { %v1344_v62 = vrot.slane %v1343_v49, 1  ;;  %6884 = vmatpush1.bf16.xpose.msra.mxu1 %v6883_v23  ;;  %v1391_v57 = vadd.f32 %v1390_v29, %v1389_v0  ;;  %v1461_v44 = vadd.f32 %v1460_v46, %v1245_v12  ;;  %v1484_v33 = vrot.slane %v1249_v63, 4  ;;  %v3898_v12 = vld [vmem:[%s7444_s27 + $0x228] sm:$0xff] }
 0x343   : > { %v1321_v17 = vadd.f32 %v1320_v45, %v1319_v18  ;;  %v1368_v21 = vrot.slane %v1367_v16, 1  ;;  %v1415_v2 = vadd.f32 %v1414_v14, %v1413_v3  ;;  %v1438_v41 = vrot.slane %v1437_v53, 2  ;;  %v3902_v29 = vld [vmem:[%s7444_s27 + $0x248] sm:$0xff] }
 0x344   : > { %v1345_v40 = vadd.f32 %v1344_v62, %v1343_v49  ;;  %v1392_v25 = vrot.slane %v1391_v57, 1  ;;  %v1462_v59 = vrot.slane %v1461_v44, 2  ;;  %v1485_v6 = vadd.f32 %v1484_v33, %v1249_v63 }
 0x345   : > { %v9152_v8 = vmul.f32 0.125, %v1321_v17  ;;  %v1369_v28 = vadd.f32 %v1368_v21, %v1367_v16  ;;  %v1416_v55 = vrot.slane %v1415_v2, 1  ;;  %v1439_v50 = vadd.f32 %v1438_v41, %v1437_v53 }
 0x346   : > { %v9154_v23 = vmul.f32 0.125, %v1345_v40  ;;  %v1393_v45 = vadd.f32 %v1392_v25, %v1391_v57  ;;  %v1463_v46 = vadd.f32 %v1462_v59, %v1461_v44  ;;  %v1486_v54 = vrot.slane %v1485_v6, 2 }
 0x347   : > { %11222 = vst [vmem:[#allocation259_spill] sm:$0xff] %v9152_v8  ;;  %v4299_v18 = vrot.slane %v3894_v39, 4  ;;  %v1417_v0 = vadd.f32 %v1416_v55, %v1415_v2  ;;  %v1440_v49 = vrot.slane %v1439_v50, 1  ;;  %v9157_v22 = vmul.f32 0.125, %v1369_v28  ;;  %v3906_v28 = vld [vmem:[%s7444_s27 + $0x268] sm:$0xff]  ;;  %v1220_v2 = vld [vmem:[%s7436_s16 + $0x10] sm:$0xff] }
 0x348   : > { %11223 = vst [vmem:[#allocation260_spill] sm:$0xff] %v9154_v23  ;;  %v1966_v17 = vsel %vm1938_vm3, %v9154_v23, %v9152_v8  ;;  %v1464_v63 = vrot.slane %v1463_v46, 1  ;;  %v1487_v3 = vadd.f32 %v1486_v54, %v1485_v6  ;;  %v9162_v53 = vmul.f32 0.125, %v1393_v45  ;;  %v1224_v54 = vld [vmem:[%s7436_s16 + $0x30] sm:$0xff] }
 0x349   : > { %11224 = vst [vmem:[#allocation261_spill] sm:$0xff] %v9157_v22  ;;  %v4300_v62 = vadd.f32 %v4299_v18, %v3894_v39  ;;  %v1441_v16 = vadd.f32 %v1440_v49, %v1439_v50  ;;  %v9165_v14 = vmul.f32 0.125, %v1417_v0  ;;  %v1967_v57 = vsel %vm1940_vm4, %v9157_v22, %v1966_v17  ;;  %v1228_v17 = vld [vmem:[%s7436_s16 + $0x50] sm:$0xff] }
 0x34a   : > { %11225 = vst [vmem:[#allocation262_spill] sm:$0xff] %v9162_v53  ;;  %v4323_v44 = vrot.slane %v3898_v12, 4  ;;  %v1465_v33 = vadd.f32 %v1464_v63, %v1463_v46  ;;  %v1488_v40 = vrot.slane %v1487_v3, 1  ;;  %v1968_v21 = vsel %vm1942_vm5, %v9162_v53, %v1967_v57 }
 0x34b   : > { %11226 = vst [vmem:[#allocation263_spill] sm:$0xff] %v9165_v14  ;;  %v4301_v6 = vrot.slane %v4300_v62, 2  ;;  %v9173_v41 = vmul.f32 0.125, %v1441_v16  ;;  %v1969_v39 = vsel %vm1944_vm6, %v9165_v14, %v1968_v21  ;;  %v4347_v59 = vrot.slane %v3902_v29, 4 }
 0x34c   : > { %v4324_v25 = vadd.f32 %v4323_v44, %v3898_v12  ;;  %v1489_v55 = vadd.f32 %v1488_v40, %v1487_v3  ;;  %v9177_v50 = vmul.f32 0.125, %v1465_v33  ;;  %v4371_v46 = vrot.slane %v3906_v28, 4  ;;  %v1232_v40 = vld [vmem:[%s7436_s16 + $0x70] sm:$0xff] }
 0x34d   : > { %11227 = vst [vmem:[#allocation264_spill] sm:$0xff] %v9173_v41  ;;  %v4302_v45 = vadd.f32 %v4301_v6, %v4300_v62  ;;  %v1970_v18 = vsel %vm1946_vm7, %v9173_v41, %v1969_v39  ;;  %v4348_v49 = vadd.f32 %v4347_v59, %v3902_v29  ;;  %v1310_v63 = vrot.slane %v1220_v2, 4 }
 0x34e   : > { %11228 = vst [vmem:[#allocation265_spill] sm:$0xff] %v9177_v50  ;;  %v4325_v0 = vrot.slane %v4324_v25, 2  ;;  %v9183_v16 = vmul.f32 0.125, %v1489_v55  ;;  %v1971_v12 = vsel %vm1948_vm8, %v9177_v50, %v1970_v18  ;;  %v4372_v3 = vadd.f32 %v4371_v46, %v3906_v28 }
 0x34f   : > { %v4303_v57 = vrot.slane %v4302_v45, 1  ;;  %v4349_v33 = vrot.slane %v4348_v49, 2  ;;  %v1311_v62 = vadd.f32 %v1310_v63, %v1220_v2  ;;  %v1334_v21 = vrot.slane %v1224_v54, 4 }
 0x350   : > { %11229 = vst [vmem:[#allocation266_spill] sm:$0xff] %v9183_v16  ;;  %v4326_v44 = vadd.f32 %v4325_v0, %v4324_v25  ;;  %v1972_v6 = vsel %vm1950_vm9, %v9183_v16, %v1971_v12  ;;  %v4373_v29 = vrot.slane %v4372_v3, 2  ;;  %v1358_v59 = vrot.slane %v1228_v17, 4  ;;  %v1236_v0 = vld [vmem:[%s7436_s16 + $0x90] sm:$0xff] }
 0x351   : > { %v4304_v39 = vadd.f32 %v4303_v57, %v4302_v45  ;;  %2369 = vmatprep.mubr.f32.mxu0 %v1972_v6  ;;  %v4350_v41 = vadd.f32 %v4349_v33, %v4348_v49  ;;  %v1312_v14 = vrot.slane %v1311_v62, 2  ;;  %v1335_v53 = vadd.f32 %v1334_v21, %v1224_v54  ;;  %v1240_v6 = vld [vmem:[%s7436_s16 + $0xb0] sm:$0xff] }
 0x352   : > { %v4327_v55 = vrot.slane %v4326_v44, 1  ;;  %v4374_v18 = vadd.f32 %v4373_v29, %v4372_v3  ;;  %v1359_v28 = vadd.f32 %v1358_v59, %v1228_v17  ;;  %v1382_v25 = vrot.slane %v1232_v40, 4 }
 0x353   : > { %v4454_v50 = vmul.f32 0.125, %v4304_v39  ;;  %v4351_v2 = vrot.slane %v4350_v41, 1  ;;  %v1313_v63 = vadd.f32 %v1312_v14, %v1311_v62  ;;  %v1336_v22 = vrot.slane %v1335_v53, 2 }
 0x354   : > { %v4328_v46 = vadd.f32 %v4327_v55, %v4326_v44  ;;  %v9193_v45 = vmul.f32 %v9043_v5, %v9043_v5  ;;  %v4375_v12 = vrot.slane %v4374_v18, 1  ;;  %v1360_v57 = vrot.slane %v1359_v28, 2 }
 0x355   : > { %v1383_v49 = vadd.f32 %v1382_v25, %v1232_v40  ;;  %v4352_v33 = vadd.f32 %v4351_v2, %v4350_v41  ;;  %v1314_v3 = vrot.slane %v1313_v63, 1  ;;  %v1337_v21 = vadd.f32 %v1336_v22, %v1335_v53  ;;  %v1244_v41 = vld [vmem:[%s7436_s16 + $0xd0] sm:$0xff] }
 0x356   : > { %11230 = vst [vmem:[#allocation267_spill] sm:$0xff] %v9193_v45  ;;  %v4458_v54 = vmul.f32 0.125, %v4328_v46  ;;  %v4376_v17 = vadd.f32 %v4375_v12, %v4374_v18  ;;  %v1361_v44 = vadd.f32 %v1360_v57, %v1359_v28  ;;  %v1406_v29 = vrot.slane %v1236_v0, 4 }
 0x357   : > { %v1384_v39 = vrot.slane %v1383_v49, 2  ;;  %v9198_v14 = vmul.f32 %v9048_v1, %v9048_v1  ;;  %v9200_v5 = vmul.f32 0.125, %v4352_v33  ;;  %v1315_v59 = vadd.f32 %v1314_v3, %v1313_v63  ;;  %v1248_v1 = vld [vmem:[%s7436_s16 + $0xf0] sm:$0xff] }
 0x358   : > { %v4608_v62 = vsel %vm1938_vm3, %v4458_v54, %v4454_v50  ;;  %v9203_v40 = vmul.f32 0.125, %v4376_v17  ;;  %v1338_v55 = vrot.slane %v1337_v21, 1  ;;  %v1362_v22 = vrot.slane %v1361_v44, 1 }
 0x359   : > { %11231 = vst [vmem:[#allocation268_spill] sm:$0xff] %v9198_v14  ;;  %v1385_v53 = vadd.f32 %v1384_v39, %v1383_v49  ;;  %v4609_v18 = vsel %vm1940_vm4, %v9200_v5, %v4608_v62  ;;  %v9208_v28 = vmul.f32 %v4454_v50, %v4454_v50  ;;  %v1407_v25 = vadd.f32 %v1406_v29, %v1236_v0  ;;  %v3893_v39 = vld [vmem:[%s7444_s27 + $0x200] sm:$0xff] }
 0x35a   : > { %v1430_v46 = vrot.slane %v1240_v6, 4  ;;  %v4610_v2 = vsel %vm1942_vm5, %v9203_v40, %v4609_v18  ;;  %v9213_v63 = vmul.f32 %v4458_v54, %v4458_v54  ;;  %v1339_v12 = vadd.f32 %v1338_v55, %v1337_v21  ;;  %v3897_v14 = vld [vmem:[%s7444_s27 + $0x220] sm:$0xff] }
 0x35b   : > { %11232 = vst [vmem:[#allocation269_spill] sm:$0xff] %v9208_v28  ;;  %v1363_v57 = vadd.f32 %v1362_v22, %v1361_v44  ;;  %4903 = vmatprep.mubr.f32.mxu1 %v4610_v2  ;;  %v1386_v33 = vrot.slane %v1385_v53, 1  ;;  %v1408_v3 = vrot.slane %v1407_v25, 2  ;;  %v1454_v17 = vrot.slane %v1244_v41, 4 }
 0x35c   : > { %11233 = vst [vmem:[#allocation270_spill] sm:$0xff] %v9213_v63  ;;  %v1431_v49 = vadd.f32 %v1430_v46, %v1240_v6  ;;  %v1478_v62 = vrot.slane %v1248_v1, 4  ;;  %v9217_v50 = vmul.f32 0.125, %v1315_v59  ;;  %v9219_v0 = vmul.f32 0.125, %v1339_v12  ;;  %v3901_v12 = vld [vmem:[%s7444_s27 + $0x240] sm:$0xff] }
 0x35d   : > { %v9221_v29 = vmul.f32 0.125, %v1363_v57  ;;  %v1387_v54 = vadd.f32 %v1386_v33, %v1385_v53  ;;  %v1409_v18 = vadd.f32 %v1408_v3, %v1407_v25  ;;  %v1455_v44 = vadd.f32 %v1454_v17, %v1244_v41  ;;  %v3905_v25 = vld [vmem:[%s7444_s27 + $0x260] sm:$0xff] }
 0x35e   : > { %11234 = vst [vmem:[#allocation271_spill] sm:$0xff] %v9217_v50  ;;  %11235 = vst [vmem:[#allocation272_spill] sm:$0xff] %v9219_v0  ;;  %v1432_v21 = vrot.slane %v1431_v49, 2  ;;  %v1479_v55 = vadd.f32 %v1478_v62, %v1248_v1  ;;  %v1959_v6 = vsel %vm1938_vm3, %v9219_v0, %v9217_v50  ;;  %v4293_v22 = vrot.slane %v3893_v39, 4 }
 0x35f   : > { %11236 = vst [vmem:[#allocation273_spill] sm:$0xff] %v9221_v29  ;;  %v4317_v46 = vrot.slane %v3897_v14, 4  ;;  %v1410_v2 = vrot.slane %v1409_v18, 1  ;;  %v1456_v59 = vrot.slane %v1455_v44, 2  ;;  %v9226_v63 = vmul.f32 0.125, %v1387_v54 }
 0x360   : > { %v1433_v45 = vadd.f32 %v1432_v21, %v1431_v49  ;;  %v1480_v57 = vrot.slane %v1479_v55, 2  ;;  %v1960_v53 = vsel %vm1940_vm4, %v9221_v29, %v1959_v6  ;;  %v4294_v33 = vadd.f32 %v4293_v22, %v3893_v39  ;;  %v1253_v22 = vld [vmem:[%s7436_s16 + $0x118] sm:$0xff] }
 0x361   : > { %11237 = vst [vmem:[#allocation274_spill] sm:$0xff] %v9226_v63  ;;  %v4318_v41 = vadd.f32 %v4317_v46, %v3897_v14  ;;  %v1411_v1 = vadd.f32 %v1410_v2, %v1409_v18  ;;  %v1457_v17 = vadd.f32 %v1456_v59, %v1455_v44  ;;  %v1961_v62 = vsel %vm1942_vm5, %v9226_v63, %v1960_v53 }
 0x362   : > { %v1434_v3 = vrot.slane %v1433_v45, 1  ;;  %v1481_v28 = vadd.f32 %v1480_v57, %v1479_v55  ;;  %v4295_v49 = vrot.slane %v4294_v33, 2  ;;  %v4341_v54 = vrot.slane %v3901_v12, 4 }
 0x363   : > { %v4319_v21 = vrot.slane %v4318_v41, 2  ;;  %v1458_v23 = vrot.slane %v1457_v17, 1  ;;  %v9234_v0 = vmul.f32 0.125, %v1411_v1  ;;  %v4365_v6 = vrot.slane %v3905_v25, 4  ;;  %v1257_v1 = vld [vmem:[%s7436_s16 + $0x138] sm:$0xff] }
 0x364   : > { %v1435_v16 = vadd.f32 %v1434_v3, %v1433_v45  ;;  %v1482_v29 = vrot.slane %v1481_v28, 1  ;;  %v4296_v39 = vadd.f32 %v4295_v49, %v4294_v33  ;;  %v4342_v18 = vadd.f32 %v4341_v54, %v3901_v12 }
 0x365   : > { %11238 = vst [vmem:[#allocation275_spill] sm:$0xff] %v9234_v0  ;;  %v4320_v14 = vadd.f32 %v4319_v21, %v4318_v41  ;;  %v1459_v46 = vadd.f32 %v1458_v23, %v1457_v17  ;;  %v1962_v55 = vsel %vm1944_vm6, %v9234_v0, %v1961_v62  ;;  %v4366_v2 = vadd.f32 %v4365_v6, %v3905_v25  ;;  %v3832_v0 = vld [vmem:[%s7444_s27 + $0x18] sm:$0xff] }
 0x366   : > { %v9237_v44 = vmul.f32 0.125, %v1435_v16  ;;  %v1483_v59 = vadd.f32 %v1482_v29, %v1481_v28  ;;  %v4297_v45 = vrot.slane %v4296_v39, 1  ;;  %v4343_v53 = vrot.slane %v4342_v18, 2  ;;  %v1261_v28 = vld [vmem:[%s7436_s16 + $0x158] sm:$0xff] }
 0x367   : > { %v4321_v57 = vrot.slane %v4320_v14, 1  ;;  %v9242_v3 = vmul.f32 0.125, %v1459_v46  ;;  %v4367_v12 = vrot.slane %v4366_v2, 2  ;;  %v1508_v41 = vrot.slane %v1253_v22, 4 }
 0x368   : > { %11239 = vst [vmem:[#allocation276_spill] sm:$0xff] %v9237_v44  ;;  %v1963_v33 = vsel %vm1946_vm7, %v9237_v44, %v1962_v55  ;;  %v9246_v23 = vmul.f32 0.125, %v1483_v59  ;;  %v4298_v16 = vadd.f32 %v4297_v45, %v4296_v39  ;;  %v4344_v25 = vadd.f32 %v4343_v53, %v4342_v18  ;;  %v1265_v44 = vld [vmem:[%s7436_s16 + $0x178] sm:$0xff] }
 0x369   : > { %11240 = vst [vmem:[#allocation277_spill] sm:$0xff] %v9242_v3  ;;  %v4322_v17 = vadd.f32 %v4321_v57, %v4320_v14  ;;  %v1964_v29 = vsel %vm1948_vm8, %v9242_v3, %v1963_v33  ;;  %v4368_v62 = vadd.f32 %v4367_v12, %v4366_v2  ;;  %v1509_v49 = vadd.f32 %v1508_v41, %v1253_v22  ;;  %v1269_v39 = vld [vmem:[%s7436_s16 + $0x198] sm:$0xff] }
 0x36a   : > { %11241 = vst [vmem:[#allocation278_spill] sm:$0xff] %v9246_v23  ;;  %v1532_v21 = vrot.slane %v1257_v1, 4  ;;  %v1965_v54 = vsel %vm1950_vm9, %v9246_v23, %v1964_v29  ;;  %v4345_v6 = vrot.slane %v4344_v25, 1  ;;  %v4453_v46 = vmul.f32 0.125, %v4298_v16  ;;  %v1273_v45 = vld [vmem:[%s7436_s16 + $0x1b8] sm:$0xff] }
 0x36b   : > { %v4457_v55 = vmul.f32 0.125, %v4322_v17  ;;  %2370 = vmatmul.mubr.f32.vlgmr.msra.gmra.mrb[0].mxu0 %v1965_v54  ;;  %v4369_v59 = vrot.slane %v4368_v62, 1  ;;  %v1510_v14 = vrot.slane %v1509_v49, 2  ;;  %v1556_v57 = vrot.slane %v1261_v28, 4 }
 0x36c   : > { %v1533_v18 = vadd.f32 %v1532_v21, %v1257_v1  ;;  %v9258_v53 = vmul.f32 %v9200_v5, %v9200_v5  ;;  %v9262_v22 = vmul.f32 %v9203_v40, %v9203_v40  ;;  %v4346_v2 = vadd.f32 %v4345_v6, %v4344_v25 }
 0x36d   : > { %v4605_v33 = vsel %vm1938_vm3, %v4457_v55, %v4453_v46  ;;  %v4370_v12 = vadd.f32 %v4369_v59, %v4368_v62  ;;  %v1511_v41 = vadd.f32 %v1510_v14, %v1509_v49  ;;  %v1557_v17 = vadd.f32 %v1556_v57, %v1261_v28  ;;  %v1277_v62 = vld [vmem:[%s7436_s16 + $0x1d8] sm:$0xff] }
 0x36e   : > { %11242 = vst [vmem:[#allocation279_spill] sm:$0xff] %v9258_v53  ;;  %11243 = vst [vmem:[#allocation280_spill] sm:$0xff] %v9262_v22  ;;  %v1534_v16 = vrot.slane %v1533_v18, 2  ;;  %v9265_v29 = vmul.f32 0.125, %v4346_v2  ;;  %v1580_v1 = vrot.slane %v1265_v44, 4  ;;  %v1604_v21 = vrot.slane %v1269_v39, 4 }
 0x36f   : > { %v1628_v54 = vrot.slane %v1273_v45, 4  ;;  %v9267_v5 = vmul.f32 0.125, %v4370_v12  ;;  %v1512_v53 = vrot.slane %v1511_v41, 1  ;;  %v1558_v40 = vrot.slane %v1557_v17, 2  ;;  %v1281_v49 = vld [vmem:[%s7436_s16 + $0x1f8] sm:$0xff] }
 0x370   : > { %v1535_v23 = vadd.f32 %v1534_v16, %v1533_v18  ;;  %v4606_v25 = vsel %vm1940_vm4, %v9265_v29, %v4605_v33  ;;  %v9271_v6 = vmul.f32 %v4453_v46, %v4453_v46  ;;  %v1581_v59 = vadd.f32 %v1580_v1, %v1265_v44 }
 0x371   : > { %v1605_v28 = vadd.f32 %v1604_v21, %v1269_v39  ;;  %v4607_v14 = vsel %vm1942_vm5, %v9267_v5, %v4606_v25  ;;  %v9277_v57 = vmul.f32 %v4457_v55, %v4457_v55  ;;  %v1513_v2 = vadd.f32 %v1512_v53, %v1511_v41 }
 0x372   : > { %11244 = vst [vmem:[#allocation281_spill] sm:$0xff] %v9271_v6  ;;  %v1536_v12 = vrot.slane %v1535_v23, 1  ;;  %4904 = vmatmul.mubr.f32.gmra.mrb[4].mxu1 %v4607_v14  ;;  %v1559_v18 = vadd.f32 %v1558_v40, %v1557_v17  ;;  %v1582_v16 = vrot.slane %v1581_v59, 2  ;;  %v1629_v3 = vadd.f32 %v1628_v54, %v1273_v45  ;;  %v3836_v40 = vld [vmem:[%s7444_s27 + $0x38] sm:$0xff] }
 0x373   : > { %11245 = vst [vmem:[#allocation282_spill] sm:$0xff] %v9277_v57  ;;  %v1606_v22 = vrot.slane %v1605_v28, 2  ;;  %v1652_v46 = vrot.slane %v1277_v62, 4  ;;  %v1676_v6 = vrot.slane %v1281_v49, 4  ;;  %v9280_v63 = vmul.f32 0.125, %v1513_v2 }
 0x374   : > { %v1537_v33 = vadd.f32 %v1536_v12, %v1535_v23  ;;  %v1560_v44 = vrot.slane %v1559_v18, 1  ;;  %v1583_v39 = vadd.f32 %v1582_v16, %v1581_v59  ;;  %v1630_v21 = vrot.slane %v1629_v3, 2  ;;  %v3840_v16 = vld [vmem:[%s7444_s27 + $0x58] sm:$0xff] }
 0x375   : > { %11246 = vst [vmem:[#allocation283_spill] sm:$0xff] %v9280_v63  ;;  %v1607_v1 = vadd.f32 %v1606_v22, %v1605_v28  ;;  %v1653_v55 = vadd.f32 %v1652_v46, %v1277_v62  ;;  %v1677_v25 = vadd.f32 %v1676_v6, %v1281_v49  ;;  %v3927_v41 = vrot.slane %v3832_v0, 4 }
 0x376   : > { %v9282_v53 = vmul.f32 0.125, %v1537_v33  ;;  %v1561_v17 = vadd.f32 %v1560_v44, %v1559_v18  ;;  %v1584_v45 = vrot.slane %v1583_v39, 1  ;;  %v1631_v23 = vadd.f32 %v1630_v21, %v1629_v3  ;;  %v3844_v33 = vld [vmem:[%s7444_s27 + $0x78] sm:$0xff] }
 0x377   : > { %v1608_v54 = vrot.slane %v1607_v1, 1  ;;  %v1654_v14 = vrot.slane %v1653_v55, 2  ;;  %v1678_v12 = vrot.slane %v1677_v25, 2  ;;  %v3928_v22 = vadd.f32 %v3927_v41, %v3832_v0 }
 0x378   : > { %11247 = vst [vmem:[#allocation284_spill] sm:$0xff] %v9282_v53  ;;  %v1994_v59 = vsel %vm1938_vm3, %v9282_v53, %v9280_v63  ;;  %v1585_v28 = vadd.f32 %v1584_v45, %v1583_v39  ;;  %v1632_v6 = vrot.slane %v1631_v23, 1  ;;  %v9288_v49 = vmul.f32 0.125, %v1561_v17  ;;  %v3848_v45 = vld [vmem:[%s7444_s27 + $0x98] sm:$0xff] }
 0x379   : > { %v1609_v62 = vadd.f32 %v1608_v54, %v1607_v1  ;;  %v1655_v2 = vadd.f32 %v1654_v14, %v1653_v55  ;;  %v1679_v18 = vadd.f32 %v1678_v12, %v1677_v25  ;;  %v3929_v46 = vrot.slane %v3928_v22, 2 }
 0x37a   : > { %11248 = vst [vmem:[#allocation285_spill] sm:$0xff] %v9288_v49  ;;  %v3951_v3 = vrot.slane %v3836_v40, 4  ;;  %v1633_v44 = vadd.f32 %v1632_v6, %v1631_v23  ;;  %v9292_v21 = vmul.f32 0.125, %v1585_v28  ;;  %v1995_v0 = vsel %vm1940_vm4, %v9288_v49, %v1994_v59  ;;  %v3852_v59 = vld [vmem:[%s7444_s27 + $0xb8] sm:$0xff] }
 0x37b   : > { %v9294_v57 = vmul.f32 0.125, %v1609_v62  ;;  %v1656_v39 = vrot.slane %v1655_v2, 1  ;;  %v1680_v1 = vrot.slane %v1679_v18, 1  ;;  %v3930_v55 = vadd.f32 %v3929_v46, %v3928_v22  ;;  %v3856_v22 = vld [vmem:[%s7444_s27 + $0xd8] sm:$0xff] }
 0x37c   : > { %11249 = vst [vmem:[#allocation286_spill] sm:$0xff] %v9292_v21  ;;  %v3952_v41 = vadd.f32 %v3951_v3, %v3836_v40  ;;  %v9298_v25 = vmul.f32 0.125, %v1633_v44  ;;  %v1996_v17 = vsel %vm1942_vm5, %v9292_v21, %v1995_v0  ;;  %v3975_v54 = vrot.slane %v3840_v16, 4  ;;  %v3860_v40 = vld [vmem:[%s7444_s27 + $0xf8] sm:$0xff] }
 0x37d   : > { %11250 = vst [vmem:[#allocation287_spill] sm:$0xff] %v9294_v57  ;;  %v3999_v23 = vrot.slane %v3844_v33, 4  ;;  %v1657_v14 = vadd.f32 %v1656_v39, %v1655_v2  ;;  %v1681_v12 = vadd.f32 %v1680_v1, %v1679_v18  ;;  %v1997_v28 = vsel %vm1944_vm6, %v9294_v57, %v1996_v17 }
 0x37e   : > { %11251 = vst [vmem:[#allocation288_spill] sm:$0xff] %v9298_v25  ;;  %v3931_v62 = vrot.slane %v3930_v55, 1  ;;  %v1998_v6 = vsel %vm1946_vm7, %v9298_v25, %v1997_v28  ;;  %v3953_v46 = vrot.slane %v3952_v41, 2  ;;  %v3976_v3 = vadd.f32 %v3975_v54, %v3840_v16 }
 0x37f   : > { %v4000_v44 = vadd.f32 %v3999_v23, %v3844_v33  ;;  %v9310_v8 = vmul.f32 0.125, %v1657_v14  ;;  %v9312_v0 = vmul.f32 0.125, %v1681_v12  ;;  %v4023_v2 = vrot.slane %v3848_v45, 4 }
 0x380   : > { %v3932_v50 = vadd.f32 %v3931_v62, %v3930_v55  ;;  %v3954_v18 = vadd.f32 %v3953_v46, %v3952_v41  ;;  %v3977_v39 = vrot.slane %v3976_v3, 2  ;;  %v4047_v17 = vrot.slane %v3852_v59, 4  ;;  %v1252_v62 = vld [vmem:[%s7436_s16 + $0x110] sm:$0xff] }
 0x381   : > { %11252 = vst [vmem:[#allocation289_spill] sm:$0xff] %v9310_v8  ;;  %11253 = vst [vmem:[#allocation290_spill] sm:$0xff] %v9312_v0  ;;  %v4001_v1 = vrot.slane %v4000_v44, 2  ;;  %v1999_v57 = vsel %vm1948_vm8, %v9310_v8, %v1998_v6  ;;  %v4024_v28 = vadd.f32 %v4023_v2, %v3848_v45  ;;  %v4071_v25 = vrot.slane %v3856_v22, 4 }
 0x382   : > { %v4095_v21 = vrot.slane %v3860_v40, 4  ;;  %v2000_v16 = vsel %vm1950_vm9, %v9312_v0, %v1999_v57  ;;  %v3955_v33 = vrot.slane %v3954_v18, 1  ;;  %v3978_v54 = vadd.f32 %v3977_v39, %v3976_v3 }
 0x383   : > { %v4002_v23 = vadd.f32 %v4001_v1, %v4000_v44  ;;  %2374 = vmatprep.mubr.f32.mxu0 %v2000_v16  ;;  %v4025_v55 = vrot.slane %v4024_v28, 2  ;;  %v4048_v14 = vadd.f32 %v4047_v17, %v3852_v59  ;;  %v4072_v41 = vadd.f32 %v4071_v25, %v3856_v22 }
 0x384   : > { %v4096_v12 = vadd.f32 %v4095_v21, %v3860_v40  ;;  %v3956_v46 = vadd.f32 %v3955_v33, %v3954_v18  ;;  %v3979_v49 = vrot.slane %v3978_v54, 1  ;;  %v9319_v45 = vmul.f32 0.125, %v3932_v50  ;;  %v1256_v40 = vld [vmem:[%s7436_s16 + $0x130] sm:$0xff] }
 0x385   : > { %v4003_v6 = vrot.slane %v4002_v23, 1  ;;  %v4026_v2 = vadd.f32 %v4025_v55, %v4024_v28  ;;  %v4049_v8 = vrot.slane %v4048_v14, 2  ;;  %v4073_v53 = vrot.slane %v4072_v41, 2  ;;  %v1260_v18 = vld [vmem:[%s7436_s16 + $0x150] sm:$0xff] }
 0x386   : > { %11254 = vst [vmem:[#allocation291_spill] sm:$0xff] %v9319_v45  ;;  %v4097_v57 = vrot.slane %v4096_v12, 2  ;;  %v3980_v0 = vadd.f32 %v3979_v49, %v3978_v54  ;;  %v9321_v44 = vmul.f32 0.125, %v3956_v46  ;;  %v1502_v39 = vrot.slane %v1252_v62, 4  ;;  %v1264_v46 = vld [vmem:[%s7436_s16 + $0x170] sm:$0xff] }
 0x387   : > { %v4004_v3 = vadd.f32 %v4003_v6, %v4002_v23  ;;  %v4027_v59 = vrot.slane %v4026_v2, 1  ;;  %v4050_v25 = vadd.f32 %v4049_v8, %v4048_v14  ;;  %v4074_v21 = vadd.f32 %v4073_v53, %v4072_v41  ;;  %v1268_v6 = vld [vmem:[%s7436_s16 + $0x190] sm:$0xff] }
 0x388   : > { %11255 = vst [vmem:[#allocation292_spill] sm:$0xff] %v9321_v44  ;;  %v4098_v22 = vadd.f32 %v4097_v57, %v4096_v12  ;;  %v9325_v1 = vmul.f32 0.125, %v3980_v0  ;;  %v4570_v17 = vsel %vm1938_vm3, %v9321_v44, %v9319_v45  ;;  %v1503_v49 = vadd.f32 %v1502_v39, %v1252_v62  ;;  %v1276_v57 = vld [vmem:[%s7436_s16 + $0x1d0] sm:$0xff] }
 0x389   : > { %v9327_v50 = vmul.f32 0.125, %v4004_v3  ;;  %v4028_v28 = vadd.f32 %v4027_v59, %v4026_v2  ;;  %v4051_v16 = vrot.slane %v4050_v25, 1  ;;  %v4075_v8 = vrot.slane %v4074_v21, 1  ;;  %v1272_v2 = vld [vmem:[%s7436_s16 + $0x1b0] sm:$0xff] }
 0x38a   : > { %11256 = vst [vmem:[#allocation293_spill] sm:$0xff] %v9325_v1  ;;  %v4099_v53 = vrot.slane %v4098_v22, 1  ;;  %v4571_v33 = vsel %vm1940_vm4, %v9325_v1, %v4570_v17  ;;  %v1504_v0 = vrot.slane %v1503_v49, 2  ;;  %v1526_v54 = vrot.slane %v1256_v40, 4 }
 0x38b   : > { %11257 = vst [vmem:[#allocation294_spill] sm:$0xff] %v9327_v50  ;;  %v1550_v23 = vrot.slane %v1260_v18, 4  ;;  %v4052_v55 = vadd.f32 %v4051_v16, %v4050_v25  ;;  %v4076_v14 = vadd.f32 %v4075_v8, %v4074_v21  ;;  %v9334_v12 = vmul.f32 0.125, %v4028_v28 }
 0x38c   : > { %v4100_v41 = vadd.f32 %v4099_v53, %v4098_v22  ;;  %v4572_v62 = vsel %vm1942_vm5, %v9327_v50, %v4571_v33  ;;  %v1505_v3 = vadd.f32 %v1504_v0, %v1503_v49  ;;  %v1527_v39 = vadd.f32 %v1526_v54, %v1256_v40  ;;  %v1280_v33 = vld [vmem:[%s7436_s16 + $0x1f0] sm:$0xff] }
 0x38d   : > { %11258 = vst [vmem:[#allocation295_spill] sm:$0xff] %v9334_v12  ;;  %v1551_v59 = vadd.f32 %v1550_v23, %v1260_v18  ;;  %v9342_v17 = vmul.f32 0.125, %v4052_v55  ;;  %v9344_v1 = vmul.f32 0.125, %v4076_v14  ;;  %v4573_v21 = vsel %vm1944_vm6, %v9334_v12, %v4572_v62 }
 0x38e   : > { %v9346_v25 = vmul.f32 0.125, %v4100_v41  ;;  %v1506_v22 = vrot.slane %v1505_v3, 1  ;;  %v1528_v28 = vrot.slane %v1527_v39, 2  ;;  %v1574_v8 = vrot.slane %v1264_v46, 4 }
 0x38f   : > { %11259 = vst [vmem:[#allocation296_spill] sm:$0xff] %v9342_v17  ;;  %11260 = vst [vmem:[#allocation297_spill] sm:$0xff] %v9344_v1  ;;  %v1552_v16 = vrot.slane %v1551_v59, 2  ;;  %v4574_v53 = vsel %vm1946_vm7, %v9342_v17, %v4573_v21  ;;  %v1598_v49 = vrot.slane %v1268_v6, 4  ;;  %v1622_v40 = vrot.slane %v1272_v2, 4 }
 0x390   : > { %11261 = vst [vmem:[#allocation298_spill] sm:$0xff] %v9346_v25  ;;  %v1646_v18 = vrot.slane %v1276_v57, 4  ;;  %v4575_v0 = vsel %vm1948_vm8, %v9344_v1, %v4574_v53  ;;  %v1507_v54 = vadd.f32 %v1506_v22, %v1505_v3  ;;  %v1529_v23 = vadd.f32 %v1528_v28, %v1527_v39  ;;  %v3831_v22 = vld [vmem:[%s7444_s27 + $0x10] sm:$0xff] }
 0x391   : > { %v1553_v55 = vadd.f32 %v1552_v16, %v1551_v59  ;;  %v4576_v14 = vsel %vm1950_vm9, %v9346_v25, %v4575_v0  ;;  %v1575_v41 = vadd.f32 %v1574_v8, %v1264_v46  ;;  %v1599_v62 = vadd.f32 %v1598_v49, %v1268_v6 }
 0x392   : > { %v1623_v12 = vadd.f32 %v1622_v40, %v1272_v2  ;;  %4973 = vmatprep.mubr.f32.mxu1 %v4576_v14  ;;  %v1530_v50 = vrot.slane %v1529_v23, 1  ;;  %v1647_v17 = vadd.f32 %v1646_v18, %v1276_v57  ;;  %v1670_v44 = vrot.slane %v1280_v33, 4 }
 0x393   : > { %v1554_v21 = vrot.slane %v1553_v55, 1  ;;  %v1576_v45 = vrot.slane %v1575_v41, 2  ;;  %v1600_v63 = vrot.slane %v1599_v62, 2  ;;  %v1812_v43 = vmul.f32 0.125, %v1507_v54 }
 0x394   : > { %v1624_v24 = vrot.slane %v1623_v12, 2  ;;  %v1531_v53 = vadd.f32 %v1530_v50, %v1529_v23  ;;  %v1648_v39 = vrot.slane %v1647_v17, 2  ;;  %v1671_v59 = vadd.f32 %v1670_v44, %v1280_v33  ;;  %v3839_v23 = vld [vmem:[%s7444_s27 + $0x50] sm:$0xff] }
 0x395   : > { %v1555_v3 = vadd.f32 %v1554_v21, %v1553_v55  ;;  %v9360_v46 = vmul.f32 %v9265_v29, %v9265_v29  ;;  %v1577_v6 = vadd.f32 %v1576_v45, %v1575_v41  ;;  %v1601_v2 = vadd.f32 %v1600_v63, %v1599_v62  ;;  %v3835_v45 = vld [vmem:[%s7444_s27 + $0x30] sm:$0xff] }
 0x396   : > { %v1625_v28 = vadd.f32 %v1624_v24, %v1623_v12  ;;  %v1649_v16 = vadd.f32 %v1648_v39, %v1647_v17  ;;  %v1672_v57 = vrot.slane %v1671_v59, 2  ;;  %v1816_v8 = vmul.f32 0.125, %v1531_v53 }
 0x397   : > { %11262 = vst [vmem:[#allocation299_spill] sm:$0xff] %v9360_v46  ;;  %v1820_v49 = vmul.f32 0.125, %v1555_v3  ;;  %v1578_v40 = vrot.slane %v1577_v6, 1  ;;  %v1602_v18 = vrot.slane %v1601_v2, 1  ;;  %v3921_v0 = vrot.slane %v3831_v22, 4 }
 0x398   : > { %v1626_v50 = vrot.slane %v1625_v28, 1  ;;  %v9364_v44 = vmul.f32 %v9267_v5, %v9267_v5  ;;  %v1650_v33 = vrot.slane %v1649_v16, 1  ;;  %v1673_v29 = vadd.f32 %v1672_v57, %v1671_v59 }
 0x399   : > { %v1987_v54 = vsel %vm1938_vm3, %v1816_v8, %v1812_v43  ;;  %v1579_v24 = vadd.f32 %v1578_v40, %v1577_v6  ;;  %v1603_v63 = vadd.f32 %v1602_v18, %v1601_v2  ;;  %v9368_v17 = vmul.f32 %v1812_v43, %v1812_v43  ;;  %v3843_v6 = vld [vmem:[%s7444_s27 + $0x70] sm:$0xff] }
 0x39a   : > { %11263 = vst [vmem:[#allocation300_spill] sm:$0xff] %v9364_v44  ;;  %v1627_v12 = vadd.f32 %v1626_v50, %v1625_v28  ;;  %v1651_v55 = vadd.f32 %v1650_v33, %v1649_v16  ;;  %v1674_v14 = vrot.slane %v1673_v29, 1  ;;  %v1988_v41 = vsel %vm1940_vm4, %v1820_v49, %v1987_v54  ;;  %v3847_v40 = vld [vmem:[%s7444_s27 + $0x90] sm:$0xff]  ;;  %v1285_v44 = vld [vmem:[%s7436_s16 + $0x218] sm:$0xff] }
 0x39b   : > { %v3922_v62 = vadd.f32 %v3921_v0, %v3831_v22  ;;  %v1824_v5 = vmul.f32 0.125, %v1579_v24  ;;  %v1828_v21 = vmul.f32 0.125, %v1603_v63  ;;  %v3945_v3 = vrot.slane %v3835_v45, 4  ;;  %v3851_v54 = vld [vmem:[%s7444_s27 + $0xb0] sm:$0xff] }
 0x39c   : > { %v1832_v53 = vmul.f32 0.125, %v1627_v12  ;;  %v1675_v39 = vadd.f32 %v1674_v14, %v1673_v29  ;;  %v9372_v59 = vmul.f32 0.125, %v1651_v55  ;;  %v3969_v43 = vrot.slane %v3839_v23, 4  ;;  %v3855_v24 = vld [vmem:[%s7444_s27 + $0xd0] sm:$0xff] }
 0x39d   : > { %v3923_v2 = vrot.slane %v3922_v62, 2  ;;  %v1989_v28 = vsel %vm1942_vm5, %v1824_v5, %v1988_v41  ;;  %v9376_v16 = vmul.f32 %v1816_v8, %v1816_v8  ;;  %v9378_v57 = vmul.f32 %v1820_v49, %v1820_v49  ;;  %v3859_v14 = vld [vmem:[%s7444_s27 + $0xf0] sm:$0xff] }
 0x39e   : > { %v9380_v22 = vmul.f32 %v1824_v5, %v1824_v5  ;;  %v9383_v18 = vmul.f32 0.125, %v1675_v39  ;;  %v1990_v50 = vsel %vm1944_vm6, %v1828_v21, %v1989_v28  ;;  %v9386_v0 = vmul.f32 %v1828_v21, %v1828_v21 }
 0x39f   : > { %11264 = vst [vmem:[#allocation301_spill] sm:$0xff] %v9378_v57  ;;  %v3924_v33 = vadd.f32 %v3923_v2, %v3922_v62  ;;  %v1991_v29 = vsel %vm1946_vm7, %v1832_v53, %v1990_v50  ;;  %v3946_v63 = vadd.f32 %v3945_v3, %v3835_v45  ;;  %v3970_v8 = vadd.f32 %v3969_v43, %v3839_v23 }
 0x3a0   : > { %11265 = vst [vmem:[#allocation302_spill] sm:$0xff] %v9380_v22  ;;  %11266 = vst [vmem:[#allocation303_spill] sm:$0xff] %v9386_v0  ;;  %v3993_v12 = vrot.slane %v3843_v6, 4  ;;  %v1992_v49 = vsel %vm1948_vm8, %v9372_v59, %v1991_v29  ;;  %v9393_v55 = vmul.f32 %v1832_v53, %v1832_v53  ;;  %v4017_v5 = vrot.slane %v3847_v40, 4 }
 0x3a1   : > { %v3925_v41 = vrot.slane %v3924_v33, 1  ;;  %v1993_v21 = vsel %vm1950_vm9, %v9383_v18, %v1992_v49  ;;  %v3947_v62 = vrot.slane %v3946_v63, 2  ;;  %v3971_v39 = vrot.slane %v3970_v8, 2 }
 0x3a2   : > { %11267 = vst [vmem:[#allocation304_spill] sm:$0xff] %v9393_v55  ;;  %v3994_v2 = vadd.f32 %v3993_v12, %v3843_v6  ;;  %2375 = vmatmul.mubr.f32.gmra.mrb[2].mxu0 %v1993_v21  ;;  %v4018_v45 = vadd.f32 %v4017_v5, %v3847_v40  ;;  %v4041_v23 = vrot.slane %v3851_v54, 4  ;;  %v4065_v3 = vrot.slane %v3855_v24, 4 }
 0x3a3   : > { %v3926_v28 = vadd.f32 %v3925_v41, %v3924_v33  ;;  %v3948_v43 = vadd.f32 %v3947_v62, %v3946_v63  ;;  %v3972_v50 = vadd.f32 %v3971_v39, %v3970_v8  ;;  %v4089_v53 = vrot.slane %v3859_v14, 4 }
 0x3a4   : > { %v3995_v29 = vrot.slane %v3994_v2, 2  ;;  %v4019_v46 = vrot.slane %v4018_v45, 2  ;;  %v4042_v25 = vadd.f32 %v4041_v23, %v3851_v54  ;;  %v4066_v1 = vadd.f32 %v4065_v3, %v3855_v24  ;;  %v1289_v24 = vld [vmem:[%s7436_s16 + $0x238] sm:$0xff] }
 0x3a5   : > { %v9399_v55 = vmul.f32 0.125, %v3926_v28  ;;  %v3949_v49 = vrot.slane %v3948_v43, 1  ;;  %v3973_v0 = vrot.slane %v3972_v50, 1  ;;  %v4090_v6 = vadd.f32 %v4089_v53, %v3859_v14 }
 0x3a6   : > { %v3996_v22 = vadd.f32 %v3995_v29, %v3994_v2  ;;  %v4020_v12 = vadd.f32 %v4019_v46, %v4018_v45  ;;  %v4043_v33 = vrot.slane %v4042_v25, 2  ;;  %v4067_v40 = vrot.slane %v4066_v1, 2 }
 0x3a7   : > { %11268 = vst [vmem:[#allocation305_spill] sm:$0xff] %v9399_v55  ;;  %v1700_v41 = vrot.slane %v1285_v44, 4  ;;  %v3950_v5 = vadd.f32 %v3949_v49, %v3948_v43  ;;  %v3974_v63 = vadd.f32 %v3973_v0, %v3972_v50  ;;  %v4091_v21 = vrot.slane %v4090_v6, 2 }
 0x3a8   : > { %v3997_v8 = vrot.slane %v3996_v22, 1  ;;  %v4021_v62 = vrot.slane %v4020_v12, 1  ;;  %v4044_v39 = vadd.f32 %v4043_v33, %v4042_v25  ;;  %v4068_v54 = vadd.f32 %v4067_v40, %v4066_v1  ;;  %v1293_v25 = vld [vmem:[%s7436_s16 + $0x258] sm:$0xff] }
 0x3a9   : > { %v1701_v28 = vadd.f32 %v1700_v41, %v1285_v44  ;;  %v4092_v3 = vadd.f32 %v4091_v21, %v4090_v6  ;;  %v9402_v57 = vmul.f32 0.125, %v3950_v5  ;;  %v9404_v14 = vmul.f32 0.125, %v3974_v63  ;;  %v1297_v6 = vld [vmem:[%s7436_s16 + $0x278] sm:$0xff] }
 0x3aa   : > { %v3998_v23 = vadd.f32 %v3997_v8, %v3996_v22  ;;  %v4022_v46 = vadd.f32 %v4021_v62, %v4020_v12  ;;  %v4045_v2 = vrot.slane %v4044_v39, 1  ;;  %v4069_v45 = vrot.slane %v4068_v54, 1  ;;  %v3864_v5 = vld [vmem:[%s7444_s27 + $0x118] sm:$0xff] }
 0x3ab   : > { %11269 = vst [vmem:[#allocation306_spill] sm:$0xff] %v9402_v57  ;;  %11270 = vst [vmem:[#allocation307_spill] sm:$0xff] %v9404_v14  ;;  %v1702_v0 = vrot.slane %v1701_v28, 2  ;;  %v4093_v43 = vrot.slane %v4092_v3, 1  ;;  %v4563_v1 = vsel %vm1938_vm3, %v9402_v57, %v9399_v55  ;;  %v1724_v44 = vrot.slane %v1289_v24, 4  ;;  %v3868_v63 = vld [vmem:[%s7444_s27 + $0x138] sm:$0xff] }
 0x3ac   : > { %v9406_v50 = vmul.f32 0.125, %v3998_v23  ;;  %v4046_v22 = vadd.f32 %v4045_v2, %v4044_v39  ;;  %v4070_v29 = vadd.f32 %v4069_v45, %v4068_v54  ;;  %v9412_v53 = vmul.f32 0.125, %v4022_v46  ;;  %v3872_v2 = vld [vmem:[%s7444_s27 + $0x158] sm:$0xff] }
 0x3ad   : > { %v4564_v49 = vsel %vm1940_vm4, %v9404_v14, %v4563_v1  ;;  %v4094_v12 = vadd.f32 %v4093_v43, %v4092_v3  ;;  %v1703_v40 = vadd.f32 %v1702_v0, %v1701_v28  ;;  %v1725_v41 = vadd.f32 %v1724_v44, %v1289_v24 }
 0x3ae   : > { %11271 = vst [vmem:[#allocation308_spill] sm:$0xff] %v9406_v50  ;;  %11272 = vst [vmem:[#allocation309_spill] sm:$0xff] %v9412_v53  ;;  %v4565_v33 = vsel %vm1942_vm5, %v9406_v50, %v4564_v49  ;;  %v9421_v8 = vmul.f32 0.125, %v4046_v22  ;;  %v9423_v21 = vmul.f32 0.125, %v4070_v29  ;;  %v1748_v39 = vrot.slane %v1293_v25, 4  ;;  %v3876_v29 = vld [vmem:[%s7444_s27 + $0x178] sm:$0xff] }
 0x3af   : > { %v4566_v62 = vsel %vm1944_vm6, %v9412_v53, %v4565_v33  ;;  %v9427_v54 = vmul.f32 0.125, %v4094_v12  ;;  %v1704_v23 = vrot.slane %v1703_v40, 1  ;;  %v1726_v3 = vrot.slane %v1725_v41, 2  ;;  %v3880_v33 = vld [vmem:[%s7444_s27 + $0x198] sm:$0xff] }
 0x3b0   : > { %11273 = vst [vmem:[#allocation310_spill] sm:$0xff] %v9421_v8  ;;  %11274 = vst [vmem:[#allocation311_spill] sm:$0xff] %v9423_v21  ;;  %v1772_v46 = vrot.slane %v1297_v6, 4  ;;  %v4567_v24 = vsel %vm1946_vm7, %v9421_v8, %v4566_v62  ;;  %v1749_v28 = vadd.f32 %v1748_v39, %v1293_v25  ;;  %v4119_v45 = vrot.slane %v3864_v5, 4 }
 0x3b1   : > { %11275 = vst [vmem:[#allocation312_spill] sm:$0xff] %v9427_v54  ;;  %v4143_v0 = vrot.slane %v3868_v63, 4  ;;  %v4568_v43 = vsel %vm1948_vm8, %v9423_v21, %v4567_v24  ;;  %v1705_v1 = vadd.f32 %v1704_v23, %v1703_v40  ;;  %v1727_v44 = vadd.f32 %v1726_v3, %v1725_v41 }
 0x3b2   : > { %v1773_v22 = vadd.f32 %v1772_v46, %v1297_v6  ;;  %v4569_v49 = vsel %vm1950_vm9, %v9427_v54, %v4568_v43  ;;  %v1750_v12 = vrot.slane %v1749_v28, 2  ;;  %v4120_v53 = vadd.f32 %v4119_v45, %v3864_v5 }
 0x3b3   : > { %v4144_v50 = vadd.f32 %v4143_v0, %v3868_v63  ;;  %4974 = vmatmul.mubr.f32.vlgmr.msra.gmra.mrb[0].mxu1 %v4569_v49  ;;  %v1728_v62 = vrot.slane %v1727_v44, 1  ;;  %v9438_v39 = vmul.f32 0.125, %v1705_v1  ;;  %v4167_v8 = vrot.slane %v3872_v2, 4 }
 0x3b4   : > { %v1774_v25 = vrot.slane %v1773_v22, 2  ;;  %v1751_v14 = vadd.f32 %v1750_v12, %v1749_v28  ;;  %v4121_v57 = vrot.slane %v4120_v53, 2  ;;  %v4191_v41 = vrot.slane %v3876_v29, 4  ;;  %v3884_v12 = vld [vmem:[%s7444_s27 + $0x1b8] sm:$0xff] }
 0x3b5   : > { %11276 = vst [vmem:[#allocation313_spill] sm:$0xff] %v9438_v39  ;;  %v4145_v40 = vrot.slane %v4144_v50, 2  ;;  %v1729_v6 = vadd.f32 %v1728_v62, %v1727_v44  ;;  %v4168_v3 = vadd.f32 %v4167_v8, %v3872_v2  ;;  %v4215_v46 = vrot.slane %v3880_v33, 4  ;;  %v3888_v2 = vld [vmem:[%s7444_s27 + $0x1d8] sm:$0xff] }
 0x3b6   : > { %v1775_v23 = vadd.f32 %v1774_v25, %v1773_v22  ;;  %v1752_v24 = vrot.slane %v1751_v14, 1  ;;  %v4122_v5 = vadd.f32 %v4121_v57, %v4120_v53  ;;  %v4192_v45 = vadd.f32 %v4191_v41, %v3876_v29  ;;  %v3892_v22 = vld [vmem:[%s7444_s27 + $0x1f8] sm:$0xff] }
 0x3b7   : > { %v4146_v63 = vadd.f32 %v4145_v40, %v4144_v50  ;;  %v9440_v43 = vmul.f32 0.125, %v1729_v6  ;;  %v4169_v1 = vrot.slane %v4168_v3, 2  ;;  %v4216_v49 = vadd.f32 %v4215_v46, %v3880_v33 }
 0x3b8   : > { %v1776_v0 = vrot.slane %v1775_v23, 1  ;;  %v1753_v28 = vadd.f32 %v1752_v24, %v1751_v14  ;;  %v4123_v54 = vrot.slane %v4122_v5, 1  ;;  %v4193_v55 = vrot.slane %v4192_v45, 2 }
 0x3b9   : > { %11277 = vst [vmem:[#allocation314_spill] sm:$0xff] %v9440_v43  ;;  %v4147_v21 = vrot.slane %v4146_v63, 1  ;;  %v2010_v8 = vsel %vm1938_vm3, %v9440_v43, %v9438_v39  ;;  %v4170_v57 = vadd.f32 %v4169_v1, %v4168_v3  ;;  %v4217_v50 = vrot.slane %v4216_v49, 2 }
 0x3ba   : > { %v1777_v44 = vadd.f32 %v1776_v0, %v1775_v23  ;;  %v9448_v53 = vmul.f32 0.125, %v1753_v28  ;;  %v4124_v29 = vadd.f32 %v4123_v54, %v4122_v5  ;;  %v4194_v33 = vadd.f32 %v4193_v55, %v4192_v45  ;;  %v1284_v55 = vld [vmem:[%s7436_s16 + $0x210] sm:$0xff] }
 0x3bb   : > { %v4148_v62 = vadd.f32 %v4147_v21, %v4146_v63  ;;  %v4171_v25 = vrot.slane %v4170_v57, 1  ;;  %v4218_v40 = vadd.f32 %v4217_v50, %v4216_v49  ;;  %v4239_v41 = vrot.slane %v3884_v12, 4  ;;  %v1288_v49 = vld [vmem:[%s7436_s16 + $0x230] sm:$0xff] }
 0x3bc   : > { %11278 = vst [vmem:[#allocation315_spill] sm:$0xff] %v9448_v53  ;;  %v9450_v14 = vmul.f32 0.125, %v1777_v44  ;;  %v2011_v6 = vsel %vm1940_vm4, %v9448_v53, %v2010_v8  ;;  %v4195_v23 = vrot.slane %v4194_v33, 1  ;;  %v4263_v46 = vrot.slane %v3888_v2, 4 }
 0x3bd   : > { %v4287_v24 = vrot.slane %v3892_v22, 4  ;;  %v4172_v0 = vadd.f32 %v4171_v25, %v4170_v57  ;;  %v4219_v1 = vrot.slane %v4218_v40, 1  ;;  %v4240_v21 = vadd.f32 %v4239_v41, %v3884_v12  ;;  %v1292_v12 = vld [vmem:[%s7436_s16 + $0x250] sm:$0xff] }
 0x3be   : > { %11279 = vst [vmem:[#allocation316_spill] sm:$0xff] %v9450_v14  ;;  %v2012_v3 = vsel %vm1942_vm5, %v9450_v14, %v2011_v6  ;;  %v4196_v54 = vadd.f32 %v4195_v23, %v4194_v33  ;;  %v4264_v5 = vadd.f32 %v4263_v46, %v3888_v2  ;;  %v9457_v45 = vmul.f32 0.125, %v4124_v29  ;;  %v1296_v46 = vld [vmem:[%s7436_s16 + $0x270] sm:$0xff] }
 0x3bf   : > { %2379 = vmatprep.mubr.f32.mxu0 %v2012_v3  ;;  %v4288_v63 = vadd.f32 %v4287_v24, %v3892_v22  ;;  %v4220_v28 = vadd.f32 %v4219_v1, %v4218_v40  ;;  %v4241_v44 = vrot.slane %v4240_v21, 2  ;;  %v9460_v8 = vmul.f32 0.125, %v4148_v62  ;;  %v3867_v14 = vld [vmem:[%s7444_s27 + $0x130] sm:$0xff] }
 0x3c0   : > { %11280 = vst [vmem:[#allocation317_spill] sm:$0xff] %v9457_v45  ;;  %v9462_v50 = vmul.f32 0.125, %v4172_v0  ;;  %v4265_v6 = vrot.slane %v4264_v5, 2  ;;  %v9464_v25 = vmul.f32 0.125, %v4196_v54  ;;  %v1694_v41 = vrot.slane %v1284_v55, 4  ;;  %v3863_v54 = vld [vmem:[%s7444_s27 + $0x110] sm:$0xff] }
 0x3c1   : > { %11281 = vst [vmem:[#allocation318_spill] sm:$0xff] %v9460_v8  ;;  %v4289_v57 = vrot.slane %v4288_v63, 2  ;;  %v4242_v33 = vadd.f32 %v4241_v44, %v4240_v21  ;;  %v9467_v2 = vmul.f32 0.125, %v4220_v28  ;;  %v4598_v22 = vsel %vm1938_vm3, %v9460_v8, %v9457_v45 }
 0x3c2   : > { %11282 = vst [vmem:[#allocation319_spill] sm:$0xff] %v9462_v50  ;;  %11283 = vst [vmem:[#allocation320_spill] sm:$0xff] %v9464_v25  ;;  %v1718_v29 = vrot.slane %v1288_v49, 4  ;;  %v4266_v40 = vadd.f32 %v4265_v6, %v4264_v5  ;;  %v4599_v23 = vsel %vm1940_vm4, %v9462_v50, %v4598_v22  ;;  %v1695_v24 = vadd.f32 %v1694_v41, %v1284_v55 }
 0x3c3   : > { %11284 = vst [vmem:[#allocation321_spill] sm:$0xff] %v9467_v2  ;;  %v4290_v62 = vadd.f32 %v4289_v57, %v4288_v63  ;;  %v4243_v3 = vrot.slane %v4242_v33, 1  ;;  %v4600_v0 = vsel %vm1942_vm5, %v9464_v25, %v4599_v23  ;;  %v1742_v21 = vrot.slane %v1292_v12, 4 }
 0x3c4   : > { %v1719_v1 = vadd.f32 %v1718_v29, %v1288_v49  ;;  %v4267_v28 = vrot.slane %v4266_v40, 1  ;;  %v4601_v8 = vsel %vm1944_vm6, %v9467_v2, %v4600_v0  ;;  %v1696_v5 = vrot.slane %v1695_v24, 2 }
 0x3c5   : > { %v4291_v44 = vrot.slane %v4290_v62, 1  ;;  %v4244_v63 = vadd.f32 %v4243_v3, %v4242_v33  ;;  %v1743_v57 = vadd.f32 %v1742_v21, %v1292_v12  ;;  %v1766_v22 = vrot.slane %v1296_v46, 4  ;;  %v3871_v21 = vld [vmem:[%s7444_s27 + $0x150] sm:$0xff] }
 0x3c6   : > { %v1720_v6 = vrot.slane %v1719_v1, 2  ;;  %v4268_v50 = vadd.f32 %v4267_v28, %v4266_v40  ;;  %v1697_v41 = vadd.f32 %v1696_v5, %v1695_v24  ;;  %v4113_v45 = vrot.slane %v3863_v54, 4 }
 0x3c7   : > { %v4292_v55 = vadd.f32 %v4291_v44, %v4290_v62  ;;  %v9480_v23 = vmul.f32 0.125, %v4244_v63  ;;  %v1744_v29 = vrot.slane %v1743_v57, 2  ;;  %v1767_v25 = vadd.f32 %v1766_v22, %v1296_v46  ;;  %v3875_v44 = vld [vmem:[%s7444_s27 + $0x170] sm:$0xff] }
 0x3c8   : > { %v1721_v49 = vadd.f32 %v1720_v6, %v1719_v1  ;;  %v9483_v53 = vmul.f32 0.125, %v4268_v50  ;;  %v1698_v33 = vrot.slane %v1697_v41, 1  ;;  %v4114_v3 = vadd.f32 %v4113_v45, %v3863_v54 }
 0x3c9   : > { %11285 = vst [vmem:[#allocation322_spill] sm:$0xff] %v9480_v23  ;;  %v9485_v0 = vmul.f32 0.125, %v4292_v55  ;;  %v4602_v12 = vsel %vm1946_vm7, %v9480_v23, %v4601_v8  ;;  %v1745_v62 = vadd.f32 %v1744_v29, %v1743_v57  ;;  %v1768_v24 = vrot.slane %v1767_v25, 2 }
 0x3ca   : > { %11286 = vst [vmem:[#allocation323_spill] sm:$0xff] %v9483_v53  ;;  %v1722_v40 = vrot.slane %v1721_v49, 1  ;;  %v4603_v28 = vsel %vm1948_vm8, %v9483_v53, %v4602_v12  ;;  %v1699_v1 = vadd.f32 %v1698_v33, %v1697_v41  ;;  %v4115_v46 = vrot.slane %v4114_v3, 2  ;;  %v3879_v53 = vld [vmem:[%s7444_s27 + $0x190] sm:$0xff] }
 0x3cb   : > { %11287 = vst [vmem:[#allocation324_spill] sm:$0xff] %v9485_v0  ;;  %v4137_v50 = vrot.slane %v3867_v14, 4  ;;  %v4604_v5 = vsel %vm1950_vm9, %v9485_v0, %v4603_v28  ;;  %v1746_v45 = vrot.slane %v1745_v62, 1  ;;  %v1769_v54 = vadd.f32 %v1768_v24, %v1767_v25  ;;  %v3883_v24 = vld [vmem:[%s7444_s27 + $0x1b0] sm:$0xff] }
 0x3cc   : > { %v1723_v63 = vadd.f32 %v1722_v40, %v1721_v49  ;;  %4978 = vmatprep.mubr.f32.mxu1 %v4604_v5  ;;  %v1844_v8 = vmul.f32 0.125, %v1699_v1  ;;  %v4116_v6 = vadd.f32 %v4115_v46, %v4114_v3  ;;  %v4161_v22 = vrot.slane %v3871_v21, 4  ;;  %v3887_v46 = vld [vmem:[%s7444_s27 + $0x1d0] sm:$0xff] }
 0x3cd   : > { %v4138_v57 = vadd.f32 %v4137_v50, %v3867_v14  ;;  %v1747_v55 = vadd.f32 %v1746_v45, %v1745_v62  ;;  %v1770_v29 = vrot.slane %v1769_v54, 1  ;;  %v4185_v33 = vrot.slane %v3875_v44, 4 }
 0x3ce   : > { %v1848_v41 = vmul.f32 0.125, %v1723_v63  ;;  %v9497_v12 = vmul.f32 %v9372_v59, %v9372_v59  ;;  %v4117_v28 = vrot.slane %v4116_v6, 1  ;;  %v4162_v25 = vadd.f32 %v4161_v22, %v3871_v21  ;;  %v3891_v22 = vld [vmem:[%s7444_s27 + $0x1f0] sm:$0xff] }
 0x3cf   : > { %v4139_v49 = vrot.slane %v4138_v57, 2  ;;  %v9502_v3 = vmul.f32 %v9383_v18, %v9383_v18  ;;  %v1771_v14 = vadd.f32 %v1770_v29, %v1769_v54  ;;  %v1852_v40 = vmul.f32 0.125, %v1747_v55 }
 0x3d0   : > { %11288 = vst [vmem:[#allocation325_spill] sm:$0xff] %v9497_v12  ;;  %v2007_v62 = vsel %vm1938_vm3, %v1848_v41, %v1844_v8  ;;  %v9506_v1 = vmul.f32 %v1844_v8, %v1844_v8  ;;  %v4163_v59 = vrot.slane %v4162_v25, 2  ;;  %v4186_v5 = vadd.f32 %v4185_v33, %v3875_v44 }
 0x3d1   : > { %11289 = vst [vmem:[#allocation326_spill] sm:$0xff] %v9502_v3  ;;  %v4140_v50 = vadd.f32 %v4139_v49, %v4138_v57  ;;  %v1856_v63 = vmul.f32 0.125, %v1771_v14  ;;  %v2008_v45 = vsel %vm1940_vm4, %v1852_v40, %v2007_v62  ;;  %v4118_v0 = vadd.f32 %v4117_v28, %v4116_v6 }
 0x3d2   : > { %11290 = vst [vmem:[#allocation327_spill] sm:$0xff] %v9506_v1  ;;  %v4209_v21 = vrot.slane %v3879_v53, 4  ;;  %v4164_v18 = vadd.f32 %v4163_v59, %v4162_v25  ;;  %v4187_v2 = vrot.slane %v4186_v5, 2  ;;  %v4233_v54 = vrot.slane %v3883_v24, 4 }
 0x3d3   : > { %v4141_v23 = vrot.slane %v4140_v50, 1  ;;  %v2009_v55 = vsel %vm1942_vm5, %v1856_v63, %v2008_v45  ;;  %v9512_v29 = vmul.f32 %v1848_v41, %v1848_v41  ;;  %v4257_v1 = vrot.slane %v3887_v46, 4 }
 0x3d4   : > { %v4210_v8 = vadd.f32 %v4209_v21, %v3879_v53  ;;  %2380 = vmatmul.mubr.f32.gmra.mrb[4].mxu0 %v2009_v55  ;;  %v4165_v49 = vrot.slane %v4164_v18, 1  ;;  %v4188_v44 = vadd.f32 %v4187_v2, %v4186_v5  ;;  %v4234_v33 = vadd.f32 %v4233_v54, %v3883_v24 }
 0x3d5   : > { %11291 = vst [vmem:[#allocation328_spill] sm:$0xff] %v9512_v29  ;;  %v4142_v57 = vadd.f32 %v4141_v23, %v4140_v50  ;;  %v4258_v6 = vadd.f32 %v4257_v1, %v3887_v46  ;;  %v4281_v28 = vrot.slane %v3891_v22, 4  ;;  %v4423_v62 = vmul.f32 0.125, %v4118_v0  ;;  %v3896_v1 = vld [vmem:[%s7444_s27 + $0x218] sm:$0xff] }
 0x3d6   : > { %v4211_v14 = vrot.slane %v4210_v8, 2  ;;  %v4166_v43 = vadd.f32 %v4165_v49, %v4164_v18  ;;  %v4189_v25 = vrot.slane %v4188_v44, 1  ;;  %v4235_v59 = vrot.slane %v4234_v33, 2  ;;  %v3900_v18 = vld [vmem:[%s7444_s27 + $0x238] sm:$0xff] }
 0x3d7   : > { %v4427_v39 = vmul.f32 0.125, %v4142_v57  ;;  %v9514_v45 = vmul.f32 %v1852_v40, %v1852_v40  ;;  %v4259_v53 = vrot.slane %v4258_v6, 2  ;;  %v4282_v21 = vadd.f32 %v4281_v28, %v3891_v22 }
 0x3d8   : > { %v4212_v41 = vadd.f32 %v4211_v14, %v4210_v8  ;;  %v4190_v55 = vadd.f32 %v4189_v25, %v4188_v44  ;;  %v4236_v23 = vadd.f32 %v4235_v59, %v4234_v33  ;;  %v4431_v2 = vmul.f32 0.125, %v4166_v43  ;;  %v3904_v43 = vld [vmem:[%s7444_s27 + $0x258] sm:$0xff] }
 0x3d9   : > { %11292 = vst [vmem:[#allocation329_spill] sm:$0xff] %v9514_v45  ;;  %v4591_v24 = vsel %vm1938_vm3, %v4427_v39, %v4423_v62  ;;  %v9518_v46 = vmul.f32 %v1856_v63, %v1856_v63  ;;  %v4260_v50 = vadd.f32 %v4259_v53, %v4258_v6  ;;  %v4283_v5 = vrot.slane %v4282_v21, 2  ;;  %v3908_v33 = vld [vmem:[%s7444_s27 + $0x278] sm:$0xff] }
 0x3da   : > { %v4213_v0 = vrot.slane %v4212_v41, 1  ;;  %v4237_v54 = vrot.slane %v4236_v23, 1  ;;  %v4435_v40 = vmul.f32 0.125, %v4190_v55  ;;  %v4592_v8 = vsel %vm1940_vm4, %v4431_v2, %v4591_v24 }
 0x3db   : > { %11293 = vst [vmem:[#allocation330_spill] sm:$0xff] %v9518_v46  ;;  %v9522_v57 = vmul.f32 %v4423_v62, %v4423_v62  ;;  %v4261_v49 = vrot.slane %v4260_v50, 1  ;;  %v4284_v44 = vadd.f32 %v4283_v5, %v4282_v21  ;;  %v4311_v14 = vrot.slane %v3896_v1, 4 }
 0x3dc   : > { %v4214_v22 = vadd.f32 %v4213_v0, %v4212_v41  ;;  %v4238_v28 = vadd.f32 %v4237_v54, %v4236_v23  ;;  %v4593_v63 = vsel %vm1942_vm5, %v4435_v40, %v4592_v8  ;;  %v9527_v25 = vmul.f32 %v4427_v39, %v4427_v39  ;;  %v3895_v39 = vld [vmem:[%s7444_s27 + $0x210] sm:$0xff] }
 0x3dd   : > { %11294 = vst [vmem:[#allocation331_spill] sm:$0xff] %v9522_v57  ;;  %v4335_v6 = vrot.slane %v3900_v18, 4  ;;  %v4262_v59 = vadd.f32 %v4261_v49, %v4260_v50  ;;  %v4285_v53 = vrot.slane %v4284_v44, 1  ;;  %v4312_v24 = vadd.f32 %v4311_v14, %v3896_v1  ;;  %v3899_v49 = vld [vmem:[%s7444_s27 + $0x230] sm:$0xff] }
 0x3de   : > { %11295 = vst [vmem:[#allocation332_spill] sm:$0xff] %v9527_v25  ;;  %v4439_v55 = vmul.f32 0.125, %v4214_v22  ;;  %v4443_v62 = vmul.f32 0.125, %v4238_v28  ;;  %v4359_v41 = vrot.slane %v3904_v43, 4  ;;  %v4383_v0 = vrot.slane %v3908_v33, 4 }
 0x3df   : > { %v4336_v57 = vadd.f32 %v4335_v6, %v3900_v18  ;;  %v4286_v21 = vadd.f32 %v4285_v53, %v4284_v44  ;;  %v9529_v5 = vmul.f32 0.125, %v4262_v59  ;;  %v9532_v54 = vmul.f32 %v4431_v2, %v4431_v2  ;;  %v3903_v2 = vld [vmem:[%s7444_s27 + $0x250] sm:$0xff] }
 0x3e0   : > { %v4594_v23 = vsel %vm1944_vm6, %v4439_v55, %v4593_v63  ;;  %v9536_v8 = vmul.f32 %v4435_v40, %v4435_v40  ;;  %v4313_v22 = vrot.slane %v4312_v24, 2  ;;  %v9541_v14 = vmul.f32 %v4439_v55, %v4439_v55  ;;  %v3907_v53 = vld [vmem:[%s7444_s27 + $0x270] sm:$0xff] }
 0x3e1   : > { %11296 = vst [vmem:[#allocation333_spill] sm:$0xff] %v9532_v54  ;;  %v4595_v50 = vsel %vm1946_vm7, %v4443_v62, %v4594_v23  ;;  %v4337_v1 = vrot.slane %v4336_v57, 2  ;;  %v4451_v18 = vmul.f32 0.125, %v4286_v21  ;;  %v4360_v28 = vadd.f32 %v4359_v41, %v3904_v43 }
 0x3e2   : > { %11297 = vst [vmem:[#allocation334_spill] sm:$0xff] %v9536_v8  ;;  %v4596_v44 = vsel %vm1948_vm8, %v9529_v5, %v4595_v50  ;;  %11298 = vst [vmem:[#allocation335_spill] sm:$0xff] %v9541_v14  ;;  %v4314_v6 = vadd.f32 %v4313_v22, %v4312_v24  ;;  %v4384_v59 = vadd.f32 %v4383_v0, %v3908_v33  ;;  %v4305_v54 = vrot.slane %v3895_v39, 4 }
 0x3e3   : > { %v4338_v63 = vadd.f32 %v4337_v1, %v4336_v57  ;;  %v4597_v23 = vsel %vm1950_vm9, %v4451_v18, %v4596_v44  ;;  %v9546_v40 = vmul.f32 %v4443_v62, %v4443_v62  ;;  %v4361_v8 = vrot.slane %v4360_v28, 2 }
 0x3e4   : > { %v4329_v25 = vrot.slane %v3899_v49, 4  ;;  %4979 = vmatmul.mubr.f32.gmra.mrb[2].mxu1 %v4597_v23  ;;  %v4315_v21 = vrot.slane %v4314_v6, 1  ;;  %v4385_v45 = vrot.slane %v4384_v59, 2  ;;  %v4306_v50 = vadd.f32 %v4305_v54, %v3895_v39 }
 0x3e5   : > { %11299 = vst [vmem:[#allocation336_spill] sm:$0xff] %v9546_v40  ;;  %v4339_v46 = vrot.slane %v4338_v63, 1  ;;  %v4362_v55 = vadd.f32 %v4361_v8, %v4360_v28  ;;  %v4353_v43 = vrot.slane %v3903_v2, 4  ;;  %v4377_v24 = vrot.slane %v3907_v53, 4 }
 0x3e6   : > { %v4330_v14 = vadd.f32 %v4329_v25, %v3899_v49  ;;  %v4316_v57 = vadd.f32 %v4315_v21, %v4314_v6  ;;  %v4386_v41 = vadd.f32 %v4385_v45, %v4384_v59  ;;  %v4307_v0 = vrot.slane %v4306_v50, 2 }
 0x3e7   : > { %v4340_v33 = vadd.f32 %v4339_v46, %v4338_v63  ;;  %v4363_v22 = vrot.slane %v4362_v55, 1  ;;  %v4354_v44 = vadd.f32 %v4353_v43, %v3903_v2  ;;  %v4378_v62 = vadd.f32 %v4377_v24, %v3907_v53 }
 0x3e8   : > { %v4331_v1 = vrot.slane %v4330_v14, 2  ;;  %v4387_v40 = vrot.slane %v4386_v41, 1  ;;  %v9548_v29 = vmul.f32 0.125, %v4316_v57  ;;  %v4308_v3 = vadd.f32 %v4307_v0, %v4306_v50 }
 0x3e9   : > { %v9550_v23 = vmul.f32 0.125, %v4340_v33  ;;  %v4364_v12 = vadd.f32 %v4363_v22, %v4362_v55  ;;  %v4355_v39 = vrot.slane %v4354_v44, 2  ;;  %v4379_v25 = vrot.slane %v4378_v62, 2  ;;  %v9575_v33 = vpop.xlane.xlu0 %6023 }
 0x3ea   : > { %v4332_v54 = vadd.f32 %v4331_v1, %v4330_v14  ;;  %v4388_v8 = vadd.f32 %v4387_v40, %v4386_v41  ;;  %v4309_v46 = vrot.slane %v4308_v3, 1  ;;  %v2974_v49 = vlaneseq }
 0x3eb   : > { %v4614_v45 = vsel %vm1938_vm3, %v9550_v23, %v9548_v29  ;;  %v9555_v28 = vmul.f32 0.125, %v4364_v12  ;;  %v4356_v63 = vadd.f32 %v4355_v39, %v4354_v44  ;;  %v4380_v59 = vadd.f32 %v4379_v25, %v4378_v62  ;;  %v9579_v44 = vpop.xlane.xlu1 %6048 }
 0x3ec   : > { %v4333_v6 = vrot.slane %v4332_v54, 1  ;;  %v9557_v2 = vmul.f32 0.125, %v4388_v8  ;;  %v4310_v53 = vadd.f32 %v4309_v46, %v4308_v3  ;;  %v9559_v21 = vand.u32 127, %v2974_v49 }
 0x3ed   : > { %v9561_v14 = vshrl.u32 %v2974_v49, 7  ;;  %v4615_v40 = vsel %vm1940_vm4, %v9555_v28, %v4614_v45  ;;  %v4357_v55 = vrot.slane %v4356_v63, 1  ;;  %v4381_v43 = vrot.slane %v4380_v59, 1 }
 0x3ee   : > { %v4334_v50 = vadd.f32 %v4333_v6, %v4332_v54  ;;  %v9567_v12 = vmul.f32 %v9529_v5, %v9529_v5  ;;  %v4616_v24 = vsel %vm1942_vm5, %v9557_v2, %v4615_v40  ;;  %v4455_v57 = vmul.f32 0.125, %v4310_v53 }
 0x3ef   : > { %v9573_v3 = vsub.s32 %v9559_v21, %v9561_v14  ;;  %v9577_v41 = vmul.f32 %v4451_v18, %v4451_v18  ;;  %4983 = vmatprep.mubr.f32.mxu1 %v4616_v24  ;;  %v4358_v0 = vadd.f32 %v4357_v55, %v4356_v63  ;;  %v4382_v22 = vadd.f32 %v4381_v43, %v4380_v59  ;;  %v11302_v24 = vld [vmem:[#allocation32_spill] sm:$0xff] }
 0x3f0   : > { %v4459_v1 = vmul.f32 0.125, %v4334_v50  ;;  %v9581_v5 = vmul.f32 %v4455_v57, %v4455_v57  ;;  %v2647_v54 = vmul.f32 %v8485_v13, %v8485_v13  ;;  %v2648_v39 = vmul.f32 %v8363_v26, %v8363_v26 }
 0x3f1   : > { %v6193_v62 = vrot.slane %v9579_v44, %v9573_v3  ;;  %v9589_v25 = vmul.f32 0.125, %v4358_v0  ;;  %v9591_v18 = vmul.f32 0.125, %v4382_v22  ;;  %v6173_v45 = vrot.slane %v9575_v33, %v9573_v3  ;;  %v11304_v0 = vld [vmem:[#allocation33_spill] sm:$0xff] }
 0x3f2   : > { %v4611_v8 = vsel %vm1938_vm3, %v4459_v1, %v4455_v57  ;;  %v9596_v46 = vmul.f32 %v4459_v1, %v4459_v1  ;;  %v2651_v49 = vmul.f32 %v8487_v36, %v8487_v36  ;;  %v2652_v13 = vmul.f32 %v8365_v4, %v8365_v4  ;;  %v11305_v1 = vld [vmem:[#allocation19_spill] sm:$0xff] }
 0x3f3   : > { %v2655_v26 = vmul.f32 %v8489_v9, %v8489_v9  ;;  %v4612_v6 = vsel %vm1940_vm4, %v9589_v25, %v4611_v8  ;;  %v2656_v63 = vmul.f32 %v8367_v51, %v8367_v51  ;;  %v2659_v59 = vmul.f32 %v8491_v58, %v8491_v58 }
 0x3f4   : > { %v2660_v53 = vmul.f32 %v8369_v38, %v8369_v38  ;;  %v4613_v36 = vsel %vm1942_vm5, %v9591_v18, %v4612_v6  ;;  %v2663_v4 = vmul.f32 %v8493_v20, %v8493_v20  ;;  %v2664_v9 = vmul.f32 %v8371_v34, %v8371_v34 }
 0x3f5   : > { %v2667_v40 = vmul.f32 %v8495_v48, %v8495_v48  ;;  %4984 = vmatmul.mubr.f32.gmra.mrb[4].mxu1 %v4613_v36  ;;  %v2668_v51 = vmul.f32 %v8373_v27, %v8373_v27  ;;  %v2671_v58 = vmul.f32 %v8497_v37, %v8497_v37  ;;  %v2672_v38 = vmul.f32 %v8375_v52, %v8375_v52  ;;  %v11300_v37 = vld [vmem:[#allocation31_spill] sm:$0xff]  ;;  %v11301_v52 = vld [vmem:[#allocation17_spill] sm:$0xff] }
 0x3f6   : > { %v2675_v50 = vmul.f32 %v8499_v32, %v8499_v32  ;;  %v2676_v20 = vmul.f32 %v8377_v11, %v8377_v11  ;;  %v2845_v34 = vsel %vm1938_vm3, %v7924_v61, %v7922_v47  ;;  %v2852_v27 = vsel %vm1938_vm3, %v7842_v30, %v7840_v15  ;;  %v11303_v47 = vld [vmem:[#allocation18_spill] sm:$0xff]  ;;  %v11308_v36 = vld [vmem:[#allocation35_spill] sm:$0xff] }
 0x3f7   : > { %v2859_v48 = vsel %vm1938_vm3, %v2651_v49, %v2647_v54  ;;  %v2846_v55 = vsel %vm1940_vm4, %v11300_v37, %v2845_v34  ;;  %v2853_v43 = vsel %vm1940_vm4, %v11301_v52, %v2852_v27  ;;  %v2866_v11 = vsel %vm1938_vm3, %v2652_v13, %v2648_v39  ;;  %v11306_v49 = vld [vmem:[#allocation34_spill] sm:$0xff]  ;;  %v11309_v27 = vld [vmem:[#allocation21_spill] sm:$0xff]  ;;  %v11310_v37 = vld [vmem:[#allocation36_spill] sm:$0xff] }
 0x3f8   : > { %v2860_v32 = vsel %vm1940_vm4, %v2655_v26, %v2859_v48  ;;  %v2847_v57 = vsel %vm1942_vm5, %v11302_v24, %v2846_v55  ;;  %v2854_v61 = vsel %vm1942_vm5, %v11303_v47, %v2853_v43  ;;  %v2867_v30 = vsel %vm1940_vm4, %v2656_v63, %v2866_v11  ;;  %v11307_v26 = vld [vmem:[#allocation20_spill] sm:$0xff]  ;;  %v11311_v52 = vld [vmem:[#allocation22_spill] sm:$0xff]  ;;  %v11312_v24 = vld [vmem:[#allocation135_spill] sm:$0xff] }
 0x3f9   : > { %v2861_v15 = vsel %vm1942_vm5, %v2659_v59, %v2860_v32  ;;  %v2848_v22 = vsel %vm1944_vm6, %v11304_v0, %v2847_v57  ;;  %v2855_v54 = vsel %vm1944_vm6, %v11305_v1, %v2854_v61  ;;  %v2868_v39 = vsel %vm1942_vm5, %v2660_v53, %v2867_v30  ;;  %v11313_v47 = vld [vmem:[#allocation119_spill] sm:$0xff]  ;;  %v11316_v0 = vld [vmem:[#allocation137_spill] sm:$0xff]  ;;  %v11318_v1 = vld [vmem:[#allocation138_spill] sm:$0xff] }
 0x3fa   : > { %v2862_v8 = vsel %vm1944_vm6, %v2663_v4, %v2861_v15  ;;  %v2849_v13 = vsel %vm1946_vm7, %v11306_v49, %v2848_v22  ;;  %v2856_v6 = vsel %vm1946_vm7, %v11307_v26, %v2855_v54  ;;  %v2869_v63 = vsel %vm1944_vm6, %v2664_v9, %v2868_v39  ;;  %v11315_v15 = vld [vmem:[#allocation120_spill] sm:$0xff]  ;;  %v11317_v22 = vld [vmem:[#allocation121_spill] sm:$0xff]  ;;  %v11320_v49 = vld [vmem:[#allocation139_spill] sm:$0xff] }
 0x3fb   : > { %v2863_v59 = vsel %vm1946_vm7, %v2667_v40, %v2862_v8  ;;  %v2850_v34 = vsel %vm1948_vm8, %v11308_v36, %v2849_v13  ;;  %v2857_v48 = vsel %vm1948_vm8, %v11309_v27, %v2856_v6  ;;  %v2870_v53 = vsel %vm1946_vm7, %v2668_v51, %v2869_v63  ;;  %v11314_v51 = vld [vmem:[#allocation136_spill] sm:$0xff]  ;;  %v11319_v8 = vld [vmem:[#allocation122_spill] sm:$0xff]  ;;  %v11321_v26 = vld [vmem:[#allocation123_spill] sm:$0xff] }
 0x3fc   : > { %v2864_v4 = vsel %vm1948_vm8, %v2671_v58, %v2863_v59  ;;  %v2851_v55 = vsel %vm1950_vm9, %v11310_v37, %v2850_v34  ;;  %v2858_v43 = vsel %vm1950_vm9, %v11311_v52, %v2857_v48  ;;  %v2871_v9 = vsel %vm1948_vm8, %v2672_v38, %v2870_v53  ;;  %v11322_v59 = vld [vmem:[#allocation140_spill] sm:$0xff]  ;;  %v11324_v27 = vld [vmem:[#allocation141_spill] sm:$0xff] }
 0x3fd   : > { %v2865_v40 = vsel %vm1950_vm9, %v2675_v50, %v2864_v4  ;;  %v2872_v32 = vsel %vm1950_vm9, %v2676_v20, %v2871_v9  ;;  %v2945_v11 = vadd.f32 %v2858_v43, %v2851_v55  ;;  %v2679_v57 = vmul.f32 %v11312_v24, %v11312_v24  ;;  %v11323_v36 = vld [vmem:[#allocation124_spill] sm:$0xff]  ;;  %v11325_v53 = vld [vmem:[#allocation125_spill] sm:$0xff]  ;;  %v11326_v55 = vld [vmem:[#allocation142_spill] sm:$0xff] }
 0x3fe   : > { %v2680_v58 = vmul.f32 %v11313_v47, %v11313_v47  ;;  %v2683_v61 = vmul.f32 %v11314_v51, %v11314_v51  ;;  %v2684_v30 = vmul.f32 %v11315_v15, %v11315_v15  ;;  %v2687_v50 = vmul.f32 %v11316_v0, %v11316_v0  ;;  %v11327_v43 = vld [vmem:[#allocation126_spill] sm:$0xff]  ;;  %v11328_v9 = vld [vmem:[#allocation37_spill] sm:$0xff]  ;;  %v11330_v47 = vld [vmem:[#allocation23_spill] sm:$0xff] }
 0x3ff   : > { %v2688_v38 = vmul.f32 %v11317_v22, %v11317_v22  ;;  %v2946_v20 = vadd.f32 %v2945_v11, %v2865_v40  ;;  %v2691_v54 = vmul.f32 %v11318_v1, %v11318_v1  ;;  %v2692_v39 = vmul.f32 %v11319_v8, %v11319_v8  ;;  %v11329_v11 = vld [vmem:[#allocation38_spill] sm:$0xff]  ;;  %v11331_v51 = vld [vmem:[#allocation24_spill] sm:$0xff]  ;;  %v11332_v22 = vld [vmem:[#allocation39_spill] sm:$0xff] }
 0x400   : > { %v2695_v13 = vmul.f32 %v11320_v49, %v11320_v49  ;;  %v2696_v6 = vmul.f32 %v11321_v26, %v11321_v26  ;;  %v2699_v63 = vmul.f32 %v11322_v59, %v11322_v59  ;;  %v2700_v34 = vmul.f32 %v11323_v36, %v11323_v36  ;;  %v11333_v1 = vld [vmem:[#allocation25_spill] sm:$0xff]  ;;  %v11334_v59 = vld [vmem:[#allocation40_spill] sm:$0xff] }
 0x401   : > { %v2703_v48 = vmul.f32 %v11324_v27, %v11324_v27  ;;  %v2947_v4 = vadd.f32 %v2946_v20, %v2872_v32  ;;  %v2704_v37 = vmul.f32 %v11325_v53, %v11325_v53  ;;  %v2707_v52 = vmul.f32 %v11326_v55, %v11326_v55  ;;  %v11335_v27 = vld [vmem:[#allocation26_spill] sm:$0xff] }
 0x402   : > { %v2708_v40 = vmul.f32 %v11327_v43, %v11327_v43  ;;  %v2873_v24 = vsel %vm1938_vm3, %v11329_v11, %v11328_v9  ;;  %v2880_v15 = vsel %vm1938_vm3, %v11331_v51, %v11330_v47  ;;  %v2887_v0 = vsel %vm1938_vm3, %v2683_v61, %v2679_v57  ;;  %v11336_v61 = vld [vmem:[#allocation41_spill] sm:$0xff]  ;;  %v11338_v43 = vld [vmem:[#allocation42_spill] sm:$0xff]  ;;  %v11339_v11 = vld [vmem:[#allocation28_spill] sm:$0xff]  ;;  %v9738_v47 = vpop.xlane.xlu1 %6053 }
 0x403   : > { %v2894_v32 = vsel %vm1938_vm3, %v2684_v30, %v2680_v58  ;;  %2948 = vadd.xlane.f32.xlu1 %v2947_v4  ;;  %v2874_v20 = vsel %vm1940_vm4, %v11332_v22, %v2873_v24  ;;  %v2881_v8 = vsel %vm1940_vm4, %v11333_v1, %v2880_v15  ;;  %v2888_v49 = vsel %vm1940_vm4, %v2687_v50, %v2887_v0  ;;  %v11337_v4 = vld [vmem:[#allocation27_spill] sm:$0xff]  ;;  %v11341_v0 = vld [vmem:[#allocation29_spill] sm:$0xff]  ;;  %v9746_v22 = vpop.xlane.xlu0 %6028  ;;  %v11343_v1 = vld [vmem:[#allocation30_spill] sm:$0xff] }
 0x404   : > { %v2895_v26 = vsel %vm1940_vm4, %v2688_v38, %v2894_v32  ;;  %v2875_v36 = vsel %vm1942_vm5, %v11334_v59, %v2874_v20  ;;  %v2882_v53 = vsel %vm1942_vm5, %v11335_v27, %v2881_v8  ;;  %v2889_v57 = vsel %vm1942_vm5, %v2691_v54, %v2888_v49  ;;  %v11340_v51 = vld [vmem:[#allocation43_spill] sm:$0xff] }
 0x405   : > { %v2896_v58 = vsel %vm1942_vm5, %v2692_v39, %v2895_v26  ;;  %v2876_v30 = vsel %vm1944_vm6, %v11336_v61, %v2875_v36  ;;  %v2883_v55 = vsel %vm1944_vm6, %v11337_v4, %v2882_v53  ;;  %v2890_v50 = vsel %vm1944_vm6, %v2695_v13, %v2889_v57  ;;  %v11344_v27 = vld [vmem:[#allocation151_spill] sm:$0xff]  ;;  %v11345_v57 = vld [vmem:[#allocation152_spill] sm:$0xff]  ;;  %v11346_v61 = vld [vmem:[#allocation153_spill] sm:$0xff] }
 0x406   : > { %v2897_v38 = vsel %vm1944_vm6, %v2696_v6, %v2896_v58  ;;  %v2877_v9 = vsel %vm1946_vm7, %v11338_v43, %v2876_v30  ;;  %v2884_v24 = vsel %vm1946_vm7, %v11339_v11, %v2883_v55  ;;  %v2891_v54 = vsel %vm1946_vm7, %v2699_v63, %v2890_v50  ;;  %v11342_v63 = vld [vmem:[#allocation44_spill] sm:$0xff] }
 0x407   : > { %v2898_v39 = vsel %vm1946_vm7, %v2700_v34, %v2897_v38  ;;  %v2878_v15 = vsel %vm1948_vm8, %v11340_v51, %v2877_v9  ;;  %v2885_v13 = vsel %vm1948_vm8, %v11341_v0, %v2884_v24  ;;  %v2892_v6 = vsel %vm1948_vm8, %v2703_v48, %v2891_v54  ;;  %v11353_v0 = vld [vmem:[#allocation62_spill] sm:$0xff] }
 0x408   : > { %v2899_v32 = vsel %vm1948_vm8, %v2704_v37, %v2898_v39  ;;  %v9750_v20 = vmul.f32 %v9589_v25, %v9589_v25  ;;  %v2879_v34 = vsel %vm1950_vm9, %v11342_v63, %v2878_v15  ;;  %v2886_v8 = vsel %vm1950_vm9, %v11343_v1, %v2885_v13  ;;  %v11352_v15 = vld [vmem:[#allocation61_spill] sm:$0xff]  ;;  %v11356_v63 = vld [vmem:[#allocation46_spill] sm:$0xff] }
 0x409   : > { %v2893_v49 = vsel %vm1950_vm9, %v2707_v52, %v2892_v6  ;;  %v9759_v26 = vmul.f32 %v9591_v18, %v9591_v18  ;;  %v2900_v48 = vsel %vm1950_vm9, %v2708_v40, %v2899_v32  ;;  %v2950_v37 = vadd.f32 %v2886_v8, %v2879_v34  ;;  %v11355_v32 = vld [vmem:[#allocation45_spill] sm:$0xff] }
 0x40a   : > { %v6197_v59 = vrot.slane %v9738_v47, %v9573_v3  ;;  %v6177_v25 = vrot.slane %v9746_v22, %v9573_v3  ;;  %v5250_v36 = vmul.f32 %v8735_v35, %v8735_v35  ;;  %v5251_v53 = vmul.f32 %v11344_v27, %v11344_v27  ;;  %v11347_v35 = vld [vmem:[#allocation154_spill] sm:$0xff] }
 0x40b   : > { %v5254_v52 = vmul.f32 %v8737_v19, %v8737_v19  ;;  %v2951_v18 = vadd.f32 %v2950_v37, %v2893_v49  ;;  %v5255_v40 = vmul.f32 %v11345_v57, %v11345_v57  ;;  %v5258_v58 = vmul.f32 %v8739_v56, %v8739_v56  ;;  %v11348_v19 = vld [vmem:[#allocation155_spill] sm:$0xff]  ;;  %v11349_v56 = vld [vmem:[#allocation156_spill] sm:$0xff] }
 0x40c   : > { %v5259_v30 = vmul.f32 %v11346_v61, %v11346_v61  ;;  %v5262_v4 = vmul.f32 %v8741_v7, %v8741_v7  ;;  %v5263_v55 = vmul.f32 %v11347_v35, %v11347_v35  ;;  %v5266_v50 = vmul.f32 %v8743_v10, %v8743_v10  ;;  %v11350_v7 = vld [vmem:[#allocation157_spill] sm:$0xff]  ;;  %v11351_v10 = vld [vmem:[#allocation158_spill] sm:$0xff]  ;;  %v11358_v49 = vld [vmem:[#allocation47_spill] sm:$0xff] }
 0x40d   : > { %v5267_v38 = vmul.f32 %v11348_v19, %v11348_v19  ;;  %v2952_v43 = vadd.f32 %v2951_v18, %v2900_v48  ;;  %v5270_v9 = vmul.f32 %v8745_v31, %v8745_v31  ;;  %v5271_v11 = vmul.f32 %v11349_v56, %v11349_v56  ;;  %v11354_v31 = vld [vmem:[#allocation63_spill] sm:$0xff]  ;;  %v11359_v18 = vld [vmem:[#allocation65_spill] sm:$0xff]  ;;  %v11360_v61 = vld [vmem:[#allocation48_spill] sm:$0xff] }
 0x40e   : > { %v5274_v24 = vmul.f32 %v8747_v42, %v8747_v42  ;;  %v5275_v54 = vmul.f32 %v11350_v7, %v11350_v7  ;;  %v5278_v39 = vmul.f32 %v8749_v60, %v8749_v60  ;;  %v5279_v51 = vmul.f32 %v11351_v10, %v11351_v10  ;;  %v11357_v60 = vld [vmem:[#allocation64_spill] sm:$0xff]  ;;  %v11362_v19 = vld [vmem:[#allocation49_spill] sm:$0xff]  ;;  %v11363_v56 = vld [vmem:[#allocation67_spill] sm:$0xff] }
 0x40f   : > { %v5448_v13 = vsel %vm1938_vm3, %v11353_v0, %v11352_v15  ;;  %2953 = vadd.xlane.f32.xlu0 %v2952_v43  ;;  %v5455_v42 = vsel %vm1938_vm3, %v11356_v63, %v11355_v32  ;;  %v5462_v34 = vsel %vm1938_vm3, %v5254_v52, %v5250_v36  ;;  %v5469_v1 = vsel %vm1938_vm3, %v5255_v40, %v5251_v53  ;;  %v11361_v52 = vld [vmem:[#allocation66_spill] sm:$0xff]  ;;  %v11365_v0 = vld [vmem:[#allocation68_spill] sm:$0xff] }
 0x410   : > { %v5449_v6 = vsel %vm1940_vm4, %v11354_v31, %v5448_v13  ;;  %v5456_v48 = vsel %vm1940_vm4, %v11358_v49, %v5455_v42  ;;  %v5463_v37 = vsel %vm1940_vm4, %v5258_v58, %v5462_v34  ;;  %v5470_v27 = vsel %vm1940_vm4, %v5259_v30, %v5469_v1  ;;  %v11364_v10 = vld [vmem:[#allocation50_spill] sm:$0xff]  ;;  %v11366_v31 = vld [vmem:[#allocation51_spill] sm:$0xff]  ;;  %v11367_v32 = vld [vmem:[#allocation52_spill] sm:$0xff] }
 0x411   : > { %v5450_v8 = vsel %vm1942_vm5, %v11357_v60, %v5449_v6  ;;  %v5457_v35 = vsel %vm1942_vm5, %v11360_v61, %v5456_v48  ;;  %v5464_v36 = vsel %vm1942_vm5, %v5262_v4, %v5463_v37  ;;  %v5471_v53 = vsel %vm1942_vm5, %v5263_v55, %v5470_v27  ;;  %v11369_v60 = vld [vmem:[#allocation159_spill] sm:$0xff]  ;;  %v11370_v49 = vld [vmem:[#allocation176_spill] sm:$0xff]  ;;  %v11372_v37 = vld [vmem:[#allocation177_spill] sm:$0xff] }
 0x412   : > { %v5451_v57 = vsel %vm1944_vm6, %v11359_v18, %v5450_v8  ;;  %v5458_v43 = vsel %vm1944_vm6, %v11362_v19, %v5457_v35  ;;  %v5465_v58 = vsel %vm1944_vm6, %v5266_v50, %v5464_v36  ;;  %v5472_v30 = vsel %vm1944_vm6, %v5267_v38, %v5471_v53  ;;  %v11373_v18 = vld [vmem:[#allocation161_spill] sm:$0xff]  ;;  %v11375_v61 = vld [vmem:[#allocation162_spill] sm:$0xff]  ;;  %v11376_v53 = vld [vmem:[#allocation179_spill] sm:$0xff] }
 0x413   : > { %v5452_v40 = vsel %vm1946_vm7, %v11361_v52, %v5451_v57  ;;  %v5459_v15 = vsel %vm1946_vm7, %v11364_v10, %v5458_v43  ;;  %v5466_v4 = vsel %vm1946_vm7, %v5270_v9, %v5465_v58  ;;  %v5473_v55 = vsel %vm1946_vm7, %v5271_v11, %v5472_v30  ;;  %v11368_v9 = vld [vmem:[#allocation175_spill] sm:$0xff]  ;;  %v11378_v43 = vld [vmem:[#allocation180_spill] sm:$0xff] }
 0x414   : > { %v5453_v7 = vsel %vm1948_vm8, %v11363_v56, %v5452_v40  ;;  %v5460_v6 = vsel %vm1948_vm8, %v11366_v31, %v5459_v15  ;;  %v5467_v50 = vsel %vm1948_vm8, %v5274_v24, %v5466_v4  ;;  %v5474_v38 = vsel %vm1948_vm8, %v5275_v54, %v5473_v55  ;;  %v11371_v24 = vld [vmem:[#allocation160_spill] sm:$0xff]  ;;  %v11377_v40 = vld [vmem:[#allocation163_spill] sm:$0xff]  ;;  %v11381_v15 = vld [vmem:[#allocation165_spill] sm:$0xff] }
 0x415   : > { %v5454_v13 = vsel %vm1950_vm9, %v11365_v0, %v5453_v7  ;;  %v5461_v63 = vsel %vm1950_vm9, %v11367_v32, %v5460_v6  ;;  %v5468_v42 = vsel %vm1950_vm9, %v5278_v39, %v5467_v50  ;;  %v5475_v34 = vsel %vm1950_vm9, %v5279_v51, %v5474_v38  ;;  %v11374_v51 = vld [vmem:[#allocation178_spill] sm:$0xff]  ;;  %v11379_v30 = vld [vmem:[#allocation164_spill] sm:$0xff]  ;;  %v11380_v7 = vld [vmem:[#allocation181_spill] sm:$0xff] }
 0x416   : > { %v5282_v11 = vmul.f32 %v11368_v9, %v11368_v9  ;;  %v5548_v1 = vadd.f32 %v5461_v63, %v5454_v13  ;;  %v5283_v8 = vmul.f32 %v11369_v60, %v11369_v60  ;;  %v5286_v48 = vmul.f32 %v11370_v49, %v11370_v49  ;;  %v11382_v55 = vld [vmem:[#allocation182_spill] sm:$0xff]  ;;  %v11384_v50 = vld [vmem:[#allocation69_spill] sm:$0xff]  ;;  %v11389_v49 = vld [vmem:[#allocation55_spill] sm:$0xff] }
 0x417   : > { %v5287_v54 = vmul.f32 %v11371_v24, %v11371_v24  ;;  %v5290_v27 = vmul.f32 %v11372_v37, %v11372_v37  ;;  %v5291_v39 = vmul.f32 %v11373_v18, %v11373_v18  ;;  %v5294_v57 = vmul.f32 %v11374_v51, %v11374_v51  ;;  %v11383_v31 = vld [vmem:[#allocation166_spill] sm:$0xff]  ;;  %v11386_v63 = vld [vmem:[#allocation53_spill] sm:$0xff]  ;;  %v11390_v18 = vld [vmem:[#allocation72_spill] sm:$0xff] }
 0x418   : > { %v5295_v35 = vmul.f32 %v11375_v61, %v11375_v61  ;;  %v5549_v36 = vadd.f32 %v5548_v1, %v5468_v42  ;;  %v5298_v52 = vmul.f32 %v11376_v53, %v11376_v53  ;;  %v5299_v19 = vmul.f32 %v11377_v40, %v11377_v40  ;;  %v11385_v38 = vld [vmem:[#allocation70_spill] sm:$0xff]  ;;  %v11388_v1 = vld [vmem:[#allocation71_spill] sm:$0xff]  ;;  %v11391_v61 = vld [vmem:[#allocation56_spill] sm:$0xff] }
 0x419   : > { %v5302_v58 = vmul.f32 %v11378_v43, %v11378_v43  ;;  %v5303_v56 = vmul.f32 %v11379_v30, %v11379_v30  ;;  %v5306_v10 = vmul.f32 %v11380_v7, %v11380_v7  ;;  %v5307_v4 = vmul.f32 %v11381_v15, %v11381_v15  ;;  %v11387_v42 = vld [vmem:[#allocation54_spill] sm:$0xff]  ;;  %v11392_v43 = vld [vmem:[#allocation73_spill] sm:$0xff] }
 0x41a   : > { %v5310_v0 = vmul.f32 %v11382_v55, %v11382_v55  ;;  %v5550_v13 = vadd.f32 %v5549_v36, %v5475_v34  ;;  %v5311_v6 = vmul.f32 %v11383_v31, %v11383_v31  ;;  %v5476_v32 = vsel %vm1938_vm3, %v11385_v38, %v11384_v50  ;;  %v11393_v7 = vld [vmem:[#allocation57_spill] sm:$0xff]  ;;  %v11395_v55 = vld [vmem:[#allocation58_spill] sm:$0xff]  ;;  %v11396_v31 = vld [vmem:[#allocation83_spill] sm:$0xff] }
 0x41b   : > { %v5483_v9 = vsel %vm1938_vm3, %v11387_v42, %v11386_v63  ;;  %v5477_v60 = vsel %vm1940_vm4, %v11388_v1, %v5476_v32  ;;  %v5490_v37 = vsel %vm1938_vm3, %v5286_v48, %v5282_v11  ;;  %v5497_v34 = vsel %vm1938_vm3, %v5287_v54, %v5283_v8  ;;  %v11394_v48 = vld [vmem:[#allocation74_spill] sm:$0xff]  ;;  %v11397_v38 = vld [vmem:[#allocation59_spill] sm:$0xff]  ;;  %v9910_v63 = vpop.xlane.xlu1 %6058  ;;  %v9912_v42 = vpop.xlane.xlu0 %6033 }
 0x41c   : > { %v5484_v24 = vsel %vm1940_vm4, %v11389_v49, %v5483_v9  ;;  %5551 = vadd.xlane.f32.xlu1 %v5550_v13  ;;  %v5478_v51 = vsel %vm1942_vm5, %v11390_v18, %v5477_v60  ;;  %v5491_v53 = vsel %vm1940_vm4, %v5290_v27, %v5490_v37  ;;  %v5498_v40 = vsel %vm1940_vm4, %v5291_v39, %v5497_v34  ;;  %v11398_v9 = vld [vmem:[#allocation92_spill] sm:$0xff]  ;;  %v11401_v37 = vld [vmem:[#allocation75_spill] sm:$0xff] }
 0x41d   : > { %v5485_v36 = vsel %vm1942_vm5, %v11391_v61, %v5484_v24  ;;  %v5479_v30 = vsel %vm1944_vm6, %v11392_v43, %v5478_v51  ;;  %v5492_v11 = vsel %vm1942_vm5, %v5294_v57, %v5491_v53  ;;  %v5499_v8 = vsel %vm1942_vm5, %v5295_v35, %v5498_v40  ;;  %v11405_v51 = vld [vmem:[#allocation76_spill] sm:$0xff] }
 0x41e   : > { %v5486_v15 = vsel %vm1944_vm6, %v11393_v7, %v5485_v36  ;;  %v5480_v54 = vsel %vm1946_vm7, %v11394_v48, %v5479_v30  ;;  %v5493_v27 = vsel %vm1944_vm6, %v5298_v52, %v5492_v11  ;;  %v5500_v39 = vsel %vm1944_vm6, %v5299_v19, %v5499_v8  ;;  %v11399_v52 = vld [vmem:[#allocation60_spill] sm:$0xff]  ;;  %v11406_v36 = vld [vmem:[#allocation209_spill] sm:$0xff]  ;;  %v11408_v7 = vld [vmem:[#allocation86_spill] sm:$0xff] }
 0x41f   : > { %v5487_v13 = vsel %vm1946_vm7, %v11395_v55, %v5486_v15  ;;  %v5481_v50 = vsel %vm1948_vm8, %v11396_v31, %v5480_v54  ;;  %v5494_v57 = vsel %vm1946_vm7, %v5302_v58, %v5493_v27  ;;  %v5501_v35 = vsel %vm1946_vm7, %v5303_v56, %v5500_v39  ;;  %v11407_v40 = vld [vmem:[#allocation200_spill] sm:$0xff]  ;;  %v11409_v11 = vld [vmem:[#allocation77_spill] sm:$0xff]  ;;  %v11410_v48 = vld [vmem:[#allocation210_spill] sm:$0xff] }
 0x420   : > { %v5488_v32 = vsel %vm1948_vm8, %v11397_v38, %v5487_v13  ;;  %v5482_v1 = vsel %vm1950_vm9, %v11398_v9, %v5481_v50  ;;  %v5495_v60 = vsel %vm1948_vm8, %v5306_v10, %v5494_v57  ;;  %v5502_v49 = vsel %vm1948_vm8, %v5307_v4, %v5501_v35  ;;  %v11411_v55 = vld [vmem:[#allocation201_spill] sm:$0xff]  ;;  %v11412_v27 = vld [vmem:[#allocation87_spill] sm:$0xff]  ;;  %v11413_v31 = vld [vmem:[#allocation78_spill] sm:$0xff] }
 0x421   : > { %v5489_v19 = vsel %vm1950_vm9, %v11399_v52, %v5488_v32  ;;  %v9927_v58 = vsel %vm1938_vm3, %v6197_v59, %v6193_v62  ;;  %v9936_v56 = vsel %vm1938_vm3, %v6177_v25, %v6173_v45  ;;  %v5496_v10 = vsel %vm1950_vm9, %v5310_v0, %v5495_v60  ;;  %v11400_v59 = vld [vmem:[#allocation84_spill] sm:$0xff]  ;;  %v11403_v0 = vld [vmem:[#allocation199_spill] sm:$0xff]  ;;  %v11415_v57 = vld [vmem:[#allocation202_spill] sm:$0xff] }
 0x422   : > { %v5553_v4 = vadd.f32 %v5489_v19, %v5482_v1  ;;  %v5503_v44 = vsel %vm1950_vm9, %v5311_v6, %v5502_v49  ;;  %v6201_v47 = vrot.slane %v9910_v63, %v9573_v3  ;;  %v6181_v62 = vrot.slane %v9912_v42, %v9573_v3  ;;  %v11402_v45 = vld [vmem:[#allocation208_spill] sm:$0xff]  ;;  %v11404_v6 = vld [vmem:[#allocation85_spill] sm:$0xff]  ;;  %v11414_v38 = vld [vmem:[#allocation211_spill] sm:$0xff] }
 0x423   : > { %v2709_v33 = vmul.f32 %v11400_v59, %v11400_v59  ;;  %v2710_v22 = vmul.f32 %v11401_v37, %v11401_v37  ;;  %v2711_v25 = vmul.f32 %v11402_v45, %v11402_v45  ;;  %v2712_v34 = vmul.f32 %v11403_v0, %v11403_v0  ;;  %v11416_v9 = vld [vmem:[#allocation88_spill] sm:$0xff]  ;;  %v11417_v52 = vld [vmem:[#allocation79_spill] sm:$0xff]  ;;  %v11422_v45 = vld [vmem:[#allocation213_spill] sm:$0xff] }
 0x424   : > { %v5554_v24 = vadd.f32 %v5553_v4, %v5496_v10  ;;  %v2713_v18 = vmul.f32 %v11404_v6, %v11404_v6  ;;  %v2714_v61 = vmul.f32 %v11405_v51, %v11405_v51  ;;  %v2715_v53 = vmul.f32 %v11406_v36, %v11406_v36  ;;  %v11418_v60 = vld [vmem:[#allocation212_spill] sm:$0xff]  ;;  %v11419_v10 = vld [vmem:[#allocation203_spill] sm:$0xff]  ;;  %v11424_v36 = vld [vmem:[#allocation90_spill] sm:$0xff] }
 0x425   : > { %v2716_v43 = vmul.f32 %v11407_v40, %v11407_v40  ;;  %v2717_v15 = vmul.f32 %v11408_v7, %v11408_v7  ;;  %v2718_v8 = vmul.f32 %v11409_v11, %v11409_v11  ;;  %v2719_v54 = vmul.f32 %v11410_v48, %v11410_v48  ;;  %v11423_v6 = vld [vmem:[#allocation204_spill] sm:$0xff]  ;;  %v11426_v11 = vld [vmem:[#allocation214_spill] sm:$0xff] }
 0x426   : > { %v5555_v30 = vadd.f32 %v5554_v24, %v5503_v44  ;;  %v2720_v13 = vmul.f32 %v11411_v55, %v11411_v55  ;;  %v2721_v39 = vmul.f32 %v11412_v27, %v11412_v27  ;;  %v2722_v50 = vmul.f32 %v11413_v31, %v11413_v31  ;;  %v11420_v44 = vld [vmem:[#allocation89_spill] sm:$0xff]  ;;  %v11421_v24 = vld [vmem:[#allocation80_spill] sm:$0xff]  ;;  %v11428_v31 = vld [vmem:[#allocation91_spill] sm:$0xff] }
 0x427   : > { %v2723_v32 = vmul.f32 %v11414_v38, %v11414_v38  ;;  %v2724_v35 = vmul.f32 %v11415_v57, %v11415_v57  ;;  %v2725_v1 = vmul.f32 %v11416_v9, %v11416_v9  ;;  %v2726_v19 = vmul.f32 %v11417_v52, %v11417_v52  ;;  %v11427_v55 = vld [vmem:[#allocation205_spill] sm:$0xff]  ;;  %v11429_v57 = vld [vmem:[#allocation82_spill] sm:$0xff]  ;;  %v11430_v52 = vld [vmem:[#allocation215_spill] sm:$0xff] }
 0x428   : > { %5556 = vadd.xlane.f32.xlu0 %v5555_v30  ;;  %v2727_v49 = vmul.f32 %v11418_v60, %v11418_v60  ;;  %v2728_v4 = vmul.f32 %v11419_v10, %v11419_v10  ;;  %v2729_v59 = vmul.f32 %v11420_v44, %v11420_v44  ;;  %v2730_v37 = vmul.f32 %v11421_v24, %v11421_v24  ;;  %v11425_v30 = vld [vmem:[#allocation81_spill] sm:$0xff]  ;;  %v11431_v10 = vld [vmem:[#allocation206_spill] sm:$0xff] }
 0x429   : > { %v2731_v0 = vmul.f32 %v11422_v45, %v11422_v45  ;;  %v2732_v51 = vmul.f32 %v11423_v6, %v11423_v6  ;;  %v2733_v40 = vmul.f32 %v11424_v36, %v11424_v36  ;;  %v2734_v7 = vmul.f32 %v11425_v30, %v11425_v30 }
 0x42a   : > { %v2735_v48 = vmul.f32 %v11426_v11, %v11426_v11  ;;  %v2736_v27 = vmul.f32 %v11427_v55, %v11427_v55  ;;  %v2737_v38 = vmul.f32 %v11428_v31, %v11428_v31  ;;  %v2738_v9 = vmul.f32 %v11429_v57, %v11429_v57 }
 0x42b   : > { %v2739_v60 = vmul.f32 %v11430_v52, %v11430_v52  ;;  %v2740_v44 = vmul.f32 %v11431_v10, %v11431_v10  ;;  %v2901_v24 = vsel %vm1938_vm3, %v2713_v18, %v2709_v33  ;;  %v2908_v45 = vsel %vm1938_vm3, %v2714_v61, %v2710_v22 }
 0x42c   : > { %v2915_v6 = vsel %vm1938_vm3, %v2715_v53, %v2711_v25  ;;  %v2902_v36 = vsel %vm1940_vm4, %v2717_v15, %v2901_v24  ;;  %v2909_v30 = vsel %vm1940_vm4, %v2718_v8, %v2908_v45  ;;  %v2922_v55 = vsel %vm1938_vm3, %v2716_v43, %v2712_v34  ;;  %v11439_v45 = vld [vmem:[#allocation242_spill] sm:$0xff] }
 0x42d   : > { %v2916_v11 = vsel %vm1940_vm4, %v2719_v54, %v2915_v6  ;;  %v2903_v31 = vsel %vm1942_vm5, %v2721_v39, %v2902_v36  ;;  %v2910_v57 = vsel %vm1942_vm5, %v2722_v50, %v2909_v30  ;;  %v2923_v33 = vsel %vm1940_vm4, %v2720_v13, %v2922_v55  ;;  %v11440_v36 = vld [vmem:[#allocation104_spill] sm:$0xff] }
 0x42e   : > { %v2917_v52 = vsel %vm1942_vm5, %v2723_v32, %v2916_v11  ;;  %v2904_v22 = vsel %vm1944_vm6, %v2725_v1, %v2903_v31  ;;  %v2911_v25 = vsel %vm1944_vm6, %v2726_v19, %v2910_v57  ;;  %v2924_v61 = vsel %vm1942_vm5, %v2724_v35, %v2923_v33  ;;  %v11441_v11 = vld [vmem:[#allocation95_spill] sm:$0xff]  ;;  %v11442_v31 = vld [vmem:[#allocation252_spill] sm:$0xff] }
 0x42f   : > { %v2918_v18 = vsel %vm1944_vm6, %v2727_v49, %v2917_v52  ;;  %v2905_v53 = vsel %vm1946_vm7, %v2729_v59, %v2904_v22  ;;  %v2912_v34 = vsel %vm1946_vm7, %v2730_v37, %v2911_v25  ;;  %v2925_v15 = vsel %vm1944_vm6, %v2728_v4, %v2924_v61  ;;  %v11432_v4 = vld [vmem:[#allocation102_spill] sm:$0xff]  ;;  %v11433_v37 = vld [vmem:[#allocation93_spill] sm:$0xff]  ;;  %v11443_v52 = vld [vmem:[#allocation243_spill] sm:$0xff] }
 0x430   : > { %v2919_v43 = vsel %vm1946_vm7, %v2731_v0, %v2918_v18  ;;  %v2906_v8 = vsel %vm1948_vm8, %v2733_v40, %v2905_v53  ;;  %v2913_v54 = vsel %vm1948_vm8, %v2734_v7, %v2912_v34  ;;  %v2926_v39 = vsel %vm1946_vm7, %v2732_v51, %v2925_v15  ;;  %v11434_v40 = vld [vmem:[#allocation250_spill] sm:$0xff]  ;;  %v11435_v7 = vld [vmem:[#allocation241_spill] sm:$0xff]  ;;  %v11445_v61 = vld [vmem:[#allocation96_spill] sm:$0xff] }
 0x431   : > { %v2920_v13 = vsel %vm1948_vm8, %v2735_v48, %v2919_v43  ;;  %v2907_v50 = vsel %vm1950_vm9, %v2737_v38, %v2906_v8  ;;  %v2914_v32 = vsel %vm1950_vm9, %v2738_v9, %v2913_v54  ;;  %v2927_v1 = vsel %vm1948_vm8, %v2736_v27, %v2926_v39  ;;  %v11436_v38 = vld [vmem:[#allocation103_spill] sm:$0xff]  ;;  %v11444_v22 = vld [vmem:[#allocation105_spill] sm:$0xff]  ;;  %v11447_v15 = vld [vmem:[#allocation244_spill] sm:$0xff] }
 0x432   : > { %v2921_v35 = vsel %vm1950_vm9, %v2739_v60, %v2920_v13  ;;  %v2928_v19 = vsel %vm1950_vm9, %v2740_v44, %v2927_v1  ;;  %v2955_v49 = vadd.f32 %v2914_v32, %v2907_v50  ;;  %v5312_v59 = vmul.f32 %v11432_v4, %v11432_v4  ;;  %v11437_v60 = vld [vmem:[#allocation94_spill] sm:$0xff]  ;;  %v11438_v44 = vld [vmem:[#allocation251_spill] sm:$0xff]  ;;  %v11446_v34 = vld [vmem:[#allocation253_spill] sm:$0xff] }
 0x433   : > { %v5313_v0 = vmul.f32 %v11433_v37, %v11433_v37  ;;  %v5314_v51 = vmul.f32 %v11434_v40, %v11434_v40  ;;  %v5315_v48 = vmul.f32 %v11435_v7, %v11435_v7  ;;  %v5316_v9 = vmul.f32 %v11436_v38, %v11436_v38  ;;  %v11448_v54 = vld [vmem:[#allocation106_spill] sm:$0xff]  ;;  %v11449_v39 = vld [vmem:[#allocation97_spill] sm:$0xff]  ;;  %v11454_v7 = vld [vmem:[#allocation255_spill] sm:$0xff] }
 0x434   : > { %v5317_v27 = vmul.f32 %v11437_v60, %v11437_v60  ;;  %v2956_v10 = vadd.f32 %v2955_v49, %v2921_v35  ;;  %v5318_v24 = vmul.f32 %v11438_v44, %v11438_v44  ;;  %v5319_v6 = vmul.f32 %v11439_v45, %v11439_v45  ;;  %v11450_v32 = vld [vmem:[#allocation254_spill] sm:$0xff]  ;;  %v11451_v1 = vld [vmem:[#allocation245_spill] sm:$0xff]  ;;  %v11452_v49 = vld [vmem:[#allocation107_spill] sm:$0xff] }
 0x435   : > { %v5320_v30 = vmul.f32 %v11440_v36, %v11440_v36  ;;  %v5321_v55 = vmul.f32 %v11441_v11, %v11441_v11  ;;  %v5322_v57 = vmul.f32 %v11442_v31, %v11442_v31  ;;  %v5323_v33 = vmul.f32 %v11443_v52, %v11443_v52  ;;  %v11453_v37 = vld [vmem:[#allocation98_spill] sm:$0xff]  ;;  %v11456_v44 = vld [vmem:[#allocation108_spill] sm:$0xff]  ;;  %v11457_v36 = vld [vmem:[#allocation99_spill] sm:$0xff] }
 0x436   : > { %v5324_v25 = vmul.f32 %v11444_v22, %v11444_v22  ;;  %v2957_v18 = vadd.f32 %v2956_v10, %v2928_v19  ;;  %v5325_v53 = vmul.f32 %v11445_v61, %v11445_v61  ;;  %v5326_v43 = vmul.f32 %v11446_v34, %v11446_v34  ;;  %v11455_v60 = vld [vmem:[#allocation246_spill] sm:$0xff]  ;;  %v11458_v31 = vld [vmem:[#allocation256_spill] sm:$0xff]  ;;  %v11459_v22 = vld [vmem:[#allocation247_spill] sm:$0xff] }
 0x437   : > { %v5327_v8 = vmul.f32 %v11447_v15, %v11447_v15  ;;  %v5328_v13 = vmul.f32 %v11448_v54, %v11448_v54  ;;  %v5329_v50 = vmul.f32 %v11449_v39, %v11449_v39  ;;  %v5330_v35 = vmul.f32 %v11450_v32, %v11450_v32  ;;  %v11460_v61 = vld [vmem:[#allocation109_spill] sm:$0xff]  ;;  %v11461_v15 = vld [vmem:[#allocation100_spill] sm:$0xff] }
 0x438   : > { %v5331_v19 = vmul.f32 %v11451_v1, %v11451_v1  ;;  %2958 = vadd.xlane.f32.xlu1 %v2957_v18  ;;  %v5332_v4 = vmul.f32 %v11452_v49, %v11452_v49  ;;  %v5333_v40 = vmul.f32 %v11453_v37, %v11453_v37  ;;  %v5334_v38 = vmul.f32 %v11454_v7, %v11454_v7  ;;  %v11462_v39 = vld [vmem:[#allocation257_spill] sm:$0xff]  ;;  %v11463_v1 = vld [vmem:[#allocation248_spill] sm:$0xff] }
 0x439   : > { %v5335_v10 = vmul.f32 %v11455_v60, %v11455_v60  ;;  %v5336_v45 = vmul.f32 %v11456_v44, %v11456_v44  ;;  %v5337_v11 = vmul.f32 %v11457_v36, %v11457_v36  ;;  %v5338_v52 = vmul.f32 %v11458_v31, %v11458_v31 }
 0x43a   : > { %v5339_v18 = vmul.f32 %v11459_v22, %v11459_v22  ;;  %v5340_v34 = vmul.f32 %v11460_v61, %v11460_v61  ;;  %v5341_v54 = vmul.f32 %v11461_v15, %v11461_v15  ;;  %v5342_v32 = vmul.f32 %v11462_v39, %v11462_v39 }
 0x43b   : > { %v5343_v49 = vmul.f32 %v11463_v1, %v11463_v1  ;;  %v5504_v37 = vsel %vm1938_vm3, %v5316_v9, %v5312_v59  ;;  %v5511_v7 = vsel %vm1938_vm3, %v5317_v27, %v5313_v0  ;;  %v5518_v60 = vsel %vm1938_vm3, %v5318_v24, %v5314_v51 }
 0x43c   : > { %v5525_v44 = vsel %vm1938_vm3, %v5319_v6, %v5315_v48  ;;  %v5505_v36 = vsel %vm1940_vm4, %v5320_v30, %v5504_v37  ;;  %v5512_v31 = vsel %vm1940_vm4, %v5321_v55, %v5511_v7  ;;  %v5519_v22 = vsel %vm1940_vm4, %v5322_v57, %v5518_v60  ;;  %v6079_v57 = vpop.xlane.xlu1 %6078  ;;  %v11468_v37 = vld [vmem:[#allocation110_spill] sm:$0xff]  ;;  %v11469_v60 = vld [vmem:[#allocation101_spill] sm:$0xff] }
 0x43d   : > { %v5526_v61 = vsel %vm1940_vm4, %v5323_v33, %v5525_v44  ;;  %v5506_v15 = vsel %vm1942_vm5, %v5324_v25, %v5505_v36  ;;  %v5513_v39 = vsel %vm1942_vm5, %v5325_v53, %v5512_v31  ;;  %v5520_v59 = vsel %vm1942_vm5, %v5326_v43, %v5519_v22  ;;  %v6074_v33 = vpop.xlane.xlu0 %6073  ;;  %v11470_v22 = vld [vmem:[#allocation112_spill] sm:$0xff] }
 0x43e   : > { %v5527_v0 = vsel %vm1942_vm5, %v5327_v8, %v5526_v61  ;;  %v5507_v51 = vsel %vm1944_vm6, %v5328_v13, %v5506_v15  ;;  %v5514_v48 = vsel %vm1944_vm6, %v5329_v50, %v5513_v39  ;;  %v5521_v9 = vsel %vm1944_vm6, %v5330_v35, %v5520_v59  ;;  %v11471_v15 = vld [vmem:[#allocation111_spill] sm:$0xff] }
 0x43f   : > { %v5528_v27 = vsel %vm1944_vm6, %v5331_v19, %v5527_v0  ;;  %v5508_v24 = vsel %vm1946_vm7, %v5332_v4, %v5507_v51  ;;  %v5515_v6 = vsel %vm1946_vm7, %v5333_v40, %v5514_v48  ;;  %v5522_v30 = vsel %vm1946_vm7, %v5334_v38, %v5521_v9  ;;  %v11472_v51 = vld [vmem:[#allocation283_spill] sm:$0xff]  ;;  %v11473_v9 = vld [vmem:[#allocation284_spill] sm:$0xff] }
 0x440   : > { %v5529_v55 = vsel %vm1946_vm7, %v5335_v10, %v5528_v27  ;;  %v5509_v25 = vsel %vm1948_vm8, %v5336_v45, %v5508_v24  ;;  %v5516_v53 = vsel %vm1948_vm8, %v5337_v11, %v5515_v6  ;;  %v5523_v43 = vsel %vm1948_vm8, %v5338_v52, %v5522_v30  ;;  %v11464_v10 = vld [vmem:[#allocation216_spill] sm:$0xff]  ;;  %v11465_v11 = vld [vmem:[#allocation207_spill] sm:$0xff]  ;;  %v11474_v24 = vld [vmem:[#allocation285_spill] sm:$0xff] }
 0x441   : > { %v5530_v8 = vsel %vm1948_vm8, %v5339_v18, %v5529_v55  ;;  %v5510_v13 = vsel %vm1950_vm9, %v5340_v34, %v5509_v25  ;;  %v5517_v50 = vsel %vm1950_vm9, %v5341_v54, %v5516_v53  ;;  %v5524_v35 = vsel %vm1950_vm9, %v5342_v32, %v5523_v43  ;;  %v11466_v18 = vld [vmem:[#allocation258_spill] sm:$0xff]  ;;  %v11467_v54 = vld [vmem:[#allocation249_spill] sm:$0xff]  ;;  %v11476_v25 = vld [vmem:[#allocation287_spill] sm:$0xff] }
 0x442   : > { %v5531_v19 = vsel %vm1950_vm9, %v5343_v49, %v5530_v8  ;;  %v5558_v4 = vadd.f32 %v5517_v50, %v5510_v13  ;;  %v6217_v40 = vrot.slane %v6079_v57, %v9573_v3  ;;  %v6213_v38 = vrot.slane %v6074_v33, %v9573_v3  ;;  %v11475_v30 = vld [vmem:[#allocation286_spill] sm:$0xff]  ;;  %v11477_v43 = vld [vmem:[#allocation288_spill] sm:$0xff]  ;;  %v11478_v13 = vld [vmem:[#allocation289_spill] sm:$0xff] }
 0x443   : > { %v2743_v45 = vmul.f32 %v11464_v10, %v11464_v10  ;;  %v2744_v52 = vmul.f32 %v11465_v11, %v11465_v11  ;;  %v5346_v34 = vmul.f32 %v11466_v18, %v11466_v18  ;;  %v5347_v32 = vmul.f32 %v11467_v54, %v11467_v54  ;;  %v11482_v10 = vld [vmem:[#allocation185_spill] sm:$0xff]  ;;  %v11484_v18 = vld [vmem:[#allocation195_spill] sm:$0xff] }
 0x444   : > { %v10143_v1 = vsel %vm1940_vm4, %v6201_v47, %v9927_v58  ;;  %v5559_v49 = vadd.f32 %v5558_v4, %v5524_v35  ;;  %v2961_v7 = vsel %vm2960_vm10, %v11468_v37, 0.0  ;;  %v2962_v44 = vsel %vm2960_vm10, %v11469_v60, 0.0  ;;  %v11479_v35 = vld [vmem:[#allocation290_spill] sm:$0xff]  ;;  %v11480_v4 = vld [vmem:[#allocation193_spill] sm:$0xff]  ;;  %v11485_v54 = vld [vmem:[#allocation187_spill] sm:$0xff] }
 0x445   : > { %v10154_v36 = vsel %vm1940_vm4, %v6181_v62, %v9936_v56  ;;  %v2963_v31 = vadd.f32 %v2962_v44, %v2961_v7  ;;  %v2964_v63 = vsel %vm2960_vm10, %v2743_v45, 0.0  ;;  %v5563_v58 = vsel %vm2960_vm10, %v11470_v22, 0.0  ;;  %v11483_v45 = vld [vmem:[#allocation186_spill] sm:$0xff]  ;;  %v11486_v37 = vld [vmem:[#allocation196_spill] sm:$0xff] }
 0x446   : > { %v5560_v47 = vadd.f32 %v5559_v49, %v5531_v19  ;;  %v2966_v61 = vsel %vm2960_vm10, %v2744_v52, 0.0  ;;  %v5564_v39 = vsel %vm2960_vm10, %v11471_v15, 0.0  ;;  %v5566_v59 = vsel %vm2960_vm10, %v5346_v34, 0.0  ;;  %v11487_v60 = vld [vmem:[#allocation188_spill] sm:$0xff] }
 0x447   : > { %v10164_v0 = vsel %vm1938_vm3, %v6217_v40, %v6213_v38  ;;  %v2965_v42 = vadd.f32 %v2964_v63, %v2963_v31  ;;  %v5565_v56 = vadd.f32 %v5564_v39, %v5563_v58  ;;  %v5568_v62 = vsel %vm2960_vm10, %v5347_v32, 0.0  ;;  %v11481_v40 = vld [vmem:[#allocation194_spill] sm:$0xff]  ;;  %v11488_v31 = vld [vmem:[#allocation301_spill] sm:$0xff] }
 0x448   : > { %5561 = vadd.xlane.f32.xlu0 %v5560_v47  ;;  %v2420_v48 = vmul.f32 %v11472_v51, %v11472_v51  ;;  %v2424_v27 = vmul.f32 %v11473_v9, %v11473_v9  ;;  %v2428_v6 = vmul.f32 %v11474_v24, %v11474_v24  ;;  %v2432_v55 = vmul.f32 %v11475_v30, %v11475_v30  ;;  %v11489_v58 = vld [vmem:[#allocation197_spill] sm:$0xff]  ;;  %v11491_v39 = vld [vmem:[#allocation302_spill] sm:$0xff]  ;;  %v11494_v51 = vld [vmem:[#allocation303_spill] sm:$0xff] }
 0x449   : > { %v2967_v57 = vadd.f32 %v2966_v61, %v2965_v42  ;;  %v5567_v33 = vadd.f32 %v5566_v59, %v5565_v56  ;;  %v2436_v53 = vmul.f32 %v11476_v25, %v11476_v25  ;;  %v2440_v8 = vmul.f32 %v11477_v43, %v11477_v43  ;;  %v11490_v61 = vld [vmem:[#allocation189_spill] sm:$0xff]  ;;  %v11492_v59 = vld [vmem:[#allocation198_spill] sm:$0xff]  ;;  %v11496_v30 = vld [vmem:[#allocation191_spill] sm:$0xff] }
 0x44a   : > { %v2444_v50 = vmul.f32 %v11478_v13, %v11478_v13  ;;  %v2448_v19 = vmul.f32 %v11479_v35, %v11479_v35  ;;  %v2573_v38 = vsel %vm1938_vm3, %v11481_v40, %v11480_v4  ;;  %v2580_v11 = vsel %vm1938_vm3, %v11483_v45, %v11482_v10  ;;  %v11493_v56 = vld [vmem:[#allocation190_spill] sm:$0xff]  ;;  %v11499_v35 = vld [vmem:[#allocation192_spill] sm:$0xff]  ;;  %v11500_v40 = vld [vmem:[#allocation325_spill] sm:$0xff] }
 0x44b   : > { %2968 = vadd.xlane.f32.xlu1 %v2967_v57  ;;  %v5569_v52 = vadd.f32 %v5568_v62, %v5567_v33  ;;  %v2574_v34 = vsel %vm1940_vm4, %v11484_v18, %v2573_v38  ;;  %v2581_v32 = vsel %vm1940_vm4, %v11485_v54, %v2580_v11  ;;  %v2587_v49 = vsel %vm1938_vm3, %v9376_v16, %v9368_v17  ;;  %v11497_v33 = vld [vmem:[#allocation304_spill] sm:$0xff]  ;;  %v11498_v43 = vld [vmem:[#allocation218_spill] sm:$0xff]  ;;  %v11502_v18 = vld [vmem:[#allocation271_spill] sm:$0xff] }
 0x44c   : > { %v2575_v7 = vsel %vm1942_vm5, %v11486_v37, %v2574_v34  ;;  %v2582_v44 = vsel %vm1942_vm5, %v11487_v60, %v2581_v32  ;;  %v2588_v63 = vsel %vm1940_vm4, %v11488_v31, %v2587_v49  ;;  %v2594_v22 = vsel %vm1938_vm3, %v2424_v27, %v2420_v48  ;;  %v11495_v27 = vld [vmem:[#allocation217_spill] sm:$0xff]  ;;  %v11501_v10 = vld [vmem:[#allocation326_spill] sm:$0xff]  ;;  %v11503_v54 = vld [vmem:[#allocation259_spill] sm:$0xff]  ;;  %v10243_v60 = vpop.xlane.xlu0 %6038 }
 0x44d   : > { %5570 = vadd.xlane.f32.xlu0 %v5569_v52  ;;  %v2576_v47 = vsel %vm1944_vm6, %v11489_v58, %v2575_v7  ;;  %v2583_v15 = vsel %vm1944_vm6, %v11490_v61, %v2582_v44  ;;  %v2589_v17 = vsel %vm1942_vm5, %v11491_v39, %v2588_v63  ;;  %v2595_v16 = vsel %vm1940_vm4, %v2428_v6, %v2594_v22  ;;  %v11504_v49 = vld [vmem:[#allocation272_spill] sm:$0xff]  ;;  %v11506_v31 = vld [vmem:[#allocation273_spill] sm:$0xff]  ;;  %v11508_v58 = vld [vmem:[#allocation274_spill] sm:$0xff] }
 0x44e   : > { %v2577_v42 = vsel %vm1946_vm7, %v11492_v59, %v2576_v47  ;;  %v2584_v62 = vsel %vm1946_vm7, %v11493_v56, %v2583_v15  ;;  %v2590_v48 = vsel %vm1944_vm6, %v11494_v51, %v2589_v17  ;;  %v2596_v9 = vsel %vm1942_vm5, %v2432_v55, %v2595_v16  ;;  %v11505_v7 = vld [vmem:[#allocation260_spill] sm:$0xff]  ;;  %v11507_v63 = vld [vmem:[#allocation261_spill] sm:$0xff]  ;;  %v11509_v47 = vld [vmem:[#allocation262_spill] sm:$0xff] }
 0x44f   : > { %v2578_v24 = vsel %vm1948_vm8, %v11495_v27, %v2577_v42  ;;  %v2585_v57 = vsel %vm1948_vm8, %v11496_v30, %v2584_v62  ;;  %v2591_v6 = vsel %vm1946_vm7, %v11497_v33, %v2590_v48  ;;  %v2597_v25 = vsel %vm1944_vm6, %v2436_v53, %v2596_v9  ;;  %v11510_v15 = vld [vmem:[#allocation275_spill] sm:$0xff]  ;;  %v11512_v59 = vld [vmem:[#allocation276_spill] sm:$0xff]  ;;  %v11514_v48 = vld [vmem:[#allocation277_spill] sm:$0xff] }
 0x450   : > { %v2579_v13 = vsel %vm1950_vm9, %v11498_v43, %v2578_v24  ;;  %v2586_v4 = vsel %vm1950_vm9, %v11499_v35, %v2585_v57  ;;  %v2592_v55 = vsel %vm1948_vm8, %v11500_v40, %v2591_v6  ;;  %v2598_v38 = vsel %vm1946_vm7, %v2440_v8, %v2597_v25  ;;  %v11511_v17 = vld [vmem:[#allocation263_spill] sm:$0xff]  ;;  %v11513_v62 = vld [vmem:[#allocation264_spill] sm:$0xff]  ;;  %v11515_v27 = vld [vmem:[#allocation265_spill] sm:$0xff] }
 0x451   : > { %v2593_v45 = vsel %vm1950_vm9, %v11501_v10, %v2592_v55  ;;  %v2599_v11 = vsel %vm1948_vm8, %v2444_v50, %v2598_v38  ;;  %v2630_v52 = vadd.f32 %v2586_v4, %v2579_v13  ;;  %v2387_v53 = vmul.f32 %v11502_v18, %v11502_v18  ;;  %v11516_v30 = vld [vmem:[#allocation278_spill] sm:$0xff]  ;;  %v11518_v25 = vld [vmem:[#allocation129_spill] sm:$0xff]  ;;  %v10275_v55 = vpop.xlane.xlu1 %6063  ;;  %v11522_v38 = vld [vmem:[#allocation131_spill] sm:$0xff] }
 0x452   : > { %v2600_v34 = vsel %vm1950_vm9, %v2448_v19, %v2599_v11  ;;  %v2388_v32 = vmul.f32 %v11503_v54, %v11503_v54  ;;  %v2391_v37 = vmul.f32 %v11504_v49, %v11504_v49  ;;  %v2392_v8 = vmul.f32 %v11505_v7, %v11505_v7  ;;  %v11517_v33 = vld [vmem:[#allocation266_spill] sm:$0xff]  ;;  %v11520_v35 = vld [vmem:[#allocation113_spill] sm:$0xff]  ;;  %v11525_v49 = vld [vmem:[#allocation116_spill] sm:$0xff] }
 0x453   : > { %v2631_v44 = vadd.f32 %v2630_v52, %v2593_v45  ;;  %v2395_v50 = vmul.f32 %v11506_v31, %v11506_v31  ;;  %v2396_v22 = vmul.f32 %v11507_v63, %v11507_v63  ;;  %v2399_v19 = vmul.f32 %v11508_v58, %v11508_v58  ;;  %v11519_v43 = vld [vmem:[#allocation130_spill] sm:$0xff]  ;;  %v11523_v45 = vld [vmem:[#allocation115_spill] sm:$0xff]  ;;  %v11526_v63 = vld [vmem:[#allocation133_spill] sm:$0xff] }
 0x454   : > { %v2400_v61 = vmul.f32 %v11509_v47, %v11509_v47  ;;  %v2403_v39 = vmul.f32 %v11510_v15, %v11510_v15  ;;  %v2404_v16 = vmul.f32 %v11511_v17, %v11511_v17  ;;  %v2407_v42 = vmul.f32 %v11512_v59, %v11512_v59  ;;  %v11521_v4 = vld [vmem:[#allocation114_spill] sm:$0xff]  ;;  %v11527_v47 = vld [vmem:[#allocation117_spill] sm:$0xff] }
 0x455   : > { %v2632_v56 = vadd.f32 %v2631_v44, %v2600_v34  ;;  %v2408_v51 = vmul.f32 %v11513_v62, %v11513_v62  ;;  %v2411_v9 = vmul.f32 %v11514_v48, %v11514_v48  ;;  %v2412_v24 = vmul.f32 %v11515_v27, %v11515_v27  ;;  %v11524_v34 = vld [vmem:[#allocation132_spill] sm:$0xff]  ;;  %v11529_v59 = vld [vmem:[#allocation118_spill] sm:$0xff]  ;;  %v11530_v62 = vld [vmem:[#allocation143_spill] sm:$0xff] }
 0x456   : > { %v2415_v57 = vmul.f32 %v11516_v30, %v11516_v30  ;;  %v2416_v6 = vmul.f32 %v11517_v33, %v11517_v33  ;;  %v2545_v13 = vsel %vm1938_vm3, %v11519_v43, %v11518_v25  ;;  %v2552_v40 = vsel %vm1938_vm3, %v11521_v4, %v11520_v35  ;;  %v11531_v27 = vld [vmem:[#allocation127_spill] sm:$0xff]  ;;  %v11532_v33 = vld [vmem:[#allocation144_spill] sm:$0xff] }
 0x457   : > { %2633 = vadd.xlane.f32.xlu1 %v2632_v56  ;;  %v2546_v10 = vsel %vm1940_vm4, %v11522_v38, %v2545_v13  ;;  %v2553_v11 = vsel %vm1940_vm4, %v11523_v45, %v2552_v40  ;;  %v2559_v52 = vsel %vm1938_vm3, %v2391_v37, %v2387_v53  ;;  %v2566_v18 = vsel %vm1938_vm3, %v2392_v8, %v2388_v32  ;;  %v10295_v37 = vpop.xlane.xlu0 %6083  ;;  %v11528_v8 = vld [vmem:[#allocation134_spill] sm:$0xff]  ;;  %v11533_v43 = vld [vmem:[#allocation128_spill] sm:$0xff]  ;;  %v11534_v45 = vld [vmem:[#allocation305_spill] sm:$0xff] }
 0x458   : > { %v2547_v54 = vsel %vm1942_vm5, %v11524_v34, %v2546_v10  ;;  %v2554_v7 = vsel %vm1942_vm5, %v11525_v49, %v2553_v11  ;;  %v2560_v44 = vsel %vm1940_vm4, %v2395_v50, %v2559_v52  ;;  %v2567_v31 = vsel %vm1940_vm4, %v2396_v22, %v2566_v18  ;;  %v11536_v18 = vld [vmem:[#allocation306_spill] sm:$0xff]  ;;  %v11538_v49 = vld [vmem:[#allocation307_spill] sm:$0xff] }
 0x459   : > { %v2548_v58 = vsel %vm1944_vm6, %v11526_v63, %v2547_v54  ;;  %v2555_v15 = vsel %vm1944_vm6, %v11527_v47, %v2554_v7  ;;  %v2561_v53 = vsel %vm1942_vm5, %v2399_v19, %v2560_v44  ;;  %v2568_v32 = vsel %vm1942_vm5, %v2400_v61, %v2567_v31  ;;  %v11537_v54 = vld [vmem:[#allocation292_spill] sm:$0xff]  ;;  %v11539_v44 = vld [vmem:[#allocation293_spill] sm:$0xff]  ;;  %v11541_v47 = vld [vmem:[#allocation294_spill] sm:$0xff] }
 0x45a   : > { %v2549_v17 = vsel %vm1946_vm7, %v11528_v8, %v2548_v58  ;;  %v2556_v50 = vsel %vm1946_vm7, %v11529_v59, %v2555_v15  ;;  %v2562_v22 = vsel %vm1944_vm6, %v2403_v39, %v2561_v53  ;;  %v2569_v56 = vsel %vm1944_vm6, %v2404_v16, %v2568_v32  ;;  %v11540_v63 = vld [vmem:[#allocation308_spill] sm:$0xff]  ;;  %v11542_v53 = vld [vmem:[#allocation309_spill] sm:$0xff] }
 0x45b   : > { %v2550_v48 = vsel %vm1948_vm8, %v11530_v62, %v2549_v17  ;;  %v2557_v19 = vsel %vm1948_vm8, %v11531_v27, %v2556_v50  ;;  %v2563_v61 = vsel %vm1946_vm7, %v2407_v42, %v2562_v22  ;;  %v2570_v30 = vsel %vm1946_vm7, %v2408_v51, %v2569_v56  ;;  %v10320_v51 = vpop.xlane.xlu1 %6098  ;;  %v11543_v17 = vld [vmem:[#allocation295_spill] sm:$0xff]  ;;  %v11544_v50 = vld [vmem:[#allocation310_spill] sm:$0xff]  ;;  %v11545_v56 = vld [vmem:[#allocation296_spill] sm:$0xff] }
 0x45c   : > { %v2551_v25 = vsel %vm1950_vm9, %v11532_v33, %v2550_v48  ;;  %v2558_v13 = vsel %vm1950_vm9, %v11533_v43, %v2557_v19  ;;  %v2564_v39 = vsel %vm1948_vm8, %v2411_v9, %v2563_v61  ;;  %v2571_v16 = vsel %vm1948_vm8, %v2412_v24, %v2570_v30  ;;  %v11535_v24 = vld [vmem:[#allocation291_spill] sm:$0xff]  ;;  %v11547_v19 = vld [vmem:[#allocation297_spill] sm:$0xff]  ;;  %v11548_v30 = vld [vmem:[#allocation312_spill] sm:$0xff] }
 0x45d   : > { %v6205_v35 = vrot.slane %v10275_v55, %v9573_v3  ;;  %v6185_v4 = vrot.slane %v10243_v60, %v9573_v3  ;;  %v2565_v42 = vsel %vm1950_vm9, %v2415_v57, %v2564_v39  ;;  %v2625_v40 = vadd.f32 %v2558_v13, %v2551_v25  ;;  %v11546_v48 = vld [vmem:[#allocation311_spill] sm:$0xff]  ;;  %v11549_v25 = vld [vmem:[#allocation298_spill] sm:$0xff]  ;;  %v11550_v13 = vld [vmem:[#allocation169_spill] sm:$0xff] }
 0x45e   : > { %v2572_v38 = vsel %vm1950_vm9, %v2416_v6, %v2571_v16  ;;  %v6233_v10 = vrot.slane %v10320_v51, %v9573_v3  ;;  %v4991_v9 = vmul.f32 %v11534_v45, %v11534_v45  ;;  %v4992_v11 = vmul.f32 %v11535_v24, %v11535_v24  ;;  %v10335_v6 = vpop.xlane.xlu0 %6103  ;;  %v11551_v39 = vld [vmem:[#allocation170_spill] sm:$0xff] }
 0x45f   : > { %v2626_v52 = vadd.f32 %v2625_v40, %v2565_v42  ;;  %v4995_v34 = vmul.f32 %v11536_v18, %v11536_v18  ;;  %v4996_v57 = vmul.f32 %v11537_v54, %v11537_v54  ;;  %v4999_v7 = vmul.f32 %v11538_v49, %v11538_v49  ;;  %v11552_v42 = vld [vmem:[#allocation145_spill] sm:$0xff]  ;;  %v11553_v40 = vld [vmem:[#allocation146_spill] sm:$0xff]  ;;  %v11555_v54 = vld [vmem:[#allocation147_spill] sm:$0xff] }
 0x460   : > { %v5000_v31 = vmul.f32 %v11539_v44, %v11539_v44  ;;  %v5003_v58 = vmul.f32 %v11540_v63, %v11540_v63  ;;  %v5004_v15 = vmul.f32 %v11541_v47, %v11541_v47  ;;  %v5007_v32 = vmul.f32 %v11542_v53, %v11542_v53  ;;  %v10373_v47 = vpop.xlane.xlu1 %6043  ;;  %v11556_v53 = vld [vmem:[#allocation172_spill] sm:$0xff] }
 0x461   : > { %v2627_v8 = vadd.f32 %v2626_v52, %v2572_v38  ;;  %v5008_v59 = vmul.f32 %v11543_v17, %v11543_v17  ;;  %v5011_v22 = vmul.f32 %v11544_v50, %v11544_v50  ;;  %v5012_v62 = vmul.f32 %v11545_v56, %v11545_v56  ;;  %v11554_v52 = vld [vmem:[#allocation171_spill] sm:$0xff]  ;;  %v11557_v17 = vld [vmem:[#allocation148_spill] sm:$0xff]  ;;  %v11558_v50 = vld [vmem:[#allocation173_spill] sm:$0xff] }
 0x462   : > { %v5015_v27 = vmul.f32 %v11546_v48, %v11546_v48  ;;  %v5016_v61 = vmul.f32 %v11547_v19, %v11547_v19  ;;  %v5019_v33 = vmul.f32 %v11548_v30, %v11548_v30  ;;  %v5020_v43 = vmul.f32 %v11549_v25, %v11549_v25  ;;  %v11560_v30 = vld [vmem:[#allocation174_spill] sm:$0xff] }
 0x463   : > { %2628 = vadd.xlane.f32.xlu0 %v2627_v8  ;;  %v5149_v16 = vsel %vm1938_vm3, %v11551_v39, %v11550_v13  ;;  %v5156_v38 = vsel %vm1938_vm3, %v11553_v40, %v11552_v42  ;;  %v5163_v45 = vsel %vm1938_vm3, %v4995_v34, %v4991_v9  ;;  %v5170_v24 = vsel %vm1938_vm3, %v4996_v57, %v4992_v11  ;;  %v10381_v57 = vpop.xlane.xlu0 %6068  ;;  %v11561_v13 = vld [vmem:[#allocation150_spill] sm:$0xff]  ;;  %v11563_v40 = vld [vmem:[#allocation167_spill] sm:$0xff] }
 0x464   : > { %v5150_v18 = vsel %vm1940_vm4, %v11554_v52, %v5149_v16  ;;  %v5157_v49 = vsel %vm1940_vm4, %v11555_v54, %v5156_v38  ;;  %v5164_v44 = vsel %vm1940_vm4, %v4999_v7, %v5163_v45  ;;  %v5171_v63 = vsel %vm1940_vm4, %v5000_v31, %v5170_v24  ;;  %v11559_v7 = vld [vmem:[#allocation149_spill] sm:$0xff]  ;;  %v11562_v16 = vld [vmem:[#allocation183_spill] sm:$0xff]  ;;  %v11564_v45 = vld [vmem:[#allocation184_spill] sm:$0xff] }
 0x465   : > { %v5151_v8 = vsel %vm1942_vm5, %v11556_v53, %v5150_v18  ;;  %v5158_v9 = vsel %vm1942_vm5, %v11557_v17, %v5157_v49  ;;  %v5165_v11 = vsel %vm1942_vm5, %v5003_v58, %v5164_v44  ;;  %v5172_v34 = vsel %vm1942_vm5, %v5004_v15, %v5171_v63  ;;  %v11565_v52 = vld [vmem:[#allocation168_spill] sm:$0xff]  ;;  %v11566_v49 = vld [vmem:[#allocation313_spill] sm:$0xff]  ;;  %v11567_v63 = vld [vmem:[#allocation314_spill] sm:$0xff] }
 0x466   : > { %v5152_v56 = vsel %vm1944_vm6, %v11558_v50, %v5151_v8  ;;  %v5159_v31 = vsel %vm1944_vm6, %v11559_v7, %v5158_v9  ;;  %v5166_v48 = vsel %vm1944_vm6, %v5007_v32, %v5165_v11  ;;  %v5173_v19 = vsel %vm1944_vm6, %v5008_v59, %v5172_v34  ;;  %v10413_v8 = vpop.xlane.xlu1 %6088  ;;  %v11569_v17 = vld [vmem:[#allocation316_spill] sm:$0xff]  ;;  %v11570_v11 = vld [vmem:[#allocation231_spill] sm:$0xff] }
 0x467   : > { %v5153_v25 = vsel %vm1946_vm7, %v11560_v30, %v5152_v56  ;;  %v5160_v58 = vsel %vm1946_vm7, %v11561_v13, %v5159_v31  ;;  %v5167_v15 = vsel %vm1946_vm7, %v5011_v22, %v5166_v48  ;;  %v5174_v39 = vsel %vm1946_vm7, %v5012_v62, %v5173_v19  ;;  %v11571_v34 = vld [vmem:[#allocation232_spill] sm:$0xff]  ;;  %v11574_v7 = vld [vmem:[#allocation327_spill] sm:$0xff]  ;;  %v10426_v19 = vpop.xlane.xlu0 %6108 }
 0x468   : > { %v5154_v42 = vsel %vm1948_vm8, %v11562_v16, %v5153_v25  ;;  %v5161_v38 = vsel %vm1948_vm8, %v11563_v40, %v5160_v58  ;;  %v5168_v32 = vsel %vm1948_vm8, %v5015_v27, %v5167_v15  ;;  %v5175_v59 = vsel %vm1948_vm8, %v5016_v61, %v5174_v39  ;;  %v11568_v27 = vld [vmem:[#allocation315_spill] sm:$0xff]  ;;  %v11573_v50 = vld [vmem:[#allocation220_spill] sm:$0xff]  ;;  %v11576_v25 = vld [vmem:[#allocation233_spill] sm:$0xff] }
 0x469   : > { %v5155_v24 = vsel %vm1950_vm9, %v11564_v45, %v5154_v42  ;;  %v5162_v18 = vsel %vm1950_vm9, %v11565_v52, %v5161_v38  ;;  %v5169_v22 = vsel %vm1950_vm9, %v5019_v33, %v5168_v32  ;;  %v5176_v62 = vsel %vm1950_vm9, %v5020_v43, %v5175_v59  ;;  %v11572_v43 = vld [vmem:[#allocation219_spill] sm:$0xff]  ;;  %v11575_v31 = vld [vmem:[#allocation328_spill] sm:$0xff]  ;;  %v11577_v58 = vld [vmem:[#allocation221_spill] sm:$0xff] }
 0x46a   : > { %v5229_v54 = vadd.f32 %v5162_v18, %v5155_v24  ;;  %v2452_v44 = vmul.f32 %v11566_v49, %v11566_v49  ;;  %v2456_v53 = vmul.f32 %v11567_v63, %v11567_v63  ;;  %v2460_v61 = vmul.f32 %v11568_v27, %v11568_v27  ;;  %v11578_v39 = vld [vmem:[#allocation329_spill] sm:$0xff]  ;;  %v11579_v42 = vld [vmem:[#allocation234_spill] sm:$0xff] }
 0x46b   : > { %v2464_v9 = vmul.f32 %v11569_v17, %v11569_v17  ;;  %v2601_v33 = vsel %vm1938_vm3, %v11571_v34, %v11570_v11  ;;  %v2604_v56 = vsel %vm1938_vm3, %v11573_v50, %v11572_v43  ;;  %v2607_v48 = vsel %vm1938_vm3, %v11575_v31, %v11574_v7  ;;  %v11580_v38 = vld [vmem:[#allocation222_spill] sm:$0xff]  ;;  %v10466_v7 = vpop.f32.mrb[0].mxu0 }
 0x46c   : > { %v5230_v30 = vadd.f32 %v5229_v54, %v5169_v22  ;;  %v2602_v13 = vsel %vm1940_vm4, %v11576_v25, %v2601_v33  ;;  %v2605_v15 = vsel %vm1940_vm4, %v11577_v58, %v2604_v56  ;;  %v2608_v16 = vsel %vm1940_vm4, %v11578_v39, %v2607_v48  ;;  %v11581_v59 = vld [vmem:[#allocation330_spill] sm:$0xff]  ;;  %v11582_v33 = vld [vmem:[#allocation281_spill] sm:$0xff]  ;;  %v10464_v56 = vpop.xlane.xlu0 %6128  ;;  %v11584_v48 = vld [vmem:[#allocation299_spill] sm:$0xff] }
 0x46d   : > { %v2603_v40 = vsel %vm1942_vm5, %v11579_v42, %v2602_v13  ;;  %v2606_v32 = vsel %vm1942_vm5, %v11580_v38, %v2605_v15  ;;  %v2609_v45 = vsel %vm1942_vm5, %v11581_v59, %v2608_v16  ;;  %v2610_v24 = vsel %vm1938_vm3, %v2456_v53, %v2452_v44  ;;  %v10453_v53 = vpop.xlane.xlu1 %6123  ;;  %v11583_v43 = vld [vmem:[#allocation282_spill] sm:$0xff]  ;;  %v11587_v13 = vld [vmem:[#allocation300_spill] sm:$0xff]  ;;  %v11588_v15 = vld [vmem:[#allocation279_spill] sm:$0xff] }
 0x46e   : > { %v6221_v52 = vrot.slane %v10295_v37, %v9573_v3  ;;  %v5231_v18 = vadd.f32 %v5230_v30, %v5176_v62  ;;  %v2611_v22 = vsel %vm1940_vm4, %v2460_v61, %v2610_v24  ;;  %v2636_v49 = vsel %vm2635_vm11, %v2603_v40, 0.0  ;;  %v11585_v30 = vld [vmem:[#allocation269_spill] sm:$0xff]  ;;  %v11589_v38 = vld [vmem:[#allocation280_spill] sm:$0xff] }
 0x46f   : > { %v2612_v54 = vsel %vm1942_vm5, %v2464_v9, %v2611_v22  ;;  %v2637_v63 = vsel %vm2635_vm11, %v2606_v32, 0.0  ;;  %v2639_v27 = vsel %vm2635_vm11, %v2609_v45, 0.0  ;;  %v6189_v44 = vrot.slane %v10373_v47, %v9573_v3 }
 0x470   : > { %5232 = vadd.xlane.f32.xlu1 %v5231_v18  ;;  %v2638_v17 = vadd.f32 %v2637_v63, %v2636_v49  ;;  %v2641_v11 = vsel %vm2635_vm11, %v2612_v54, 0.0  ;;  %v5056_v62 = vmul.f32 %v9548_v29, %v9548_v29  ;;  %v5060_v61 = vmul.f32 %v9550_v23, %v9550_v23  ;;  %v11590_v63 = vld [vmem:[#allocation317_spill] sm:$0xff] }
 0x471   : > { %v5064_v9 = vmul.f32 %v9555_v28, %v9555_v28  ;;  %v5068_v34 = vmul.f32 %v9557_v2, %v9557_v2  ;;  %v5205_v50 = vsel %vm1938_vm3, %v11583_v43, %v11582_v33  ;;  %v6237_v31 = vrot.slane %v10335_v6, %v9573_v3  ;;  %v11586_v28 = vld [vmem:[#allocation270_spill] sm:$0xff]  ;;  %v2373_v2 = vpop.f32.mrb[1].mxu0  ;;  %v10507_v43 = vpop.xlane.xlu0 %6113 }
 0x472   : > { %v2640_v29 = vadd.f32 %v2639_v27, %v2638_v17  ;;  %v5206_v23 = vsel %vm1940_vm4, %v11584_v48, %v5205_v50  ;;  %v5208_v25 = vsel %vm1938_vm3, %v11586_v28, %v11585_v30  ;;  %v5211_v16 = vsel %vm1938_vm3, %v9596_v46, %v9581_v5  ;;  %v10497_v27 = vpop.xlane.xlu1 %6093  ;;  %v11591_v17 = vld [vmem:[#allocation318_spill] sm:$0xff]  ;;  %v11596_v30 = vld [vmem:[#allocation323_spill] sm:$0xff] }
 0x473   : > { %v5207_v58 = vsel %vm1942_vm5, %v11587_v13, %v5206_v23  ;;  %v5209_v39 = vsel %vm1940_vm4, %v11588_v15, %v5208_v25  ;;  %v5214_v42 = vsel %vm1938_vm3, %v5060_v61, %v5056_v62  ;;  %v5212_v59 = vsel %vm1940_vm4, %v9750_v20, %v5211_v16  ;;  %v11593_v61 = vld [vmem:[#allocation320_spill] sm:$0xff]  ;;  %v11595_v48 = vld [vmem:[#allocation322_spill] sm:$0xff]  ;;  %v11600_v16 = vld [vmem:[#allocation223_spill] sm:$0xff] }
 0x474   : > { %v2642_v40 = vadd.f32 %v2641_v11, %v2640_v29  ;;  %v5210_v32 = vsel %vm1942_vm5, %v11589_v38, %v5209_v39  ;;  %v5215_v45 = vsel %vm1940_vm4, %v5064_v9, %v5214_v42  ;;  %v5213_v24 = vsel %vm1942_vm5, %v9759_v26, %v5212_v59  ;;  %v11592_v11 = vld [vmem:[#allocation319_spill] sm:$0xff]  ;;  %v11597_v25 = vld [vmem:[#allocation324_spill] sm:$0xff] }
 0x475   : > { %v5216_v18 = vsel %vm1942_vm5, %v5068_v34, %v5215_v45  ;;  %v5239_v22 = vsel %vm2635_vm11, %v5207_v58, 0.0  ;;  %v5240_v5 = vsel %vm2635_vm11, %v5210_v32, 0.0  ;;  %v5242_v54 = vsel %vm2635_vm11, %v5213_v24, 0.0  ;;  %v11594_v34 = vld [vmem:[#allocation321_spill] sm:$0xff]  ;;  %v10509_v50 = vpop.f32.mrb[2].mxu0  ;;  %v11598_v58 = vld [vmem:[#allocation235_spill] sm:$0xff] }
 0x476   : > { %2643 = vadd.xlane.f32.xlu0 %v2642_v40  ;;  %v5241_v46 = vadd.f32 %v5240_v5, %v5239_v22  ;;  %v5244_v49 = vsel %vm2635_vm11, %v5216_v18, 0.0  ;;  %v5024_v20 = vmul.f32 %v11590_v63, %v11590_v63  ;;  %v5028_v26 = vmul.f32 %v11591_v17, %v11591_v17  ;;  %v2378_v13 = vpop.f32.mrb[3].mxu0  ;;  %v11599_v15 = vld [vmem:[#allocation236_spill] sm:$0xff]  ;;  %v11602_v38 = vld [vmem:[#allocation331_spill] sm:$0xff]  ;;  %v11604_v18 = vld [vmem:[#allocation237_spill] sm:$0xff] }
 0x477   : > { %v5032_v62 = vmul.f32 %v11592_v11, %v11592_v11  ;;  %v5036_v9 = vmul.f32 %v11593_v61, %v11593_v61  ;;  %v5040_v33 = vmul.f32 %v11594_v34, %v11594_v34  ;;  %v5044_v23 = vmul.f32 %v11595_v48, %v11595_v48  ;;  %v11601_v42 = vld [vmem:[#allocation224_spill] sm:$0xff]  ;;  %v11605_v5 = vld [vmem:[#allocation225_spill] sm:$0xff]  ;;  %v11607_v17 = vld [vmem:[#allocation238_spill] sm:$0xff] }
 0x478   : > { %v5243_v29 = vadd.f32 %v5242_v54, %v5241_v46  ;;  %v5048_v28 = vmul.f32 %v11596_v30, %v11596_v30  ;;  %v5052_v2 = vmul.f32 %v11597_v25, %v11597_v25  ;;  %v5177_v39 = vsel %vm1938_vm3, %v11599_v15, %v11598_v58  ;;  %v11603_v32 = vld [vmem:[#allocation332_spill] sm:$0xff]  ;;  %v11606_v54 = vld [vmem:[#allocation333_spill] sm:$0xff]  ;;  %v11608_v61 = vld [vmem:[#allocation226_spill] sm:$0xff] }
 0x479   : > { %v5184_v40 = vsel %vm1938_vm3, %v11601_v42, %v11600_v16  ;;  %v5191_v59 = vsel %vm1938_vm3, %v11603_v32, %v11602_v38  ;;  %v5198_v45 = vsel %vm1938_vm3, %v5028_v26, %v5024_v20  ;;  %v5178_v22 = vsel %vm1940_vm4, %v11604_v18, %v5177_v39  ;;  %v11609_v48 = vld [vmem:[#allocation334_spill] sm:$0xff]  ;;  %v11610_v20 = vld [vmem:[#allocation239_spill] sm:$0xff]  ;;  %v6134_v39 = vpop.xlane.xlu1 %6133  ;;  %v11613_v16 = vld [vmem:[#allocation240_spill] sm:$0xff] }
 0x47a   : > { %v5245_v24 = vadd.f32 %v5244_v49, %v5243_v29  ;;  %v5185_v46 = vsel %vm1940_vm4, %v11605_v5, %v5184_v40  ;;  %v5192_v63 = vsel %vm1940_vm4, %v11606_v54, %v5191_v59  ;;  %v5179_v11 = vsel %vm1942_vm5, %v11607_v17, %v5178_v22  ;;  %v11611_v29 = vld [vmem:[#allocation227_spill] sm:$0xff]  ;;  %v11614_v40 = vld [vmem:[#allocation228_spill] sm:$0xff]  ;;  %v11617_v22 = vld [vmem:[#allocation229_spill] sm:$0xff] }
 0x47b   : > { %v5186_v34 = vsel %vm1942_vm5, %v11608_v61, %v5185_v46  ;;  %v5193_v30 = vsel %vm1942_vm5, %v11609_v48, %v5192_v63  ;;  %v5199_v49 = vsel %vm1940_vm4, %v5032_v62, %v5198_v45  ;;  %v5180_v26 = vsel %vm1944_vm6, %v11610_v20, %v5179_v11  ;;  %v11612_v13 = vld [vmem:[#allocation335_spill] sm:$0xff]  ;;  %v11615_v62 = vld [vmem:[#allocation336_spill] sm:$0xff]  ;;  %v6119_v45 = vpop.xlane.xlu0 %6118  ;;  %v11619_v17 = vld [vmem:[#allocation230_spill] sm:$0xff] }
 0x47c   : > { %5246 = vadd.xlane.f32.xlu1 %v5245_v24  ;;  %v5187_v25 = vsel %vm1944_vm6, %v11611_v29, %v5186_v34  ;;  %v5194_v58 = vsel %vm1944_vm6, %v11612_v13, %v5193_v30  ;;  %v5200_v15 = vsel %vm1942_vm5, %v5036_v9, %v5199_v49  ;;  %v5181_v42 = vsel %vm1946_vm7, %v11613_v16, %v5180_v26  ;;  %v11616_v24 = vld [vmem:[#allocation267_spill] sm:$0xff]  ;;  %v11618_v54 = vld [vmem:[#allocation268_spill] sm:$0xff] }
 0x47d   : > { %v5188_v38 = vsel %vm1946_vm7, %v11614_v40, %v5187_v25  ;;  %v5195_v32 = vsel %vm1946_vm7, %v11615_v62, %v5194_v58  ;;  %v5201_v59 = vsel %vm1944_vm6, %v5040_v33, %v5200_v15  ;;  %v5182_v18 = vsel %vm1948_vm8, %v11616_v24, %v5181_v42 }
 0x47e   : > { %v5189_v5 = vsel %vm1948_vm8, %v11617_v22, %v5188_v38  ;;  %v5196_v9 = vsel %vm1948_vm8, %v9567_v12, %v5195_v32  ;;  %v5202_v46 = vsel %vm1946_vm7, %v5044_v23, %v5201_v59  ;;  %v5183_v63 = vsel %vm1950_vm9, %v11618_v54, %v5182_v18 }
 0x47f   : > { %v5190_v11 = vsel %vm1950_vm9, %v11619_v17, %v5189_v5  ;;  %v5197_v33 = vsel %vm1950_vm9, %v9577_v41, %v5196_v9  ;;  %v5203_v61 = vsel %vm1948_vm8, %v5048_v28, %v5202_v46  ;;  %v6279_v34 = vsel %vm1940_vm4, %v6221_v52, %v10164_v0  ;;  %v6139_v28 = vpop.xlane.xlu1 %6138 }
 0x480   : > { %v5204_v12 = vsel %vm1950_vm9, %v5052_v2, %v5203_v61  ;;  %v5234_v23 = vadd.f32 %v5190_v11, %v5183_v63  ;;  %v6209_v48 = vrot.slane %v10381_v57, %v9573_v3  ;;  %v6225_v30 = vrot.slane %v10413_v8, %v9573_v3 }
 0x481   : > { %v6272_v41 = vsel %vm1942_vm5, %v6185_v4, %v10154_v36  ;;  %v6253_v37 = vrot.slane %v10453_v53, %v9573_v3  ;;  %v6241_v57 = vrot.slane %v10426_v19, %v9573_v3  ;;  %v6229_v8 = vrot.slane %v10497_v27, %v9573_v3  ;;  %v6144_v19 = vpop.xlane.xlu0 %6143 }
 0x482   : > { %v5235_v0 = vadd.f32 %v5234_v23, %v5197_v33  ;;  %v6273_v52 = vsel %vm1944_vm6, %v6189_v44, %v6272_v41  ;;  %v6282_v36 = vsel %vm1938_vm3, %v6237_v31, %v6233_v10  ;;  %v6276_v4 = vsel %vm1942_vm5, %v6205_v35, %v10143_v1 }
 0x483   : > { %v6296_v60 = vsel %vm6295_vm12, %v6273_v52, 0.0  ;;  %v6257_v47 = vrot.slane %v10464_v56, %v9573_v3  ;;  %v6277_v51 = vsel %vm1944_vm6, %v6209_v48, %v6276_v4  ;;  %v6261_v6 = vrot.slane %v6134_v39, %v9573_v3 }
 0x484   : > { %v5236_v44 = vadd.f32 %v5235_v0, %v5204_v12  ;;  %6297 = vadd.xlane.f32.xlu1 %v6296_v60  ;;  %v6245_v10 = vrot.slane %v10507_v43, %v9573_v3  ;;  %v6280_v31 = vsel %vm1942_vm5, %v6225_v30, %v6279_v34  ;;  %v6265_v55 = vrot.slane %v6139_v28, %v9573_v3 }
 0x485   : > { %v6286_v53 = vsel %vm1938_vm3, %v6257_v47, %v6253_v37  ;;  %v6249_v1 = vrot.slane %v6119_v45, %v9573_v3  ;;  %v6283_v35 = vsel %vm1940_vm4, %v6241_v57, %v6282_v36  ;;  %v6281_v27 = vsel %vm1944_vm6, %v6229_v8, %v6280_v31  ;;  %v415_v57 = vld [vmem:[#allocation2 + $0x8] sm:$0xff] }
 0x486   : > { %5237 = vadd.xlane.f32.xlu0 %v5236_v44  ;;  %v6287_v56 = vsel %vm1940_vm4, %v6261_v6, %v6286_v53  ;;  %v6269_v2 = vrot.slane %v6144_v19, %v9573_v3  ;;  %v10620_v49 = vpop.f32.mrb[0].mxu1  ;;  %v6299_v43 = vsel %vm6295_vm12, %v6277_v51, 0.0  ;;  %v6302_v20 = vsel %vm6295_vm12, %v6281_v27, 0.0  ;;  %v414_v51 = vld [vmem:[#allocation2] sm:$0xff]  ;;  %v3026_v27 = vld [vmem:[#allocation3] sm:$0xff] }
 0x487   : > { %v6284_v26 = vsel %vm1942_vm5, %v6245_v10, %v6283_v35  ;;  %v6288_v29 = vsel %vm1942_vm5, %v6265_v55, %v6287_v56  ;;  %v4977_v25 = vpop.f32.mrb[1].mxu1  ;;  %v2980_v45 = vadd.s32 4294967288, %v9559_v21  ;;  %v2987_v18 = vadd.s32 4294967280, %v9559_v21 }
 0x488   : > { %6303 = vadd.xlane.f32.xlu1 %v6302_v20  ;;  %v6285_v13 = vsel %vm1944_vm6, %v6249_v1, %v6284_v26  ;;  %v6289_v58 = vsel %vm1944_vm6, %v6269_v2, %v6288_v29  ;;  %v2994_v5 = vadd.s32 4294967272, %v9559_v21  ;;  %v3013_v41 = vmul.f32 2.0, %v10509_v50  ;;  %v416_v25 = vld [vmem:[#allocation2 + $0x10] sm:$0xf] }
 0x489   : > { %v6308_v15 = vsel %vm6295_vm12, %v6289_v58, 0.0  ;;  %v6305_v39 = vsel %vm6295_vm12, %v6285_v13, 0.0  ;;  %v2983_v22 = vsub.s32 %v2980_v45, %v9561_v14  ;;  %v2990_v46 = vsub.s32 %v2987_v18, %v9561_v14  ;;  %v3027_v18 = vld [vmem:[#allocation3 + $0x8] sm:$0xff] }
 0x48a   : > { %6300 = vadd.xlane.f32.xlu0 %v6299_v43  ;;  %v2997_v11 = vsub.s32 %v2994_v5, %v9561_v14  ;;  %v3012_v60 = vmul.f32 2.0, %v10466_v7  ;;  %v5606_v7 = vmul.f32 2.0, %v10620_v49  ;;  %vm6382_vm9 = vcmask (!%p6786_p3), 32768  }
 0x48c   : > { %6309 = vadd.xlane.f32.xlu1 %v6308_v15 }
 0x48e   : > { %6306 = vadd.xlane.f32.xlu0 %v6305_v39 }
 0x490   : > { %v2949_v59 = vpop.xlane.xlu1 %2948 }
 0x491   : > { %v2979_v63 = vrot.slane %v2949_v59, %v9573_v3 }
 0x49c   : > { %v2954_v9 = vpop.xlane.xlu0 %2953 }
 0x49d   : > { %v2984_v17 = vrot.slane %v2954_v9, %v2983_v22 }
 0x49f   : > { %v2986_v61 = vsel %vm2985_vm13, %v2984_v17, %v2979_v63 }
 0x4a7   : > { %v2381_v16 = vpop.f32.mrb[4].mxu0 }
 0x4a8   : > { %v2383_v42 = vpop.f32.mrb[5].mxu0  ;;  %v3014_v20 = vmul.f32 2.0, %v2381_v16 }
 0x4a9   : > { %v5552_v24 = vpop.xlane.xlu1 %5551 }
 0x4aa   : > { %v5579_v47 = vrot.slane %v5552_v24, %v9573_v3 }
 0x4b5   : > { %v5557_v12 = vpop.xlane.xlu0 %5556 }
 0x4b6   : > { %v5583_v19 = vrot.slane %v5557_v12, %v2983_v22  ;;  %v5919_v12 = vld [vmem:[#allocation4] sm:$0x1f] }
 0x4b7   : > { %v10630_v40 = vpop.f32.mrb[2].mxu1 }
 0x4b8   : > { %v4982_v38 = vpop.f32.mrb[3].mxu1  ;;  %v5584_v10 = vsel %vm2985_vm13, %v5583_v19, %v5579_v47  ;;  %v5607_v45 = vmul.f32 2.0, %v10630_v40 }
 0x4b9   : > { %v3028_v38 = vld [vmem:[#allocation3 + $0x10] sm:$0xf] }
 0x4c5   : > { %v2959_v54 = vpop.xlane.xlu1 %2958 }
 0x4c6   : > { %v2991_v33 = vrot.slane %v2959_v54, %v2990_v46 }
 0x4c8   : > { %v4985_v62 = vpop.f32.mrb[4].mxu1  ;;  %v2993_v48 = vsel %vm2992_vm14, %v2991_v33, %v2986_v61 }
 0x4c9   : > { %v4987_v32 = vpop.f32.mrb[5].mxu1  ;;  %v5608_v15 = vmul.f32 2.0, %v4985_v62 }
 0x4d5   : > { %v5562_v37 = vpop.xlane.xlu0 %5561 }
 0x4d6   : > { %v5588_v50 = vrot.slane %v5562_v37, %v2990_v46  ;;  %v7169_v37 = vmov (!%p6786_p3), 0  }
 0x4d7   : > { %6982 = vset.pattern.permute.xlu1 (!%p6786_p3), %v7169_v37  ;;  %6981 = vset.pattern.permute.xlu0 (!%p6786_p3), %v7169_v37 }
 0x4d8   : > { %v2969_v34 = vpop.xlane.xlu1 %2968  ;;  %v5589_v55 = vsel %vm2992_vm14, %v5588_v50, %v5584_v10 }
 0x4d9   : > { %v2998_v23 = vrot.slane %v2969_v34, %v2997_v11 }
 0x4da   : > { %v5571_v36 = vpop.xlane.xlu0 %5570 }
 0x4db   : > { %v3000_v30 = vsel %vm2999_vm15, %v2998_v23, %v2993_v48  ;;  %v5593_v31 = vrot.slane %v5571_v36, %v2997_v11 }
 0x4dd   : > { %v5594_v1 = vsel %vm2999_vm15, %v5593_v31, %v5589_v55  ;;  %vm7174_vm15 = vmmov (!%p6786_p3), 1  }
 0x4e4   : > { %v2634_v0 = vpop.xlane.xlu1 %2633 }
 0x4e5   : > { %v3010_v52 = vadd.f32 %v3000_v30, %v2634_v0  ;;  %v6351_v0 = vld [vmem:[%s10787_s0 + $0x18] sm:$0x1] (!%p6786_p3) }
 0x4e7   : > { %v3016_v8 = vsub.f32 %v3010_v52, %v3013_v41  ;;  %v6350_v41 = vld [vmem:[%s10787_s0 + $0x10] sm:$0xff] (!%p6786_p3)  ;;  %v6349_v52 = vld [vmem:[%s10787_s0 + $0x8] sm:$0xff] (!%p6786_p3) }
 0x4e8   : > { %6359 = vperm.xlu1 (!%p6786_p3), %6982, %v6350_v41  }
 0x4e9   : > { %v3019_v28 = vadd.f32 %v3016_v8, %v415_v57  ;;  %v7170_v57 = vmov (!%p6786_p3), 0.0|0.0   ;;  %v7172_v8 = vmov (!%p6786_p3), 0.0  }
 0x4ea   : > { %6885 = vmatprep.subr.bf16.mxu0 (!%p6786_p3), %v7170_v57  ;;  %6892 = vmatprep.subr.bf16.mxu1 (!%p6786_p3), %v7170_v57 }
 0x4eb   : > { %3023 = vst.msk [vmem:[#allocation2 + $0x8] sm:$0xff] %vm3021_vm0, %v3019_v28 }
 0x4ec   : > { %6362 = vperm.xlu1 (!%p6786_p3), %6982, %v6351_v0  }
 0x4f0   : > { %v2629_v4 = vpop.xlane.xlu0 %2628 }
 0x4f1   : > { %v3009_v44 = vadd.f32 %v3000_v30, %v2629_v4 }
 0x4f3   : > { %v3015_v6 = vsub.f32 %v3009_v44, %v3012_v60 }
 0x4f5   : > { %v3018_v53 = vadd.f32 %v3015_v6, %v414_v51 }
 0x4f7   : > { %3022 = vst.msk [vmem:[#allocation2] sm:$0xff] %vm3021_vm0, %v3018_v53 }
 0x4fd   : > { %v5233_v35 = vpop.xlane.xlu1 %5232 }
 0x4fe   : > { %v5603_v56 = vadd.f32 %v5594_v1, %v5233_v35 }
 0x500   : > { %v5609_v2 = vsub.f32 %v5603_v56, %v5606_v7 }
 0x502   : > { %v5612_v43 = vadd.f32 %v5609_v2, %v3026_v27  ;;  %v6401_v27 = vld [vmem:[#allocation2] sm:$0xff] (!%p6786_p3) }
 0x503   : > { %v2644_v26 = vpop.xlane.xlu0 %2643 }
 0x504   : > { %5615 = vst.msk [vmem:[#allocation3] sm:$0xff] %vm3021_vm0, %v5612_v43  ;;  %v3011_v29 = vadd.f32 %v3000_v30, %v2644_v26  ;;  %v6404_v26 = vmax.f32 (!%p6786_p3), %v6401_v27, 0.0 }
 0x506   : > { %v3017_v13 = vsub.f32 %v3011_v29, %v3014_v20  ;;  %6983 = vrsqrt.f32 (!%p6786_p3), %v6404_v26  ;;  %vm6409_vm11 = vcmp.eq.f32.partialorder (!%p6786_p3), %v6404_v26, inf  ;;  %vm6411_vm13 = vcmp.eq.f32.partialorder (!%p6786_p3), %v6404_v26, 0.0 }
 0x508   : > { %v3020_v58 = vadd.f32 %v3017_v13, %v416_v25  ;;  %v6402_v13 = vld [vmem:[#allocation2 + $0x8] sm:$0xff] (!%p6786_p3) }
 0x509   : > { %v5247_v39 = vpop.xlane.xlu1 %5246 }
 0x50a   : > { %3025 = vst.msk [vmem:[#allocation2 + $0x10] sm:$0xf] %vm3024_vm1, %v3020_v58  ;;  %v5605_v42 = vadd.f32 %v5594_v1, %v5247_v39 }
 0x50b   : > { %v6428_v43 = vld [vmem:[#allocation3] sm:$0xff] (!%p6786_p3) }
 0x50c   : > { %v5611_v49 = vsub.f32 %v5605_v42, %v5608_v15  ;;  %v6431_v29 = vmax.f32 (!%p6786_p3), %v6428_v43, 0.0  ;;  %v10696_v42 = vmax.f32 (!%p6786_p3), %v6402_v13, 0.0 }
 0x50e   : > { %v5614_v32 = vadd.f32 %v5611_v49, %v3028_v38  ;;  %6985 = vrsqrt.f32 (!%p6786_p3), %v6431_v29  ;;  %vm6436_vm12 = vcmp.eq.f32.partialorder (!%p6786_p3), %v6431_v29, inf  ;;  %vm6438_vm14 = vcmp.eq.f32.partialorder (!%p6786_p3), %v6431_v29, 0.0 }
 0x510   : > { %5617 = vst.msk [vmem:[#allocation3 + $0x10] sm:$0xf] %vm3024_vm1, %v5614_v32  ;;  %vm6890_vm1 = vmpackc.low (!%p6786_p3), %vm2960_vm10, %vm7174_vm15 }
 0x511   : > { %v6298_v59 = vpop.xlane.xlu1 %6297  ;;  %v6403_v49 = vld [vmem:[#allocation2 + $0x10] sm:$0xf] (!%p6786_p3) }
 0x512   : > { %v6319_v17 = vrot.slane %v6298_v59, %v9573_v3  ;;  %v10701_v59 = vmax.f32 (!%p6786_p3), %v6403_v49, 0.0 }
 0x513   : > { %v5238_v16 = vpop.xlane.xlu0 %5237 }
 0x514   : > { %v5604_v24 = vadd.f32 %v5594_v1, %v5238_v16  ;;  %v6984_v16 = vpop.eup (!%p6786_p3), %6983 }
 0x515   : > { %v6304_v22 = vpop.xlane.xlu1 %6303 }
 0x516   : > { %v5610_v5 = vsub.f32 %v5604_v24, %v5607_v45  ;;  %v6327_v62 = vrot.slane %v6304_v22, %v9573_v3 }
 0x517   : > { %v6301_v9 = vpop.xlane.xlu0 %6300  ;;  %v6430_v32 = vld [vmem:[#allocation3 + $0x10] sm:$0xf] (!%p6786_p3) }
 0x518   : > { %v5613_v46 = vadd.f32 %v5610_v5, %v3027_v18  ;;  %v6323_v54 = vrot.slane %v6301_v9, %v9573_v3  ;;  %v10704_v45 = vmax.f32 (!%p6786_p3), %v6430_v32, 0.0  ;;  %v6986_v24 = vpop.eup (!%p6786_p3), %6985  ;;  %v6408_v9 = vmul.f32 (!%p6786_p3), %v6984_v16, %v6404_v26 }
 0x519   : > { %v6310_v63 = vpop.xlane.xlu1 %6309 }
 0x51a   : > { %5616 = vst.msk [vmem:[#allocation3 + $0x8] sm:$0xff] %vm3021_vm0, %v5613_v46  ;;  %v6335_v33 = vrot.slane %v6310_v63, %v9573_v3  ;;  %v6336_v40 = vsel %vm1938_vm3, %v6323_v54, %v6319_v17  ;;  %vm7171_vm3 = vmmov (!%p6786_p3), 0   ;;  %v6435_v46 = vmul.f32 (!%p6786_p3), %v6986_v24, %v6431_v29 }
 0x51b   : > { %v6307_v11 = vpop.xlane.xlu0 %6306  ;;  %v6337_v34 = vsel %vm1940_vm4, %v6327_v62, %v6336_v40  ;;  %6827 = vmatprep.mubr.msk.f32.mxu0 (!%p6786_p3), %vm7171_vm3, %v7172_v8  ;;  %6844 = vmatprep.mubr.msk.f32.mxu1 (!%p6786_p3), %vm7171_vm3, %v7172_v8 }
 0x51c   : > { %v6331_v61 = vrot.slane %v6307_v11, %v9573_v3  ;;  %6347 = sbr.rel (%p6786_p3) target bundleno = 1707 (0x6ab), region = 64  ;;  %v6348_v3 = vld [vmem:[%s10787_s0] sm:$0xff] (!%p6786_p3) }
 0x51d   : > { %6353 = vperm.xlu0 (!%p6786_p3), %6981, %v6348_v3  }
 0x51e   : > { %v6338_v23 = vsel %vm1942_vm5, %v6331_v61, %v6337_v34 }
 0x51f   : > { %v6339_v48 = vsel %vm1944_vm6, %v6335_v33, %v6338_v23  ;;  %vm6376_vm6 = vcmask (!%p6786_p3), 39936   ;;  %v6439_v23 = vand.u32 (!%p6786_p3), 2147483648, %v6431_v29 }
 0x520   : > { %v6341_v30 = vadd.f32 %v6339_v48, %v5919_v12  ;;  %v6412_v12 = vand.u32 (!%p6786_p3), 2147483648, %v6404_v26  ;;  %v6410_v48 = vsel (!%p6786_p3), %vm6409_vm11, %v6404_v26, %v6408_v9  ;;  %vm6452_vm11 = vcmp.eq.f32.partialorder (!%p6786_p3), %v10704_v45, 0.0 }
 0x521   : > { %6356 = vperm.xlu0 (!%p6786_p3), %6981, %v6349_v52   ;;  %v6429_v15 = vld [vmem:[#allocation3 + $0x8] sm:$0xff] (!%p6786_p3) }
 0x522   : > { %6343 = vst.msk [vmem:[#allocation4] sm:$0x1f] %vm6342_vm2, %v6341_v30  ;;  %v10698_v38 = vmax.f32 (!%p6786_p3), %v6429_v15, 0.0  ;;  %v6437_v30 = vsel (!%p6786_p3), %vm6436_vm12, %v6431_v29, %v6435_v46  ;;  %vm6416_vm2 = vcmp.eq.f32.partialorder (!%p6786_p3), %v10696_v42, inf  ;;  %vm6646_vm12 = vcmp.lt.s32.totalorder (!%p6786_p3), %v9559_v21, %v9561_v14 }
 0x524   : > { %vm6445_vm10 = vcmp.eq.f32.partialorder %v10698_v38, 0.0 }
 0x529   : > { %v10682_v28 = vld [vmem:[#allocation4] sm:$0x1f] }
 0x52a   : > { %6648 = vrot.lane.b32.xlu0 %v10682_v28, %s7173_s14 }
 0x567   : > { %v6360_v36 = vpop.permute.xlu1 %6359 }
 0x568   : > { %vm6366_vm5 = vcmp.eq.s32.totalorder %v6360_v36, %v9559_v21  ;;  %v6413_v36 = vsel %vm6411_vm13, %v6412_v12, %v6410_v48  ;;  %vm6654_vm13 = vcmask 28672  }
 0x569   : > { %v6789_v44 = vsel %vm6366_vm5, 1.0, %v7172_v8  ;;  %vm6418_vm5 = vcmp.eq.f32.partialorder %v10696_v42, 0.0 }
 0x56a   : > { %v6380_v31 = vsel %vm6376_vm6, %v6789_v44, 0.0  ;;  %v6393_v54 = vsub.f32 0.0, %v6789_v44 }
 0x56b   : > { %v6363_v47 = vpop.permute.xlu1 %6362 }
 0x56c   : > { %vm6367_vm7 = vcmp.eq.s32.totalorder %v6363_v47, %v9559_v21  ;;  %v6446_v47 = vand.u32 2147483648, %v10698_v38 }
 0x56d   : > { %v6790_v10 = vsel %vm6367_vm7, 1.0, %v7172_v8  ;;  %vm6423_vm7 = vcmp.eq.f32.partialorder %v10701_v59, inf }
 0x56e   : > { %v6383_v1 = vsel %vm6382_vm9, %v6790_v10, 0.0  ;;  %v6394_v62 = vsub.f32 0.0, %v6790_v10  ;;  %v6426_v10 = vand.u32 2147483648, %v10701_v59  ;;  %vm6425_vm9 = vcmp.eq.f32.partialorder %v10701_v59, 0.0 }
 0x59c   : > { %v6354_v60 = vpop.permute.xlu0 %6353 }
 0x59d   : > { %vm6364_vm4 = vcmp.eq.s32.totalorder %v6354_v60, %v9559_v21  ;;  %v6440_v60 = vsel %vm6438_vm14, %v6439_v23, %v6437_v30 }
 0x59e   : > { %v6787_v4 = vsel %vm6364_vm4, 1.0, %v7172_v8  ;;  %vm6443_vm4 = vcmp.eq.f32.partialorder %v10698_v38, inf }
 0x59f   : > { %v6377_v6 = vsel %vm6376_vm6, %v6787_v4, 0.0  ;;  %v6391_v18 = vsub.f32 0.0, %v6787_v4 }
 0x5a0   : > { %v6357_v19 = vpop.permute.xlu0 %6356 }
 0x5a1   : > { %vm6365_vm8 = vcmp.eq.s32.totalorder %v6357_v19, %v9559_v21 }
 0x5a2   : > { %v6788_v51 = vsel %vm6365_vm8, 1.0, %v7172_v8  ;;  %vm6450_vm8 = vcmp.eq.f32.partialorder %v10704_v45, inf }
 0x5a3   : > { %v6378_v50 = vsel %vm6376_vm6, %v6788_v51, 0.0  ;;  %v6392_v22 = vsub.f32 0.0, %v6788_v51 }
 0x5a4   : > { %v6379_v53 = vadd.f32 %v6378_v50, %v6377_v6 }
 0x5a6   : > { %v6381_v55 = vadd.f32 %v6380_v31, %v6379_v53  ;;  %v6453_v53 = vand.u32 2147483648, %v10704_v45 }
 0x5a8   : > { %v6384_v7 = vadd.f32 %v6383_v1, %v6381_v55 }
 0x5aa   : > { %v6385_v35 = vrot.slane %v6384_v7, 4 }
 0x5ac   : > { %v6386_v56 = vadd.f32 %v6385_v35, %v6384_v7  ;;  %v6649_v35 = vpop.permute.xlu0 %6648 }
 0x5ae   : > { %v6387_v2 = vrot.slane %v6386_v56, 2 }
 0x5b0   : > { %v6388_v20 = vadd.f32 %v6387_v2, %v6386_v56  ;;  %v6651_v56 = vsel %vm6646_vm12, %v10682_v28, %v6649_v35 }
 0x5b1   : > { %v6652_v27 = vsub.f32 0.0, %v6651_v56 }
 0x5b2   : > { %v6389_v25 = vrot.slane %v6388_v20, 1 }
 0x5b3   : > { %v6653_v2 = vmul.f32 0.125, %v6652_v27 }
 0x5b4   : > { %v6390_v58 = vadd.f32 %v6389_v25, %v6388_v20 }
 0x5b5   : > { %6655 = vst.msk [vmem:[%s10794_s7] sm:$0x1f] %vm6654_vm13, %v6653_v2 }
 0x5b6   : > { %v6395_v39 = vmax.f32 %v6390_v58, 1.0 }
 0x5b8   : > { %6987 = vrcp.f32 %v6395_v39 }
 0x5b9   : > { %6989 = vrsqrt.f32 %v10696_v42 }
 0x5ba   : > { %6991 = vrsqrt.f32 %v10698_v38 }
 0x5bb   : > { %6993 = vrsqrt.f32 %v10701_v59 }
 0x5bc   : > { %6995 = vrsqrt.f32 %v10704_v45 }
 0x5c2   : > { %v6988_v5 = vpop.eup %6987 }
 0x5c3   : > { %v6397_v63 = vmul.f32 %v6988_v5, %v6391_v18  ;;  %v6398_v17 = vmul.f32 %v6988_v5, %v6392_v22  ;;  %v6990_v11 = vpop.eup %6989  ;;  %v6399_v61 = vmul.f32 %v6988_v5, %v6393_v54  ;;  %v6400_v34 = vmul.f32 %v6988_v5, %v6394_v62 }
 0x5c4   : > { %v6992_v33 = vpop.eup %6991  ;;  %v6415_v41 = vmul.f32 %v6990_v11, %v10696_v42 }
 0x5c5   : > { %v6886_v40 = vpack.c.bf16 %v6398_v17, %v6397_v63  ;;  %v6994_v3 = vpop.eup %6993  ;;  %v6442_v37 = vmul.f32 %v6992_v33, %v10698_v38  ;;  %v6889_v52 = vpack.c.bf16 %v6400_v34, %v6399_v61 }
 0x5c6   : > { %v6996_v0 = vpop.eup %6995  ;;  %v6417_v4 = vsel %vm6416_vm2, %v10696_v42, %v6415_v41  ;;  %v6422_v44 = vmul.f32 %v6994_v3, %v10701_v59 }
 0x5c7   : > { %6887 = vmatpush3.bf16.msra.mxu0 %v6886_v40  ;;  %6894 = vmatpush3.bf16.msra.mxu1 %v6886_v40  ;;  %v6444_v19 = vsel %vm6443_vm4, %v10698_v38, %v6442_v37  ;;  %v6449_v51 = vmul.f32 %v6996_v0, %v10704_v45 }
 0x5c8   : > { %6888 = vmatprep.subr.bf16.mxu0 %v7170_v57  ;;  %6895 = vmatprep.subr.bf16.mxu1 %v7170_v57  ;;  %v6419_v57 = vand.u32 2147483648, %v10696_v42  ;;  %v6447_v50 = vsel %vm6445_vm10, %v6446_v47, %v6444_v19  ;;  %v6424_v31 = vsel %vm6423_vm7, %v10701_v59, %v6422_v44 }
 0x5c9   : > { %v6451_v55 = vsel %vm6450_vm8, %v10704_v45, %v6449_v51  ;;  %v6427_v1 = vsel %vm6425_vm9, %v6426_v10, %v6424_v31 }
 0x5ca   : > { %v6420_v6 = vsel %vm6418_vm5, %v6419_v57, %v6417_v4  ;;  %v6454_v7 = vsel %vm6452_vm11, %v6453_v53, %v6451_v55 }
 0x5cb   : > { %6891 = vmatpush3.bf16.msk.msra.mxu0 %vm6890_vm1, %v6889_v52  ;;  %6898 = vmatpush3.bf16.msk.msra.mxu1 %vm6890_vm1, %v6889_v52 }
 0x5ce   : > { %6828 = vmatmul.mubr.msk.f32.vlgmr.msra.gmra.mrb[0].mxu0 %vm3021_vm0, %v6413_v36  ;;  %6845 = vmatmul.mubr.msk.f32.vlgmr.msra.gmra.mrb[0].mxu1 %vm3021_vm0, %v6440_v60 }
 0x5cf   : > { %6830 = vmatprep.mubr.msk.f32.mxu0 %vm7171_vm3, %v7172_v8  ;;  %6847 = vmatprep.mubr.msk.f32.mxu1 %vm7171_vm3, %v7172_v8 }
 0x5d2   : > { %6831 = vmatmul.mubr.msk.f32.gmra.mrb[2].mxu0 %vm3021_vm0, %v6420_v6  ;;  %6848 = vmatmul.mubr.msk.f32.gmra.mrb[2].mxu1 %vm3021_vm0, %v6447_v50 }
 0x5d3   : > { %6833 = vmatprep.mubr.msk.f32.mxu0 %vm7171_vm3, %v7172_v8  ;;  %6850 = vmatprep.mubr.msk.f32.mxu1 %vm7171_vm3, %v7172_v8 }
 0x5d6   : > { %6834 = vmatmul.mubr.msk.f32.gmra.mrb[4].mxu0 %vm3021_vm0, %v6427_v1  ;;  %6851 = vmatmul.mubr.msk.f32.gmra.mrb[4].mxu1 %vm3021_vm0, %v6454_v7  ;;  %vm6549_vm0 = vcmask 35840  }
 0x6a1   : > { %v6533_v8 = vpop.f32.mrb[0].mxu0  ;;  %v6626_v43 = vpop.f32.mrb[0].mxu1 }
 0x6a2   : > { %6547 = vst.msk [vmem:[%s10792_s5] sm:$0xff] %vm6376_vm6, %v6533_v8  ;;  %6640 = vst.msk [vmem:[%s10793_s6] sm:$0xff] %vm6376_vm6, %v6626_v43  ;;  %v6829_v21 = vpop.f32.mrb[1].mxu0  ;;  %v6846_v14 = vpop.f32.mrb[1].mxu1 }
 0x6a5   : > { %v6538_v28 = vpop.f32.mrb[2].mxu0  ;;  %v6631_v20 = vpop.f32.mrb[2].mxu1 }
 0x6a6   : > { %6548 = vst.msk [vmem:[%s10792_s5 + $0x8] sm:$0xff] %vm6376_vm6, %v6538_v28  ;;  %6641 = vst.msk [vmem:[%s10793_s6 + $0x8] sm:$0xff] %vm6376_vm6, %v6631_v20  ;;  %v6832_v26 = vpop.f32.mrb[3].mxu0  ;;  %v6849_v29 = vpop.f32.mrb[3].mxu1 }
 0x6a9   : > { %v6543_v25 = vpop.f32.mrb[4].mxu0  ;;  %v6636_v13 = vpop.f32.mrb[4].mxu1 }
 0x6aa   : > { %6550 = vst.msk [vmem:[%s10792_s5 + $0x10] sm:$0xf] %vm6549_vm0, %v6543_v25  ;;  %6642 = vst.msk [vmem:[%s10793_s6 + $0x10] sm:$0xf] %vm6549_vm0, %v6636_v13  ;;  %v6835_v58 = vpop.f32.mrb[5].mxu0  ;;  %v6852_v15 = vpop.f32.mrb[5].mxu1 }
 0x6ab PF: > { %s11620_s30 = sld [smem:[#allocation15_spill]]  ;;  %s11621_s26 = sld [smem:[#allocation16_spill]] }
 0x6ac   : > { %p24_p5 = scmp.ge.s32.totalorder %s7237_s29, 6   ;;  %s11622_s24 = smov %s7151_s25 }
 0x6ad   : > { %s11624_s27 = smov %s7237_s29 }
 0x6ae   :  { %26 = sbr.rel (!%p24_p5) target bundleno = 9 (0x9), region = 137 }
 0x6b1   : > { %s11623_s25 = smov %s11620_s30 }
 0x6b5   :  { %6679 = vsyncpa [#allocation6], 1 }
 0x6b6   :  { %6681 = vsyncpa [#allocation6 + $0x1], 1 }
 0x6b7   :  { %6682 = vsyncpa [#allocation8], 1 }
 0x6b8   :  { %6684 = vsyncpa [#allocation8 + $0x1], 1 }
 0x6b9   :  { %6685 = vsyncpa [#allocation11], 1 }
 0x6ba   :  { %6687 = vsyncpa [#allocation11 + $0x1], 1 }

</bundles_post_ra>
